<compile_context>
chip_gen: v5e
topology: v5e:2x2
jax: 0.10.0
libtpu: 0.0.40
codegen_flags: <defaults>
</compile_context>

<pallas_src>
import jax
import jax.numpy as jnp
import numpy as np
from jax import lax
from jax.experimental import pallas as pl
from jax.experimental.pallas import tpu as pltpu  # noqa: F401  (TPU backend)


# ------------------------------ Pallas kernel -------------------------------

def us_cnn_kernel(x_ref,
                  w1_ref, s1_ref, w2_ref, s2_ref, w3_ref, s3_ref,
                  u1_ref, wd1_ref, sd1_ref,
                  ut2_ref, wd2_ref, sd2_ref,
                  ut3_ref, wd3_ref, sd3_ref,
                  o_ref):
    """Whole Us_CNN forward, full batch, one invocation, everything in VMEM.

    Layout: channels on sublanes, (batch * length) on lanes, so every layer
    is one MXU matmul for the entire batch and no transposes exist anywhere.
    """
    B, C_in, L_in = x_ref.shape

    def conv_block(src, l_per, w_ref, s_ref, k_taps):
        # src: (C, B*l_per). One (C_out, K*C) @ (K*C, B*l_out) MXU matmul for
        # the whole batch, fused BN shift + ReLU.
        l_out = l_per - k_taps + 1
        patches = jnp.concatenate(
            [jnp.concatenate([src[:, b * l_per + k: b * l_per + k + l_out]
                              for k in range(k_taps)], axis=0)
             for b in range(B)], axis=1)                             # (K*C, B*l_out)
        y = jnp.dot(w_ref[...], patches, preferred_element_type=jnp.float32)
        return jnp.maximum(y + s_ref[...], 0.0), l_out

    # --- f1 (Conv1d 4->32, k=3): C_in=4 is not sublane-aligned, so use a
    #     3-tap accumulation (batched over samples) instead of an
    #     unaligned-concat im2col.  alpha & BN scale already folded into w1.
    l1 = L_in - 3 + 1
    acc = jnp.zeros((w1_ref.shape[0], B * l1), jnp.float32)
    for k in range(3):
        tap = jnp.concatenate([x_ref[b][:, k:k + l1] for b in range(B)], axis=1)
        acc = acc + jnp.dot(w1_ref[:, k * C_in:(k + 1) * C_in], tap,
                            preferred_element_type=jnp.float32)
    h = jnp.maximum(acc + s1_ref[...], 0.0)                          # (32, B*14)
    l = l1

    # --- f2 / f3: one batched im2col matmul each.
    h, l = conv_block(h, l, w2_ref, s2_ref, 3)                       # (64, B*12)
    h, l = conv_block(h, l, w3_ref, s3_ref, 3)                       # (32, B*10)

    # --- AdaptiveAvgPool1d(1) per sample; expand(-1,-1,10) + zero-upsample +
    #     pad for d1 collapses to an outer product with a static 0/1 lane
    #     mask (the d1 input columns are all identical).
    up = jnp.concatenate(
        [jnp.mean(h[:, b * l:(b + 1) * l], axis=1, keepdims=True) * u1_ref[...]
         for b in range(B)], axis=1)                                 # (32, B*45)
    l = u1_ref.shape[1]

    # --- d1 (ConvTranspose1d 32->64, k=15, s=2, p=1)
    h, l = conv_block(up, l, wd1_ref, sd1_ref, 15)                   # (64, B*31)

    # --- d2: zero-upsample + pad for the WHOLE batch via one matmul with a
    #     static block-diagonal 0/1 matrix, then one batched im2col matmul.
    up = jnp.dot(h, ut2_ref[...], preferred_element_type=jnp.float32)  # (64, B*87)
    l = ut2_ref.shape[1] // B
    h, l = conv_block(up, l, wd2_ref, sd2_ref, 15)                   # (32, B*73)

    # --- d3
    up = jnp.dot(h, ut3_ref[...], preferred_element_type=jnp.float32)  # (32, B*165)
    l = ut3_ref.shape[1] // B
    y, l = conv_block(up, l, wd3_ref, sd3_ref, 13)                   # (13, B*153)

    for b in range(B):                                               # lane-dense row slabs
        o_ref[b] = y[:, b * l:(b + 1) * l]


def us_cnn_forward(x_ncl, p):
    """x_ncl: (B, channels, L) torch-convention input.  Returns (B, 13, 153)."""
    B = x_ncl.shape[0]
    return pl.pallas_call(
        us_cnn_kernel,
        out_shape=jax.ShapeDtypeStruct((B, 13, 153), jnp.float32),
        # No grid / no BlockSpecs: whole (tiny) arrays are mapped into VMEM,
        # single invocation, no software pipeline or per-step overhead.
    )(x_ncl.astype(jnp.float32),
      p["f1"][0], p["f1"][1], p["f2"][0], p["f2"][1], p["f3"][0], p["f3"][1],
      p["u1"], p["d1"][0], p["d1"][1],
      p["ut2"], p["d2"][0], p["d2"][1],
      p["ut3"], p["d3"][0], p["d3"][1])


# ------------------------ parameter prep (outside kernel) -------------------

def _fold_bn(bias, bn, eps=1e-5):
    s = bn["gamma"] / jnp.sqrt(bn["var"] + eps)
    shift = (bias - bn["mean"]) * s + bn["beta"]
    return s, shift


def prep_conv(layer, extra_scale=1.0):
    """torch Conv1d weight (C_out, C_in, K) -> im2col matrix (C_out, K*C_in)
    with BN scale (and optional alpha) folded in; per-channel shift column."""
    w, b = layer["w"], layer["b"]
    c_out, c_in, k = w.shape
    s, shift = _fold_bn(b, layer["bn"])
    w_mat = jnp.transpose(w, (0, 2, 1)).reshape(c_out, k * c_in)     # [o, k*C_in + c] = w[o,c,k]
    w_eff = w_mat * (s * extra_scale)[:, None]
    return w_eff.astype(jnp.float32), shift[:, None].astype(jnp.float32)


def prep_deconv(layer):
    """torch ConvTranspose1d weight (C_in, C_out, K) -> flipped im2col matrix
    (C_out, K*C_in) with BN scale folded in; per-channel shift column."""
    w_t, b = layer["w"], layer["b"]
    c_in, c_out, k = w_t.shape
    s, shift = _fold_bn(b, layer["bn"])
    w_f = jnp.flip(w_t, axis=2)                                      # w_f[c,o,k] = w_t[c,o,K-1-k]
    w_mat = jnp.transpose(w_f, (1, 2, 0)).reshape(c_out, k * c_in)   # [o, k*C_in + c]
    w_eff = w_mat * s[:, None]
    return w_eff.astype(jnp.float32), shift[:, None].astype(jnp.float32)


def upsample_pad_matrix(l_in, stride, k, pad):
    """Static 0/1 matrix M (l_in, l_up) so that  x(C, l_in) @ M  equals the
    zero-upsampled (by `stride`) and (k-1-pad)-padded signal used by the
    valid-conv lowering of ConvTranspose1d."""
    q = k - 1 - pad
    l_up = (l_in - 1) * stride + 1 + 2 * q
    m = np.zeros((l_in, l_up), np.float32)
    m[np.arange(l_in), q + stride * np.arange(l_in)] = 1.0
    return m


def pack_params(raw, batch, pool_expand_len=10):
    alpha = raw["alpha"]
    m1 = upsample_pad_matrix(pool_expand_len, 2, 15, 1)              # (10, 45)
    u1 = m1.sum(axis=0, keepdims=True)                               # (1, 45) row mask
    l1_out = m1.shape[1] - 15 + 1                                    # 31
    ut2 = upsample_pad_matrix(l1_out, 2, 15, 1)                      # (31, 87)
    l2_out = ut2.shape[1] - 15 + 1                                   # 73
    ut3 = upsample_pad_matrix(l2_out, 2, 13, 2)                      # (73, 165)
    eye = np.eye(batch, dtype=np.float32)
    return {
        "f1": prep_conv(raw["f1"], extra_scale=alpha),               # alpha folded here
        "f2": prep_conv(raw["f2"]),
        "f3": prep_conv(raw["f3"]),
        "d1": prep_deconv(raw["d1"]),
        "d2": prep_deconv(raw["d2"]),
        "d3": prep_deconv(raw["d3"]),
        "u1": jnp.asarray(u1),
        "ut2": jnp.asarray(np.kron(eye, ut2)),                       # (B*31, B*87) block-diag
        "ut3": jnp.asarray(np.kron(eye, ut3)),                       # (B*73, B*165) block-diag
    }


def init_raw_params(key, channels):
    """Raw, torch-layout parameters (weights, biases, BN running stats)."""
    def bn(keys, c):
        kg, kb, km, kv = keys
        return dict(gamma=jax.random.uniform(kg, (c,), jnp.float32, 0.5, 1.5),
                    beta=jax.random.normal(kb, (c,), jnp.float32) * 0.1,
                    mean=jax.random.normal(km, (c,), jnp.float32) * 0.1,
                    var=jax.random.uniform(kv, (c,), jnp.float32, 0.5, 1.5))

    def conv(key, c_in, c_out, k):
        kw, kb, *kbn = jax.random.split(key, 6)
        return dict(w=jax.random.normal(kw, (c_out, c_in, k), jnp.float32) * 0.1,
                    b=jax.random.normal(kb, (c_out,), jnp.float32) * 0.1,
                    bn=bn(kbn, c_out))

    def deconv(key, c_in, c_out, k):
        kw, kb, *kbn = jax.random.split(key, 6)
        return dict(w=jax.random.normal(kw, (c_in, c_out, k), jnp.float32) * 0.1,
                    b=jax.random.normal(kb, (c_out,), jnp.float32) * 0.1,
                    bn=bn(kbn, c_out))

    keys = jax.random.split(key, 6)
    return {
        "alpha": jnp.asarray(0.5, jnp.float32),   # torch init is 0; nonzero to exercise path
        "f1": conv(keys[0], channels, 32, 3),
        "f2": conv(keys[1], 32, 64, 3),
        "f3": conv(keys[2], 64, 32, 3),
        "d1": deconv(keys[3], 32, 64, 15),        # stride 2, padding 1
        "d2": deconv(keys[4], 64, 32, 15),        # stride 2, padding 1
        "d3": deconv(keys[5], 32, 13, 13),        # stride 2, padding 2
    }


# --------------------------- pure-JAX reference ------------------------------

_PREC = lax.Precision.HIGHEST


def _bn_relu_ref(y_ncl, bn, eps=1e-5):
    s = bn["gamma"] / jnp.sqrt(bn["var"] + eps)
    y = (y_ncl - bn["mean"][None, :, None]) * s[None, :, None] + bn["beta"][None, :, None]
    return jnp.maximum(y, 0.0)


def _conv_ref(x, layer):
    y = lax.conv_general_dilated(
        x, layer["w"], window_strides=(1,), padding="VALID",
        dimension_numbers=("NCH", "OIH", "NCH"), precision=_PREC)
    return _bn_relu_ref(y + layer["b"][None, :, None], layer["bn"])


def _deconv_ref(x, layer, stride, pad):
    w_t = layer["w"]                                   # (C_in, C_out, K)
    k = w_t.shape[-1]
    w_conv = jnp.transpose(jnp.flip(w_t, axis=2), (1, 0, 2))   # (C_out, C_in, K), flipped
    y = lax.conv_general_dilated(
        x, w_conv, window_strides=(1,),
        padding=[(k - 1 - pad, k - 1 - pad)], lhs_dilation=(stride,),
        dimension_numbers=("NCH", "OIH", "NCH"), precision=_PREC)
    return _bn_relu_ref(y + layer["b"][None, :, None], layer["bn"])


def us_cnn_forward_ref(x_ncl, raw):
    x = x_ncl.astype(jnp.float32) * raw["alpha"]
    h = _conv_ref(x, raw["f1"])
    h = _conv_ref(h, raw["f2"])
    h = _conv_ref(h, raw["f3"])
    m = jnp.mean(h, axis=2, keepdims=True)                         # AdaptiveAvgPool1d(1)
    h = jnp.broadcast_to(m, (m.shape[0], m.shape[1], 10))          # expand(-1, -1, 10)
    h = _deconv_ref(h, raw["d1"], 2, 1)
    h = _deconv_ref(h, raw["d2"], 2, 1)
    h = _deconv_ref(h, raw["d3"], 2, 2)
    return h                                                       # (B, 13, 153)


# ---------------------------------- main -------------------------------------

if __name__ == "__main__":
    key = jax.random.PRNGKey(0)
    k_x, k_p = jax.random.split(key)
    B, channels, L = 2, 4, 16
    x = jax.random.normal(k_x, (B, channels, L), jnp.float32)

    raw = init_raw_params(k_p, channels)
    packed = pack_params(raw, batch=B)

    out = jax.jit(us_cnn_forward)(x, packed)
    out = jax.block_until_ready(out)
    assert out.shape == (B, 13, 153), out.shape

    ref = us_cnn_forward_ref(x, raw)
    np.testing.assert_allclose(np.asarray(out), np.asarray(ref), rtol=1e-4, atol=1e-4)
    print("KERNEL_OK")
</pallas_src>

<mosaic_0001>
module attributes {stable_mosaic.version = 11 : i64} {
  func.func @us_cnn_kernel(%arg0: memref<2x4x16xf32, #tpu.memory_space<vmem>>, %arg1: memref<32x12xf32, #tpu.memory_space<vmem>>, %arg2: memref<32x1xf32, #tpu.memory_space<vmem>>, %arg3: memref<64x96xf32, #tpu.memory_space<vmem>>, %arg4: memref<64x1xf32, #tpu.memory_space<vmem>>, %arg5: memref<32x192xf32, #tpu.memory_space<vmem>>, %arg6: memref<32x1xf32, #tpu.memory_space<vmem>>, %arg7: memref<1x45xf32, #tpu.memory_space<vmem>>, %arg8: memref<64x480xf32, #tpu.memory_space<vmem>>, %arg9: memref<64x1xf32, #tpu.memory_space<vmem>>, %arg10: memref<62x174xf32, #tpu.memory_space<vmem>>, %arg11: memref<32x960xf32, #tpu.memory_space<vmem>>, %arg12: memref<32x1xf32, #tpu.memory_space<vmem>>, %arg13: memref<146x330xf32, #tpu.memory_space<vmem>>, %arg14: memref<13x416xf32, #tpu.memory_space<vmem>>, %arg15: memref<13x1xf32, #tpu.memory_space<vmem>>, %arg16: memref<2x13x153xf32, #tpu.memory_space<vmem>>) attributes {dimension_semantics = [], scalar_prefetch = 0 : i64, scratch_operands = 0 : i64, tpu.core_type = #tpu.core_type<tc>} {
    %cst = arith.constant 0.000000e+00 : f32
    %0 = vector.broadcast %cst : f32 to vector<32x28xf32>
    %c0 = arith.constant 0 : index
    %c0_0 = arith.constant 0 : index
    %c0_1 = arith.constant 0 : index
    %1 = vector.load %arg0[%c0, %c0_0, %c0_1] : memref<2x4x16xf32, #tpu.memory_space<vmem>>, vector<1x4x16xf32>
    %2 = vector.shape_cast %1 : vector<1x4x16xf32> to vector<4x16xf32>
    %3 = vector.extract_strided_slice %2 {offsets = [0, 0], sizes = [4, 14], strides = [1, 1]} : vector<4x16xf32> to vector<4x14xf32>
    %c1 = arith.constant 1 : index
    %c0_2 = arith.constant 0 : index
    %c0_3 = arith.constant 0 : index
    %4 = vector.load %arg0[%c1, %c0_2, %c0_3] : memref<2x4x16xf32, #tpu.memory_space<vmem>>, vector<1x4x16xf32>
    %5 = vector.shape_cast %4 : vector<1x4x16xf32> to vector<4x16xf32>
    %6 = vector.extract_strided_slice %5 {offsets = [0, 0], sizes = [4, 14], strides = [1, 1]} : vector<4x16xf32> to vector<4x14xf32>
    %7 = tpu.concatenate %3, %6 in 1 : vector<4x14xf32>, vector<4x14xf32> -> vector<4x28xf32>
    %c0_4 = arith.constant 0 : index
    %c0_5 = arith.constant 0 : index
    %8 = vector.load %arg1[%c0_4, %c0_5] : memref<32x12xf32, #tpu.memory_space<vmem>>, vector<32x4xf32>
    %cst_6 = arith.constant dense<0.000000e+00> : vector<32x28xf32>
    %9 = tpu.matmul %8, %7, %cst_6 {dimension_numbers = #tpu.dot_dimension_numbers<[1], [0], [0], [1], [0, 0, 1, 1], [], []>} : vector<32x4xf32>, vector<4x28xf32>, vector<32x28xf32> -> vector<32x28xf32>
    %10 = arith.addf %0, %9 : vector<32x28xf32>
    %c0_7 = arith.constant 0 : index
    %c0_8 = arith.constant 0 : index
    %c0_9 = arith.constant 0 : index
    %11 = vector.load %arg0[%c0_7, %c0_8, %c0_9] : memref<2x4x16xf32, #tpu.memory_space<vmem>>, vector<1x4x16xf32>
    %12 = vector.shape_cast %11 : vector<1x4x16xf32> to vector<4x16xf32>
    %13 = vector.extract_strided_slice %12 {offsets = [0, 1], sizes = [4, 14], strides = [1, 1]} : vector<4x16xf32> to vector<4x14xf32>
    %c1_10 = arith.constant 1 : index
    %c0_11 = arith.constant 0 : index
    %c0_12 = arith.constant 0 : index
    %14 = vector.load %arg0[%c1_10, %c0_11, %c0_12] : memref<2x4x16xf32, #tpu.memory_space<vmem>>, vector<1x4x16xf32>
    %15 = vector.shape_cast %14 : vector<1x4x16xf32> to vector<4x16xf32>
    %16 = vector.extract_strided_slice %15 {offsets = [0, 1], sizes = [4, 14], strides = [1, 1]} : vector<4x16xf32> to vector<4x14xf32>
    %17 = tpu.concatenate %13, %16 in 1 : vector<4x14xf32>, vector<4x14xf32> -> vector<4x28xf32>
    %c0_13 = arith.constant 0 : index
    %c4 = arith.constant 4 : index
    %18 = vector.load %arg1[%c0_13, %c4] : memref<32x12xf32, #tpu.memory_space<vmem>>, vector<32x4xf32>
    %cst_14 = arith.constant dense<0.000000e+00> : vector<32x28xf32>
    %19 = tpu.matmul %18, %17, %cst_14 {dimension_numbers = #tpu.dot_dimension_numbers<[1], [0], [0], [1], [0, 0, 1, 1], [], []>} : vector<32x4xf32>, vector<4x28xf32>, vector<32x28xf32> -> vector<32x28xf32>
    %20 = arith.addf %10, %19 : vector<32x28xf32>
    %c0_15 = arith.constant 0 : index
    %c0_16 = arith.constant 0 : index
    %c0_17 = arith.constant 0 : index
    %21 = vector.load %arg0[%c0_15, %c0_16, %c0_17] : memref<2x4x16xf32, #tpu.memory_space<vmem>>, vector<1x4x16xf32>
    %22 = vector.shape_cast %21 : vector<1x4x16xf32> to vector<4x16xf32>
    %23 = vector.extract_strided_slice %22 {offsets = [0, 2], sizes = [4, 14], strides = [1, 1]} : vector<4x16xf32> to vector<4x14xf32>
    %c1_18 = arith.constant 1 : index
    %c0_19 = arith.constant 0 : index
    %c0_20 = arith.constant 0 : index
    %24 = vector.load %arg0[%c1_18, %c0_19, %c0_20] : memref<2x4x16xf32, #tpu.memory_space<vmem>>, vector<1x4x16xf32>
    %25 = vector.shape_cast %24 : vector<1x4x16xf32> to vector<4x16xf32>
    %26 = vector.extract_strided_slice %25 {offsets = [0, 2], sizes = [4, 14], strides = [1, 1]} : vector<4x16xf32> to vector<4x14xf32>
    %27 = tpu.concatenate %23, %26 in 1 : vector<4x14xf32>, vector<4x14xf32> -> vector<4x28xf32>
    %c0_21 = arith.constant 0 : index
    %c8 = arith.constant 8 : index
    %28 = vector.load %arg1[%c0_21, %c8] : memref<32x12xf32, #tpu.memory_space<vmem>>, vector<32x4xf32>
    %cst_22 = arith.constant dense<0.000000e+00> : vector<32x28xf32>
    %29 = tpu.matmul %28, %27, %cst_22 {dimension_numbers = #tpu.dot_dimension_numbers<[1], [0], [0], [1], [0, 0, 1, 1], [], []>} : vector<32x4xf32>, vector<4x28xf32>, vector<32x28xf32> -> vector<32x28xf32>
    %30 = arith.addf %20, %29 : vector<32x28xf32>
    %c0_23 = arith.constant 0 : index
    %c0_24 = arith.constant 0 : index
    %31 = vector.load %arg2[%c0_23, %c0_24] : memref<32x1xf32, #tpu.memory_space<vmem>>, vector<32x1xf32>
    %32 = vector.broadcast %31 : vector<32x1xf32> to vector<32x28xf32>
    %33 = arith.addf %30, %32 : vector<32x28xf32>
    %cst_25 = arith.constant 0.000000e+00 : f32
    %34 = vector.broadcast %cst_25 : f32 to vector<32x28xf32>
    %35 = arith.maximumf %33, %34 : vector<32x28xf32>
    %36 = vector.extract_strided_slice %35 {offsets = [0, 0], sizes = [32, 12], strides = [1, 1]} : vector<32x28xf32> to vector<32x12xf32>
    %37 = vector.extract_strided_slice %35 {offsets = [0, 1], sizes = [32, 12], strides = [1, 1]} : vector<32x28xf32> to vector<32x12xf32>
    %38 = vector.extract_strided_slice %35 {offsets = [0, 2], sizes = [32, 12], strides = [1, 1]} : vector<32x28xf32> to vector<32x12xf32>
    %39 = tpu.concatenate %36, %37, %38 in 0 : vector<32x12xf32>, vector<32x12xf32>, vector<32x12xf32> -> vector<96x12xf32>
    %40 = vector.extract_strided_slice %35 {offsets = [0, 14], sizes = [32, 12], strides = [1, 1]} : vector<32x28xf32> to vector<32x12xf32>
    %41 = vector.extract_strided_slice %35 {offsets = [0, 15], sizes = [32, 12], strides = [1, 1]} : vector<32x28xf32> to vector<32x12xf32>
    %42 = vector.extract_strided_slice %35 {offsets = [0, 16], sizes = [32, 12], strides = [1, 1]} : vector<32x28xf32> to vector<32x12xf32>
    %43 = tpu.concatenate %40, %41, %42 in 0 : vector<32x12xf32>, vector<32x12xf32>, vector<32x12xf32> -> vector<96x12xf32>
    %44 = tpu.concatenate %39, %43 in 1 : vector<96x12xf32>, vector<96x12xf32> -> vector<96x24xf32>
    %c0_26 = arith.constant 0 : index
    %c0_27 = arith.constant 0 : index
    %45 = vector.load %arg3[%c0_26, %c0_27] : memref<64x96xf32, #tpu.memory_space<vmem>>, vector<64x96xf32>
    %cst_28 = arith.constant dense<0.000000e+00> : vector<64x24xf32>
    %46 = tpu.matmul %45, %44, %cst_28 {dimension_numbers = #tpu.dot_dimension_numbers<[1], [0], [0], [1], [0, 0, 1, 1], [], []>} : vector<64x96xf32>, vector<96x24xf32>, vector<64x24xf32> -> vector<64x24xf32>
    %c0_29 = arith.constant 0 : index
    %c0_30 = arith.constant 0 : index
    %47 = vector.load %arg4[%c0_29, %c0_30] : memref<64x1xf32, #tpu.memory_space<vmem>>, vector<64x1xf32>
    %48 = vector.broadcast %47 : vector<64x1xf32> to vector<64x24xf32>
    %49 = arith.addf %46, %48 : vector<64x24xf32>
    %cst_31 = arith.constant 0.000000e+00 : f32
    %50 = vector.broadcast %cst_31 : f32 to vector<64x24xf32>
    %51 = arith.maximumf %49, %50 : vector<64x24xf32>
    %52 = vector.extract_strided_slice %51 {offsets = [0, 0], sizes = [64, 10], strides = [1, 1]} : vector<64x24xf32> to vector<64x10xf32>
    %53 = vector.extract_strided_slice %51 {offsets = [0, 1], sizes = [64, 10], strides = [1, 1]} : vector<64x24xf32> to vector<64x10xf32>
    %54 = vector.extract_strided_slice %51 {offsets = [0, 2], sizes = [64, 10], strides = [1, 1]} : vector<64x24xf32> to vector<64x10xf32>
    %55 = tpu.concatenate %52, %53, %54 in 0 : vector<64x10xf32>, vector<64x10xf32>, vector<64x10xf32> -> vector<192x10xf32>
    %56 = vector.extract_strided_slice %51 {offsets = [0, 12], sizes = [64, 10], strides = [1, 1]} : vector<64x24xf32> to vector<64x10xf32>
    %57 = vector.extract_strided_slice %51 {offsets = [0, 13], sizes = [64, 10], strides = [1, 1]} : vector<64x24xf32> to vector<64x10xf32>
    %58 = vector.extract_strided_slice %51 {offsets = [0, 14], sizes = [64, 10], strides = [1, 1]} : vector<64x24xf32> to vector<64x10xf32>
    %59 = tpu.concatenate %56, %57, %58 in 0 : vector<64x10xf32>, vector<64x10xf32>, vector<64x10xf32> -> vector<192x10xf32>
    %60 = tpu.concatenate %55, %59 in 1 : vector<192x10xf32>, vector<192x10xf32> -> vector<192x20xf32>
    %c0_32 = arith.constant 0 : index
    %c0_33 = arith.constant 0 : index
    %61 = vector.load %arg5[%c0_32, %c0_33] : memref<32x192xf32, #tpu.memory_space<vmem>>, vector<32x192xf32>
    %cst_34 = arith.constant dense<0.000000e+00> : vector<32x20xf32>
    %62 = tpu.matmul %61, %60, %cst_34 {dimension_numbers = #tpu.dot_dimension_numbers<[1], [0], [0], [1], [0, 0, 1, 1], [], []>} : vector<32x192xf32>, vector<192x20xf32>, vector<32x20xf32> -> vector<32x20xf32>
    %c0_35 = arith.constant 0 : index
    %c0_36 = arith.constant 0 : index
    %63 = vector.load %arg6[%c0_35, %c0_36] : memref<32x1xf32, #tpu.memory_space<vmem>>, vector<32x1xf32>
    %64 = vector.broadcast %63 : vector<32x1xf32> to vector<32x20xf32>
    %65 = arith.addf %62, %64 : vector<32x20xf32>
    %cst_37 = arith.constant 0.000000e+00 : f32
    %66 = vector.broadcast %cst_37 : f32 to vector<32x20xf32>
    %67 = arith.maximumf %65, %66 : vector<32x20xf32>
    %68 = vector.extract_strided_slice %67 {offsets = [0, 0], sizes = [32, 10], strides = [1, 1]} : vector<32x20xf32> to vector<32x10xf32>
    %cst_38 = arith.constant dense<0.000000e+00> : vector<32xf32>
    %69 = vector.multi_reduction <add>, %68, %cst_38 [1] : vector<32x10xf32> to vector<32xf32>
    %70 = vector.shape_cast %69 : vector<32xf32> to vector<32x1xf32>
    %cst_39 = arith.constant 1.000000e+01 : f32
    %71 = vector.broadcast %cst_39 : f32 to vector<32x1xf32>
    %72 = arith.divf %70, %71 : vector<32x1xf32>
    %c0_40 = arith.constant 0 : index
    %c0_41 = arith.constant 0 : index
    %73 = vector.load %arg7[%c0_40, %c0_41] : memref<1x45xf32, #tpu.memory_space<vmem>>, vector<1x45xf32>
    %74 = vector.broadcast %72 : vector<32x1xf32> to vector<32x45xf32>
    %75 = vector.broadcast %73 : vector<1x45xf32> to vector<32x45xf32>
    %76 = arith.mulf %74, %75 : vector<32x45xf32>
    %77 = vector.extract_strided_slice %67 {offsets = [0, 10], sizes = [32, 10], strides = [1, 1]} : vector<32x20xf32> to vector<32x10xf32>
    %cst_42 = arith.constant dense<0.000000e+00> : vector<32xf32>
    %78 = vector.multi_reduction <add>, %77, %cst_42 [1] : vector<32x10xf32> to vector<32xf32>
    %79 = vector.shape_cast %78 : vector<32xf32> to vector<32x1xf32>
    %cst_43 = arith.constant 1.000000e+01 : f32
    %80 = vector.broadcast %cst_43 : f32 to vector<32x1xf32>
    %81 = arith.divf %79, %80 : vector<32x1xf32>
    %c0_44 = arith.constant 0 : index
    %c0_45 = arith.constant 0 : index
    %82 = vector.load %arg7[%c0_44, %c0_45] : memref<1x45xf32, #tpu.memory_space<vmem>>, vector<1x45xf32>
    %83 = vector.broadcast %81 : vector<32x1xf32> to vector<32x45xf32>
    %84 = vector.broadcast %82 : vector<1x45xf32> to vector<32x45xf32>
    %85 = arith.mulf %83, %84 : vector<32x45xf32>
    %86 = tpu.concatenate %76, %85 in 1 : vector<32x45xf32>, vector<32x45xf32> -> vector<32x90xf32>
    %87 = vector.extract_strided_slice %86 {offsets = [0, 0], sizes = [32, 31], strides = [1, 1]} : vector<32x90xf32> to vector<32x31xf32>
    %88 = vector.extract_strided_slice %86 {offsets = [0, 1], sizes = [32, 31], strides = [1, 1]} : vector<32x90xf32> to vector<32x31xf32>
    %89 = vector.extract_strided_slice %86 {offsets = [0, 2], sizes = [32, 31], strides = [1, 1]} : vector<32x90xf32> to vector<32x31xf32>
    %90 = vector.extract_strided_slice %86 {offsets = [0, 3], sizes = [32, 31], strides = [1, 1]} : vector<32x90xf32> to vector<32x31xf32>
    %91 = vector.extract_strided_slice %86 {offsets = [0, 4], sizes = [32, 31], strides = [1, 1]} : vector<32x90xf32> to vector<32x31xf32>
    %92 = vector.extract_strided_slice %86 {offsets = [0, 5], sizes = [32, 31], strides = [1, 1]} : vector<32x90xf32> to vector<32x31xf32>
    %93 = vector.extract_strided_slice %86 {offsets = [0, 6], sizes = [32, 31], strides = [1, 1]} : vector<32x90xf32> to vector<32x31xf32>
    %94 = vector.extract_strided_slice %86 {offsets = [0, 7], sizes = [32, 31], strides = [1, 1]} : vector<32x90xf32> to vector<32x31xf32>
    %95 = vector.extract_strided_slice %86 {offsets = [0, 8], sizes = [32, 31], strides = [1, 1]} : vector<32x90xf32> to vector<32x31xf32>
    %96 = vector.extract_strided_slice %86 {offsets = [0, 9], sizes = [32, 31], strides = [1, 1]} : vector<32x90xf32> to vector<32x31xf32>
    %97 = vector.extract_strided_slice %86 {offsets = [0, 10], sizes = [32, 31], strides = [1, 1]} : vector<32x90xf32> to vector<32x31xf32>
    %98 = vector.extract_strided_slice %86 {offsets = [0, 11], sizes = [32, 31], strides = [1, 1]} : vector<32x90xf32> to vector<32x31xf32>
    %99 = vector.extract_strided_slice %86 {offsets = [0, 12], sizes = [32, 31], strides = [1, 1]} : vector<32x90xf32> to vector<32x31xf32>
    %100 = vector.extract_strided_slice %86 {offsets = [0, 13], sizes = [32, 31], strides = [1, 1]} : vector<32x90xf32> to vector<32x31xf32>
    %101 = vector.extract_strided_slice %86 {offsets = [0, 14], sizes = [32, 31], strides = [1, 1]} : vector<32x90xf32> to vector<32x31xf32>
    %102 = tpu.concatenate %87, %88, %89, %90, %91, %92, %93, %94, %95, %96, %97, %98, %99, %100, %101 in 0 : vector<32x31xf32>, vector<32x31xf32>, vector<32x31xf32>, vector<32x31xf32>, vector<32x31xf32>, vector<32x31xf32>, vector<32x31xf32>, vector<32x31xf32>, vector<32x31xf32>, vector<32x31xf32>, vector<32x31xf32>, vector<32x31xf32>, vector<32x31xf32>, vector<32x31xf32>, vector<32x31xf32> -> vector<480x31xf32>
    %103 = vector.extract_strided_slice %86 {offsets = [0, 45], sizes = [32, 31], strides = [1, 1]} : vector<32x90xf32> to vector<32x31xf32>
    %104 = vector.extract_strided_slice %86 {offsets = [0, 46], sizes = [32, 31], strides = [1, 1]} : vector<32x90xf32> to vector<32x31xf32>
    %105 = vector.extract_strided_slice %86 {offsets = [0, 47], sizes = [32, 31], strides = [1, 1]} : vector<32x90xf32> to vector<32x31xf32>
    %106 = vector.extract_strided_slice %86 {offsets = [0, 48], sizes = [32, 31], strides = [1, 1]} : vector<32x90xf32> to vector<32x31xf32>
    %107 = vector.extract_strided_slice %86 {offsets = [0, 49], sizes = [32, 31], strides = [1, 1]} : vector<32x90xf32> to vector<32x31xf32>
    %108 = vector.extract_strided_slice %86 {offsets = [0, 50], sizes = [32, 31], strides = [1, 1]} : vector<32x90xf32> to vector<32x31xf32>
    %109 = vector.extract_strided_slice %86 {offsets = [0, 51], sizes = [32, 31], strides = [1, 1]} : vector<32x90xf32> to vector<32x31xf32>
    %110 = vector.extract_strided_slice %86 {offsets = [0, 52], sizes = [32, 31], strides = [1, 1]} : vector<32x90xf32> to vector<32x31xf32>
    %111 = vector.extract_strided_slice %86 {offsets = [0, 53], sizes = [32, 31], strides = [1, 1]} : vector<32x90xf32> to vector<32x31xf32>
    %112 = vector.extract_strided_slice %86 {offsets = [0, 54], sizes = [32, 31], strides = [1, 1]} : vector<32x90xf32> to vector<32x31xf32>
    %113 = vector.extract_strided_slice %86 {offsets = [0, 55], sizes = [32, 31], strides = [1, 1]} : vector<32x90xf32> to vector<32x31xf32>
    %114 = vector.extract_strided_slice %86 {offsets = [0, 56], sizes = [32, 31], strides = [1, 1]} : vector<32x90xf32> to vector<32x31xf32>
    %115 = vector.extract_strided_slice %86 {offsets = [0, 57], sizes = [32, 31], strides = [1, 1]} : vector<32x90xf32> to vector<32x31xf32>
    %116 = vector.extract_strided_slice %86 {offsets = [0, 58], sizes = [32, 31], strides = [1, 1]} : vector<32x90xf32> to vector<32x31xf32>
    %117 = vector.extract_strided_slice %86 {offsets = [0, 59], sizes = [32, 31], strides = [1, 1]} : vector<32x90xf32> to vector<32x31xf32>
    %118 = tpu.concatenate %103, %104, %105, %106, %107, %108, %109, %110, %111, %112, %113, %114, %115, %116, %117 in 0 : vector<32x31xf32>, vector<32x31xf32>, vector<32x31xf32>, vector<32x31xf32>, vector<32x31xf32>, vector<32x31xf32>, vector<32x31xf32>, vector<32x31xf32>, vector<32x31xf32>, vector<32x31xf32>, vector<32x31xf32>, vector<32x31xf32>, vector<32x31xf32>, vector<32x31xf32>, vector<32x31xf32> -> vector<480x31xf32>
    %119 = tpu.concatenate %102, %118 in 1 : vector<480x31xf32>, vector<480x31xf32> -> vector<480x62xf32>
    %c0_46 = arith.constant 0 : index
    %c0_47 = arith.constant 0 : index
    %120 = vector.load %arg8[%c0_46, %c0_47] : memref<64x480xf32, #tpu.memory_space<vmem>>, vector<64x480xf32>
    %cst_48 = arith.constant dense<0.000000e+00> : vector<64x62xf32>
    %121 = tpu.matmul %120, %119, %cst_48 {dimension_numbers = #tpu.dot_dimension_numbers<[1], [0], [0], [1], [0, 0, 1, 1], [], []>} : vector<64x480xf32>, vector<480x62xf32>, vector<64x62xf32> -> vector<64x62xf32>
    %c0_49 = arith.constant 0 : index
    %c0_50 = arith.constant 0 : index
    %122 = vector.load %arg9[%c0_49, %c0_50] : memref<64x1xf32, #tpu.memory_space<vmem>>, vector<64x1xf32>
    %123 = vector.broadcast %122 : vector<64x1xf32> to vector<64x62xf32>
    %124 = arith.addf %121, %123 : vector<64x62xf32>
    %cst_51 = arith.constant 0.000000e+00 : f32
    %125 = vector.broadcast %cst_51 : f32 to vector<64x62xf32>
    %126 = arith.maximumf %124, %125 : vector<64x62xf32>
    %c0_52 = arith.constant 0 : index
    %c0_53 = arith.constant 0 : index
    %127 = vector.load %arg10[%c0_52, %c0_53] : memref<62x174xf32, #tpu.memory_space<vmem>>, vector<62x174xf32>
    %cst_54 = arith.constant dense<0.000000e+00> : vector<64x174xf32>
    %128 = tpu.matmul %126, %127, %cst_54 {dimension_numbers = #tpu.dot_dimension_numbers<[1], [0], [0], [1], [0, 0, 1, 1], [], []>} : vector<64x62xf32>, vector<62x174xf32>, vector<64x174xf32> -> vector<64x174xf32>
    %129 = vector.extract_strided_slice %128 {offsets = [0, 0], sizes = [64, 73], strides = [1, 1]} : vector<64x174xf32> to vector<64x73xf32>
    %130 = vector.extract_strided_slice %128 {offsets = [0, 1], sizes = [64, 73], strides = [1, 1]} : vector<64x174xf32> to vector<64x73xf32>
    %131 = vector.extract_strided_slice %128 {offsets = [0, 2], sizes = [64, 73], strides = [1, 1]} : vector<64x174xf32> to vector<64x73xf32>
    %132 = vector.extract_strided_slice %128 {offsets = [0, 3], sizes = [64, 73], strides = [1, 1]} : vector<64x174xf32> to vector<64x73xf32>
    %133 = vector.extract_strided_slice %128 {offsets = [0, 4], sizes = [64, 73], strides = [1, 1]} : vector<64x174xf32> to vector<64x73xf32>
    %134 = vector.extract_strided_slice %128 {offsets = [0, 5], sizes = [64, 73], strides = [1, 1]} : vector<64x174xf32> to vector<64x73xf32>
    %135 = vector.extract_strided_slice %128 {offsets = [0, 6], sizes = [64, 73], strides = [1, 1]} : vector<64x174xf32> to vector<64x73xf32>
    %136 = vector.extract_strided_slice %128 {offsets = [0, 7], sizes = [64, 73], strides = [1, 1]} : vector<64x174xf32> to vector<64x73xf32>
    %137 = vector.extract_strided_slice %128 {offsets = [0, 8], sizes = [64, 73], strides = [1, 1]} : vector<64x174xf32> to vector<64x73xf32>
    %138 = vector.extract_strided_slice %128 {offsets = [0, 9], sizes = [64, 73], strides = [1, 1]} : vector<64x174xf32> to vector<64x73xf32>
    %139 = vector.extract_strided_slice %128 {offsets = [0, 10], sizes = [64, 73], strides = [1, 1]} : vector<64x174xf32> to vector<64x73xf32>
    %140 = vector.extract_strided_slice %128 {offsets = [0, 11], sizes = [64, 73], strides = [1, 1]} : vector<64x174xf32> to vector<64x73xf32>
    %141 = vector.extract_strided_slice %128 {offsets = [0, 12], sizes = [64, 73], strides = [1, 1]} : vector<64x174xf32> to vector<64x73xf32>
    %142 = vector.extract_strided_slice %128 {offsets = [0, 13], sizes = [64, 73], strides = [1, 1]} : vector<64x174xf32> to vector<64x73xf32>
    %143 = vector.extract_strided_slice %128 {offsets = [0, 14], sizes = [64, 73], strides = [1, 1]} : vector<64x174xf32> to vector<64x73xf32>
    %144 = tpu.concatenate %129, %130, %131, %132, %133, %134, %135, %136, %137, %138, %139, %140, %141, %142, %143 in 0 : vector<64x73xf32>, vector<64x73xf32>, vector<64x73xf32>, vector<64x73xf32>, vector<64x73xf32>, vector<64x73xf32>, vector<64x73xf32>, vector<64x73xf32>, vector<64x73xf32>, vector<64x73xf32>, vector<64x73xf32>, vector<64x73xf32>, vector<64x73xf32>, vector<64x73xf32>, vector<64x73xf32> -> vector<960x73xf32>
    %145 = vector.extract_strided_slice %128 {offsets = [0, 87], sizes = [64, 73], strides = [1, 1]} : vector<64x174xf32> to vector<64x73xf32>
    %146 = vector.extract_strided_slice %128 {offsets = [0, 88], sizes = [64, 73], strides = [1, 1]} : vector<64x174xf32> to vector<64x73xf32>
    %147 = vector.extract_strided_slice %128 {offsets = [0, 89], sizes = [64, 73], strides = [1, 1]} : vector<64x174xf32> to vector<64x73xf32>
    %148 = vector.extract_strided_slice %128 {offsets = [0, 90], sizes = [64, 73], strides = [1, 1]} : vector<64x174xf32> to vector<64x73xf32>
    %149 = vector.extract_strided_slice %128 {offsets = [0, 91], sizes = [64, 73], strides = [1, 1]} : vector<64x174xf32> to vector<64x73xf32>
    %150 = vector.extract_strided_slice %128 {offsets = [0, 92], sizes = [64, 73], strides = [1, 1]} : vector<64x174xf32> to vector<64x73xf32>
    %151 = vector.extract_strided_slice %128 {offsets = [0, 93], sizes = [64, 73], strides = [1, 1]} : vector<64x174xf32> to vector<64x73xf32>
    %152 = vector.extract_strided_slice %128 {offsets = [0, 94], sizes = [64, 73], strides = [1, 1]} : vector<64x174xf32> to vector<64x73xf32>
    %153 = vector.extract_strided_slice %128 {offsets = [0, 95], sizes = [64, 73], strides = [1, 1]} : vector<64x174xf32> to vector<64x73xf32>
    %154 = vector.extract_strided_slice %128 {offsets = [0, 96], sizes = [64, 73], strides = [1, 1]} : vector<64x174xf32> to vector<64x73xf32>
    %155 = vector.extract_strided_slice %128 {offsets = [0, 97], sizes = [64, 73], strides = [1, 1]} : vector<64x174xf32> to vector<64x73xf32>
    %156 = vector.extract_strided_slice %128 {offsets = [0, 98], sizes = [64, 73], strides = [1, 1]} : vector<64x174xf32> to vector<64x73xf32>
    %157 = vector.extract_strided_slice %128 {offsets = [0, 99], sizes = [64, 73], strides = [1, 1]} : vector<64x174xf32> to vector<64x73xf32>
    %158 = vector.extract_strided_slice %128 {offsets = [0, 100], sizes = [64, 73], strides = [1, 1]} : vector<64x174xf32> to vector<64x73xf32>
    %159 = vector.extract_strided_slice %128 {offsets = [0, 101], sizes = [64, 73], strides = [1, 1]} : vector<64x174xf32> to vector<64x73xf32>
    %160 = tpu.concatenate %145, %146, %147, %148, %149, %150, %151, %152, %153, %154, %155, %156, %157, %158, %159 in 0 : vector<64x73xf32>, vector<64x73xf32>, vector<64x73xf32>, vector<64x73xf32>, vector<64x73xf32>, vector<64x73xf32>, vector<64x73xf32>, vector<64x73xf32>, vector<64x73xf32>, vector<64x73xf32>, vector<64x73xf32>, vector<64x73xf32>, vector<64x73xf32>, vector<64x73xf32>, vector<64x73xf32> -> vector<960x73xf32>
    %161 = tpu.concatenate %144, %160 in 1 : vector<960x73xf32>, vector<960x73xf32> -> vector<960x146xf32>
    %c0_55 = arith.constant 0 : index
    %c0_56 = arith.constant 0 : index
    %162 = vector.load %arg11[%c0_55, %c0_56] : memref<32x960xf32, #tpu.memory_space<vmem>>, vector<32x960xf32>
    %cst_57 = arith.constant dense<0.000000e+00> : vector<32x146xf32>
    %163 = tpu.matmul %162, %161, %cst_57 {dimension_numbers = #tpu.dot_dimension_numbers<[1], [0], [0], [1], [0, 0, 1, 1], [], []>} : vector<32x960xf32>, vector<960x146xf32>, vector<32x146xf32> -> vector<32x146xf32>
    %c0_58 = arith.constant 0 : index
    %c0_59 = arith.constant 0 : index
    %164 = vector.load %arg12[%c0_58, %c0_59] : memref<32x1xf32, #tpu.memory_space<vmem>>, vector<32x1xf32>
    %165 = vector.broadcast %164 : vector<32x1xf32> to vector<32x146xf32>
    %166 = arith.addf %163, %165 : vector<32x146xf32>
    %cst_60 = arith.constant 0.000000e+00 : f32
    %167 = vector.broadcast %cst_60 : f32 to vector<32x146xf32>
    %168 = arith.maximumf %166, %167 : vector<32x146xf32>
    %c0_61 = arith.constant 0 : index
    %c0_62 = arith.constant 0 : index
    %169 = vector.load %arg13[%c0_61, %c0_62] : memref<146x330xf32, #tpu.memory_space<vmem>>, vector<146x330xf32>
    %cst_63 = arith.constant dense<0.000000e+00> : vector<32x330xf32>
    %170 = tpu.matmul %168, %169, %cst_63 {dimension_numbers = #tpu.dot_dimension_numbers<[1], [0], [0], [1], [0, 0, 1, 1], [], []>} : vector<32x146xf32>, vector<146x330xf32>, vector<32x330xf32> -> vector<32x330xf32>
    %171 = vector.extract_strided_slice %170 {offsets = [0, 0], sizes = [32, 153], strides = [1, 1]} : vector<32x330xf32> to vector<32x153xf32>
    %172 = vector.extract_strided_slice %170 {offsets = [0, 1], sizes = [32, 153], strides = [1, 1]} : vector<32x330xf32> to vector<32x153xf32>
    %173 = vector.extract_strided_slice %170 {offsets = [0, 2], sizes = [32, 153], strides = [1, 1]} : vector<32x330xf32> to vector<32x153xf32>
    %174 = vector.extract_strided_slice %170 {offsets = [0, 3], sizes = [32, 153], strides = [1, 1]} : vector<32x330xf32> to vector<32x153xf32>
    %175 = vector.extract_strided_slice %170 {offsets = [0, 4], sizes = [32, 153], strides = [1, 1]} : vector<32x330xf32> to vector<32x153xf32>
    %176 = vector.extract_strided_slice %170 {offsets = [0, 5], sizes = [32, 153], strides = [1, 1]} : vector<32x330xf32> to vector<32x153xf32>
    %177 = vector.extract_strided_slice %170 {offsets = [0, 6], sizes = [32, 153], strides = [1, 1]} : vector<32x330xf32> to vector<32x153xf32>
    %178 = vector.extract_strided_slice %170 {offsets = [0, 7], sizes = [32, 153], strides = [1, 1]} : vector<32x330xf32> to vector<32x153xf32>
    %179 = vector.extract_strided_slice %170 {offsets = [0, 8], sizes = [32, 153], strides = [1, 1]} : vector<32x330xf32> to vector<32x153xf32>
    %180 = vector.extract_strided_slice %170 {offsets = [0, 9], sizes = [32, 153], strides = [1, 1]} : vector<32x330xf32> to vector<32x153xf32>
    %181 = vector.extract_strided_slice %170 {offsets = [0, 10], sizes = [32, 153], strides = [1, 1]} : vector<32x330xf32> to vector<32x153xf32>
    %182 = vector.extract_strided_slice %170 {offsets = [0, 11], sizes = [32, 153], strides = [1, 1]} : vector<32x330xf32> to vector<32x153xf32>
    %183 = vector.extract_strided_slice %170 {offsets = [0, 12], sizes = [32, 153], strides = [1, 1]} : vector<32x330xf32> to vector<32x153xf32>
    %184 = tpu.concatenate %171, %172, %173, %174, %175, %176, %177, %178, %179, %180, %181, %182, %183 in 0 : vector<32x153xf32>, vector<32x153xf32>, vector<32x153xf32>, vector<32x153xf32>, vector<32x153xf32>, vector<32x153xf32>, vector<32x153xf32>, vector<32x153xf32>, vector<32x153xf32>, vector<32x153xf32>, vector<32x153xf32>, vector<32x153xf32>, vector<32x153xf32> -> vector<416x153xf32>
    %185 = vector.extract_strided_slice %170 {offsets = [0, 165], sizes = [32, 153], strides = [1, 1]} : vector<32x330xf32> to vector<32x153xf32>
    %186 = vector.extract_strided_slice %170 {offsets = [0, 166], sizes = [32, 153], strides = [1, 1]} : vector<32x330xf32> to vector<32x153xf32>
    %187 = vector.extract_strided_slice %170 {offsets = [0, 167], sizes = [32, 153], strides = [1, 1]} : vector<32x330xf32> to vector<32x153xf32>
    %188 = vector.extract_strided_slice %170 {offsets = [0, 168], sizes = [32, 153], strides = [1, 1]} : vector<32x330xf32> to vector<32x153xf32>
    %189 = vector.extract_strided_slice %170 {offsets = [0, 169], sizes = [32, 153], strides = [1, 1]} : vector<32x330xf32> to vector<32x153xf32>
    %190 = vector.extract_strided_slice %170 {offsets = [0, 170], sizes = [32, 153], strides = [1, 1]} : vector<32x330xf32> to vector<32x153xf32>
    %191 = vector.extract_strided_slice %170 {offsets = [0, 171], sizes = [32, 153], strides = [1, 1]} : vector<32x330xf32> to vector<32x153xf32>
    %192 = vector.extract_strided_slice %170 {offsets = [0, 172], sizes = [32, 153], strides = [1, 1]} : vector<32x330xf32> to vector<32x153xf32>
    %193 = vector.extract_strided_slice %170 {offsets = [0, 173], sizes = [32, 153], strides = [1, 1]} : vector<32x330xf32> to vector<32x153xf32>
    %194 = vector.extract_strided_slice %170 {offsets = [0, 174], sizes = [32, 153], strides = [1, 1]} : vector<32x330xf32> to vector<32x153xf32>
    %195 = vector.extract_strided_slice %170 {offsets = [0, 175], sizes = [32, 153], strides = [1, 1]} : vector<32x330xf32> to vector<32x153xf32>
    %196 = vector.extract_strided_slice %170 {offsets = [0, 176], sizes = [32, 153], strides = [1, 1]} : vector<32x330xf32> to vector<32x153xf32>
    %197 = vector.extract_strided_slice %170 {offsets = [0, 177], sizes = [32, 153], strides = [1, 1]} : vector<32x330xf32> to vector<32x153xf32>
    %198 = tpu.concatenate %185, %186, %187, %188, %189, %190, %191, %192, %193, %194, %195, %196, %197 in 0 : vector<32x153xf32>, vector<32x153xf32>, vector<32x153xf32>, vector<32x153xf32>, vector<32x153xf32>, vector<32x153xf32>, vector<32x153xf32>, vector<32x153xf32>, vector<32x153xf32>, vector<32x153xf32>, vector<32x153xf32>, vector<32x153xf32>, vector<32x153xf32> -> vector<416x153xf32>
    %199 = tpu.concatenate %184, %198 in 1 : vector<416x153xf32>, vector<416x153xf32> -> vector<416x306xf32>
    %c0_64 = arith.constant 0 : index
    %c0_65 = arith.constant 0 : index
    %200 = vector.load %arg14[%c0_64, %c0_65] : memref<13x416xf32, #tpu.memory_space<vmem>>, vector<13x416xf32>
    %cst_66 = arith.constant dense<0.000000e+00> : vector<13x306xf32>
    %201 = tpu.matmul %200, %199, %cst_66 {dimension_numbers = #tpu.dot_dimension_numbers<[1], [0], [0], [1], [0, 0, 1, 1], [], []>} : vector<13x416xf32>, vector<416x306xf32>, vector<13x306xf32> -> vector<13x306xf32>
    %c0_67 = arith.constant 0 : index
    %c0_68 = arith.constant 0 : index
    %202 = vector.load %arg15[%c0_67, %c0_68] : memref<13x1xf32, #tpu.memory_space<vmem>>, vector<13x1xf32>
    %203 = vector.broadcast %202 : vector<13x1xf32> to vector<13x306xf32>
    %204 = arith.addf %201, %203 : vector<13x306xf32>
    %cst_69 = arith.constant 0.000000e+00 : f32
    %205 = vector.broadcast %cst_69 : f32 to vector<13x306xf32>
    %206 = arith.maximumf %204, %205 : vector<13x306xf32>
    %207 = vector.extract_strided_slice %206 {offsets = [0, 0], sizes = [13, 153], strides = [1, 1]} : vector<13x306xf32> to vector<13x153xf32>
    %c0_70 = arith.constant 0 : index
    %c0_71 = arith.constant 0 : index
    %c0_72 = arith.constant 0 : index
    %208 = vector.load %arg16[%c0_70, %c0_71, %c0_72] : memref<2x13x153xf32, #tpu.memory_space<vmem>>, vector<1x13x153xf32>
    %209 = vector.shape_cast %208 : vector<1x13x153xf32> to vector<13x153xf32>
    %210 = vector.shape_cast %207 : vector<13x153xf32> to vector<1x13x153xf32>
    tpu.vector_store %arg16[%c0_70, %c0_71, %c0_72], %210 {strides = array<i32>} : memref<2x13x153xf32, #tpu.memory_space<vmem>>, vector<1x13x153xf32>,
    %211 = vector.extract_strided_slice %206 {offsets = [0, 153], sizes = [13, 153], strides = [1, 1]} : vector<13x306xf32> to vector<13x153xf32>
    %c1_73 = arith.constant 1 : index
    %c0_74 = arith.constant 0 : index
    %c0_75 = arith.constant 0 : index
    %212 = vector.load %arg16[%c1_73, %c0_74, %c0_75] : memref<2x13x153xf32, #tpu.memory_space<vmem>>, vector<1x13x153xf32>
    %213 = vector.shape_cast %212 : vector<1x13x153xf32> to vector<13x153xf32>
    %214 = vector.shape_cast %211 : vector<13x153xf32> to vector<1x13x153xf32>
    tpu.vector_store %arg16[%c1_73, %c0_74, %c0_75], %214 {strides = array<i32>} : memref<2x13x153xf32, #tpu.memory_space<vmem>>, vector<1x13x153xf32>,
    return
  }
}

</mosaic_0001>

<bundles_post_ra>
// kernel: us_cnn_forward.1
= control target key start
LH: loop header
LB: loop body
LE: loop exit
PB: predicated region body
PF: predicated region fallthrough
CT: control target
= control target key end

     0   :  { %s12874_s0 = inlined_call_operand.vmem [shape: f32[2,4,16], index: 0, kind: input, shape index: {}]   ;;  %s12875_s1 = inlined_call_operand.vmem [shape: f32[32,12], index: 1, kind: input, shape index: {}]   ;;  %s12876_s2 = inlined_call_operand.vmem [shape: f32[32,1], index: 2, kind: input, shape index: {}]   ;;  %s12877_s3 = inlined_call_operand.vmem [shape: f32[64,96], index: 3, kind: input, shape index: {}]   ;;  %s12878_s4 = inlined_call_operand.vmem [shape: f32[64,1], index: 4, kind: input, shape index: {}]   ;;  %s12879_s5 = inlined_call_operand.vmem [shape: f32[32,192], index: 5, kind: input, shape index: {}]   ;;  %s12880_s6 = inlined_call_operand.vmem [shape: f32[32,1], index: 6, kind: input, shape index: {}]   ;;  %s12881_s7 = inlined_call_operand.vmem [shape: f32[1,45], index: 7, kind: input, shape index: {}]   ;;  %s12882_s8 = inlined_call_operand.hbm [shape: f32[64,480], index: 8, kind: input, shape index: {}]   ;;  %s12883_s9 = inlined_call_operand.vmem [shape: f32[64,1], index: 9, kind: input, shape index: {}]   ;;  %s12884_s10 = inlined_call_operand.vmem [shape: f32[62,174], index: 10, kind: input, shape index: {}]   ;;  %s12885_s11 = inlined_call_operand.hbm [shape: f32[32,960], index: 11, kind: input, shape index: {}]   ;;  %s12886_s12 = inlined_call_operand.vmem [shape: f32[32,1], index: 12, kind: input, shape index: {}]   ;;  %s12887_s13 = inlined_call_operand.hbm [shape: f32[146,330], index: 13, kind: input, shape index: {}]   ;;  %s12888_s14 = inlined_call_operand.hbm [shape: f32[13,416], index: 14, kind: input, shape index: {}]   ;;  %s12889_s15 = inlined_call_operand.vmem [shape: f32[13,1], index: 15, kind: input, shape index: {}]   ;;  %s12890_s16 = inlined_call_operand.vmem [shape: f32[2,13,153], index: 16, kind: output, shape index: {}]  }
   0x1   :  { %13392 = sst [smem:[#allocation159_spill]] %s12874_s0 }
   0x2   :  { %21 = vsyncpa [#allocation3], 0 }
   0x3   :  { %22 = vsyncpa [#allocation5], 0  ;;  %s61_s23 = sshll.u32 %s12885_s11, 4  ;;  %s62_s23 = int_to_ptr.hbm [resolvable:$true] %s61_s23 }
   0x4   :  { %23 = vsyncpa [#allocation8], 0  ;;  %s7656_s24 = smov [#allocation4]   ;;  %s44_s28 = sshll.u32 %s12882_s8, 4  ;;  %s45_s28 = int_to_ptr.hbm [resolvable:$true] %s44_s28 }
   0x5   :  { %s63_s25 = sshll.u32 %s7656_s24, 4  ;;  %s7657_s29 = smov 1024   ;;  %s64_s25 = int_to_ptr.vmem [resolvable:$true] %s63_s25 }
   0x6   :  { %s7658_s30 = smov 64   ;;  %s7659_s0 = smov [#allocation2]  }
   0x7   :  { %69 = dma.hbm_to_vmem [thread:$0]  %s62_s23, 4096, %s64_s25, [#allocation5], %s7657_s29, %s7657_s29, %s7658_s30  }
   0x8   :  { %s46_s17 = sshll.u32 %s7659_s0, 4  ;;  %s7660_s18 = smov 512   ;;  %s47_s17 = int_to_ptr.vmem [resolvable:$true] %s46_s17 }
   0x9   :  { %s7661_s19 = smov 32   ;;  %s76_s21 = sshll.u32 %s12887_s13, 4  ;;  %s77_s21 = int_to_ptr.hbm [resolvable:$true] %s76_s21 }
   0xa   :  { %52 = dma.hbm_to_vmem [thread:$0]  %s45_s28, 4096, %s47_s17, [#allocation3], %s7660_s18, %s7660_s18, %s7661_s19  }
   0xb   :  { %s7662_s22 = smov [#allocation6]   ;;  %s89_s27 = sshll.u32 %s12888_s14, 4  ;;  %s90_s27 = int_to_ptr.hbm [resolvable:$true] %s89_s27 }
   0xc   :  { %s78_s24 = sshll.u32 %s7662_s22, 4  ;;  %s7663_s23 = smov 384   ;;  %s79_s24 = int_to_ptr.vmem [resolvable:$true] %s78_s24 }
   0xd   :  { %s7664_s25 = smov 24   ;;  %s7665_s29 = smov [#allocation7]  }
   0xe   :  { %84 = dma.hbm_to_vmem [thread:$0]  %s77_s21, 7296, %s79_s24, [#allocation5], %s7663_s23, %s7663_s23, %s7664_s25  }
   0xf   :  { %s91_s30 = sshll.u32 %s7665_s29, 4  ;;  %s92_s30 = int_to_ptr.vmem [resolvable:$true] %s91_s30 }
  0x10   :  { %97 = dma.hbm_to_vmem [thread:$0]  %s90_s27, 1024, %s92_s30, [#allocation8], %s7660_s18, %s7660_s18, %s7661_s19  }
  0x11   :  { %7650 = dma.done.wait [#allocation3], 4096  }
  0x12   :  { %7651 = vsyncadd [#allocation3], 4294963200 }
  0x13   :  { %7652 = dma.done.wait [#allocation5], 11392  }
  0x14   :  { %7653 = vsyncadd [#allocation5], 4294955904 }
  0x15   :  { %7654 = dma.done.wait [#allocation8], 1024  }
  0x16   :  { %7655 = vsyncadd [#allocation8], 4294966272  ;;  %s13393_s0 = sld [smem:[#allocation159_spill]]  ;;  %s7666_s17 = smov 14   ;;  %v126_v1 = vld [vmem:[%s12875_s1 + $0x8] sm:$0xff]  ;;  %v125_v3 = vld [vmem:[%s12875_s1] sm:$0xff] }
  0x17   :  { %s7667_s14 = smov 13   ;;  %s7668_s21 = smov 124   ;;  %v127_v4 = vld [vmem:[%s12875_s1 + $0x10] sm:$0xff]  ;;  %v128_v5 = vld [vmem:[%s12875_s1 + $0x18] sm:$0xff]  ;;  %vm123_vm0 = vcmask 113664   ;;  %vm158_vm1 = vcmask 1043456  }
  0x18   :  { %143 = vrot.lane.b32.xlu2 %v126_v1, %s7668_s21  ;;  %s7669_s27 = smov 127   ;;  %s7670_s29 = smov 126   ;;  %vm149_vm2 = vcmask 31744   ;;  %v290_v14 = vld [vmem:[%s12876_s2] sm:$0xff]  ;;  %v7673_v15 = vmov 0   ;;  %v293_v20 = vld [vmem:[%s12876_s2 + $0x18] sm:$0xff] }
  0x19   :  { %s7671_s30 = smov 12   ;;  %s7672_s13 = smov 120   ;;  %5417 = vset.pattern.permute.xlu1 %v7673_v15  ;;  %5419 = vset.pattern.permute.xlu0 %v7673_v15  ;;  %v292_v21 = vld [vmem:[%s12876_s2 + $0x10] sm:$0xff]  ;;  %v291_v22 = vld [vmem:[%s12876_s2 + $0x8] sm:$0xff]  ;;  %vm374_vm3 = vcmask 97280   ;;  %vm443_vm4 = vcmask 785408  }
  0x1a   :  { %5418 = vset.pattern.permute.xlu2 %v7673_v15  ;;  %v400_v15 = vld [vmem:[%s12878_s4 + $0x28] sm:$0xff]  ;;  %vm621_vm5 = vcmask 80896   ;;  %vm678_vm6 = vcmask 523264   ;;  %s7676_s20 = smov 45   ;;  %vm836_vm8 = vcmask 367616   ;;  %s7681_s18 = smov 115  }
  0x1b   :  { %s7682_s2 = smov 117   ;;  %s7683_s19 = smov 119   ;;  %vm1181_vm9 = vcmask 252928   ;;  %vm1559_vm10 = vcmask 1045504   ;;  %vm1534_vm11 = vcmask 506880   ;;  %vm2016_vm12 = vcmask 1039360  }
  0x1c   :  { %v5299_v0 = vld [vmem:[%s13393_s0 + $0x4] sm:$0xf]  ;;  %v116_v2 = vld [vmem:[%s13393_s0] sm:$0xf]  ;;  %s7684_s22 = smov 114   ;;  %s7685_s24 = smov 116  }
  0x1d   :  { %120 = vrot.lane.b32.xlu0 %v5299_v0, %s7666_s17  ;;  %133 = vrot.lane.b32.xlu1 %v5299_v0, %s7667_s14  ;;  %vm2066_vm13 = vcmask 1022976   ;;  %vm2041_vm14 = vcmask 1031168   ;;  %vm2091_vm15 = vcmask 1014784  }
  0x20   :  { %145 = vrot.lane.b32.xlu2 %v127_v4, %s7668_s21 }
  0x25   :  { %130 = vrot.lane.b32.xlu0 %v116_v2, %s7669_s27  ;;  %141 = vrot.lane.b32.xlu1 %v125_v3, %s7668_s21 }
  0x28   :  { %234 = vrot.lane.b32.xlu2 %v5299_v0, %s7671_s30 }
  0x2d   :  { %147 = vrot.lane.b32.xlu0 %v128_v5, %s7668_s21  ;;  %231 = vrot.lane.b32.xlu1 %v116_v2, %s7670_s29 }
  0x30   :  { %242 = vrot.lane.b32.xlu2 %v127_v4, %s7672_s13 }
  0x35   :  { %238 = vrot.lane.b32.xlu0 %v125_v3, %s7672_s13  ;;  %240 = vrot.lane.b32.xlu1 %v126_v1, %s7672_s13 }
  0x38   :  { %301 = vperm.xlu2 %5418, %v291_v22  }
  0x3d   :  { %244 = vrot.lane.b32.xlu0 %v128_v5, %s7672_s13  ;;  %296 = vperm.xlu1 %5417, %v290_v14   ;;  %v398_v14 = vld [vmem:[%s12878_s4 + $0x18] sm:$0xff] }
  0x45   :  { %306 = vperm.xlu0 %5419, %v292_v21   ;;  %311 = vperm.xlu1 %5417, %v293_v20  }
  0x72   :  { %v144_v6 = vpop.permute.xlu2 %143 }
  0x7a   :  { %v146_v10 = vpop.permute.xlu2 %145 }
  0x82   :  { %v235_v16 = vpop.permute.xlu2 %234 }
  0x8a   :  { %v243_v25 = vpop.permute.xlu2 %242 }
  0x8f   :  { %v121_v7 = vpop.permute.xlu0 %120  ;;  %v134_v8 = vpop.permute.xlu1 %133 }
  0x90   :  { %v124_v9 = vsel %vm123_vm0, %v116_v2, %v121_v7 }
  0x91   :  { %5305 = vmatpush.msk.msra.mxu1 %vm158_vm1, %v124_v9 }
  0x92   :  { %5306 = vmatmul.msk.f32.vlgmr.msra.gmra.mxu1 %vm149_vm2, %v125_v3  ;;  %v302_v37 = vpop.permute.xlu2 %301  ;;  %v396_v3 = vld [vmem:[%s12878_s4 + $0x8] sm:$0xff] }
  0x97   :  { %v131_v11 = vpop.permute.xlu0 %130  ;;  %v142_v12 = vpop.permute.xlu1 %141 }
  0x98   :  { %v136_v13 = vsel %vm123_vm0, %v131_v11, %v134_v8 }
  0x99   :  { %5300 = vmatpush.msk.msra.mxu0 %vm158_vm1, %v136_v13  ;;  %v397_v13 = vld [vmem:[%s12878_s4 + $0x10] sm:$0xff] }
  0x9a   :  { %5301 = vmatmul.msk.f32.vlgmr.msra.gmra.mxu0 %vm149_vm2, %v142_v12  ;;  %5307 = vmatmul.msk.f32.gmra.mxu1 %vm149_vm2, %v126_v1  ;;  %v395_v12 = vld [vmem:[%s12878_s4] sm:$0xff] }
  0x9f   :  { %v148_v17 = vpop.permute.xlu0 %147  ;;  %v232_v18 = vpop.permute.xlu1 %231 }
  0xa0   :  { %v237_v19 = vsel %vm123_vm0, %v232_v18, %v235_v16  ;;  %v401_v16 = vld [vmem:[%s12878_s4 + $0x30] sm:$0xff]  ;;  %vm2141_vm0 = vcmask 998400  }
  0xa1   :  { %5310 = vmatpush.msk.msra.mxu2 %vm158_vm1, %v237_v19  ;;  %vm2116_vm1 = vcmask 1006592  }
  0xa2   :  { %5302 = vmatmul.msk.f32.gmra.mxu0 %vm149_vm2, %v144_v6  ;;  %5308 = vmatmul.msk.f32.gmra.mxu1 %vm149_vm2, %v127_v4  ;;  %v399_v4 = vld [vmem:[%s12878_s4 + $0x20] sm:$0xff] }
  0xa7   :  { %v239_v23 = vpop.permute.xlu0 %238  ;;  %v241_v24 = vpop.permute.xlu1 %240 }
  0xa8   :  { %5311 = vmatmul.msk.f32.vlgmr.msra.gmra.mxu2 %vm149_vm2, %v239_v23 }
  0xaa   :  { %5303 = vmatmul.msk.f32.gmra.mxu0 %vm149_vm2, %v146_v10  ;;  %5309 = vmatmul.msk.f32.gmra.mxu1 %vm149_vm2, %v128_v5  ;;  %v402_v5 = vld [vmem:[%s12878_s4 + $0x38] sm:$0xff]  ;;  %s7679_s4 = smov 125  }
  0xaf   :  { %v245_v26 = vpop.permute.xlu0 %244  ;;  %v297_v34 = vpop.permute.xlu1 %296 }
  0xb0   :  { %5312 = vmatmul.msk.f32.gmra.mxu2 %vm149_vm2, %v241_v24 }
  0xb2   :  { %5304 = vmatmul.msk.f32.gmra.mxu0 %vm149_vm2, %v148_v17 }
  0xb7   :  { %v307_v51 = vpop.permute.xlu0 %306  ;;  %v312_v56 = vpop.permute.xlu1 %311 }
  0xb8   :  { %5313 = vmatmul.msk.f32.gmra.mxu2 %vm149_vm2, %v243_v25 }
  0xc0   :  { %5314 = vmatmul.msk.f32.gmra.mxu2 %vm149_vm2, %v245_v26  ;;  %vm2166_vm2 = vcmask 990208  }
 0x10f   :  { %v219_v27 = vpop.f32.mrf.mxu1 }
 0x117   :  { %v179_v28 = vpop.f32.mrf.mxu0  ;;  %v222_v29 = vpop.f32.mrf.mxu1 }
 0x118   :  { %v220_v32 = vadd.f32 %v219_v27, %v179_v28 }
 0x11f   :  { %v182_v30 = vpop.f32.mrf.mxu0  ;;  %v225_v41 = vpop.f32.mrf.mxu1 }
 0x120   :  { %v223_v35 = vadd.f32 %v222_v29, %v182_v30 }
 0x127   :  { %v185_v40 = vpop.f32.mrf.mxu0  ;;  %v228_v49 = vpop.f32.mrf.mxu1 }
 0x128   :  { %v226_v47 = vadd.f32 %v225_v41, %v185_v40  ;;  %v387_v41 = vld [vmem:[%s12877_s3] sm:$0xff] }
 0x12b   :  { %v274_v31 = vpop.f32.mrf.mxu2 }
 0x12c   :  { %v286_v33 = vadd.f32 %v274_v31, %v220_v32 }
 0x12e   :  { %v7842_v38 = vadd.f32 %v297_v34, %v286_v33 }
 0x12f   :  { %v188_v48 = vpop.f32.mrf.mxu0 }
 0x130   :  { %v318_v43 = vmax.f32 %v7842_v38, 0.0  ;;  %v229_v52 = vadd.f32 %v228_v49, %v188_v48  ;;  %v390_v38 = vld [vmem:[%s12877_s3 + $0x18] sm:$0xff] }
 0x131   :  { %v394_v48 = vld [vmem:[%s12877_s3 + $0x38] sm:$0xff] }
 0x133   :  { %v277_v36 = vpop.f32.mrf.mxu2 }
 0x134   :  { %v287_v39 = vadd.f32 %v277_v36, %v223_v35 }
 0x136   :  { %v7844_v42 = vadd.f32 %v302_v37, %v287_v39 }
 0x138   :  { %v319_v44 = vmax.f32 %v7844_v42, 0.0  ;;  %v388_v42 = vld [vmem:[%s12877_s3 + $0x8] sm:$0xff] }
 0x13a   :  { %v5420_v45 = vpack.i.bf16 %v319_v44, %v318_v43 }
 0x13b   :  { %v280_v46 = vpop.f32.mrf.mxu2 }
 0x13c   :  { %5421 = vrot.lane.b32.xlu2 %v5420_v45, %s7669_s27  ;;  %v288_v50 = vadd.f32 %v280_v46, %v226_v47  ;;  %v392_v46 = vld [vmem:[%s12877_s3 + $0x28] sm:$0xff]  ;;  %v393_v47 = vld [vmem:[%s12877_s3 + $0x30] sm:$0xff] }
 0x13e   :  { %v7853_v54 = vadd.f32 %v307_v51, %v288_v50 }
 0x140   :  { %v320_v58 = vmax.f32 %v7853_v54, 0.0 }
 0x143   :  { %v283_v53 = vpop.f32.mrf.mxu2 }
 0x144   :  { %v289_v55 = vadd.f32 %v283_v53, %v229_v52  ;;  %5431 = vrot.lane.b32.xlu2 %v5420_v45, %s7670_s29 }
 0x146   :  { %v7856_v57 = vadd.f32 %v312_v56, %v289_v55 }
 0x148   :  { %v321_v59 = vmax.f32 %v7856_v57, 0.0 }
 0x14a   :  { %v5435_v60 = vpack.i.bf16 %v321_v59, %v320_v58 }
 0x14c   :  { %5436 = vrot.lane.b32.xlu0 %v5435_v60, %s7670_s29  ;;  %5426 = vrot.lane.b32.xlu1 %v5435_v60, %s7669_s27 }
 0x196   :  { %v5422_v61 = vpop.permute.xlu2 %5421 }
 0x197   :  { %v5424_v62 = vunpack.i.h.bf16 %v5422_v61  ;;  %v5423_v63 = vunpack.i.l.bf16 %v5422_v61  ;;  %5441 = vrot.lane.b32.xlu1 %v5422_v61, %s7670_s29 }
 0x19e   :  { %v7867_v0 = vpop.permute.xlu2 %5431 }
 0x19f   :  { %v5434_v1 = vunpack.i.h.bf16 %v7867_v0  ;;  %v5433_v2 = vunpack.i.l.bf16 %v7867_v0  ;;  %5451 = vrot.lane.b32.xlu0 %v7867_v0, %s7670_s29 }
 0x1a1   :  { %v376_v40 = vsel %vm374_vm3, %v319_v44, %v5434_v1  ;;  %v375_v45 = vsel %vm374_vm3, %v318_v43, %v5433_v2  ;;  %v389_v44 = vld [vmem:[%s12877_s3 + $0x10] sm:$0xff]  ;;  %v391_v43 = vld [vmem:[%s12877_s3 + $0x20] sm:$0xff]  ;;  %s7674_s3 = smov 118  }
 0x1a7   :  { %410 = vperm.xlu0 %5419, %v396_v3  }
 0x1af   :  { %425 = vperm.xlu0 %5419, %v399_v4  }
 0x1b7   :  { %440 = vperm.xlu0 %5419, %v402_v5  }
 0x1be   :  { %v5437_v6 = vpop.permute.xlu0 %5436  ;;  %v5427_v7 = vpop.permute.xlu1 %5426 }
 0x1bf   :  { %v5439_v8 = vunpack.i.h.bf16 %v5437_v6  ;;  %v5438_v9 = vunpack.i.l.bf16 %v5437_v6  ;;  %v5429_v10 = vunpack.i.h.bf16 %v5427_v7  ;;  %v5428_v11 = vunpack.i.l.bf16 %v5427_v7  ;;  %5446 = vrot.lane.b32.xlu2 %v5427_v7, %s7670_s29  ;;  %5456 = vrot.lane.b32.xlu1 %v5437_v6, %s7670_s29 }
 0x1c1   :  { %v378_v37 = vsel %vm374_vm3, %v321_v59, %v5439_v8  ;;  %v377_v39 = vsel %vm374_vm3, %v320_v58, %v5438_v9 }
 0x1c7   :  { %405 = vperm.xlu2 %5418, %v395_v12   ;;  %415 = vperm.xlu1 %5417, %v397_v13  }
 0x1cf   :  { %420 = vperm.xlu2 %5418, %v398_v14   ;;  %430 = vperm.xlu1 %5417, %v400_v15  }
 0x1d7   :  { %435 = vperm.xlu2 %5418, %v401_v16  }
 0x209   :  { %v5442_v17 = vpop.permute.xlu1 %5441 }
 0x20a   :  { %v5444_v31 = vunpack.i.h.bf16 %v5442_v17  ;;  %v5443_v33 = vunpack.i.l.bf16 %v5442_v17 }
 0x20c   :  { %v380_v35 = vsel %vm374_vm3, %v5424_v62, %v5444_v31  ;;  %v379_v36 = vsel %vm374_vm3, %v5423_v63, %v5443_v33 }
 0x211   :  { %v5452_v18 = vpop.permute.xlu0 %5451 }
 0x212   :  { %v5454_v22 = vunpack.i.h.bf16 %v5452_v18  ;;  %v5453_v25 = vunpack.i.l.bf16 %v5452_v18 }
 0x214   :  { %v384_v28 = vsel %vm374_vm3, %v5434_v1, %v5454_v22  ;;  %v383_v30 = vsel %vm374_vm3, %v5433_v2, %v5453_v25 }
 0x219   :  { %v5447_v24 = vpop.permute.xlu2 %5446  ;;  %v411_v52 = vpop.permute.xlu0 %410 }
 0x21a   :  { %v5449_v27 = vunpack.i.h.bf16 %v5447_v24  ;;  %v5448_v29 = vunpack.i.l.bf16 %v5447_v24 }
 0x21c   :  { %v382_v32 = vsel %vm374_vm3, %v5429_v10, %v5449_v27  ;;  %v381_v34 = vsel %vm374_vm3, %v5428_v11, %v5448_v29 }
 0x221   :  { %v406_v50 = vpop.permute.xlu2 %405  ;;  %v426_v4 = vpop.permute.xlu0 %425 }
 0x229   :  { %v421_v61 = vpop.permute.xlu2 %420  ;;  %v441_v15 = vpop.permute.xlu0 %440 }
 0x231   :  { %v5457_v19 = vpop.permute.xlu1 %5456  ;;  %v436_v13 = vpop.permute.xlu2 %435 }
 0x232   :  { %v5459_v20 = vunpack.i.h.bf16 %v5457_v19  ;;  %v5458_v21 = vunpack.i.l.bf16 %v5457_v19 }
 0x234   :  { %v386_v23 = vsel %vm374_vm3, %v5439_v8, %v5459_v20  ;;  %v385_v26 = vsel %vm374_vm3, %v5438_v9, %v5458_v21  ;;  %vm2216_vm3 = vcmask 973824  }
 0x235   :  { %472 = vmatpush.msra.mxu3 %v386_v23 }
 0x237   :  { %473 = vmatpush.msra.mxu3 %v385_v26 }
 0x239   :  { %474 = vmatpush.msra.mxu3 %v384_v28  ;;  %v416_v59 = vpop.permute.xlu1 %415 }
 0x23b   :  { %475 = vmatpush.msra.mxu3 %v383_v30 }
 0x23d   :  { %476 = vmatpush.msra.mxu3 %v382_v32 }
 0x23f   :  { %477 = vmatpush.msra.mxu3 %v381_v34 }
 0x241   :  { %478 = vmatpush.msra.mxu3 %v380_v35  ;;  %v431_v6 = vpop.permute.xlu1 %430 }
 0x243   :  { %479 = vmatpush.msra.mxu3 %v379_v36  ;;  %v656_v36 = vld [vmem:[%s12880_s6 + $0x10] sm:$0xff] }
 0x245   :  { %480 = vmatpush.msra.mxu3 %v378_v37 }
 0x247   :  { %481 = vmatpush.msra.mxu3 %v377_v39 }
 0x249   :  { %482 = vmatpush.msra.mxu3 %v376_v40 }
 0x24b   :  { %483 = vmatpush.msra.mxu3 %v375_v45 }
 0x24c   :  { %5315 = vmatmul.msk.f32.vlgmr.msra.gmra.mxu3 %vm443_vm4, %v387_v41  ;;  %v1276_v41 = vld [vmem:[%s12883_s9 + $0x10] sm:$0xff] }
 0x254   :  { %5316 = vmatmul.msk.f32.gmra.mxu3 %vm443_vm4, %v388_v42 }
 0x25c   :  { %5317 = vmatmul.msk.f32.gmra.mxu3 %vm443_vm4, %v389_v44 }
 0x264   :  { %5318 = vmatmul.msk.f32.gmra.mxu3 %vm443_vm4, %v390_v38  ;;  %v654_v38 = vld [vmem:[%s12880_s6] sm:$0xff] }
 0x26c   :  { %5319 = vmatmul.msk.f32.gmra.mxu3 %vm443_vm4, %v391_v43  ;;  %v1279_v43 = vld [vmem:[%s12883_s9 + $0x28] sm:$0xff] }
 0x274   :  { %5320 = vmatmul.msk.f32.gmra.mxu3 %vm443_vm4, %v392_v46 }
 0x27c   :  { %5321 = vmatmul.msk.f32.gmra.mxu3 %vm443_vm4, %v393_v47 }
 0x284   :  { %5322 = vmatmul.msk.f32.gmra.mxu3 %vm443_vm4, %v394_v48 }
 0x2cf   :  { %v485_v49 = vpop.f32.mrf.mxu3 }
 0x2d0   :  { %v7955_v51 = vadd.f32 %v485_v49, %v406_v50  ;;  %v657_v49 = vld [vmem:[%s12880_s6 + $0x18] sm:$0xff]  ;;  %v1274_v50 = vld [vmem:[%s12883_s9] sm:$0xff] }
 0x2d2   :  { %v509_v55 = vmax.f32 %v7955_v51, 0.0  ;;  %v650_v51 = vld [vmem:[%s12879_s5 + $0x20] sm:$0xff] }
 0x2d7   :  { %v488_v53 = vpop.f32.mrf.mxu3 }
 0x2d8   :  { %v7957_v54 = vadd.f32 %v488_v53, %v411_v52  ;;  %v655_v52 = vld [vmem:[%s12880_s6 + $0x8] sm:$0xff]  ;;  %v1277_v53 = vld [vmem:[%s12883_s9 + $0x18] sm:$0xff]  ;;  %s7678_s6 = smov 123  }
 0x2da   :  { %v510_v56 = vmax.f32 %v7957_v54, 0.0  ;;  %v651_v54 = vld [vmem:[%s12879_s5 + $0x28] sm:$0xff] }
 0x2dc   :  { %v5460_v57 = vpack.i.bf16 %v510_v56, %v509_v55 }
 0x2de   :  { %5461 = vrot.lane.b32.xlu1 %v5460_v57, %s7669_s27 }
 0x2df   :  { %v491_v58 = vpop.f32.mrf.mxu3 }
 0x2e0   :  { %v7966_v60 = vadd.f32 %v491_v58, %v416_v59  ;;  %v1280_v58 = vld [vmem:[%s12883_s9 + $0x30] sm:$0xff]  ;;  %v1278_v59 = vld [vmem:[%s12883_s9 + $0x20] sm:$0xff] }
 0x2e2   :  { %v511_v0 = vmax.f32 %v7966_v60, 0.0 }
 0x2e7   :  { %v494_v62 = vpop.f32.mrf.mxu3 }
 0x2e8   :  { %v7968_v63 = vadd.f32 %v494_v62, %v421_v61  ;;  %v1281_v61 = vld [vmem:[%s12883_s9 + $0x38] sm:$0xff] }
 0x2ea   :  { %v512_v1 = vmax.f32 %v7968_v63, 0.0 }
 0x2ec   :  { %v5465_v2 = vpack.i.bf16 %v512_v1, %v511_v0 }
 0x2ee   :  { %5466 = vrot.lane.b32.xlu2 %v5465_v2, %s7669_s27 }
 0x2ef   :  { %v497_v3 = vpop.f32.mrf.mxu3 }
 0x2f0   :  { %v7977_v5 = vadd.f32 %v497_v3, %v426_v4 }
 0x2f2   :  { %v513_v9 = vmax.f32 %v7977_v5, 0.0 }
 0x2f6   :  { %5481 = vrot.lane.b32.xlu2 %v5460_v57, %s7670_s29  ;;  %v1275_v57 = vld [vmem:[%s12883_s9 + $0x8] sm:$0xff]  ;;  %s7680_s9 = smov 122  }
 0x2f7   :  { %v500_v7 = vpop.f32.mrf.mxu3 }
 0x2f8   :  { %v7980_v8 = vadd.f32 %v500_v7, %v431_v6 }
 0x2fa   :  { %v514_v10 = vmax.f32 %v7980_v8, 0.0  ;;  %v649_v8 = vld [vmem:[%s12879_s5 + $0x18] sm:$0xff] }
 0x2fc   :  { %v5470_v11 = vpack.i.bf16 %v514_v10, %v513_v9 }
 0x2fe   :  { %5471 = vrot.lane.b32.xlu0 %v5470_v11, %s7669_s27 }
 0x2ff   :  { %v503_v12 = vpop.f32.mrf.mxu3 }
 0x300   :  { %v7989_v14 = vadd.f32 %v503_v12, %v436_v13 }
 0x302   :  { %v515_v18 = vmax.f32 %v7989_v14, 0.0 }
 0x306   :  { %5486 = vrot.lane.b32.xlu0 %v5465_v2, %s7670_s29 }
 0x307   :  { %v506_v16 = vpop.f32.mrf.mxu3 }
 0x308   :  { %v7992_v17 = vadd.f32 %v506_v16, %v441_v15 }
 0x30a   :  { %v516_v19 = vmax.f32 %v7992_v17, 0.0 }
 0x30c   :  { %v5495_v20 = vpack.i.bf16 %v516_v19, %v515_v18 }
 0x30e   :  { %5496 = vrot.lane.b32.xlu2 %v5495_v20, %s7670_s29  ;;  %5476 = vrot.lane.b32.xlu1 %v5495_v20, %s7669_s27 }
 0x316   :  { %5491 = vrot.lane.b32.xlu1 %v5470_v11, %s7670_s29 }
 0x348   :  { %v8003_v21 = vpop.permute.xlu2 %5466 }
 0x349   :  { %v5469_v22 = vunpack.i.h.bf16 %v8003_v21  ;;  %v5468_v23 = vunpack.i.l.bf16 %v8003_v21  ;;  %5506 = vrot.lane.b32.xlu1 %v8003_v21, %s7670_s29 }
 0x350   :  { %v8009_v24 = vpop.permute.xlu2 %5481  ;;  %v8011_v25 = vpop.permute.xlu1 %5461 }
 0x351   :  { %v5484_v26 = vunpack.i.h.bf16 %v8009_v24  ;;  %v5483_v27 = vunpack.i.l.bf16 %v8009_v24  ;;  %v5464_v28 = vunpack.i.h.bf16 %v8011_v25  ;;  %v5463_v29 = vunpack.i.l.bf16 %v8011_v25  ;;  %5516 = vrot.lane.b32.xlu1 %v8009_v24, %s7670_s29  ;;  %5501 = vrot.lane.b32.xlu0 %v8011_v25, %s7670_s29  ;;  %v647_v25 = vld [vmem:[%s12879_s5 + $0x8] sm:$0xff] }
 0x353   :  { %v623_v63 = vsel %vm621_vm5, %v510_v56, %v5484_v26  ;;  %v622_v60 = vsel %vm621_vm5, %v509_v55, %v5483_v27  ;;  %v648_v56 = vld [vmem:[%s12879_s5 + $0x10] sm:$0xff] }
 0x354   :  { %v652_v55 = vld [vmem:[%s12879_s5 + $0x30] sm:$0xff] }
 0x368   :  { %v8021_v30 = vpop.permute.xlu2 %5496 }
 0x369   :  { %v5499_v31 = vunpack.i.h.bf16 %v8021_v30  ;;  %v5498_v32 = vunpack.i.l.bf16 %v8021_v30  ;;  %5536 = vrot.lane.b32.xlu1 %v8021_v30, %s7670_s29 }
 0x370   :  { %v8027_v33 = vpop.permute.xlu0 %5471 }
 0x371   :  { %v5474_v34 = vunpack.i.h.bf16 %v8027_v33  ;;  %v5473_v35 = vunpack.i.l.bf16 %v8027_v33  ;;  %5511 = vrot.lane.b32.xlu2 %v8027_v33, %s7670_s29  ;;  %670 = vperm.xlu1 %5417, %v656_v36  }
 0x378   :  { %v8036_v37 = vpop.permute.xlu0 %5486 }
 0x379   :  { %v5489_v39 = vunpack.i.h.bf16 %v8036_v37  ;;  %v5488_v40 = vunpack.i.l.bf16 %v8036_v37  ;;  %5521 = vrot.lane.b32.xlu2 %v8036_v37, %s7670_s29  ;;  %1294 = vperm.xlu1 %5417, %v1276_v41  }
 0x37b   :  { %v624_v5 = vsel %vm621_vm5, %v511_v0, %v5488_v40  ;;  %v653_v0 = vld [vmem:[%s12879_s5 + $0x38] sm:$0xff] }
 0x380   :  { %v5477_v45 = vpop.permute.xlu1 %5476 }
 0x381   :  { %v5479_v42 = vunpack.i.h.bf16 %v5477_v45  ;;  %v5478_v44 = vunpack.i.l.bf16 %v5477_v45  ;;  %660 = vperm.xlu2 %5418, %v654_v38   ;;  %1309 = vperm.xlu1 %5417, %v1279_v43  }
 0x382   :  { %5526 = vrot.lane.b32.xlu0 %v5477_v45, %s7670_s29 }
 0x388   :  { %v8052_v46 = vpop.permute.xlu1 %5491 }
 0x389   :  { %v5494_v47 = vunpack.i.h.bf16 %v8052_v46  ;;  %v5493_v48 = vunpack.i.l.bf16 %v8052_v46  ;;  %675 = vperm.xlu2 %5418, %v657_v49  }
 0x38a   :  { %5531 = vrot.lane.b32.xlu0 %v8052_v46, %s7670_s29 }
 0x38b   :  { %v626_v14 = vsel %vm621_vm5, %v513_v9, %v5493_v48 }
 0x391   :  { %1284 = vperm.xlu2 %5418, %v1274_v50  }
 0x392   :  { %665 = vperm.xlu0 %5419, %v655_v52  }
 0x399   :  { %1299 = vperm.xlu2 %5418, %v1277_v53  }
 0x39a   :  { %1289 = vperm.xlu0 %5419, %v1275_v57  }
 0x3a1   :  { %1314 = vperm.xlu2 %5418, %v1280_v58  }
 0x3a2   :  { %1304 = vperm.xlu0 %5419, %v1278_v59  }
 0x3aa   :  { %1319 = vperm.xlu0 %5419, %v1281_v61  }
 0x3bb   :  { %v5507_v62 = vpop.permute.xlu1 %5506 }
 0x3bc   :  { %v5509_v43 = vunpack.i.h.bf16 %v5507_v62  ;;  %v5508_v53 = vunpack.i.l.bf16 %v5507_v62 }
 0x3be   :  { %v632_v33 = vsel %vm621_vm5, %v5468_v23, %v5508_v53 }
 0x3c3   :  { %v5517_v2 = vpop.permute.xlu1 %5516  ;;  %v5502_v12 = vpop.permute.xlu0 %5501 }
 0x3c4   :  { %v5503_v62 = vunpack.i.l.bf16 %v5502_v12  ;;  %v5518_v21 = vunpack.i.l.bf16 %v5517_v2 }
 0x3c6   :  { %v630_v23 = vsel %vm621_vm5, %v5463_v29, %v5503_v62  ;;  %v628_v29 = vsel %vm621_vm5, %v515_v18, %v5498_v32  ;;  %v638_v17 = vsel %vm621_vm5, %v5483_v27, %v5518_v21  ;;  %v625_v18 = vsel %vm621_vm5, %v512_v1, %v5489_v39  ;;  %v646_v1 = vld [vmem:[%s12879_s5] sm:$0xff] }
 0x3cb   :  { %v5512_v13 = vpop.permute.xlu2 %5511 }
 0x3cc   :  { %v5514_v36 = vunpack.i.h.bf16 %v5512_v13  ;;  %v5513_v45 = vunpack.i.l.bf16 %v5512_v13 }
 0x3ce   :  { %v635_v49 = vsel %vm621_vm5, %v5474_v34, %v5514_v36  ;;  %v634_v59 = vsel %vm621_vm5, %v5473_v35, %v5513_v45 }
 0x3d3   :  { %v5522_v50 = vpop.permute.xlu2 %5521 }
 0x3d4   :  { %v5524_v61 = vunpack.i.h.bf16 %v5522_v50 }
 0x3db   :  { %v5537_v3 = vpop.permute.xlu1 %5536 }
 0x3dc   :  { %v5539_v4 = vunpack.i.h.bf16 %v5537_v3  ;;  %v5538_v6 = vunpack.i.l.bf16 %v5537_v3  ;;  %v5523_v3 = vunpack.i.l.bf16 %v5522_v50 }
 0x3de   :  { %v645_v7 = vsel %vm621_vm5, %v5499_v31, %v5539_v4  ;;  %v644_v11 = vsel %vm621_vm5, %v5498_v32, %v5538_v6  ;;  %v5519_v4 = vunpack.i.h.bf16 %v5517_v2  ;;  %v641_v6 = vsel %vm621_vm5, %v5489_v39, %v5524_v61 }
 0x3df   :  { %728 = vmatpush.msrb.mxu1 %v645_v7  ;;  %v640_v7 = vsel %vm621_vm5, %v5488_v40, %v5523_v3 }
 0x3e0   :  { %v639_v2 = vsel %vm621_vm5, %v5484_v26, %v5519_v4 }
 0x3e1   :  { %729 = vmatpush.msrb.mxu1 %v644_v11 }
 0x3f4   :  { %v5527_v15 = vpop.permute.xlu0 %5526 }
 0x3f5   :  { %v5529_v16 = vunpack.i.h.bf16 %v5527_v15  ;;  %v5528_v20 = vunpack.i.l.bf16 %v5527_v15 }
 0x3f7   :  { %v637_v41 = vsel %vm621_vm5, %v5479_v42, %v5529_v16  ;;  %v636_v38 = vsel %vm621_vm5, %v5478_v44, %v5528_v20  ;;  %v5504_v42 = vunpack.i.h.bf16 %v5502_v12  ;;  %v633_v44 = vsel %vm621_vm5, %v5469_v22, %v5509_v43 }
 0x3f8   :  { %691 = vmatpush.msrb.mxu0 %v637_v41 }
 0x3f9   :  { %v631_v22 = vsel %vm621_vm5, %v5464_v28, %v5504_v42  ;;  %v629_v28 = vsel %vm621_vm5, %v516_v19, %v5499_v31  ;;  %v627_v19 = vsel %vm621_vm5, %v514_v10, %v5494_v47  ;;  %v661_v10 = vpop.permute.xlu2 %660 }
 0x3fa   :  { %692 = vmatpush.msrb.mxu0 %v636_v38 }
 0x3fc   :  { %v5532_v52 = vpop.permute.xlu0 %5531  ;;  %693 = vmatpush.msrb.mxu0 %v635_v49 }
 0x3fd   :  { %v5534_v57 = vunpack.i.h.bf16 %v5532_v52  ;;  %v5533_v58 = vunpack.i.l.bf16 %v5532_v52 }
 0x3fe   :  { %694 = vmatpush.msrb.mxu0 %v634_v59 }
 0x3ff   :  { %v643_v34 = vsel %vm621_vm5, %v5494_v47, %v5534_v57  ;;  %v642_v35 = vsel %vm621_vm5, %v5493_v48, %v5533_v58  ;;  %v671_v47 = vpop.permute.xlu1 %670 }
 0x400   :  { %695 = vmatpush.msrb.mxu0 %v633_v44  ;;  %730 = vmatpush.msrb.mxu1 %v643_v34 }
 0x401   :  { %v676_v41 = vpop.permute.xlu2 %675 }
 0x402   :  { %696 = vmatpush.msrb.mxu0 %v632_v33  ;;  %731 = vmatpush.msrb.mxu1 %v642_v35 }
 0x404   :  { %697 = vmatpush.msrb.mxu0 %v631_v22  ;;  %732 = vmatpush.msrb.mxu1 %v641_v6  ;;  %v666_v32 = vpop.permute.xlu0 %665 }
 0x406   :  { %698 = vmatpush.msrb.mxu0 %v630_v23  ;;  %733 = vmatpush.msrb.mxu1 %v640_v7  ;;  %v7675_v7 = vmov 10.0  }
 0x407   :  { %v8210_v61 = vpop.permute.xlu1 %1294  ;;  %7551 = vrcp.f32 %v7675_v7 }
 0x408   :  { %699 = vmatpush.msrb.mxu0 %v629_v28  ;;  %734 = vmatpush.msrb.mxu1 %v639_v2 }
 0x409   :  { %v8200_v53 = vpop.permute.xlu2 %1284 }
 0x40a   :  { %700 = vmatpush.msrb.mxu0 %v628_v29  ;;  %735 = vmatpush.msrb.mxu1 %v638_v17 }
 0x40b   :  { %5323 = vmatmul.msk.f32.vlgmr.msrb.gmra.mxu1 %vm678_vm6, %v647_v25 }
 0x40c   :  { %701 = vmatpush.msrb.mxu0 %v627_v19  ;;  %v8202_v57 = vpop.permute.xlu0 %1289 }
 0x40d   :  { %v7552_v28 = vpop.eup %7551 }
 0x40e   :  { %702 = vmatpush.msrb.mxu0 %v626_v14  ;;  %v766_v2 = vmul.f32 10.0, %v7552_v28  ;;  %vm770_vm7 = vweird.f32 %v7552_v28 }
 0x40f   :  { %v8215_v3 = vpop.permute.xlu1 %1309 }
 0x410   :  { %703 = vmatpush.msrb.mxu0 %v625_v18  ;;  %13398 = vst [vmem:[#allocation16_spill] sm:$0xff] %v8215_v3  ;;  %v767_v25 = vsub.f32 1.0, %v766_v2 }
 0x411   :  { %v8204_v58 = vpop.permute.xlu2 %1299 }
 0x412   :  { %704 = vmatpush.msrb.mxu0 %v624_v5  ;;  %13394 = vst [vmem:[#allocation12_spill] sm:$0xff] %v8204_v58  ;;  %v768_v17 = vmul.f32 %v7552_v28, %v767_v25 }
 0x413   :  { %5324 = vmatmul.msk.f32.gmra.mxu1 %vm678_vm6, %v649_v8 }
 0x414   :  { %705 = vmatpush.msrb.mxu0 %v623_v63  ;;  %v8206_v59 = vpop.permute.xlu0 %1304  ;;  %v769_v19 = vadd.f32 %v7552_v28, %v768_v17  ;;  %v7550_v63 = vld [vmem:[%s12881_s7] ss:$0 sm:$0xff]  ;;  %s7677_s7 = smov 121  }
 0x415   :  { %13395 = vst [vmem:[#allocation13_spill] sm:$0xff] %v8206_v59 }
 0x416   :  { %706 = vmatpush.msrb.mxu0 %v622_v60  ;;  %v771_v18 = vsel %vm770_vm7, %v7552_v28, %v769_v19  ;;  %vm2291_vm7 = vcmask 949248  }
 0x417   :  { %707 = vmatmul.f32.vlgmr.msrb.gmra.mxu0 %v646_v1 }
 0x419   :  { %v8208_v42 = vpop.permute.xlu2 %1314 }
 0x41a   :  { %13396 = vst [vmem:[#allocation14_spill] sm:$0xff] %v8208_v42 }
 0x41b   :  { %5325 = vmatmul.msk.f32.gmra.mxu1 %vm678_vm6, %v651_v54 }
 0x41c   :  { %v8212_v44 = vpop.permute.xlu0 %1319 }
 0x41d   :  { %13397 = vst [vmem:[#allocation15_spill] sm:$0xff] %v8212_v44 }
 0x41f   :  { %710 = vmatmul.f32.gmra.mxu0 %v648_v56 }
 0x423   :  { %5326 = vmatmul.msk.f32.gmra.mxu1 %vm678_vm6, %v653_v0 }
 0x427   :  { %713 = vmatmul.f32.gmra.mxu0 %v650_v51 }
 0x42f   :  { %716 = vmatmul.f32.gmra.mxu0 %v652_v55 }
 0x488   :  { %v737_v9 = vpop.f32.mrf.mxu1 }
 0x490   :  { %v740_v31 = vpop.f32.mrf.mxu1 }
 0x494   :  { %v708_v24 = vpop.f32.mrf.mxu0 }
 0x495   :  { %v709_v26 = vadd.f32 %v708_v24, %v661_v10 }
 0x497   :  { %v738_v27 = vadd.f32 %v737_v9, %v709_v26 }
 0x498   :  { %v743_v11 = vpop.f32.mrf.mxu1 }
 0x499   :  { %v749_v30 = vmax.f32 %v738_v27, 0.0 }
 0x49b   :  { %788 = vrot.lane.b32.xlu0 %v749_v30, %s7674_s3  ;;  %v753_v16 = vsel %vm621_vm5, %v749_v30, 0.0 }
 0x49c   :  { %v711_v37 = vpop.f32.mrf.mxu0 }
 0x49d   :  { %v712_v39 = vadd.f32 %v711_v37, %v666_v32 }
 0x49f   :  { %v741_v40 = vadd.f32 %v740_v31, %v712_v39 }
 0x4a0   :  { %v746_v38 = vpop.f32.mrf.mxu1 }
 0x4a1   :  { %v750_v46 = vmax.f32 %v741_v40, 0.0 }
 0x4a3   :  { %790 = vrot.lane.b32.xlu1 %v750_v46, %s7674_s3  ;;  %v756_v36 = vsel %vm621_vm5, %v750_v46, 0.0 }
 0x4a4   :  { %v714_v48 = vpop.f32.mrf.mxu0 }
 0x4a5   :  { %v715_v12 = vadd.f32 %v714_v48, %v671_v47 }
 0x4a7   :  { %v744_v13 = vadd.f32 %v743_v11, %v715_v12 }
 0x4a9   :  { %v751_v15 = vmax.f32 %v744_v13, 0.0 }
 0x4ab   :  { %792 = vrot.lane.b32.xlu2 %v751_v15, %s7674_s3  ;;  %v759_v49 = vsel %vm621_vm5, %v751_v15, 0.0 }
 0x4ac   :  { %v717_v20 = vpop.f32.mrf.mxu0 }
 0x4ad   :  { %v718_v45 = vadd.f32 %v717_v20, %v676_v41 }
 0x4af   :  { %v747_v43 = vadd.f32 %v746_v38, %v718_v45 }
 0x4b1   :  { %v752_v50 = vmax.f32 %v747_v43, 0.0 }
 0x4b3   :  { %v762_v52 = vsel %vm621_vm5, %v752_v50, 0.0 }
 0x4c5   :  { %754 = vadd.xlane.f32.xlu0 %v753_v16 }
 0x4cd   :  { %757 = vadd.xlane.f32.xlu1 %v756_v36 }
 0x4d4   :  { %760 = vadd.xlane.f32.xlu2 %v759_v49 }
 0x4d9   :  { %794 = vrot.lane.b32.xlu0 %v752_v50, %s7674_s3 }
 0x4dc   :  { %763 = vadd.xlane.f32.xlu2 %v762_v52 }
 0x505   :  { %v793_v34 = vpop.permute.xlu2 %792 }
 0x506   :  { %v806_v62 = vsel %vm621_vm5, %v793_v34, 0.0 }
 0x507   :  { %807 = vadd.xlane.f32.xlu2 %v806_v62 }
 0x50d   :  { %v789_v33 = vpop.permute.xlu0 %788 }
 0x50e   :  { %v800_v35 = vsel %vm621_vm5, %v789_v33, 0.0 }
 0x50f   :  { %801 = vadd.xlane.f32.xlu1 %v800_v35 }
 0x515   :  { %v791_v4 = vpop.permute.xlu1 %790 }
 0x516   :  { %v803_v22 = vsel %vm621_vm5, %v791_v4, 0.0 }
 0x517   :  { %804 = vadd.xlane.f32.xlu0 %v803_v22 }
 0x538   :  { %v755_v6 = vpop.xlane.xlu0 %754 }
 0x539   :  { %v772_v31 = vmul.f32 %v771_v18, %v755_v6 }
 0x53b   :  { %v780_v39 = vmul.f32 %v7550_v63, %v772_v31 }
 0x540   :  { %v758_v29 = vpop.xlane.xlu1 %757 }
 0x541   :  { %v773_v32 = vmul.f32 %v771_v18, %v758_v29 }
 0x543   :  { %v781_v40 = vmul.f32 %v7550_v63, %v773_v32 }
 0x547   :  { %v761_v0 = vpop.xlane.xlu2 %760 }
 0x548   :  { %v774_v13 = vmul.f32 %v771_v18, %v761_v0 }
 0x54a   :  { %v782_v20 = vmul.f32 %v7550_v63, %v774_v13 }
 0x54b   :  { %v795_v21 = vpop.permute.xlu0 %794 }
 0x54c   :  { %v809_v23 = vsel %vm621_vm5, %v795_v21, 0.0  ;;  %vm2241_vm5 = vcmask 965632  }
 0x54d   :  { %810 = vadd.xlane.f32.xlu1 %v809_v23 }
 0x54f   :  { %v764_v51 = vpop.xlane.xlu2 %763 }
 0x550   :  { %v775_v15 = vmul.f32 %v771_v18, %v764_v51 }
 0x552   :  { %v783_v36 = vmul.f32 %v7550_v63, %v775_v15 }
 0x57a   :  { %v808_v55 = vpop.xlane.xlu2 %807 }
 0x57b   :  { %v814_v9 = vmul.f32 %v808_v55, %v771_v18 }
 0x57d   :  { %v818_v26 = vmul.f32 %v7550_v63, %v814_v9 }
 0x582   :  { %v802_v14 = vpop.xlane.xlu1 %801 }
 0x583   :  { %v812_v8 = vmul.f32 %v802_v14, %v771_v18 }
 0x585   :  { %v816_v60 = vmul.f32 %v7550_v63, %v812_v8 }
 0x58a   :  { %v805_v5 = vpop.xlane.xlu0 %804 }
 0x58b   :  { %v813_v1 = vmul.f32 %v805_v5, %v771_v18 }
 0x58d   :  { %v817_v54 = vmul.f32 %v7550_v63, %v813_v1 }
 0x58f   :  { %v5540_v56 = vpack.i.bf16 %v817_v54, %v816_v60 }
 0x591   :  { %5541 = vrot.lane.b32.xlu0 %v5540_v56, %s7676_s20 }
 0x5c0   :  { %v811_v10 = vpop.xlane.xlu1 %810 }
 0x5c1   :  { %v815_v24 = vmul.f32 %v811_v10, %v771_v18 }
 0x5c3   :  { %v819_v27 = vmul.f32 %v7550_v63, %v815_v24 }
 0x5c5   :  { %v5545_v30 = vpack.i.bf16 %v819_v27, %v818_v26 }
 0x5c7   :  { %5546 = vrot.lane.b32.xlu2 %v5545_v30, %s7676_s20 }
 0x603   :  { %v5542_v37 = vpop.permute.xlu0 %5541 }
 0x604   :  { %v5544_v46 = vunpack.i.h.bf16 %v5542_v37  ;;  %v5543_v47 = vunpack.i.l.bf16 %v5542_v37 }
 0x606   :  { %v8224_v48 = vsel %vm836_vm8, %v781_v40, %v5544_v46  ;;  %v8227_v11 = vsel %vm836_vm8, %v780_v39, %v5543_v47 }
 0x607   :  { %v5565_v12 = vpack.i.bf16 %v8224_v48, %v8227_v11 }
 0x609   :  { %5566 = vrot.lane.b32.xlu0 %v5565_v12, %s7668_s21  ;;  %5556 = vrot.lane.b32.xlu2 %v5565_v12, %s7670_s29 }
 0x60a   :  { %5551 = vrot.lane.b32.xlu1 %v5565_v12, %s7669_s27 }
 0x611   :  { %5581 = vrot.lane.b32.xlu0 %v5565_v12, %s7677_s7  ;;  %5571 = vrot.lane.b32.xlu2 %v5565_v12, %s7678_s6 }
 0x612   :  { %5561 = vrot.lane.b32.xlu1 %v5565_v12, %s7679_s4 }
 0x619   :  { %5596 = vrot.lane.b32.xlu0 %v5565_v12, %s7674_s3  ;;  %5586 = vrot.lane.b32.xlu2 %v5565_v12, %s7672_s13 }
 0x61a   :  { %5576 = vrot.lane.b32.xlu1 %v5565_v12, %s7680_s9 }
 0x621   :  { %v5547_v16 = vpop.permute.xlu2 %5546  ;;  %5611 = vrot.lane.b32.xlu0 %v5565_v12, %s7681_s18  ;;  %5601 = vrot.lane.b32.xlu2 %v5565_v12, %s7682_s2 }
 0x622   :  { %v5549_v41 = vunpack.i.h.bf16 %v5547_v16  ;;  %v5548_v45 = vunpack.i.l.bf16 %v5547_v16  ;;  %5591 = vrot.lane.b32.xlu1 %v5565_v12, %s7683_s19 }
 0x624   :  { %v8244_v38 = vsel %vm836_vm8, %v783_v36, %v5549_v41  ;;  %v8247_v43 = vsel %vm836_vm8, %v782_v20, %v5548_v45  ;;  %vm2266_vm8 = vcmask 957440  }
 0x625   :  { %v5620_v49 = vpack.i.bf16 %v8244_v38, %v8247_v43 }
 0x629   :  { %5621 = vrot.lane.b32.xlu0 %v5620_v49, %s7669_s27  ;;  %5616 = vrot.lane.b32.xlu2 %v5565_v12, %s7684_s22 }
 0x62a   :  { %5606 = vrot.lane.b32.xlu1 %v5565_v12, %s7685_s24 }
 0x631   :  { %5626 = vrot.lane.b32.xlu0 %v5620_v49, %s7670_s29  ;;  %5631 = vrot.lane.b32.xlu2 %v5620_v49, %s7679_s4 }
 0x632   :  { %5636 = vrot.lane.b32.xlu1 %v5620_v49, %s7668_s21 }
 0x639   :  { %5641 = vrot.lane.b32.xlu0 %v5620_v49, %s7678_s6  ;;  %5646 = vrot.lane.b32.xlu2 %v5620_v49, %s7680_s9 }
 0x63a   :  { %5651 = vrot.lane.b32.xlu1 %v5620_v49, %s7677_s7 }
 0x641   :  { %5656 = vrot.lane.b32.xlu0 %v5620_v49, %s7672_s13  ;;  %5661 = vrot.lane.b32.xlu2 %v5620_v49, %s7683_s19 }
 0x642   :  { %5666 = vrot.lane.b32.xlu1 %v5620_v49, %s7674_s3 }
 0x649   :  { %5671 = vrot.lane.b32.xlu0 %v5620_v49, %s7682_s2  ;;  %5676 = vrot.lane.b32.xlu2 %v5620_v49, %s7685_s24 }
 0x64a   :  { %5681 = vrot.lane.b32.xlu1 %v5620_v49, %s7681_s18 }
 0x651   :  { %5686 = vrot.lane.b32.xlu0 %v5620_v49, %s7684_s22 }
 0x663   :  { %v8267_v50 = vpop.permute.xlu2 %5556 }
 0x664   :  { %5696 = vrot.lane.b32.xlu0 %v8267_v50, %s7684_s22 }
 0x66b   :  { %v8273_v62 = vpop.permute.xlu2 %5571 }
 0x66c   :  { %5711 = vrot.lane.b32.xlu0 %v8273_v62, %s7684_s22 }
 0x673   :  { %v8279_v4 = vpop.permute.xlu2 %5586 }
 0x674   :  { %5726 = vrot.lane.b32.xlu0 %v8279_v4, %s7684_s22 }
 0x67b   :  { %v8285_v21 = vpop.permute.xlu0 %5566  ;;  %v8287_v23 = vpop.permute.xlu2 %5601 }
 0x67c   :  { %v8291_v2 = vpop.permute.xlu1 %5551  ;;  %5741 = vrot.lane.b32.xlu0 %v8287_v23, %s7684_s22 }
 0x67d   :  { %5691 = vrot.lane.b32.xlu1 %v8291_v2, %s7684_s22 }
 0x683   :  { %v8301_v14 = vpop.permute.xlu0 %5581  ;;  %v8303_v18 = vpop.permute.xlu2 %5616 }
 0x684   :  { %v8307_v63 = vpop.permute.xlu1 %5561  ;;  %5756 = vrot.lane.b32.xlu0 %v8303_v18, %s7684_s22 }
 0x685   :  { %v5564_v1 = vunpack.i.h.bf16 %v8307_v63  ;;  %5701 = vrot.lane.b32.xlu2 %v8307_v63, %s7684_s22  ;;  %5706 = vrot.lane.b32.xlu1 %v8285_v21, %s7684_s22  ;;  %v13399_v3 = vunpack.i.l.bf16 %v8307_v63  ;;  %v13400_v63 = vunpack.i.h.bf16 %v8301_v14 }
 0x68b   :  { %v8319_v0 = vpop.permute.xlu0 %5596  ;;  %v8321_v51 = vpop.permute.xlu2 %5631 }
 0x68c   :  { %v5634_v55 = vunpack.i.h.bf16 %v8321_v51  ;;  %v5633_v9 = vunpack.i.l.bf16 %v8321_v51  ;;  %v8325_v10 = vpop.permute.xlu1 %5576  ;;  %5771 = vrot.lane.b32.xlu0 %v8321_v51, %s7684_s22 }
 0x68d   :  { %5716 = vrot.lane.b32.xlu2 %v8325_v10, %s7684_s22  ;;  %5721 = vrot.lane.b32.xlu1 %v8301_v14, %s7684_s22 }
 0x693   :  { %v8337_v31 = vpop.permute.xlu0 %5611  ;;  %v8339_v32 = vpop.permute.xlu2 %5646 }
 0x694   :  { %v8343_v40 = vpop.permute.xlu1 %5591  ;;  %5786 = vrot.lane.b32.xlu0 %v8339_v32, %s7684_s22 }
 0x695   :  { %5731 = vrot.lane.b32.xlu2 %v8343_v40, %s7684_s22  ;;  %5736 = vrot.lane.b32.xlu1 %v8319_v0, %s7684_s22 }
 0x69b   :  { %v8355_v15 = vpop.permute.xlu0 %5621  ;;  %v8357_v16 = vpop.permute.xlu2 %5661 }
 0x69c   :  { %v8361_v41 = vpop.permute.xlu1 %5606  ;;  %5801 = vrot.lane.b32.xlu0 %v8357_v16, %s7684_s22 }
 0x69d   :  { %5746 = vrot.lane.b32.xlu2 %v8361_v41, %s7684_s22  ;;  %5751 = vrot.lane.b32.xlu1 %v8337_v31, %s7684_s22 }
 0x6a3   :  { %v8373_v13 = vpop.permute.xlu0 %5626  ;;  %v8375_v47 = vpop.permute.xlu2 %5676 }
 0x6a4   :  { %v8381_v36 = vpop.permute.xlu1 %5636  ;;  %5816 = vrot.lane.b32.xlu0 %v8375_v47, %s7684_s22 }
 0x6a5   :  { %5761 = vrot.lane.b32.xlu2 %v8355_v15, %s7684_s22  ;;  %5766 = vrot.lane.b32.xlu1 %v8373_v13, %s7684_s22 }
 0x6ab   :  { %v8391_v27 = vpop.permute.xlu0 %5641 }
 0x6ac   :  { %v8395_v28 = vpop.permute.xlu1 %5651 }
 0x6ad   :  { %5776 = vrot.lane.b32.xlu2 %v8381_v36, %s7684_s22  ;;  %5781 = vrot.lane.b32.xlu1 %v8391_v27, %s7684_s22  ;;  %v5654_v7 = vunpack.i.h.bf16 %v8395_v28  ;;  %v5653_v19 = vunpack.i.l.bf16 %v8395_v28 }
 0x6b3   :  { %v8403_v5 = vpop.permute.xlu0 %5656 }
 0x6b4   :  { %v8407_v30 = vpop.permute.xlu1 %5666 }
 0x6b5   :  { %5791 = vrot.lane.b32.xlu2 %v8395_v28, %s7684_s22  ;;  %5796 = vrot.lane.b32.xlu1 %v8403_v5, %s7684_s22 }
 0x6bb   :  { %v8415_v29 = vpop.permute.xlu0 %5671 }
 0x6bc   :  { %v8419_v25 = vpop.permute.xlu1 %5681 }
 0x6bd   :  { %5806 = vrot.lane.b32.xlu2 %v8407_v30, %s7684_s22  ;;  %5811 = vrot.lane.b32.xlu1 %v8415_v29, %s7684_s22 }
 0x6c3   :  { %v8427_v20 = vpop.permute.xlu0 %5686 }
 0x6c5   :  { %5821 = vrot.lane.b32.xlu2 %v8419_v25, %s7684_s22  ;;  %5826 = vrot.lane.b32.xlu1 %v8427_v20, %s7684_s22 }
 0x6d6   :  { %v8435_v17 = vpop.permute.xlu0 %5696 }
 0x6de   :  { %v8437_v46 = vpop.permute.xlu0 %5711 }
 0x6df   :  { %v5702_v22 = vpop.permute.xlu2 %5701 }
 0x6e0   :  { %v5704_v45 = vunpack.i.h.bf16 %v5702_v22  ;;  %v5703_v54 = vunpack.i.l.bf16 %v5702_v22 }
 0x6e6   :  { %v8439_v28 = vpop.permute.xlu0 %5726 }
 0x6e7   :  { %v8441_v8 = vpop.permute.xlu2 %5716 }
 0x6ee   :  { %v8443_v12 = vpop.permute.xlu0 %5741 }
 0x6ef   :  { %v8445_v35 = vpop.permute.xlu2 %5731  ;;  %v8447_v33 = vpop.permute.xlu1 %5691 }
 0x6f6   :  { %v8449_v6 = vpop.permute.xlu0 %5756 }
 0x6f7   :  { %v8451_v26 = vpop.permute.xlu2 %5746  ;;  %v8453_v34 = vpop.permute.xlu1 %5706 }
 0x6fe   :  { %v5772_v24 = vpop.permute.xlu0 %5771 }
 0x6ff   :  { %v5774_v52 = vunpack.i.h.bf16 %v5772_v24  ;;  %v5773_v39 = vunpack.i.l.bf16 %v5772_v24  ;;  %v8455_v49 = vpop.permute.xlu2 %5761  ;;  %v5722_v37 = vpop.permute.xlu1 %5721  ;;  %v1195_v24 = vsel %vm1181_vm9, %v5564_v1, %v5704_v45 }
 0x700   :  { %v5723_v1 = vunpack.i.l.bf16 %v5722_v37 }
 0x701   :  { %v1197_v56 = vsel %vm1181_vm9, %v5634_v55, %v5774_v52  ;;  %v1196_v60 = vsel %vm1181_vm9, %v5633_v9, %v5773_v39  ;;  %v1194_v52 = vsel %vm1181_vm9, %v13399_v3, %v5703_v54 }
 0x702   :  { %1346 = vmatpush.msrb.mxu2 %v1197_v56 }
 0x704   :  { %1347 = vmatpush.msrb.mxu2 %v1196_v60  ;;  %v5724_v60 = vunpack.i.h.bf16 %v5722_v37  ;;  %v5699_v37 = vunpack.i.h.bf16 %v8435_v17 }
 0x706   :  { %1348 = vmatpush.msrb.mxu2 %v1195_v24  ;;  %v5787_v39 = vpop.permute.xlu0 %5786  ;;  %v1211_v3 = vsel %vm1181_vm9, %v13400_v63, %v5724_v60  ;;  %v13403_v60 = vunpack.i.h.bf16 %v8339_v32  ;;  %v13405_v63 = vunpack.i.l.bf16 %v8339_v32 }
 0x707   :  { %v8466_v44 = vpop.permute.xlu2 %5776  ;;  %v8468_v42 = vpop.permute.xlu1 %5736  ;;  %v5789_v24 = vunpack.i.h.bf16 %v5787_v39 }
 0x708   :  { %1349 = vmatpush.msrb.mxu2 %v1194_v52  ;;  %v5788_v52 = vunpack.i.l.bf16 %v5787_v39  ;;  %v5698_v39 = vunpack.i.l.bf16 %v8435_v17 }
 0x70f   :  { %v5792_v22 = vpop.permute.xlu2 %5791  ;;  %v8473_v56 = vpop.permute.xlu1 %5751 }
 0x710   :  { %v5794_v51 = vunpack.i.h.bf16 %v5792_v22  ;;  %v5793_v55 = vunpack.i.l.bf16 %v5792_v22  ;;  %v13401_v22 = vunpack.i.l.bf16 %v8301_v14  ;;  %v5718_v14 = vunpack.i.l.bf16 %v8441_v8 }
 0x712   :  { %v1213_v9 = vsel %vm1181_vm9, %v5654_v7, %v5794_v51  ;;  %v1212_v45 = vsel %vm1181_vm9, %v5653_v19, %v5793_v55  ;;  %v1210_v7 = vsel %vm1181_vm9, %v13401_v22, %v5723_v1  ;;  %v5719_v19 = vunpack.i.h.bf16 %v8441_v8 }
 0x713   :  { %1387 = vmatpush.msra.mxu0 %v1213_v9  ;;  %v13402_v51 = vunpack.i.h.bf16 %v8373_v13  ;;  %v1209_v9 = vsel %vm1181_vm9, %v13403_v60, %v5789_v24  ;;  %v13404_v1 = vunpack.i.l.bf16 %v8373_v13  ;;  %v13406_v24 = vunpack.i.h.bf16 %v8267_v50 }
 0x714   :  { %v5763_v13 = vunpack.i.l.bf16 %v8455_v49  ;;  %v13410_v60 = vunpack.i.h.bf16 %v8355_v15 }
 0x715   :  { %1388 = vmatpush.msra.mxu0 %v1212_v45  ;;  %v1191_v17 = vsel %vm1181_vm9, %v13406_v24, %v5699_v37  ;;  %v5714_v37 = vunpack.i.h.bf16 %v8437_v46 }
 0x717   :  { %v5767_v54 = vpop.permute.xlu1 %5766  ;;  %1389 = vmatpush.msra.mxu0 %v1211_v3  ;;  %v1208_v3 = vsel %vm1181_vm9, %v13405_v63, %v5788_v52 }
 0x718   :  { %v5769_v59 = vunpack.i.h.bf16 %v5767_v54  ;;  %v5768_v58 = vunpack.i.l.bf16 %v5767_v54  ;;  %v13407_v54 = vunpack.i.h.bf16 %v8325_v10 }
 0x719   :  { %1390 = vmatpush.msra.mxu0 %v1210_v7 }
 0x71a   :  { %v1193_v55 = vsel %vm1181_vm9, %v13402_v51, %v5769_v59  ;;  %v1192_v45 = vsel %vm1181_vm9, %v13404_v1, %v5768_v58  ;;  %v5764_v59 = vunpack.i.h.bf16 %v8455_v49  ;;  %v1207_v8 = vsel %vm1181_vm9, %v13407_v54, %v5719_v19 }
 0x71b   :  { %1350 = vmatpush.msrb.mxu2 %v1193_v55  ;;  %1391 = vmatpush.msra.mxu0 %v1209_v9  ;;  %v13408_v58 = vunpack.i.l.bf16 %v8267_v50  ;;  %v13409_v51 = vunpack.i.l.bf16 %v8325_v10  ;;  %v5694_v19 = vunpack.i.h.bf16 %v8447_v33  ;;  %v13411_v9 = vunpack.i.h.bf16 %v8391_v27 }
 0x71c   :  { %v1189_v50 = vsel %vm1181_vm9, %v13410_v60, %v5764_v59  ;;  %v5713_v10 = vunpack.i.l.bf16 %v8437_v46  ;;  %v13414_v59 = vunpack.i.h.bf16 %v8291_v2  ;;  %v13415_v46 = vunpack.i.h.bf16 %v8273_v62 }
 0x71d   :  { %1351 = vmatpush.msrb.mxu2 %v1192_v45  ;;  %1392 = vmatpush.msra.mxu0 %v1208_v3  ;;  %v1190_v32 = vsel %vm1181_vm9, %v13408_v58, %v5698_v39  ;;  %v1206_v55 = vsel %vm1181_vm9, %v13409_v51, %v5718_v14  ;;  %v5693_v39 = vunpack.i.l.bf16 %v8447_v33  ;;  %v13412_v14 = vunpack.i.l.bf16 %v8355_v15 }
 0x71e   :  { %v13413_v45 = vunpack.i.l.bf16 %v8391_v27  ;;  %v5779_v3 = vunpack.i.h.bf16 %v8466_v44  ;;  %v1187_v24 = vsel %vm1181_vm9, %v13414_v59, %v5694_v19  ;;  %v1203_v33 = vsel %vm1181_vm9, %v13415_v46, %v5714_v37 }
 0x71f   :  { %v5782_v22 = vpop.permute.xlu1 %5781  ;;  %1352 = vmatpush.msrb.mxu2 %v1191_v17  ;;  %1393 = vmatpush.msra.mxu0 %v1207_v8  ;;  %v1188_v1 = vsel %vm1181_vm9, %v13412_v14, %v5763_v13  ;;  %v5778_v27 = vunpack.i.l.bf16 %v8466_v44  ;;  %v13416_v15 = vunpack.i.l.bf16 %v8291_v2  ;;  %v13417_v8 = vunpack.i.l.bf16 %v8273_v62  ;;  %v5807_v14 = vpop.permute.xlu2 %5806 }
 0x720   :  { %v5784_v52 = vunpack.i.h.bf16 %v5782_v22  ;;  %v5783_v7 = vunpack.i.l.bf16 %v5782_v22  ;;  %v5709_v58 = vunpack.i.h.bf16 %v8453_v34  ;;  %v5708_v2 = vunpack.i.l.bf16 %v8453_v34 }
 0x721   :  { %1353 = vmatpush.msrb.mxu2 %v1190_v32  ;;  %1394 = vmatpush.msra.mxu0 %v1206_v55  ;;  %v1186_v54 = vsel %vm1181_vm9, %v13416_v15, %v5693_v39  ;;  %v1202_v22 = vsel %vm1181_vm9, %v13417_v8, %v5713_v10  ;;  %v13418_v32 = vunpack.i.h.bf16 %v8427_v20  ;;  %v13420_v62 = vunpack.i.l.bf16 %v8427_v20  ;;  %v1247_v15 = vld [vmem:[#allocation2 + $0x28] sm:$0xff] }
 0x722   :  { %v1205_v49 = vsel %vm1181_vm9, %v13411_v9, %v5784_v52  ;;  %v1204_v63 = vsel %vm1181_vm9, %v13413_v45, %v5783_v7  ;;  %v13419_v52 = vunpack.i.h.bf16 %v8381_v36  ;;  %v13421_v51 = vunpack.i.l.bf16 %v8381_v36 }
 0x723   :  { %1354 = vmatpush.msrb.mxu2 %v1189_v50  ;;  %1395 = vmatpush.msra.mxu0 %v1205_v49  ;;  %v1185_v13 = vsel %vm1181_vm9, %v8244_v38, %v13418_v32  ;;  %v1184_v7 = vsel %vm1181_vm9, %v8247_v43, %v13420_v62  ;;  %v13422_v38 = vunpack.i.h.bf16 %v8303_v18  ;;  %v13423_v19 = vunpack.i.h.bf16 %v8285_v21  ;;  %v1242_v50 = vld [vmem:[#allocation2] sm:$0xff]  ;;  %v1243_v43 = vld [vmem:[#allocation2 + $0x8] sm:$0xff] }
 0x724   :  { %v1201_v44 = vsel %vm1181_vm9, %v13419_v52, %v5779_v3  ;;  %v1200_v55 = vsel %vm1181_vm9, %v13421_v51, %v5778_v27  ;;  %v13424_v49 = vunpack.i.l.bf16 %v8303_v18  ;;  %v13425_v39 = vunpack.i.l.bf16 %v8285_v21  ;;  %v1246_v27 = vld [vmem:[#allocation2 + $0x20] sm:$0xff] }
 0x725   :  { %1355 = vmatpush.msrb.mxu2 %v1188_v1  ;;  %1396 = vmatpush.msra.mxu0 %v1204_v63  ;;  %v1183_v37 = vsel %vm1181_vm9, %v8224_v48, %v13422_v38  ;;  %v1199_v34 = vsel %vm1181_vm9, %v13423_v19, %v5709_v58  ;;  %v5744_v1 = vunpack.i.h.bf16 %v8443_v12  ;;  %v13426_v45 = vunpack.i.h.bf16 %v8415_v29 }
 0x726   :  { %v1182_v10 = vsel %vm1181_vm9, %v8227_v11, %v13424_v49  ;;  %v1198_v48 = vsel %vm1181_vm9, %v13425_v39, %v5708_v2  ;;  %v5743_v3 = vunpack.i.l.bf16 %v8443_v12  ;;  %v13427_v11 = vunpack.i.l.bf16 %v8415_v29  ;;  %v5802_v29 = vpop.permute.xlu0 %5801 }
 0x727   :  { %v8536_v17 = vpop.permute.xlu1 %5796  ;;  %1356 = vmatpush.msrb.mxu2 %v1187_v24  ;;  %1397 = vmatpush.msra.mxu0 %v1203_v33  ;;  %v5809_v59 = vunpack.i.h.bf16 %v5807_v14  ;;  %v13428_v24 = vunpack.i.h.bf16 %v8287_v23  ;;  %v13429_v58 = vunpack.i.l.bf16 %v8287_v23  ;;  %v5759_v32 = vunpack.i.h.bf16 %v8449_v6 }
 0x728   :  { %v13430_v52 = vunpack.i.h.bf16 %v8407_v30  ;;  %v13431_v2 = vunpack.i.h.bf16 %v8427_v20  ;;  %v5758_v23 = vunpack.i.l.bf16 %v8449_v6  ;;  %v5738_v51 = vunpack.i.l.bf16 %v8468_v42 }
 0x729   :  { %1357 = vmatpush.msrb.mxu2 %v1186_v54  ;;  %1398 = vmatpush.msra.mxu0 %v1202_v22  ;;  %v1227_v46 = vsel %vm1181_vm9, %v13428_v24, %v5744_v1  ;;  %v5808_v54 = vunpack.i.l.bf16 %v5807_v14  ;;  %v1226_v12 = vsel %vm1181_vm9, %v13429_v58, %v5743_v3  ;;  %v13435_v6 = vunpack.i.h.bf16 %v8303_v18 }
 0x72a   :  { %v13436_v49 = vunpack.i.l.bf16 %v8319_v0  ;;  %v13437_v39 = vunpack.i.l.bf16 %v8303_v18  ;;  %v5734_v14 = vunpack.i.h.bf16 %v8445_v35  ;;  %v5754_v1 = vunpack.i.h.bf16 %v8473_v56 }
 0x72b   :  { %1358 = vmatpush.msrb.mxu2 %v1185_v13  ;;  %1399 = vmatpush.msra.mxu0 %v1201_v44  ;;  %v5739_v13 = vunpack.i.h.bf16 %v8468_v42  ;;  %v1225_v44 = vsel %vm1181_vm9, %v13430_v52, %v5809_v59  ;;  %v1239_v42 = vsel %vm1181_vm9, %v13435_v6, %v5759_v32  ;;  %v13439_v3 = vunpack.i.h.bf16 %v8419_v25  ;;  %v1245_v6 = vld [vmem:[#allocation2 + $0x18] sm:$0xff] }
 0x72c   :  { %v5733_v18 = vunpack.i.l.bf16 %v8445_v35  ;;  %v13440_v59 = vunpack.i.l.bf16 %v8357_v16  ;;  %v13443_v35 = vunpack.i.h.bf16 %v8337_v31  ;;  %v5798_v58 = vunpack.i.l.bf16 %v8536_v17 }
 0x72d   :  { %1359 = vmatpush.msrb.mxu2 %v1184_v7  ;;  %1400 = vmatpush.msra.mxu0 %v1200_v55  ;;  %v5822_v7 = vpop.permute.xlu2 %5821  ;;  %v13432_v55 = vunpack.i.l.bf16 %v8407_v30  ;;  %v1250_v30 = vld [vmem:[#allocation2 + $0x40] sm:$0xff]  ;;  %v13445_v32 = vunpack.i.l.bf16 %v8337_v31  ;;  %v5729_v52 = vunpack.i.h.bf16 %v8439_v28  ;;  %v5728_v31 = vunpack.i.l.bf16 %v8439_v28 }
 0x72f   :  { %v5812_v60 = vpop.permute.xlu1 %5811  ;;  %1360 = vmatpush.msrb.mxu2 %v1183_v37  ;;  %1401 = vmatpush.msra.mxu0 %v1199_v34  ;;  %v1224_v38 = vsel %vm1181_vm9, %v13432_v55, %v5808_v54  ;;  %v13433_v37 = vunpack.i.l.bf16 %v8427_v20  ;;  %v5804_v34 = vunpack.i.h.bf16 %v5802_v29  ;;  %v5823_v20 = vunpack.i.l.bf16 %v5822_v7 }
 0x730   :  { %v5814_v9 = vunpack.i.h.bf16 %v5812_v60  ;;  %v5813_v36 = vunpack.i.l.bf16 %v5812_v60  ;;  %v5824_v60 = vunpack.i.h.bf16 %v5822_v7  ;;  %v13442_v54 = vunpack.i.h.bf16 %v8343_v40 }
 0x731   :  { %1361 = vmatpush.msrb.mxu2 %v1182_v10  ;;  %1402 = vmatpush.msra.mxu0 %v1198_v48  ;;  %v1222_v10 = vsel %vm1181_vm9, %v13436_v49, %v5738_v51  ;;  %v1238_v48 = vsel %vm1181_vm9, %v13437_v39, %v5758_v23  ;;  %v5748_v7 = vunpack.i.l.bf16 %v8451_v26  ;;  %v13448_v23 = vunpack.i.l.bf16 %v8403_v5  ;;  %v1253_v49 = vld [vmem:[#allocation2 + $0x58] sm:$0xff]  ;;  %v1270_v39 = vld [vmem:[#allocation2 + $0xe0] sm:$0xff] }
 0x732   :  { %1362 = vmatmul.f32.vlgmr.msrb.gmra.mxu2 %v1242_v50  ;;  %v1229_v63 = vsel %vm1181_vm9, %v13426_v45, %v5814_v9  ;;  %1403 = vmatmul.f32.vlgmr.msra.gmra.mxu0 %v1243_v43  ;;  %v1228_v21 = vsel %vm1181_vm9, %v13427_v11, %v5813_v36  ;;  %v13434_v50 = vunpack.i.h.bf16 %v8319_v0  ;;  %v1251_v9 = vld [vmem:[#allocation2 + $0x48] sm:$0xff]  ;;  %v5803_v36 = vunpack.i.l.bf16 %v5802_v29  ;;  %v5817_v11 = vpop.permute.xlu0 %5816 }
 0x733   :  { %1428 = vmatpush.msra.mxu1 %v1229_v63  ;;  %v13438_v45 = vunpack.i.h.bf16 %v8357_v16  ;;  %v1237_v0 = vsel %vm1181_vm9, %v13439_v3, %v5824_v60  ;;  %v1254_v16 = vld [vmem:[#allocation2 + $0x60] sm:$0xff]  ;;  %v1216_v51 = vsel %vm1181_vm9, %v13448_v23, %v5798_v58  ;;  %v13449_v55 = vunpack.i.l.bf16 %v8375_v47  ;;  %v1264_v3 = vld [vmem:[#allocation2 + $0xb0] sm:$0xff] }
 0x734   :  { %v1223_v43 = vsel %vm1181_vm9, %v13434_v50, %v5739_v13  ;;  %v1220_v24 = vsel %vm1181_vm9, %v13440_v59, %v5803_v36  ;;  %v13452_v60 = vunpack.i.l.bf16 %v8279_v4  ;;  %v13453_v50 = vunpack.i.l.bf16 %v8361_v41  ;;  %v1249_v36 = vld [vmem:[#allocation2 + $0x38] sm:$0xff]  ;;  %v1520_v58 = vld [vmem:[%s12884_s10 + $0x10] sm:$0xff] }
 0x735   :  { %1429 = vmatpush.msra.mxu1 %v1228_v21  ;;  %v1221_v63 = vsel %vm1181_vm9, %v13438_v45, %v5804_v34  ;;  %v5753_v21 = vunpack.i.l.bf16 %v8473_v56  ;;  %v1235_v56 = vsel %vm1181_vm9, %v13443_v35, %v5754_v1  ;;  %v13451_v34 = vunpack.i.h.bf16 %v8361_v41  ;;  %v1252_v41 = vld [vmem:[#allocation2 + $0x50] sm:$0xff]  ;;  %v1271_v1 = vld [vmem:[#allocation2 + $0xe8] sm:$0xff]  ;;  %v1273_v59 = vld [vmem:[#allocation2 + $0xf8] sm:$0xff] }
 0x736   :  { %v1260_v45 = vld [vmem:[#allocation2 + $0x90] sm:$0xff]  ;;  %v1527_v35 = vld [vmem:[%s12884_s10 + $0x48] sm:$0xff] }
 0x737   :  { %v5827_v33 = vpop.permute.xlu1 %5826  ;;  %1430 = vmatpush.msra.mxu1 %v1227_v46  ;;  %v13441_v46 = vunpack.i.l.bf16 %v8419_v25  ;;  %v5818_v25 = vunpack.i.l.bf16 %v5817_v11  ;;  %v1234_v13 = vsel %vm1181_vm9, %v13445_v32, %v5753_v21  ;;  %v1272_v21 = vld [vmem:[#allocation2 + $0xf0] sm:$0xff]  ;;  %v1519_v32 = vld [vmem:[%s12884_s10 + $0x8] sm:$0xff] }
 0x738   :  { %v5829_v8 = vunpack.i.h.bf16 %v5827_v33  ;;  %v5828_v22 = vunpack.i.l.bf16 %v5827_v33 }
 0x739   :  { %1431 = vmatpush.msra.mxu1 %v1226_v12  ;;  %v1236_v33 = vsel %vm1181_vm9, %v13441_v46, %v5823_v20  ;;  %v13444_v12 = vunpack.i.l.bf16 %v8343_v40  ;;  %v1263_v20 = vld [vmem:[#allocation2 + $0xa8] sm:$0xff]  ;;  %v1532_v46 = vld [vmem:[%s12884_s10 + $0x70] sm:$0x3f] }
 0x73a   :  { %1365 = vmatmul.f32.gmra.mxu2 %v1246_v27  ;;  %v1241_v62 = vsel %vm1181_vm9, %v13431_v2, %v5829_v8  ;;  %1406 = vmatmul.f32.gmra.mxu0 %v1247_v15  ;;  %v1240_v19 = vsel %vm1181_vm9, %v13433_v37, %v5828_v22  ;;  %v5819_v27 = vunpack.i.h.bf16 %v5817_v11  ;;  %v5799_v15 = vunpack.i.h.bf16 %v8536_v17  ;;  %v1255_v22 = vld [vmem:[#allocation2 + $0x68] sm:$0xff]  ;;  %v1268_v11 = vld [vmem:[#allocation2 + $0xd0] sm:$0xff] }
 0x73b   :  { %1432 = vmatpush.msra.mxu1 %v1225_v44  ;;  %1473 = vmatpush.msrb.mxu3 %v1241_v62  ;;  %v1219_v8 = vsel %vm1181_vm9, %v13442_v54, %v5734_v14  ;;  %v1218_v29 = vsel %vm1181_vm9, %v13444_v12, %v5733_v18  ;;  %v5749_v44 = vunpack.i.h.bf16 %v8451_v26  ;;  %v13446_v2 = vunpack.i.h.bf16 %v8403_v5  ;;  %v1258_v26 = vld [vmem:[#allocation2 + $0x80] sm:$0xff]  ;;  %v1244_v5 = vld [vmem:[#allocation2 + $0x10] sm:$0xff]  ;;  %v1257_v14 = vld [vmem:[#allocation2 + $0x78] sm:$0xff] }
 0x73c   :  { %v13447_v17 = vunpack.i.h.bf16 %v8375_v47  ;;  %v13450_v37 = vunpack.i.h.bf16 %v8279_v4  ;;  %v1214_v47 = vsel %vm1181_vm9, %v13452_v60, %v5728_v31  ;;  %v1266_v4 = vld [vmem:[#allocation2 + $0xc0] sm:$0xff]  ;;  %v1269_v18 = vld [vmem:[#allocation2 + $0xd8] sm:$0xff]  ;;  %5335 = vmatpush.msk.msra.mxu2 %vm1559_vm10, %v1532_v46 }
 0x73d   :  { %1433 = vmatpush.msra.mxu1 %v1224_v38  ;;  %1474 = vmatpush.msrb.mxu3 %v1240_v19  ;;  %v1217_v62 = vsel %vm1181_vm9, %v13446_v2, %v5799_v15  ;;  %v1232_v38 = vsel %vm1181_vm9, %v13449_v55, %v5818_v25  ;;  %v1231_v28 = vsel %vm1181_vm9, %v13451_v34, %v5749_v44  ;;  %v1528_v15 = vld [vmem:[%s12884_s10 + $0x50] sm:$0xff]  ;;  %v1529_v54 = vld [vmem:[%s12884_s10 + $0x58] sm:$0xff]  ;;  %v1523_v25 = vld [vmem:[%s12884_s10 + $0x28] sm:$0xff] }
 0x73e   :  { %v1233_v40 = vsel %vm1181_vm9, %v13447_v17, %v5819_v27  ;;  %v1215_v19 = vsel %vm1181_vm9, %v13450_v37, %v5729_v52  ;;  %v1530_v27 = vld [vmem:[%s12884_s10 + $0x60] sm:$0xff]  ;;  %v1521_v12 = vld [vmem:[%s12884_s10 + $0x18] sm:$0xff] }
 0x73f   :  { %1434 = vmatpush.msra.mxu1 %v1223_v43  ;;  %1475 = vmatpush.msrb.mxu3 %v1239_v42  ;;  %v1230_v43 = vsel %vm1181_vm9, %v13453_v50, %v5748_v7  ;;  %v1259_v42 = vld [vmem:[#allocation2 + $0x88] sm:$0xff]  ;;  %vm2316_vm9 = vcmask 941056  }
 0x740   :  { %1575 = vmatpush.msra.mxu2 %v1530_v27 }
 0x741   :  { %1435 = vmatpush.msra.mxu1 %v1222_v10  ;;  %1476 = vmatpush.msrb.mxu3 %v1238_v48  ;;  %v1267_v10 = vld [vmem:[#allocation2 + $0xc8] sm:$0xff]  ;;  %v1256_v48 = vld [vmem:[#allocation2 + $0x70] sm:$0xff] }
 0x742   :  { %1368 = vmatmul.f32.gmra.mxu2 %v1250_v30  ;;  %1409 = vmatmul.f32.gmra.mxu0 %v1251_v9  ;;  %v1262_v30 = vld [vmem:[#allocation2 + $0xa0] sm:$0xff]  ;;  %v1248_v9 = vld [vmem:[#allocation2 + $0x30] sm:$0xff] }
 0x743   :  { %1436 = vmatpush.msra.mxu1 %v1221_v63  ;;  %1477 = vmatpush.msrb.mxu3 %v1237_v0  ;;  %v1261_v63 = vld [vmem:[#allocation2 + $0x98] sm:$0xff] }
 0x744   :  { %v1265_v0 = vld [vmem:[#allocation2 + $0xb8] sm:$0xff]  ;;  %1576 = vmatpush.msra.mxu2 %v1528_v15 }
 0x745   :  { %1437 = vmatpush.msra.mxu1 %v1220_v24  ;;  %1478 = vmatpush.msrb.mxu3 %v1236_v33  ;;  %v1533_v24 = vld [vmem:[%s12884_s10 + $0x78] sm:$0x3f]  ;;  %v1531_v33 = vld [vmem:[%s12884_s10 + $0x68] sm:$0xff] }
 0x746   :  { %5344 = vmatpush.msk.msrb.mxu0 %vm1559_vm10, %v1533_v24  ;;  %vm2341_vm10 = vcmask 932864  }
 0x747   :  { %1438 = vmatpush.msra.mxu1 %v1219_v8  ;;  %1479 = vmatpush.msrb.mxu3 %v1235_v56  ;;  %v1526_v8 = vld [vmem:[%s12884_s10 + $0x40] sm:$0xff]  ;;  %v1524_v56 = vld [vmem:[%s12884_s10 + $0x30] sm:$0xff] }
 0x748   :  { %1616 = vmatpush.msrb.mxu0 %v1531_v33  ;;  %1577 = vmatpush.msra.mxu2 %v1526_v8 }
 0x749   :  { %1439 = vmatpush.msra.mxu1 %v1218_v29  ;;  %1480 = vmatpush.msrb.mxu3 %v1234_v13  ;;  %v1518_v29 = vld [vmem:[%s12884_s10] sm:$0xff] }
 0x74a   :  { %1371 = vmatmul.f32.gmra.mxu2 %v1254_v16  ;;  %1412 = vmatmul.f32.gmra.mxu0 %v1255_v22  ;;  %v1525_v16 = vld [vmem:[%s12884_s10 + $0x38] sm:$0xff]  ;;  %v1522_v22 = vld [vmem:[%s12884_s10 + $0x20] sm:$0xff] }
 0x74b   :  { %1440 = vmatpush.msra.mxu1 %v1217_v62  ;;  %1481 = vmatpush.msrb.mxu3 %v1233_v40 }
 0x74c   :  { %1617 = vmatpush.msrb.mxu0 %v1529_v54  ;;  %1578 = vmatpush.msra.mxu2 %v1524_v56 }
 0x74d   :  { %1441 = vmatpush.msra.mxu1 %v1216_v51  ;;  %1482 = vmatpush.msrb.mxu3 %v1232_v38 }
 0x74e   :  { %1618 = vmatpush.msrb.mxu0 %v1527_v35  ;;  %1579 = vmatpush.msra.mxu2 %v1522_v22 }
 0x74f   :  { %1442 = vmatpush.msra.mxu1 %v1215_v19  ;;  %1483 = vmatpush.msrb.mxu3 %v1231_v28 }
 0x750   :  { %1619 = vmatpush.msrb.mxu0 %v1525_v16  ;;  %1580 = vmatpush.msra.mxu2 %v1520_v58  ;;  %v13457_v16 = vld [vmem:[#allocation14_spill] sm:$0xff] }
 0x751   :  { %1443 = vmatpush.msra.mxu1 %v1214_v47  ;;  %1484 = vmatpush.msrb.mxu3 %v1230_v43 }
 0x752   :  { %1374 = vmatmul.f32.gmra.mxu2 %v1258_v26  ;;  %1444 = vmatmul.f32.vlgmr.msra.gmra.mxu1 %v1244_v5 }
 0x753   :  { %5327 = vmatmul.msk.f32.vlgmr.msrb.gmra.mxu3 %vm443_vm4, %v1245_v6  ;;  %1415 = vmatmul.f32.gmra.mxu0 %v1259_v42 }
 0x754   :  { %1620 = vmatpush.msrb.mxu0 %v1523_v25  ;;  %1581 = vmatpush.msra.mxu2 %v1518_v29 }
 0x756   :  { %1621 = vmatpush.msrb.mxu0 %v1521_v12 }
 0x758   :  { %1622 = vmatpush.msrb.mxu0 %v1519_v32 }
 0x75a   :  { %1377 = vmatmul.f32.gmra.mxu2 %v1262_v30  ;;  %1447 = vmatmul.f32.gmra.mxu1 %v1248_v9  ;;  %v13454_v9 = vld [vmem:[#allocation12_spill] sm:$0xff] }
 0x75b   :  { %5328 = vmatmul.msk.f32.gmra.mxu3 %vm443_vm4, %v1249_v36  ;;  %1418 = vmatmul.f32.gmra.mxu0 %v1263_v20 }
 0x762   :  { %1380 = vmatmul.f32.gmra.mxu2 %v1266_v4  ;;  %1450 = vmatmul.f32.gmra.mxu1 %v1252_v41 }
 0x763   :  { %5329 = vmatmul.msk.f32.gmra.mxu3 %vm443_vm4, %v1253_v49  ;;  %1421 = vmatmul.f32.gmra.mxu0 %v1267_v10 }
 0x76a   :  { %1383 = vmatmul.f32.gmra.mxu2 %v1270_v39  ;;  %1453 = vmatmul.f32.gmra.mxu1 %v1256_v48  ;;  %v13455_v48 = vld [vmem:[#allocation13_spill] sm:$0xff] }
 0x76b   :  { %5330 = vmatmul.msk.f32.gmra.mxu3 %vm443_vm4, %v1257_v14  ;;  %1424 = vmatmul.f32.gmra.mxu0 %v1271_v1 }
 0x772   :  { %1456 = vmatmul.f32.gmra.mxu1 %v1260_v45 }
 0x773   :  { %5331 = vmatmul.msk.f32.gmra.mxu3 %vm443_vm4, %v1261_v63 }
 0x77a   :  { %1459 = vmatmul.f32.gmra.mxu1 %v1264_v3 }
 0x77b   :  { %5332 = vmatmul.msk.f32.gmra.mxu3 %vm443_vm4, %v1265_v0 }
 0x782   :  { %1462 = vmatmul.f32.gmra.mxu1 %v1268_v11 }
 0x783   :  { %5333 = vmatmul.msk.f32.gmra.mxu3 %vm443_vm4, %v1269_v18 }
 0x78a   :  { %1465 = vmatmul.f32.gmra.mxu1 %v1272_v21 }
 0x78b   :  { %5334 = vmatmul.msk.f32.gmra.mxu3 %vm443_vm4, %v1273_v59  ;;  %v13456_v59 = vld [vmem:[#allocation16_spill] sm:$0xff]  ;;  %vm2191_vm4 = vcmask 982016  }
 0x7af   :  { %v1404_v52 = vpop.f32.mrf.mxu0 }
 0x7b5   :  { %v1363_v13 = vpop.f32.mrf.mxu2 }
 0x7b6   :  { %v1364_v62 = vadd.f32 %v1363_v13, %v8200_v53 }
 0x7b7   :  { %v1407_v2 = vpop.f32.mrf.mxu0 }
 0x7b8   :  { %v1405_v31 = vadd.f32 %v1404_v52, %v1364_v62 }
 0x7bd   :  { %v1366_v44 = vpop.f32.mrf.mxu2 }
 0x7be   :  { %v1367_v55 = vadd.f32 %v1366_v44, %v8202_v57  ;;  %v13458_v44 = vld [vmem:[#allocation15_spill] sm:$0xff] }
 0x7bf   :  { %v1410_v23 = vpop.f32.mrf.mxu0 }
 0x7c0   :  { %v1408_v34 = vadd.f32 %v1407_v2, %v1367_v55 }
 0x7c5   :  { %v1369_v40 = vpop.f32.mrf.mxu2 }
 0x7c6   :  { %v1370_v5 = vadd.f32 %v1369_v40, %v8210_v61 }
 0x7c7   :  { %v1413_v50 = vpop.f32.mrf.mxu0 }
 0x7c8   :  { %v1411_v6 = vadd.f32 %v1410_v23, %v1370_v5 }
 0x7cd   :  { %v1372_v28 = vpop.f32.mrf.mxu2 }
 0x7ce   :  { %v1373_v36 = vadd.f32 %v1372_v28, %v13454_v9 }
 0x7cf   :  { %v1445_v17 = vpop.f32.mrf.mxu1 }
 0x7d0   :  { %v1446_v7 = vadd.f32 %v1445_v17, %v1405_v31  ;;  %v1416_v49 = vpop.f32.mrf.mxu0  ;;  %v1414_v10 = vadd.f32 %v1413_v50, %v1373_v36 }
 0x7d5   :  { %v1375_v42 = vpop.f32.mrf.mxu2 }
 0x7d6   :  { %v1486_v51 = vpop.f32.mrf.mxu3  ;;  %v1376_v14 = vadd.f32 %v1375_v42, %v13455_v48 }
 0x7d7   :  { %v1487_v38 = vadd.f32 %v1486_v51, %v1446_v7  ;;  %v1448_v37 = vpop.f32.mrf.mxu1 }
 0x7d8   :  { %v1449_v26 = vadd.f32 %v1448_v37, %v1408_v34  ;;  %v1417_v0 = vadd.f32 %v1416_v49, %v1376_v14  ;;  %v1419_v11 = vpop.f32.mrf.mxu0 }
 0x7d9   :  { %v1510_v19 = vmax.f32 %v1487_v38, 0.0 }
 0x7db   :  { %5336 = vmatmul.msk.f32.vlgmr.msra.gmra.mxu2 %vm1534_vm11, %v1510_v19  ;;  %5345 = vmatmul.msk.f32.vlgmr.msrb.gmra.mxu0 %vm1534_vm11, %v1510_v19 }
 0x7dd   :  { %v1378_v63 = vpop.f32.mrf.mxu2 }
 0x7de   :  { %v1489_v53 = vpop.f32.mrf.mxu3  ;;  %v1379_v24 = vadd.f32 %v1378_v63, %v13456_v59 }
 0x7df   :  { %v1490_v60 = vadd.f32 %v1489_v53, %v1449_v26  ;;  %v1451_v47 = vpop.f32.mrf.mxu1 }
 0x7e0   :  { %v1452_v57 = vadd.f32 %v1451_v47, %v1411_v6  ;;  %v1420_v54 = vadd.f32 %v1419_v11, %v1379_v24  ;;  %v1422_v35 = vpop.f32.mrf.mxu0 }
 0x7e1   :  { %v1511_v43 = vmax.f32 %v1490_v60, 0.0 }
 0x7e3   :  { %5337 = vmatmul.msk.f32.gmra.mxu2 %vm1534_vm11, %v1511_v43  ;;  %5346 = vmatmul.msk.f32.gmra.mxu0 %vm1534_vm11, %v1511_v43 }
 0x7e5   :  { %v1381_v15 = vpop.f32.mrf.mxu2 }
 0x7e6   :  { %v1492_v30 = vpop.f32.mrf.mxu3  ;;  %v1382_v22 = vadd.f32 %v1381_v15, %v13457_v16 }
 0x7e7   :  { %v1493_v20 = vadd.f32 %v1492_v30, %v1452_v57  ;;  %v1454_v4 = vpop.f32.mrf.mxu1 }
 0x7e8   :  { %v1455_v61 = vadd.f32 %v1454_v4, %v1414_v10  ;;  %v1423_v29 = vadd.f32 %v1422_v35, %v1382_v22  ;;  %v1425_v17 = vpop.f32.mrf.mxu0 }
 0x7e9   :  { %v1512_v41 = vmax.f32 %v1493_v20, 0.0 }
 0x7eb   :  { %5338 = vmatmul.msk.f32.gmra.mxu2 %vm1534_vm11, %v1512_v41  ;;  %5347 = vmatmul.msk.f32.gmra.mxu0 %vm1534_vm11, %v1512_v41 }
 0x7ed   :  { %v1384_v32 = vpop.f32.mrf.mxu2 }
 0x7ee   :  { %v1495_v39 = vpop.f32.mrf.mxu3  ;;  %v1385_v2 = vadd.f32 %v1384_v32, %v13458_v44 }
 0x7ef   :  { %v1496_v1 = vadd.f32 %v1495_v39, %v1455_v61  ;;  %v1457_v45 = vpop.f32.mrf.mxu1 }
 0x7f0   :  { %v1458_v18 = vadd.f32 %v1457_v45, %v1417_v0  ;;  %v1426_v7 = vadd.f32 %v1425_v17, %v1385_v2 }
 0x7f1   :  { %v1513_v3 = vmax.f32 %v1496_v1, 0.0 }
 0x7f3   :  { %5339 = vmatmul.msk.f32.gmra.mxu2 %vm1534_vm11, %v1513_v3  ;;  %5348 = vmatmul.msk.f32.gmra.mxu0 %vm1534_vm11, %v1513_v3 }
 0x7f6   :  { %v1498_v21 = vpop.f32.mrf.mxu3 }
 0x7f7   :  { %v1499_v46 = vadd.f32 %v1498_v21, %v1458_v18  ;;  %v1460_v33 = vpop.f32.mrf.mxu1 }
 0x7f8   :  { %v1461_v8 = vadd.f32 %v1460_v33, %v1420_v54 }
 0x7f9   :  { %v1514_v27 = vmax.f32 %v1499_v46, 0.0 }
 0x7fb   :  { %5340 = vmatmul.msk.f32.gmra.mxu2 %vm1534_vm11, %v1514_v27  ;;  %5349 = vmatmul.msk.f32.gmra.mxu0 %vm1534_vm11, %v1514_v27 }
 0x7fe   :  { %v1501_v56 = vpop.f32.mrf.mxu3 }
 0x7ff   :  { %v1502_v25 = vadd.f32 %v1501_v56, %v1461_v8  ;;  %v1463_v58 = vpop.f32.mrf.mxu1 }
 0x800   :  { %v1464_v13 = vadd.f32 %v1463_v58, %v1423_v29 }
 0x801   :  { %v1515_v12 = vmax.f32 %v1502_v25, 0.0 }
 0x803   :  { %5341 = vmatmul.msk.f32.gmra.mxu2 %vm1534_vm11, %v1515_v12  ;;  %5350 = vmatmul.msk.f32.gmra.mxu0 %vm1534_vm11, %v1515_v12 }
 0x806   :  { %v1504_v52 = vpop.f32.mrf.mxu3 }
 0x807   :  { %v1505_v62 = vadd.f32 %v1504_v52, %v1464_v13  ;;  %v1466_v31 = vpop.f32.mrf.mxu1 }
 0x808   :  { %v1467_v23 = vadd.f32 %v1466_v31, %v1426_v7 }
 0x809   :  { %v1516_v40 = vmax.f32 %v1505_v62, 0.0 }
 0x80b   :  { %5342 = vmatmul.msk.f32.gmra.mxu2 %vm1534_vm11, %v1516_v40  ;;  %5351 = vmatmul.msk.f32.gmra.mxu0 %vm1534_vm11, %v1516_v40 }
 0x80e   :  { %v1507_v51 = vpop.f32.mrf.mxu3 }
 0x80f   :  { %v1508_v55 = vadd.f32 %v1507_v51, %v1467_v23 }
 0x811   :  { %v1517_v38 = vmax.f32 %v1508_v55, 0.0 }
 0x813   :  { %5343 = vmatmul.msk.f32.gmra.mxu2 %vm1534_vm11, %v1517_v38  ;;  %5352 = vmatmul.msk.f32.gmra.mxu0 %vm1534_vm11, %v1517_v38  ;;  %vm3150_vm11 = vcmask 596992  }
 0x858   :  { %v1624_v37 = vpop.f32.mrf.mxu0 }
 0x85e   :  { %v8763_v28 = vpop.f32.mrf.mxu2 }
 0x85f   :  { %13459 = vst [vmem:[#allocation12_spill] sm:$0xff] %v8763_v28 }
 0x860   :  { %v1627_v19 = vpop.f32.mrf.mxu0 }
 0x861   :  { %v5840_v34 = vpack.i.bf16 %v1627_v19, %v1624_v37 }
 0x863   :  { %5841 = vrot.lane.b32.xlu2 %v5840_v34, %s7679_s4  ;;  %5836 = vrot.lane.b32.xlu1 %v5840_v34, %s7670_s29 }
 0x864   :  { %5831 = vrot.lane.b32.xlu0 %v5840_v34, %s7669_s27 }
 0x866   :  { %v8769_v26 = vpop.f32.mrf.mxu2 }
 0x867   :  { %13460 = vst [vmem:[#allocation13_spill] sm:$0xff] %v8769_v26  ;;  %v5905_v53 = vpack.i.bf16 %v8769_v26, %v8763_v28 }
 0x868   :  { %v1630_v5 = vpop.f32.mrf.mxu0 }
 0x86b   :  { %5856 = vrot.lane.b32.xlu2 %v5840_v34, %s7680_s9  ;;  %5851 = vrot.lane.b32.xlu1 %v5840_v34, %s7678_s6 }
 0x86c   :  { %5846 = vrot.lane.b32.xlu0 %v5840_v34, %s7668_s21 }
 0x86e   :  { %v8797_v50 = vpop.f32.mrf.mxu2 }
 0x86f   :  { %13461 = vst [vmem:[#allocation16_spill] sm:$0xff] %v8797_v50 }
 0x870   :  { %v1633_v60 = vpop.f32.mrf.mxu0 }
 0x871   :  { %v5975_v47 = vpack.i.bf16 %v1633_v60, %v1630_v5 }
 0x873   :  { %5871 = vrot.lane.b32.xlu2 %v5840_v34, %s7683_s19  ;;  %5866 = vrot.lane.b32.xlu1 %v5840_v34, %s7672_s13 }
 0x874   :  { %5861 = vrot.lane.b32.xlu0 %v5840_v34, %s7677_s7 }
 0x876   :  { %v8806_v57 = vpop.f32.mrf.mxu2 }
 0x877   :  { %13462 = vst [vmem:[#allocation14_spill] sm:$0xff] %v8806_v57  ;;  %v6045_v42 = vpack.i.bf16 %v8806_v57, %v8797_v50 }
 0x878   :  { %v1636_v10 = vpop.f32.mrf.mxu0 }
 0x87b   :  { %5886 = vrot.lane.b32.xlu2 %v5840_v34, %s7685_s24  ;;  %5881 = vrot.lane.b32.xlu1 %v5840_v34, %s7682_s2 }
 0x87c   :  { %5876 = vrot.lane.b32.xlu0 %v5840_v34, %s7674_s3 }
 0x87e   :  { %v8880_v15 = vpop.f32.mrf.mxu2 }
 0x87f   :  { %13474 = vst [vmem:[#allocation27_spill] sm:$0xff] %v8880_v15 }
 0x880   :  { %v1639_v63 = vpop.f32.mrf.mxu0 }
 0x881   :  { %v6115_v3 = vpack.i.bf16 %v1639_v63, %v1636_v10 }
 0x883   :  { %5896 = vrot.lane.b32.xlu1 %v5840_v34, %s7684_s22  ;;  %5906 = vrot.lane.b32.xlu2 %v5905_v53, %s7670_s29 }
 0x884   :  { %5891 = vrot.lane.b32.xlu0 %v5840_v34, %s7681_s18 }
 0x886   :  { %v8896_v22 = vpop.f32.mrf.mxu2 }
 0x887   :  { %13478 = vst [vmem:[#allocation31_spill] sm:$0xff] %v8896_v22  ;;  %v6185_v58 = vpack.i.bf16 %v8896_v22, %v8880_v15 }
 0x888   :  { %v1642_v40 = vpop.f32.mrf.mxu0 }
 0x88b   :  { %5921 = vrot.lane.b32.xlu2 %v5905_v53, %s7678_s6  ;;  %5901 = vrot.lane.b32.xlu1 %v5905_v53, %s7669_s27 }
 0x88c   :  { %5911 = vrot.lane.b32.xlu0 %v5905_v53, %s7679_s4 }
 0x88e   :  { %v8967_v10 = vpop.f32.mrf.mxu2 }
 0x88f   :  { %13492 = vst [vmem:[#allocation45_spill] sm:$0xff] %v8967_v10 }
 0x890   :  { %v1645_v38 = vpop.f32.mrf.mxu0 }
 0x891   :  { %v6260_v19 = vpack.i.bf16 %v1645_v38, %v1642_v40 }
 0x893   :  { %5936 = vrot.lane.b32.xlu2 %v5905_v53, %s7672_s13  ;;  %5916 = vrot.lane.b32.xlu1 %v5905_v53, %s7668_s21 }
 0x894   :  { %5926 = vrot.lane.b32.xlu0 %v5905_v53, %s7680_s9 }
 0x896   :  { %v8983_v15 = vpop.f32.mrf.mxu2 }
 0x897   :  { %13498 = vst [vmem:[#allocation51_spill] sm:$0xff] %v8983_v15  ;;  %v6325_v50 = vpack.i.bf16 %v8983_v15, %v8967_v10 }
 0x89b   :  { %5951 = vrot.lane.b32.xlu2 %v5905_v53, %s7682_s2  ;;  %5931 = vrot.lane.b32.xlu1 %v5905_v53, %s7677_s7 }
 0x89c   :  { %5941 = vrot.lane.b32.xlu0 %v5905_v53, %s7683_s19 }
 0x8a3   :  { %5966 = vrot.lane.b32.xlu2 %v5905_v53, %s7684_s22  ;;  %5946 = vrot.lane.b32.xlu1 %v5905_v53, %s7674_s3 }
 0x8a4   :  { %5956 = vrot.lane.b32.xlu0 %v5905_v53, %s7685_s24 }
 0x8ab   :  { %5976 = vrot.lane.b32.xlu2 %v5975_v47, %s7670_s29  ;;  %5961 = vrot.lane.b32.xlu1 %v5905_v53, %s7681_s18 }
 0x8ac   :  { %5981 = vrot.lane.b32.xlu0 %v5975_v47, %s7679_s4 }
 0x8b3   :  { %5991 = vrot.lane.b32.xlu2 %v5975_v47, %s7678_s6  ;;  %5971 = vrot.lane.b32.xlu1 %v5975_v47, %s7669_s27 }
 0x8b4   :  { %5996 = vrot.lane.b32.xlu0 %v5975_v47, %s7680_s9 }
 0x8bb   :  { %6006 = vrot.lane.b32.xlu2 %v5975_v47, %s7672_s13  ;;  %5986 = vrot.lane.b32.xlu1 %v5975_v47, %s7668_s21 }
 0x8bc   :  { %6011 = vrot.lane.b32.xlu0 %v5975_v47, %s7683_s19 }
 0x8bd   :  { %v8799_v43 = vpop.permute.xlu2 %5841 }
 0x8c3   :  { %6021 = vrot.lane.b32.xlu2 %v5975_v47, %s7682_s2  ;;  %6001 = vrot.lane.b32.xlu1 %v5975_v47, %s7677_s7 }
 0x8c4   :  { %6026 = vrot.lane.b32.xlu0 %v5975_v47, %s7685_s24 }
 0x8c5   :  { %v8804_v6 = vpop.permute.xlu2 %5856 }
 0x8cb   :  { %6036 = vrot.lane.b32.xlu2 %v5975_v47, %s7684_s22  ;;  %6016 = vrot.lane.b32.xlu1 %v5975_v47, %s7674_s3 }
 0x8cc   :  { %6046 = vrot.lane.b32.xlu0 %v6045_v42, %s7670_s29 }
 0x8cd   :  { %v8813_v30 = vpop.permute.xlu2 %5871 }
 0x8d3   :  { %6031 = vrot.lane.b32.xlu1 %v5975_v47, %s7681_s18  ;;  %6041 = vrot.lane.b32.xlu2 %v6045_v42, %s7669_s27 }
 0x8d4   :  { %6061 = vrot.lane.b32.xlu0 %v6045_v42, %s7678_s6 }
 0x8d5   :  { %v8818_v9 = vpop.permute.xlu2 %5886  ;;  %v8820_v36 = vpop.permute.xlu1 %5836 }
 0x8d6   :  { %v8822_v20 = vpop.permute.xlu0 %5831 }
 0x8db   :  { %6051 = vrot.lane.b32.xlu1 %v6045_v42, %s7679_s4  ;;  %6056 = vrot.lane.b32.xlu2 %v6045_v42, %s7668_s21 }
 0x8dc   :  { %6076 = vrot.lane.b32.xlu0 %v6045_v42, %s7672_s13 }
 0x8dd   :  { %v8827_v4 = vpop.permute.xlu1 %5851  ;;  %v8829_v41 = vpop.permute.xlu2 %5906 }
 0x8de   :  { %13463 = vst [vmem:[#allocation15_spill] sm:$0xff] %v8829_v41  ;;  %v8831_v49 = vpop.permute.xlu0 %5846 }
 0x8e3   :  { %6066 = vrot.lane.b32.xlu1 %v6045_v42, %s7680_s9  ;;  %6071 = vrot.lane.b32.xlu2 %v6045_v42, %s7677_s7 }
 0x8e4   :  { %6091 = vrot.lane.b32.xlu0 %v6045_v42, %s7682_s2 }
 0x8e5   :  { %v8836_v61 = vpop.permute.xlu1 %5866  ;;  %v8838_v39 = vpop.permute.xlu2 %5921 }
 0x8e6   :  { %13464 = vst [vmem:[#allocation17_spill] sm:$0xff] %v8838_v39  ;;  %v8840_v48 = vpop.permute.xlu0 %5861 }
 0x8eb   :  { %6081 = vrot.lane.b32.xlu1 %v6045_v42, %s7683_s19  ;;  %6086 = vrot.lane.b32.xlu2 %v6045_v42, %s7674_s3 }
 0x8ec   :  { %6106 = vrot.lane.b32.xlu0 %v6045_v42, %s7684_s22 }
 0x8ed   :  { %v8845_v14 = vpop.permute.xlu1 %5881  ;;  %v8847_v1 = vpop.permute.xlu2 %5936 }
 0x8ee   :  { %13465 = vst [vmem:[#allocation18_spill] sm:$0xff] %v8847_v1  ;;  %v8849_v45 = vpop.permute.xlu0 %5876 }
 0x8f3   :  { %6096 = vrot.lane.b32.xlu1 %v6045_v42, %s7685_s24  ;;  %6101 = vrot.lane.b32.xlu2 %v6045_v42, %s7681_s18 }
 0x8f4   :  { %6116 = vrot.lane.b32.xlu0 %v6115_v3, %s7670_s29 }
 0x8f5   :  { %v8854_v0 = vpop.permute.xlu1 %5896  ;;  %v8856_v11 = vpop.permute.xlu2 %5951 }
 0x8f6   :  { %13466 = vst [vmem:[#allocation19_spill] sm:$0xff] %v8854_v0  ;;  %v8858_v18 = vpop.permute.xlu0 %5891 }
 0x8f7   :  { %13467 = vst [vmem:[#allocation20_spill] sm:$0xff] %v8856_v11 }
 0x8f8   :  { %13468 = vst [vmem:[#allocation21_spill] sm:$0xff] %v8858_v18 }
 0x8fb   :  { %6121 = vrot.lane.b32.xlu1 %v6115_v3, %s7679_s4  ;;  %6111 = vrot.lane.b32.xlu2 %v6115_v3, %s7669_s27 }
 0x8fc   :  { %6131 = vrot.lane.b32.xlu0 %v6115_v3, %s7678_s6 }
 0x8fd   :  { %v8863_v21 = vpop.permute.xlu2 %5966  ;;  %v8865_v59 = vpop.permute.xlu1 %5901 }
 0x8fe   :  { %13469 = vst [vmem:[#allocation22_spill] sm:$0xff] %v8863_v21  ;;  %v8867_v24 = vpop.permute.xlu0 %5911  ;;  %v12920_v18 = vunpack.i.l.bf16 %v8865_v59 }
 0x8ff   :  { %13470 = vst [vmem:[#allocation23_spill] sm:$0xff] %v8865_v59 }
 0x900   :  { %13471 = vst [vmem:[#allocation24_spill] sm:$0xff] %v8867_v24 }
 0x903   :  { %6136 = vrot.lane.b32.xlu1 %v6115_v3, %s7680_s9  ;;  %6126 = vrot.lane.b32.xlu2 %v6115_v3, %s7668_s21 }
 0x904   :  { %6146 = vrot.lane.b32.xlu0 %v6115_v3, %s7672_s13 }
 0x905   :  { %v8872_v46 = vpop.permute.xlu2 %5976  ;;  %v8874_v33 = vpop.permute.xlu1 %5916 }
 0x906   :  { %13472 = vst [vmem:[#allocation25_spill] sm:$0xff] %v8874_v33  ;;  %v8876_v27 = vpop.permute.xlu0 %5926 }
 0x907   :  { %13473 = vst [vmem:[#allocation26_spill] sm:$0xff] %v8876_v27 }
 0x90b   :  { %6151 = vrot.lane.b32.xlu1 %v6115_v3, %s7683_s19  ;;  %6141 = vrot.lane.b32.xlu2 %v6115_v3, %s7677_s7 }
 0x90c   :  { %6161 = vrot.lane.b32.xlu0 %v6115_v3, %s7682_s2 }
 0x90d   :  { %v8883_v54 = vpop.permute.xlu2 %5991  ;;  %v8885_v8 = vpop.permute.xlu1 %5931 }
 0x90e   :  { %13475 = vst [vmem:[#allocation28_spill] sm:$0xff] %v8885_v8  ;;  %v8887_v35 = vpop.permute.xlu0 %5941 }
 0x90f   :  { %13476 = vst [vmem:[#allocation29_spill] sm:$0xff] %v8887_v35 }
 0x913   :  { %6166 = vrot.lane.b32.xlu1 %v6115_v3, %s7685_s24  ;;  %6156 = vrot.lane.b32.xlu2 %v6115_v3, %s7674_s3 }
 0x914   :  { %6176 = vrot.lane.b32.xlu0 %v6115_v3, %s7684_s22 }
 0x915   :  { %v8892_v56 = vpop.permute.xlu2 %6006  ;;  %v8894_v16 = vpop.permute.xlu1 %5946 }
 0x916   :  { %13477 = vst [vmem:[#allocation30_spill] sm:$0xff] %v8894_v16  ;;  %v8898_v25 = vpop.permute.xlu0 %5956 }
 0x917   :  { %13479 = vst [vmem:[#allocation32_spill] sm:$0xff] %v8898_v25 }
 0x91b   :  { %6171 = vrot.lane.b32.xlu2 %v6115_v3, %s7681_s18  ;;  %6186 = vrot.lane.b32.xlu1 %v6185_v58, %s7670_s29 }
 0x91c   :  { %6181 = vrot.lane.b32.xlu0 %v6185_v58, %s7669_s27 }
 0x91d   :  { %v8905_v12 = vpop.permute.xlu2 %6021  ;;  %v8907_v29 = vpop.permute.xlu1 %5961 }
 0x91e   :  { %13480 = vst [vmem:[#allocation33_spill] sm:$0xff] %v8907_v29  ;;  %v8909_v32 = vpop.permute.xlu0 %5981 }
 0x923   :  { %6191 = vrot.lane.b32.xlu2 %v6185_v58, %s7679_s4  ;;  %6201 = vrot.lane.b32.xlu1 %v6185_v58, %s7678_s6 }
 0x924   :  { %6196 = vrot.lane.b32.xlu0 %v6185_v58, %s7668_s21 }
 0x925   :  { %v8914_v13 = vpop.permute.xlu2 %6036  ;;  %v8916_v52 = vpop.permute.xlu1 %5971 }
 0x926   :  { %13481 = vst [vmem:[#allocation34_spill] sm:$0xff] %v8914_v13  ;;  %v8918_v44 = vpop.permute.xlu0 %5996 }
 0x92b   :  { %6206 = vrot.lane.b32.xlu2 %v6185_v58, %s7680_s9  ;;  %6216 = vrot.lane.b32.xlu1 %v6185_v58, %s7672_s13 }
 0x92c   :  { %6211 = vrot.lane.b32.xlu0 %v6185_v58, %s7677_s7 }
 0x92d   :  { %v8923_v2 = vpop.permute.xlu1 %5986  ;;  %v8925_v62 = vpop.permute.xlu2 %6041 }
 0x92e   :  { %13482 = vst [vmem:[#allocation35_spill] sm:$0xff] %v8925_v62  ;;  %v8927_v17 = vpop.permute.xlu0 %6011 }
 0x933   :  { %6221 = vrot.lane.b32.xlu2 %v6185_v58, %s7683_s19  ;;  %6231 = vrot.lane.b32.xlu1 %v6185_v58, %s7682_s2 }
 0x934   :  { %6226 = vrot.lane.b32.xlu0 %v6185_v58, %s7674_s3 }
 0x935   :  { %v8932_v31 = vpop.permute.xlu1 %6001  ;;  %v8934_v7 = vpop.permute.xlu2 %6056 }
 0x936   :  { %13483 = vst [vmem:[#allocation36_spill] sm:$0xff] %v8934_v7  ;;  %v8936_v23 = vpop.permute.xlu0 %6026 }
 0x93b   :  { %6236 = vrot.lane.b32.xlu2 %v6185_v58, %s7685_s24  ;;  %6246 = vrot.lane.b32.xlu1 %v6185_v58, %s7684_s22 }
 0x93c   :  { %6241 = vrot.lane.b32.xlu0 %v6185_v58, %s7681_s18 }
 0x93d   :  { %v8941_v51 = vpop.permute.xlu1 %6016  ;;  %v8943_v55 = vpop.permute.xlu2 %6071 }
 0x93e   :  { %13484 = vst [vmem:[#allocation37_spill] sm:$0xff] %v8943_v55  ;;  %v8945_v37 = vpop.permute.xlu0 %6046 }
 0x93f   :  { %13485 = vst [vmem:[#allocation38_spill] sm:$0xff] %v8945_v37 }
 0x943   :  { %6261 = vrot.lane.b32.xlu2 %v6260_v19, %s7679_s4  ;;  %6256 = vrot.lane.b32.xlu1 %v6260_v19, %s7670_s29 }
 0x944   :  { %6251 = vrot.lane.b32.xlu0 %v6260_v19, %s7669_s27 }
 0x945   :  { %v8950_v34 = vpop.permute.xlu1 %6031  ;;  %v8952_v53 = vpop.permute.xlu2 %6086 }
 0x946   :  { %13486 = vst [vmem:[#allocation39_spill] sm:$0xff] %v8950_v34  ;;  %v8954_v5 = vpop.permute.xlu0 %6061 }
 0x947   :  { %13487 = vst [vmem:[#allocation40_spill] sm:$0xff] %v8952_v53 }
 0x948   :  { %13488 = vst [vmem:[#allocation41_spill] sm:$0xff] %v8954_v5 }
 0x94b   :  { %6276 = vrot.lane.b32.xlu2 %v6260_v19, %s7680_s9  ;;  %6271 = vrot.lane.b32.xlu1 %v6260_v19, %s7678_s6 }
 0x94c   :  { %6266 = vrot.lane.b32.xlu0 %v6260_v19, %s7668_s21 }
 0x94d   :  { %v8959_v60 = vpop.permute.xlu1 %6051  ;;  %v8961_v47 = vpop.permute.xlu2 %6101 }
 0x94e   :  { %13489 = vst [vmem:[#allocation42_spill] sm:$0xff] %v8959_v60  ;;  %v8963_v42 = vpop.permute.xlu0 %6076 }
 0x94f   :  { %13490 = vst [vmem:[#allocation43_spill] sm:$0xff] %v8961_v47 }
 0x950   :  { %13491 = vst [vmem:[#allocation44_spill] sm:$0xff] %v8963_v42 }
 0x953   :  { %6291 = vrot.lane.b32.xlu2 %v6260_v19, %s7683_s19  ;;  %6286 = vrot.lane.b32.xlu1 %v6260_v19, %s7672_s13 }
 0x954   :  { %6281 = vrot.lane.b32.xlu0 %v6260_v19, %s7677_s7 }
 0x955   :  { %v8970_v63 = vpop.permute.xlu1 %6066  ;;  %v8972_v3 = vpop.permute.xlu2 %6111 }
 0x956   :  { %13493 = vst [vmem:[#allocation46_spill] sm:$0xff] %v8970_v63  ;;  %v8974_v58 = vpop.permute.xlu0 %6091 }
 0x957   :  { %13494 = vst [vmem:[#allocation47_spill] sm:$0xff] %v8972_v3  ;;  %v5863_v3 = vunpack.i.l.bf16 %v8840_v48 }
 0x958   :  { %13495 = vst [vmem:[#allocation48_spill] sm:$0xff] %v8974_v58 }
 0x95b   :  { %6306 = vrot.lane.b32.xlu2 %v6260_v19, %s7685_s24  ;;  %6301 = vrot.lane.b32.xlu1 %v6260_v19, %s7682_s2 }
 0x95c   :  { %6296 = vrot.lane.b32.xlu0 %v6260_v19, %s7674_s3 }
 0x95d   :  { %v8979_v40 = vpop.permute.xlu1 %6081  ;;  %v8981_v38 = vpop.permute.xlu2 %6126 }
 0x95e   :  { %13496 = vst [vmem:[#allocation49_spill] sm:$0xff] %v8979_v40  ;;  %v8985_v28 = vpop.permute.xlu0 %6106 }
 0x95f   :  { %13497 = vst [vmem:[#allocation50_spill] sm:$0xff] %v8981_v38 }
 0x960   :  { %13499 = vst [vmem:[#allocation52_spill] sm:$0xff] %v8985_v28 }
 0x963   :  { %6316 = vrot.lane.b32.xlu1 %v6260_v19, %s7684_s22  ;;  %6326 = vrot.lane.b32.xlu2 %v6325_v50, %s7670_s29 }
 0x964   :  { %6311 = vrot.lane.b32.xlu0 %v6260_v19, %s7681_s18 }
 0x965   :  { %v8992_v57 = vpop.permute.xlu1 %6096  ;;  %v8994_v22 = vpop.permute.xlu2 %6141 }
 0x966   :  { %13500 = vst [vmem:[#allocation53_spill] sm:$0xff] %v8992_v57  ;;  %v8996_v26 = vpop.permute.xlu0 %6116 }
 0x967   :  { %13501 = vst [vmem:[#allocation54_spill] sm:$0xff] %v8994_v22 }
 0x968   :  { %13502 = vst [vmem:[#allocation55_spill] sm:$0xff] %v8996_v26  ;;  %v12933_v26 = vunpack.i.l.bf16 %v8885_v8 }
 0x96b   :  { %6341 = vrot.lane.b32.xlu2 %v6325_v50, %s7678_s6  ;;  %6321 = vrot.lane.b32.xlu1 %v6325_v50, %s7669_s27 }
 0x96c   :  { %6331 = vrot.lane.b32.xlu0 %v6325_v50, %s7679_s4 }
 0x96d   :  { %v9001_v13 = vpop.permute.xlu1 %6121  ;;  %v9003_v10 = vpop.permute.xlu2 %6156 }
 0x96e   :  { %13503 = vst [vmem:[#allocation56_spill] sm:$0xff] %v9001_v13  ;;  %v9005_v15 = vpop.permute.xlu0 %6131  ;;  %v12926_v13 = vunpack.i.l.bf16 %v8829_v41 }
 0x96f   :  { %13504 = vst [vmem:[#allocation57_spill] sm:$0xff] %v9003_v10 }
 0x970   :  { %13505 = vst [vmem:[#allocation58_spill] sm:$0xff] %v9005_v15 }
 0x973   :  { %6356 = vrot.lane.b32.xlu2 %v6325_v50, %s7672_s13  ;;  %6336 = vrot.lane.b32.xlu1 %v6325_v50, %s7668_s21 }
 0x974   :  { %6346 = vrot.lane.b32.xlu0 %v6325_v50, %s7680_s9 }
 0x975   :  { %v9010_v19 = vpop.permute.xlu1 %6136  ;;  %v9012_v28 = vpop.permute.xlu2 %6171 }
 0x976   :  { %13506 = vst [vmem:[#allocation59_spill] sm:$0xff] %v9010_v19  ;;  %v9014_v0 = vpop.permute.xlu0 %6146  ;;  %v13515_v19 = vunpack.i.l.bf16 %v8867_v24 }
 0x977   :  { %13507 = vst [vmem:[#allocation60_spill] sm:$0xff] %v9012_v28  ;;  %v5833_v28 = vunpack.i.l.bf16 %v8822_v20 }
 0x978   :  { %13508 = vst [vmem:[#allocation61_spill] sm:$0xff] %v9014_v0 }
 0x979   :  { %v2017_v29 = vsel %vm2016_vm12, %v12920_v18, %v5833_v28  ;;  %v5838_v18 = vunpack.i.l.bf16 %v8820_v36 }
 0x97a   :  { %v6390_v15 = vpack.i.bf16 %v5833_v28, %v2017_v29  ;;  %v5858_v28 = vunpack.i.l.bf16 %v8804_v6 }
 0x97b   :  { %6371 = vrot.lane.b32.xlu2 %v6325_v50, %s7682_s2  ;;  %6351 = vrot.lane.b32.xlu1 %v6325_v50, %s7677_s7 }
 0x97c   :  { %6361 = vrot.lane.b32.xlu0 %v6325_v50, %s7683_s19 }
 0x97d   :  { %v9019_v21 = vpop.permute.xlu1 %6151  ;;  %v9021_v34 = vpop.permute.xlu2 %6191 }
 0x97e   :  { %13509 = vst [vmem:[#allocation62_spill] sm:$0xff] %v9019_v21  ;;  %v9023_v47 = vpop.permute.xlu0 %6161  ;;  %v5843_v21 = vunpack.i.l.bf16 %v8799_v43 }
 0x97f   :  { %13510 = vst [vmem:[#allocation63_spill] sm:$0xff] %v9021_v34  ;;  %v12927_v34 = vunpack.i.l.bf16 %v8874_v33 }
 0x980   :  { %13511 = vst [vmem:[#allocation64_spill] sm:$0xff] %v9023_v47  ;;  %v2067_v22 = vsel %vm2066_vm13, %v13515_v19, %v5843_v21 }
 0x981   :  { %v6400_v38 = vpack.i.bf16 %v5843_v21, %v2067_v22  ;;  %v2042_v22 = vsel %vm2041_vm14, %v12926_v13, %v5838_v18  ;;  %v12935_v13 = vunpack.i.l.bf16 %v8887_v35 }
 0x983   :  { %6386 = vrot.lane.b32.xlu2 %v6325_v50, %s7684_s22  ;;  %6366 = vrot.lane.b32.xlu1 %v6325_v50, %s7674_s3 }
 0x984   :  { %6376 = vrot.lane.b32.xlu0 %v6325_v50, %s7685_s24 }
 0x985   :  { %v9032_v10 = vpop.permute.xlu1 %6166  ;;  %v9034_v0 = vpop.permute.xlu2 %6206 }
 0x986   :  { %13512 = vst [vmem:[#allocation65_spill] sm:$0xff] %v9032_v10  ;;  %v9039_v47 = vpop.permute.xlu0 %6176  ;;  %v12929_v10 = vunpack.i.l.bf16 %v8876_v27 }
 0x987   :  { %13513 = vst [vmem:[#allocation66_spill] sm:$0xff] %v9034_v0  ;;  %v6395_v0 = vpack.i.bf16 %v5838_v18, %v2042_v22  ;;  %v5873_v18 = vunpack.i.l.bf16 %v8813_v30 }
 0x988   :  { %13514 = vst [vmem:[#allocation67_spill] sm:$0xff] %v9039_v47  ;;  %v5848_v47 = vunpack.i.l.bf16 %v8831_v49 }
 0x98b   :  { %6391 = vrot.lane.b32.xlu2 %v6390_v15, %s7684_s22  ;;  %6381 = vrot.lane.b32.xlu1 %v6325_v50, %s7681_s18  ;;  %v2092_v50 = vsel %vm2091_vm15, %v12927_v34, %v5848_v47  ;;  %v5853_v34 = vunpack.i.l.bf16 %v8827_v4 }
 0x98c   :  { %6401 = vrot.lane.b32.xlu0 %v6400_v38, %s7684_s22  ;;  %v2142_v38 = vsel %vm2141_vm0, %v12929_v10, %v5858_v28  ;;  %v6405_v19 = vpack.i.bf16 %v5848_v47, %v2092_v50  ;;  %v12938_v10 = vunpack.i.l.bf16 %v8847_v1 }
 0x98d   :  { %v9053_v29 = vpop.permute.xlu2 %6221  ;;  %v9055_v21 = vpop.permute.xlu1 %6186 }
 0x98e   :  { %13516 = vst [vmem:[#allocation68_spill] sm:$0xff] %v9053_v29  ;;  %v9063_v15 = vpop.permute.xlu0 %6181  ;;  %v12932_v29 = vunpack.i.l.bf16 %v8838_v39 }
 0x98f   :  { %13517 = vst [vmem:[#allocation69_spill] sm:$0xff] %v9055_v21  ;;  %v6415_v21 = vpack.i.bf16 %v5858_v28, %v2142_v38 }
 0x990   :  { %v2117_v22 = vsel %vm2116_vm1, %v12932_v29, %v5853_v34  ;;  %v12941_v29 = vunpack.i.l.bf16 %v8898_v25 }
 0x993   :  { %6406 = vrot.lane.b32.xlu2 %v6405_v19, %s7684_s22  ;;  %6396 = vrot.lane.b32.xlu1 %v6395_v0, %s7684_s22  ;;  %v2167_v0 = vsel %vm2166_vm2, %v12933_v26, %v5863_v3  ;;  %v6410_v19 = vpack.i.bf16 %v5853_v34, %v2117_v22  ;;  %v5868_v26 = vunpack.i.l.bf16 %v8836_v61  ;;  %v5888_v34 = vunpack.i.l.bf16 %v8818_v9 }
 0x994   :  { %6416 = vrot.lane.b32.xlu0 %v6415_v21, %s7684_s22  ;;  %v2217_v21 = vsel %vm2216_vm3, %v12935_v13, %v5873_v18  ;;  %v6420_v38 = vpack.i.bf16 %v5863_v3, %v2167_v0  ;;  %v12945_v13 = vunpack.i.h.bf16 %v8829_v41  ;;  %v12949_v41 = vunpack.i.h.bf16 %v8874_v33 }
 0x995   :  { %v9077_v47 = vpop.permute.xlu2 %6236  ;;  %v9079_v28 = vpop.permute.xlu1 %6201  ;;  %v2192_v22 = vsel %vm2191_vm4, %v12938_v10, %v5868_v26  ;;  %v12946_v10 = vunpack.i.h.bf16 %v8865_v59  ;;  %v12994_v59 = vunpack.i.h.bf16 %v8959_v60 }
 0x996   :  { %13518 = vst [vmem:[#allocation70_spill] sm:$0xff] %v9077_v47  ;;  %v9087_v50 = vpop.permute.xlu0 %6196  ;;  %v12939_v47 = vunpack.i.l.bf16 %v8894_v16 }
 0x997   :  { %13519 = vst [vmem:[#allocation71_spill] sm:$0xff] %v9079_v28  ;;  %v6430_v28 = vpack.i.bf16 %v5873_v18, %v2217_v21 }
 0x998   :  { %13520 = vst [vmem:[#allocation72_spill] sm:$0xff] %v9087_v50  ;;  %v5878_v50 = vunpack.i.l.bf16 %v8849_v45 }
 0x99a   :  { %v2242_v0 = vsel %vm2241_vm5, %v12939_v47, %v5878_v50  ;;  %v5839_v47 = vunpack.i.h.bf16 %v8820_v36 }
 0x99b   :  { %6421 = vrot.lane.b32.xlu2 %v6420_v38, %s7684_s22  ;;  %6411 = vrot.lane.b32.xlu1 %v6410_v19, %s7684_s22  ;;  %v6435_v38 = vpack.i.bf16 %v5878_v50, %v2242_v0  ;;  %v6425_v19 = vpack.i.bf16 %v5868_v26, %v2192_v22  ;;  %v5834_v26 = vunpack.i.h.bf16 %v8822_v20 }
 0x99c   :  { %6431 = vrot.lane.b32.xlu0 %v6430_v28, %s7684_s22  ;;  %v2292_v28 = vsel %vm2291_vm7, %v12941_v29, %v5888_v34 }
 0x99d   :  { %v9101_v3 = vpop.permute.xlu2 %6261  ;;  %v9103_v18 = vpop.permute.xlu1 %6216  ;;  %v2018_v36 = vsel %vm2016_vm12, %v12946_v10, %v5834_v26  ;;  %v12952_v10 = vunpack.i.h.bf16 %v8885_v8  ;;  %v12989_v8 = vunpack.i.l.bf16 %v8974_v58 }
 0x99e   :  { %13521 = vst [vmem:[#allocation73_spill] sm:$0xff] %v9101_v3  ;;  %v9111_v21 = vpop.permute.xlu0 %6211  ;;  %v12944_v3 = vunpack.i.l.bf16 %v8856_v11  ;;  %v6450_v29 = vpack.i.bf16 %v5834_v26, %v2018_v36 }
 0x99f   :  { %13522 = vst [vmem:[#allocation74_spill] sm:$0xff] %v9103_v18  ;;  %v6445_v18 = vpack.i.bf16 %v5888_v34, %v2292_v28  ;;  %v2043_v34 = vsel %vm2041_vm14, %v12945_v13, %v5839_v47  ;;  %v5854_v13 = vunpack.i.h.bf16 %v8827_v4 }
 0x9a0   :  { %13523 = vst [vmem:[#allocation75_spill] sm:$0xff] %v9111_v21  ;;  %v5883_v21 = vunpack.i.l.bf16 %v8845_v14 }
 0x9a2   :  { %v2267_v0 = vsel %vm2266_vm8, %v12944_v3, %v5883_v21  ;;  %v5844_v3 = vunpack.i.h.bf16 %v8799_v43 }
 0x9a3   :  { %6436 = vrot.lane.b32.xlu2 %v6435_v38, %s7684_s22  ;;  %6426 = vrot.lane.b32.xlu1 %v6425_v19, %s7684_s22  ;;  %v6440_v20 = vpack.i.bf16 %v5883_v21, %v2267_v0  ;;  %v12948_v38 = vunpack.i.h.bf16 %v8838_v39  ;;  %v12947_v19 = vunpack.i.h.bf16 %v8867_v24  ;;  %v12987_v39 = vunpack.i.l.bf16 %v8992_v57 }
 0x9a4   :  { %6446 = vrot.lane.b32.xlu0 %v6445_v18, %s7684_s22  ;;  %v6455_v18 = vpack.i.bf16 %v5839_v47, %v2043_v34  ;;  %v5849_v47 = vunpack.i.h.bf16 %v8831_v49  ;;  %v12992_v24 = vunpack.i.l.bf16 %v8952_v53 }
 0x9a5   :  { %v9125_v50 = vpop.permute.xlu2 %6276  ;;  %v9127_v22 = vpop.permute.xlu1 %6231  ;;  %v2118_v26 = vsel %vm2116_vm1, %v12948_v38, %v5854_v13  ;;  %v2068_v0 = vsel %vm2066_vm13, %v12947_v19, %v5844_v3  ;;  %v5859_v19 = vunpack.i.h.bf16 %v8804_v6  ;;  %v5869_v38 = vunpack.i.h.bf16 %v8836_v61 }
 0x9a6   :  { %13524 = vst [vmem:[#allocation76_spill] sm:$0xff] %v9127_v22  ;;  %v9135_v28 = vpop.permute.xlu0 %6226  ;;  %v2093_v43 = vsel %vm2091_vm15, %v12949_v41, %v5849_v47  ;;  %v6470_v4 = vpack.i.bf16 %v5854_v13, %v2118_v26  ;;  %v6460_v49 = vpack.i.bf16 %v5844_v3, %v2068_v0  ;;  %v5864_v13 = vunpack.i.h.bf16 %v8840_v48 }
 0x9a7   :  { %13525 = vst [vmem:[#allocation77_spill] sm:$0xff] %v9135_v28  ;;  %v12955_v41 = vunpack.i.h.bf16 %v8894_v16 }
 0x9a8   :  { %v2168_v6 = vsel %vm2166_vm2, %v12952_v10, %v5864_v13  ;;  %v12962_v10 = vunpack.i.l.bf16 %v8945_v37 }
 0x9ab   :  { %6456 = vrot.lane.b32.xlu2 %v6455_v18, %s7684_s22  ;;  %6441 = vrot.lane.b32.xlu1 %v6440_v20, %s7684_s22  ;;  %v12951_v18 = vunpack.i.h.bf16 %v8876_v27  ;;  %v6465_v20 = vpack.i.bf16 %v5849_v47, %v2093_v43  ;;  %v12980_v27 = vunpack.i.l.bf16 %v8963_v42 }
 0x9ac   :  { %6451 = vrot.lane.b32.xlu0 %v6450_v29, %s7684_s22  ;;  %v12950_v29 = vunpack.i.h.bf16 %v8847_v1 }
 0x9ad   :  { %v9149_v21 = vpop.permute.xlu2 %6291  ;;  %v9151_v34 = vpop.permute.xlu1 %6246  ;;  %v2143_v0 = vsel %vm2141_vm0, %v12951_v18, %v5859_v19  ;;  %v5884_v18 = vunpack.i.h.bf16 %v8845_v14 }
 0x9ae   :  { %13526 = vst [vmem:[#allocation78_spill] sm:$0xff] %v9151_v34  ;;  %v9159_v36 = vpop.permute.xlu0 %6241  ;;  %v2193_v47 = vsel %vm2191_vm4, %v12950_v29, %v5869_v38  ;;  %v6475_v48 = vpack.i.bf16 %v5859_v19, %v2143_v0  ;;  %v5874_v29 = vunpack.i.h.bf16 %v8813_v30 }
 0x9af   :  { %13527 = vst [vmem:[#allocation79_spill] sm:$0xff] %v9159_v36  ;;  %v6485_v61 = vpack.i.bf16 %v5869_v38, %v2193_v47  ;;  %v5879_v38 = vunpack.i.h.bf16 %v8849_v45 }
 0x9b1   :  { %v2243_v30 = vsel %vm2241_vm5, %v12955_v41, %v5879_v38  ;;  %v12969_v41 = vunpack.i.l.bf16 %v8970_v63 }
 0x9b3   :  { %6471 = vrot.lane.b32.xlu2 %v6470_v4, %s7684_s22  ;;  %6461 = vrot.lane.b32.xlu1 %v6460_v49, %s7684_s22  ;;  %v12954_v4 = vunpack.i.h.bf16 %v8856_v11  ;;  %v12953_v49 = vunpack.i.h.bf16 %v8887_v35  ;;  %v12979_v11 = vunpack.i.l.bf16 %v8979_v40 }
 0x9b4   :  { %6466 = vrot.lane.b32.xlu0 %v6465_v20, %s7684_s22  ;;  %v6480_v20 = vpack.i.bf16 %v5864_v13, %v2168_v6 }
 0x9b5   :  { %v9173_v3 = vpop.permute.xlu2 %6306  ;;  %v9175_v26 = vpop.permute.xlu1 %6256  ;;  %v2268_v13 = vsel %vm2266_vm8, %v12954_v4, %v5884_v18  ;;  %v2218_v0 = vsel %vm2216_vm3, %v12953_v49, %v5874_v29  ;;  %v5889_v49 = vunpack.i.h.bf16 %v8818_v9  ;;  %v5983_v4 = vunpack.i.l.bf16 %v8909_v32 }
 0x9b6   :  { %v9183_v43 = vpop.permute.xlu0 %6251  ;;  %v6500_v14 = vpack.i.bf16 %v5884_v18, %v2268_v13  ;;  %v6490_v45 = vpack.i.bf16 %v5874_v29, %v2218_v0  ;;  %v5978_v18 = vunpack.i.l.bf16 %v8872_v46 }
 0x9b8   :  { %v2044_v9 = vsel %vm2041_vm14, %v12962_v10, %v5978_v18  ;;  %v12978_v10 = vunpack.i.l.bf16 %v8934_v7 }
 0x9b9   :  { %v6515_v1 = vpack.i.bf16 %v5978_v18, %v2044_v9 }
 0x9bb   :  { %6486 = vrot.lane.b32.xlu2 %v6485_v61, %s7684_s22  ;;  %6476 = vrot.lane.b32.xlu1 %v6475_v48, %s7684_s22  ;;  %v12960_v61 = vunpack.i.h.bf16 %v8898_v25  ;;  %v12961_v48 = vunpack.i.l.bf16 %v8959_v60  ;;  %v12971_v25 = vunpack.i.l.bf16 %v8954_v5 }
 0x9bc   :  { %6481 = vrot.lane.b32.xlu0 %v6480_v20, %s7684_s22  ;;  %v6495_v20 = vpack.i.bf16 %v5879_v38, %v2243_v30 }
 0x9bd   :  { %v9197_v19 = vpop.permute.xlu1 %6271  ;;  %v9199_v47 = vpop.permute.xlu2 %6326  ;;  %v2293_v38 = vsel %vm2291_vm7, %v12960_v61, %v5889_v49  ;;  %v2069_v0 = vsel %vm2066_vm13, %v12961_v48, %v5983_v4  ;;  %v5998_v61 = vunpack.i.l.bf16 %v8918_v44  ;;  %v5973_v48 = vunpack.i.l.bf16 %v8916_v52 }
 0x9be   :  { %13528 = vst [vmem:[#allocation80_spill] sm:$0xff] %v9199_v47  ;;  %v9207_v6 = vpop.permute.xlu0 %6266 }
 0x9c3   :  { %6501 = vrot.lane.b32.xlu2 %v6500_v14, %s7684_s22  ;;  %6491 = vrot.lane.b32.xlu1 %v6490_v45, %s7684_s22  ;;  %v6520_v14 = vpack.i.bf16 %v5983_v4, %v2069_v0  ;;  %v6505_v45 = vpack.i.bf16 %v5889_v49, %v2293_v38  ;;  %v5993_v4 = vunpack.i.l.bf16 %v8883_v54  ;;  %v2144_v0 = vsel %vm2141_vm0, %v12969_v41, %v5998_v61 }
 0x9c4   :  { %6496 = vrot.lane.b32.xlu0 %v6495_v20, %s7684_s22  ;;  %v12970_v20 = vunpack.i.l.bf16 %v8925_v62  ;;  %v6013_v41 = vunpack.i.l.bf16 %v8927_v17 }
 0x9c5   :  { %v9221_v29 = vpop.permute.xlu1 %6286  ;;  %v9223_v13 = vpop.permute.xlu2 %6341 }
 0x9c6   :  { %13529 = vst [vmem:[#allocation81_spill] sm:$0xff] %v9223_v13  ;;  %v9231_v30 = vpop.permute.xlu0 %6281  ;;  %v2019_v18 = vsel %vm2016_vm12, %v12970_v20, %v5973_v48  ;;  %v5988_v20 = vunpack.i.l.bf16 %v8923_v2 }
 0x9cb   :  { %6521 = vrot.lane.b32.xlu2 %v6520_v14, %s7684_s22  ;;  %6506 = vrot.lane.b32.xlu1 %v6505_v45, %s7684_s22  ;;  %v6535_v14 = vpack.i.bf16 %v5998_v61, %v2144_v0  ;;  %v6510_v45 = vpack.i.bf16 %v5973_v48, %v2019_v18  ;;  %v6008_v61 = vunpack.i.l.bf16 %v8892_v56  ;;  %v2219_v0 = vsel %vm2216_vm3, %v12979_v11, %v6013_v41 }
 0x9cc   :  { %6516 = vrot.lane.b32.xlu0 %v6515_v1, %s7684_s22  ;;  %v2119_v1 = vsel %vm2116_vm1, %v12971_v25, %v5993_v4  ;;  %v12988_v25 = vunpack.i.l.bf16 %v8943_v55  ;;  %v6003_v11 = vunpack.i.l.bf16 %v8932_v31 }
 0x9cd   :  { %v9245_v49 = vpop.permute.xlu1 %6301  ;;  %v9247_v38 = vpop.permute.xlu2 %6356  ;;  %v6530_v35 = vpack.i.bf16 %v5993_v4, %v2119_v1  ;;  %v2094_v4 = vsel %vm2091_vm15, %v12978_v10, %v5988_v20  ;;  %v6028_v10 = vunpack.i.l.bf16 %v8936_v23 }
 0x9ce   :  { %13530 = vst [vmem:[#allocation82_spill] sm:$0xff] %v9247_v38  ;;  %v9255_v9 = vpop.permute.xlu0 %6296 }
 0x9d3   :  { %6536 = vrot.lane.b32.xlu2 %v6535_v14, %s7684_s22  ;;  %6511 = vrot.lane.b32.xlu1 %v6510_v45, %s7684_s22  ;;  %v6550_v14 = vpack.i.bf16 %v6013_v41, %v2219_v0  ;;  %v6525_v45 = vpack.i.bf16 %v5988_v20, %v2094_v4  ;;  %v6023_v41 = vunpack.i.l.bf16 %v8905_v12  ;;  %v2294_v0 = vsel %vm2291_vm7, %v12987_v39, %v6028_v10 }
 0x9d4   :  { %6531 = vrot.lane.b32.xlu0 %v6530_v35, %s7684_s22  ;;  %v2194_v35 = vsel %vm2191_vm4, %v12980_v27, %v6008_v61  ;;  %v12993_v27 = vunpack.i.h.bf16 %v8925_v62  ;;  %v5974_v39 = vunpack.i.h.bf16 %v8916_v52  ;;  %v12997_v62 = vunpack.i.h.bf16 %v8970_v63 }
 0x9d5   :  { %v9269_v48 = vpop.permute.xlu1 %6316  ;;  %v9271_v18 = vpop.permute.xlu2 %6371  ;;  %v6545_v16 = vpack.i.bf16 %v6008_v61, %v2194_v35  ;;  %v2169_v61 = vsel %vm2166_vm2, %v12988_v25, %v6003_v11  ;;  %v6018_v25 = vunpack.i.l.bf16 %v8941_v51 }
 0x9d6   :  { %13531 = vst [vmem:[#allocation83_spill] sm:$0xff] %v9269_v48  ;;  %v9279_v1 = vpop.permute.xlu0 %6311  ;;  %v13573_v48 = vld [vmem:[#allocation68_spill] sm:$0xff] }
 0x9d7   :  { %13532 = vst [vmem:[#allocation84_spill] sm:$0xff] %v9271_v18 }
 0x9d8   :  { %13533 = vst [vmem:[#allocation85_spill] sm:$0xff] %v9279_v1 }
 0x9db   :  { %6551 = vrot.lane.b32.xlu2 %v6550_v14, %s7684_s22  ;;  %6526 = vrot.lane.b32.xlu1 %v6525_v45, %s7684_s22  ;;  %v6565_v14 = vpack.i.bf16 %v6028_v10, %v2294_v0  ;;  %v6540_v45 = vpack.i.bf16 %v6003_v11, %v2169_v61  ;;  %v5984_v10 = vunpack.i.h.bf16 %v8909_v32  ;;  %v2244_v0 = vsel %vm2241_vm5, %v12992_v24, %v6018_v25 }
 0x9dc   :  { %6546 = vrot.lane.b32.xlu0 %v6545_v16, %s7684_s22  ;;  %v2269_v16 = vsel %vm2266_vm8, %v12989_v8, %v6023_v41  ;;  %v6555_v32 = vpack.i.bf16 %v6018_v25, %v2244_v0  ;;  %v5979_v24 = vunpack.i.h.bf16 %v8872_v46 }
 0x9dd   :  { %v9293_v20 = vpop.permute.xlu2 %6386  ;;  %v9295_v4 = vpop.permute.xlu1 %6321  ;;  %v6560_v33 = vpack.i.bf16 %v6023_v41, %v2269_v16  ;;  %v2020_v41 = vsel %vm2016_vm12, %v12993_v27, %v5974_v39  ;;  %v5989_v27 = vunpack.i.h.bf16 %v8923_v2  ;;  %v12999_v2 = vunpack.i.h.bf16 %v8943_v55 }
 0x9de   :  { %13534 = vst [vmem:[#allocation86_spill] sm:$0xff] %v9293_v20  ;;  %v9303_v35 = vpop.permute.xlu0 %6331  ;;  %v6570_v52 = vpack.i.bf16 %v5974_v39, %v2020_v41  ;;  %v5999_v39 = vunpack.i.h.bf16 %v8918_v44 }
 0x9df   :  { %13535 = vst [vmem:[#allocation87_spill] sm:$0xff] %v9303_v35 }
 0x9e0   :  { %v2145_v46 = vsel %vm2141_vm0, %v12997_v62, %v5999_v39  ;;  %v13013_v62 = vunpack.i.l.bf16 %v9063_v15 }
 0x9e3   :  { %6566 = vrot.lane.b32.xlu2 %v6565_v14, %s7684_s22  ;;  %6541 = vrot.lane.b32.xlu1 %v6540_v45, %s7684_s22  ;;  %v12995_v14 = vunpack.i.h.bf16 %v8934_v7  ;;  %v12996_v45 = vunpack.i.h.bf16 %v8945_v37 }
 0x9e4   :  { %6561 = vrot.lane.b32.xlu0 %v6560_v33, %s7684_s22  ;;  %v2070_v33 = vsel %vm2066_vm13, %v12994_v59, %v5984_v10  ;;  %v13000_v59 = vunpack.i.h.bf16 %v8979_v40  ;;  %v13557_v40 = vld [vmem:[#allocation71_spill] sm:$0xff] }
 0x9e5   :  { %v9317_v11 = vpop.permute.xlu2 %6391  ;;  %v9319_v61 = vpop.permute.xlu1 %6336  ;;  %v6580_v8 = vpack.i.bf16 %v5984_v10, %v2070_v33  ;;  %v2095_v10 = vsel %vm2091_vm15, %v12995_v14, %v5989_v27  ;;  %v2045_v0 = vsel %vm2041_vm14, %v12996_v45, %v5979_v24  ;;  %v5994_v14 = vunpack.i.h.bf16 %v8883_v54 }
 0x9e6   :  { %13536 = vst [vmem:[#allocation88_spill] sm:$0xff] %v9317_v11  ;;  %v9327_v16 = vpop.permute.xlu0 %6346  ;;  %v6575_v44 = vpack.i.bf16 %v5979_v24, %v2045_v0  ;;  %v6004_v45 = vunpack.i.h.bf16 %v8932_v31  ;;  %v13036_v63 = vunpack.i.l.bf16 %v13557_v40 }
 0x9e7   :  { %13537 = vst [vmem:[#allocation89_spill] sm:$0xff] %v9319_v61 }
 0x9e8   :  { %13538 = vst [vmem:[#allocation90_spill] sm:$0xff] %v9327_v16 }
 0x9eb   :  { %6571 = vrot.lane.b32.xlu2 %v6570_v52, %s7684_s22  ;;  %6556 = vrot.lane.b32.xlu1 %v6555_v32, %s7684_s22  ;;  %v12998_v52 = vunpack.i.h.bf16 %v8954_v5  ;;  %v6595_v32 = vpack.i.bf16 %v5999_v39, %v2145_v46  ;;  %v2170_v39 = vsel %vm2166_vm2, %v12999_v2, %v6004_v45  ;;  %v6019_v2 = vunpack.i.h.bf16 %v8941_v51 }
 0x9ec   :  { %6581 = vrot.lane.b32.xlu0 %v6580_v8, %s7684_s22  ;;  %v6585_v8 = vpack.i.bf16 %v5989_v27, %v2095_v10  ;;  %v6014_v27 = vunpack.i.h.bf16 %v8927_v17  ;;  %v6600_v31 = vpack.i.bf16 %v6004_v45, %v2170_v39 }
 0x9ed   :  { %v9341_v25 = vpop.permute.xlu2 %6406  ;;  %v9343_v41 = vpop.permute.xlu1 %6351  ;;  %v2120_v0 = vsel %vm2116_vm1, %v12998_v52, %v5994_v14  ;;  %v6009_v52 = vunpack.i.h.bf16 %v8892_v56 }
 0x9ee   :  { %13539 = vst [vmem:[#allocation91_spill] sm:$0xff] %v9341_v25  ;;  %v9351_v33 = vpop.permute.xlu0 %6361  ;;  %v2220_v54 = vsel %vm2216_vm3, %v13000_v59, %v6014_v27  ;;  %v6590_v17 = vpack.i.bf16 %v5994_v14, %v2120_v0  ;;  %v13545_v59 = vld [vmem:[#allocation47_spill] sm:$0xff]  ;;  %v13050_v25 = vunpack.i.l.bf16 %v9135_v28 }
 0x9ef   :  { %13540 = vst [vmem:[#allocation92_spill] sm:$0xff] %v9343_v41  ;;  %v6113_v45 = vunpack.i.l.bf16 %v13545_v59 }
 0x9f0   :  { %13541 = vst [vmem:[#allocation93_spill] sm:$0xff] %v9351_v33 }
 0x9f1   :  { %v2021_v56 = vsel %vm2016_vm12, %v13013_v62, %v6113_v45  ;;  %v13552_v62 = vld [vmem:[#allocation50_spill] sm:$0xff] }
 0x9f2   :  { %v6625_v55 = vpack.i.bf16 %v6113_v45, %v2021_v56 }
 0x9f3   :  { %6586 = vrot.lane.b32.xlu2 %v6585_v8, %s7684_s22  ;;  %6576 = vrot.lane.b32.xlu1 %v6575_v44, %s7684_s22  ;;  %v13010_v8 = vunpack.i.h.bf16 %v8952_v53  ;;  %v13009_v44 = vunpack.i.h.bf16 %v8963_v42  ;;  %v13550_v53 = vld [vmem:[#allocation72_spill] sm:$0xff] }
 0x9f4   :  { %6596 = vrot.lane.b32.xlu0 %v6595_v32, %s7684_s22  ;;  %v6610_v32 = vpack.i.bf16 %v6014_v27, %v2220_v54  ;;  %v13029_v37 = vunpack.i.l.bf16 %v13550_v53 }
 0x9f5   :  { %v9365_v24 = vpop.permute.xlu2 %6421  ;;  %v9367_v10 = vpop.permute.xlu1 %6366  ;;  %v2245_v27 = vsel %vm2241_vm5, %v13010_v8, %v6019_v2  ;;  %v2195_v0 = vsel %vm2191_vm4, %v13009_v44, %v6009_v52  ;;  %v6024_v44 = vunpack.i.h.bf16 %v8905_v12  ;;  %v13551_v8 = vld [vmem:[#allocation55_spill] sm:$0xff] }
 0x9f6   :  { %13542 = vst [vmem:[#allocation94_spill] sm:$0xff] %v9365_v24  ;;  %v9375_v46 = vpop.permute.xlu0 %6376  ;;  %v6615_v51 = vpack.i.bf16 %v6019_v2, %v2245_v27  ;;  %v6118_v42 = vunpack.i.l.bf16 %v13551_v8  ;;  %v6128_v2 = vunpack.i.l.bf16 %v13552_v62 }
 0x9f7   :  { %13543 = vst [vmem:[#allocation95_spill] sm:$0xff] %v9367_v10 }
 0x9f8   :  { %13544 = vst [vmem:[#allocation96_spill] sm:$0xff] %v9375_v46  ;;  %v2096_v12 = vsel %vm2091_vm15, %v13029_v37, %v6128_v2  ;;  %v13561_v37 = vld [vmem:[#allocation54_spill] sm:$0xff] }
 0x9f9   :  { %v6640_v60 = vpack.i.bf16 %v6128_v2, %v2096_v12 }
 0x9fb   :  { %6601 = vrot.lane.b32.xlu2 %v6600_v31, %s7684_s22  ;;  %6591 = vrot.lane.b32.xlu1 %v6590_v17, %s7684_s22  ;;  %v6605_v31 = vpack.i.bf16 %v6009_v52, %v2195_v0  ;;  %v13025_v17 = vunpack.i.h.bf16 %v8974_v58  ;;  %v13558_v58 = vld [vmem:[#allocation75_spill] sm:$0xff] }
 0x9fc   :  { %6611 = vrot.lane.b32.xlu0 %v6610_v32, %s7684_s22  ;;  %v13549_v32 = vld [vmem:[#allocation69_spill] sm:$0xff] }
 0x9fd   :  { %v9389_v14 = vpop.permute.xlu2 %6436  ;;  %v9391_v39 = vpop.permute.xlu1 %6381  ;;  %v13026_v7 = vunpack.i.l.bf16 %v13549_v32  ;;  %v2270_v45 = vsel %vm2266_vm8, %v13025_v17, %v6024_v44  ;;  %v13559_v17 = vld [vmem:[#allocation56_spill] sm:$0xff]  ;;  %v13055_v34 = vunpack.i.h.bf16 %v13549_v32  ;;  %v13091_v32 = vunpack.i.h.bf16 %v9295_v4 }
 0x9fe   :  { %13546 = vst [vmem:[#allocation47_spill] sm:$0xff] %v9389_v14  ;;  %v9399_v54 = vpop.permute.xlu0 %6401  ;;  %v13565_v14 = vld [vmem:[#allocation66_spill] sm:$0xff] }
 0x9ff   :  { %13547 = vst [vmem:[#allocation97_spill] sm:$0xff] %v9391_v39  ;;  %v2046_v0 = vsel %vm2041_vm14, %v13026_v7, %v6118_v42  ;;  %v6123_v7 = vunpack.i.l.bf16 %v13559_v17 }
 0xa00   :  { %13548 = vst [vmem:[#allocation98_spill] sm:$0xff] %v9399_v54  ;;  %v13566_v54 = vld [vmem:[#allocation74_spill] sm:$0xff] }
 0xa03   :  { %6616 = vrot.lane.b32.xlu2 %v6615_v51, %s7684_s22  ;;  %6606 = vrot.lane.b32.xlu1 %v6605_v31, %s7684_s22  ;;  %v6620_v51 = vpack.i.bf16 %v6024_v44, %v2270_v45  ;;  %v13556_v31 = vld [vmem:[#allocation63_spill] sm:$0xff] }
 0xa04   :  { %6626 = vrot.lane.b32.xlu0 %v6625_v55, %s7684_s22  ;;  %v6630_v55 = vpack.i.bf16 %v6118_v42, %v2046_v0  ;;  %v13037_v5 = vunpack.i.l.bf16 %v13556_v31  ;;  %v6143_v42 = vunpack.i.l.bf16 %v13561_v37 }
 0xa05   :  { %v9413_v52 = vpop.permute.xlu2 %6456  ;;  %v9415_v27 = vpop.permute.xlu1 %6396 }
 0xa06   :  { %13553 = vst [vmem:[#allocation55_spill] sm:$0xff] %v9413_v52  ;;  %v9423_v56 = vpop.permute.xlu0 %6416  ;;  %v2071_v2 = vsel %vm2066_vm13, %v13037_v5, %v6123_v7 }
 0xa07   :  { %13554 = vst [vmem:[#allocation50_spill] sm:$0xff] %v9415_v27  ;;  %v13040_v27 = vunpack.i.l.bf16 %v13558_v58 }
 0xa08   :  { %13555 = vst [vmem:[#allocation99_spill] sm:$0xff] %v9423_v56  ;;  %v13560_v56 = vld [vmem:[#allocation58_spill] sm:$0xff] }
 0xa09   :  { %v6133_v52 = vunpack.i.l.bf16 %v13560_v56 }
 0xa0b   :  { %6631 = vrot.lane.b32.xlu2 %v6630_v55, %s7684_s22  ;;  %6621 = vrot.lane.b32.xlu1 %v6620_v51, %s7684_s22  ;;  %v2121_v0 = vsel %vm2116_vm1, %v13036_v63, %v6133_v52  ;;  %v6635_v51 = vpack.i.bf16 %v6123_v7, %v2071_v2  ;;  %v13567_v63 = vld [vmem:[#allocation59_spill] sm:$0xff] }
 0xa0c   :  { %6641 = vrot.lane.b32.xlu0 %v6640_v60, %s7684_s22  ;;  %v2171_v60 = vsel %vm2166_vm2, %v13040_v27, %v6143_v42  ;;  %v6645_v55 = vpack.i.bf16 %v6133_v52, %v2121_v0  ;;  %v6138_v5 = vunpack.i.l.bf16 %v13567_v63  ;;  %v13569_v27 = vld [vmem:[#allocation57_spill] sm:$0xff] }
 0xa0d   :  { %v9437_v44 = vpop.permute.xlu2 %6471  ;;  %v9439_v45 = vpop.permute.xlu1 %6411  ;;  %v6655_v24 = vpack.i.bf16 %v6143_v42, %v2171_v60  ;;  %v6158_v52 = vunpack.i.l.bf16 %v13569_v27 }
 0xa0e   :  { %13562 = vst [vmem:[#allocation56_spill] sm:$0xff] %v9437_v44  ;;  %v9447_v12 = vpop.permute.xlu0 %6431  ;;  %v13047_v44 = vunpack.i.l.bf16 %v13565_v14 }
 0xa0f   :  { %13563 = vst [vmem:[#allocation58_spill] sm:$0xff] %v9439_v45  ;;  %v13046_v45 = vunpack.i.l.bf16 %v13566_v54 }
 0xa10   :  { %13564 = vst [vmem:[#allocation54_spill] sm:$0xff] %v9447_v12  ;;  %v13568_v12 = vld [vmem:[#allocation61_spill] sm:$0xff]  ;;  %v2146_v42 = vsel %vm2141_vm0, %v13047_v44, %v6138_v5 }
 0xa11   :  { %v6148_v11 = vunpack.i.l.bf16 %v13568_v12 }
 0xa13   :  { %6646 = vrot.lane.b32.xlu2 %v6645_v55, %s7684_s22  ;;  %6636 = vrot.lane.b32.xlu1 %v6635_v51, %s7684_s22  ;;  %v2196_v0 = vsel %vm2191_vm4, %v13046_v45, %v6148_v11  ;;  %v6650_v51 = vpack.i.bf16 %v6138_v5, %v2146_v42  ;;  %v13574_v45 = vld [vmem:[#allocation62_spill] sm:$0xff] }
 0xa14   :  { %6656 = vrot.lane.b32.xlu0 %v6655_v24, %s7684_s22  ;;  %v2246_v24 = vsel %vm2241_vm5, %v13050_v25, %v6158_v52  ;;  %v6660_v55 = vpack.i.bf16 %v6148_v11, %v2196_v0  ;;  %v6153_v44 = vunpack.i.l.bf16 %v13574_v45  ;;  %v6119_v11 = vunpack.i.h.bf16 %v13551_v8 }
 0xa15   :  { %v9461_v7 = vpop.permute.xlu2 %6486  ;;  %v9463_v2 = vpop.permute.xlu1 %6426  ;;  %v6670_v20 = vpack.i.bf16 %v6158_v52, %v2246_v24  ;;  %v13057_v25 = vunpack.i.h.bf16 %v9063_v15 }
 0xa16   :  { %13570 = vst [vmem:[#allocation59_spill] sm:$0xff] %v9461_v7  ;;  %v9471_v60 = vpop.permute.xlu0 %6446  ;;  %v13053_v7 = vunpack.i.l.bf16 %v13573_v48 }
 0xa17   :  { %13571 = vst [vmem:[#allocation61_spill] sm:$0xff] %v9463_v2  ;;  %v13054_v2 = vunpack.i.l.bf16 %v9127_v22 }
 0xa18   :  { %13572 = vst [vmem:[#allocation57_spill] sm:$0xff] %v9471_v60  ;;  %v13575_v60 = vld [vmem:[#allocation64_spill] sm:$0xff]  ;;  %v2221_v52 = vsel %vm2216_vm3, %v13053_v7, %v6153_v44  ;;  %v6114_v7 = vunpack.i.h.bf16 %v13545_v59 }
 0xa19   :  { %v6163_v1 = vunpack.i.l.bf16 %v13575_v60  ;;  %v6665_v8 = vpack.i.bf16 %v6153_v44, %v2221_v52 }
 0xa1b   :  { %6661 = vrot.lane.b32.xlu2 %v6660_v55, %s7684_s22  ;;  %6651 = vrot.lane.b32.xlu1 %v6650_v51, %s7684_s22  ;;  %v2271_v0 = vsel %vm2266_vm8, %v13054_v2, %v6163_v1  ;;  %v13056_v51 = vunpack.i.h.bf16 %v13556_v31  ;;  %v6124_v2 = vunpack.i.h.bf16 %v13559_v17 }
 0xa1c   :  { %6671 = vrot.lane.b32.xlu0 %v6670_v20, %s7684_s22  ;;  %v2047_v20 = vsel %vm2041_vm14, %v13055_v34, %v6119_v11  ;;  %v6675_v55 = vpack.i.bf16 %v6163_v1, %v2271_v0  ;;  %v6134_v1 = vunpack.i.h.bf16 %v13560_v56  ;;  %v2022_v0 = vsel %vm2016_vm12, %v13057_v25, %v6114_v7 }
 0xa1d   :  { %v9485_v5 = vpop.permute.xlu2 %6501  ;;  %v9487_v42 = vpop.permute.xlu1 %6441  ;;  %v6680_v56 = vpack.i.bf16 %v6114_v7, %v2022_v0  ;;  %v13061_v34 = vunpack.i.h.bf16 %v13566_v54  ;;  %v6139_v25 = vunpack.i.h.bf16 %v13567_v63  ;;  %v13076_v54 = vunpack.i.l.bf16 %v9319_v61 }
 0xa1e   :  { %13576 = vst [vmem:[#allocation62_spill] sm:$0xff] %v9485_v5  ;;  %v9495_v24 = vpop.permute.xlu0 %6451  ;;  %v13058_v5 = vunpack.i.h.bf16 %v13557_v40 }
 0xa1f   :  { %13577 = vst [vmem:[#allocation64_spill] sm:$0xff] %v9487_v42  ;;  %v6685_v42 = vpack.i.bf16 %v6119_v11, %v2047_v20  ;;  %v2072_v11 = vsel %vm2066_vm13, %v13056_v51, %v6124_v2  ;;  %v6129_v51 = vunpack.i.h.bf16 %v13552_v62 }
 0xa20   :  { %13578 = vst [vmem:[#allocation100_spill] sm:$0xff] %v9495_v24  ;;  %v2122_v59 = vsel %vm2116_vm1, %v13058_v5, %v6134_v1  ;;  %v6690_v17 = vpack.i.bf16 %v6124_v2, %v2072_v11  ;;  %v6149_v2 = vunpack.i.h.bf16 %v13568_v12  ;;  %v13064_v5 = vunpack.i.h.bf16 %v9127_v22 }
 0xa21   :  { %v13084_v22 = vunpack.i.l.bf16 %v9351_v33 }
 0xa22   :  { %v2197_v62 = vsel %vm2191_vm4, %v13061_v34, %v6149_v2  ;;  %v13070_v34 = vunpack.i.l.bf16 %v9303_v35 }
 0xa23   :  { %6676 = vrot.lane.b32.xlu2 %v6675_v55, %s7684_s22  ;;  %6666 = vrot.lane.b32.xlu1 %v6665_v8, %s7684_s22  ;;  %v13059_v55 = vunpack.i.h.bf16 %v13550_v53  ;;  %v6700_v8 = vpack.i.bf16 %v6134_v1, %v2122_v59  ;;  %v13089_v53 = vunpack.i.l.bf16 %v9367_v10 }
 0xa24   :  { %6686 = vrot.lane.b32.xlu0 %v6685_v42, %s7684_s22  ;;  %v13060_v42 = vunpack.i.h.bf16 %v13565_v14 }
 0xa25   :  { %v9509_v44 = vpop.permute.xlu2 %6521  ;;  %v9511_v52 = vpop.permute.xlu1 %6461  ;;  %v2097_v0 = vsel %vm2091_vm15, %v13059_v55, %v6129_v51  ;;  %v6144_v55 = vunpack.i.h.bf16 %v13561_v37 }
 0xa26   :  { %13579 = vst [vmem:[#allocation101_spill] sm:$0xff] %v9509_v44  ;;  %v9519_v20 = vpop.permute.xlu0 %6466  ;;  %v2147_v1 = vsel %vm2141_vm0, %v13060_v42, %v6139_v25  ;;  %v6695_v12 = vpack.i.bf16 %v6129_v51, %v2097_v0  ;;  %v6154_v42 = vunpack.i.h.bf16 %v13574_v45 }
 0xa27   :  { %13580 = vst [vmem:[#allocation102_spill] sm:$0xff] %v9511_v52  ;;  %v6705_v63 = vpack.i.bf16 %v6139_v25, %v2147_v1  ;;  %v6164_v25 = vunpack.i.h.bf16 %v13575_v60 }
 0xa28   :  { %13581 = vst [vmem:[#allocation103_spill] sm:$0xff] %v9519_v20 }
 0xa29   :  { %v2272_v37 = vsel %vm2266_vm8, %v13064_v5, %v6164_v25  ;;  %v13588_v5 = vld [vmem:[#allocation73_spill] sm:$0xff] }
 0xa2b   :  { %6691 = vrot.lane.b32.xlu2 %v6690_v17, %s7684_s22  ;;  %6681 = vrot.lane.b32.xlu1 %v6680_v56, %s7684_s22  ;;  %v13062_v17 = vunpack.i.h.bf16 %v13573_v48  ;;  %v13063_v56 = vunpack.i.h.bf16 %v13558_v58  ;;  %v13096_v58 = vunpack.i.h.bf16 %v8992_v57 }
 0xa2c   :  { %6701 = vrot.lane.b32.xlu0 %v6700_v8, %s7684_s22  ;;  %v6715_v8 = vpack.i.bf16 %v6149_v2, %v2197_v62 }
 0xa2d   :  { %v9533_v7 = vpop.permute.xlu2 %6536  ;;  %v9535_v11 = vpop.permute.xlu1 %6476  ;;  %v2222_v2 = vsel %vm2216_vm3, %v13062_v17, %v6154_v42  ;;  %v2172_v0 = vsel %vm2166_vm2, %v13063_v56, %v6144_v55  ;;  %v6159_v17 = vunpack.i.h.bf16 %v13569_v27  ;;  %v6253_v56 = vunpack.i.l.bf16 %v9183_v43 }
 0xa2e   :  { %13582 = vst [vmem:[#allocation104_spill] sm:$0xff] %v9533_v7  ;;  %v9543_v59 = vpop.permute.xlu0 %6481  ;;  %v6720_v45 = vpack.i.bf16 %v6154_v42, %v2222_v2  ;;  %v6710_v60 = vpack.i.bf16 %v6144_v55, %v2172_v0  ;;  %v6263_v42 = vunpack.i.l.bf16 %v13588_v5 }
 0xa2f   :  { %13583 = vst [vmem:[#allocation105_spill] sm:$0xff] %v9535_v11 }
 0xa30   :  { %13584 = vst [vmem:[#allocation106_spill] sm:$0xff] %v9543_v59  ;;  %v2073_v27 = vsel %vm2066_vm13, %v13070_v34, %v6263_v42  ;;  %v13082_v34 = vunpack.i.l.bf16 %v9223_v13 }
 0xa33   :  { %6706 = vrot.lane.b32.xlu2 %v6705_v63, %s7684_s22  ;;  %6696 = vrot.lane.b32.xlu1 %v6695_v12, %s7684_s22  ;;  %v13068_v63 = vunpack.i.h.bf16 %v9135_v28  ;;  %v13069_v12 = vunpack.i.l.bf16 %v9295_v4  ;;  %v13083_v28 = vunpack.i.l.bf16 %v9343_v41 }
 0xa34   :  { %6716 = vrot.lane.b32.xlu0 %v6715_v8, %s7684_s22  ;;  %v6730_v8 = vpack.i.bf16 %v6164_v25, %v2272_v37 }
 0xa35   :  { %v9557_v51 = vpop.permute.xlu2 %6551  ;;  %v9559_v1 = vpop.permute.xlu1 %6491  ;;  %v2247_v25 = vsel %vm2241_vm5, %v13068_v63, %v6159_v17  ;;  %v2023_v0 = vsel %vm2016_vm12, %v13069_v12, %v6253_v56  ;;  %v6258_v63 = vunpack.i.l.bf16 %v9175_v26  ;;  %v6268_v12 = vunpack.i.l.bf16 %v9207_v6 }
 0xa36   :  { %13585 = vst [vmem:[#allocation107_spill] sm:$0xff] %v9557_v51  ;;  %v9567_v62 = vpop.permute.xlu0 %6496 }
 0xa37   :  { %13586 = vst [vmem:[#allocation108_spill] sm:$0xff] %v9559_v1 }
 0xa38   :  { %13587 = vst [vmem:[#allocation109_spill] sm:$0xff] %v9567_v62 }
 0xa3b   :  { %6721 = vrot.lane.b32.xlu2 %v6720_v45, %s7684_s22  ;;  %6711 = vrot.lane.b32.xlu1 %v6710_v60, %s7684_s22  ;;  %v6725_v45 = vpack.i.bf16 %v6159_v17, %v2247_v25  ;;  %v6735_v60 = vpack.i.bf16 %v6253_v56, %v2023_v0  ;;  %v6278_v17 = vunpack.i.l.bf16 %v9125_v50  ;;  %v2098_v0 = vsel %vm2091_vm15, %v13076_v54, %v6268_v12 }
 0xa3c   :  { %6731 = vrot.lane.b32.xlu0 %v6730_v8, %s7684_s22  ;;  %v13077_v8 = vunpack.i.l.bf16 %v9199_v47  ;;  %v6273_v54 = vunpack.i.l.bf16 %v9197_v19 }
 0xa3d   :  { %v9581_v55 = vpop.permute.xlu2 %6566  ;;  %v9583_v2 = vpop.permute.xlu1 %6506 }
 0xa3e   :  { %13589 = vst [vmem:[#allocation73_spill] sm:$0xff] %v9581_v55  ;;  %v9591_v37 = vpop.permute.xlu0 %6516  ;;  %v13078_v55 = vunpack.i.l.bf16 %v9327_v16 }
 0xa3f   :  { %13590 = vst [vmem:[#allocation110_spill] sm:$0xff] %v9583_v2  ;;  %v6745_v2 = vpack.i.bf16 %v6263_v42, %v2073_v27  ;;  %v2048_v42 = vsel %vm2041_vm14, %v13077_v8, %v6258_v63  ;;  %v6283_v8 = vunpack.i.l.bf16 %v9231_v30 }
 0xa40   :  { %13591 = vst [vmem:[#allocation111_spill] sm:$0xff] %v9591_v37 }
 0xa43   :  { %6726 = vrot.lane.b32.xlu1 %v6725_v45, %s7684_s22  ;;  %6736 = vrot.lane.b32.xlu2 %v6735_v60, %s7684_s22  ;;  %v6740_v45 = vpack.i.bf16 %v6258_v63, %v2048_v42  ;;  %v6750_v60 = vpack.i.bf16 %v6268_v12, %v2098_v0  ;;  %v6293_v63 = vunpack.i.l.bf16 %v9149_v21  ;;  %v2173_v0 = vsel %vm2166_vm2, %v13083_v28, %v6283_v8 }
 0xa44   :  { %6746 = vrot.lane.b32.xlu0 %v6745_v2, %s7684_s22  ;;  %v2148_v2 = vsel %vm2141_vm0, %v13078_v55, %v6278_v17  ;;  %v13088_v55 = vunpack.i.l.bf16 %v9247_v38  ;;  %v6298_v28 = vunpack.i.l.bf16 %v9255_v9 }
 0xa45   :  { %v9605_v56 = vpop.permute.xlu2 %6571  ;;  %v9607_v25 = vpop.permute.xlu1 %6511  ;;  %v6760_v48 = vpack.i.bf16 %v6278_v17, %v2148_v2  ;;  %v2123_v17 = vsel %vm2116_vm1, %v13082_v34, %v6273_v54  ;;  %v6288_v34 = vunpack.i.l.bf16 %v9221_v29 }
 0xa46   :  { %13592 = vst [vmem:[#allocation112_spill] sm:$0xff] %v9605_v56  ;;  %v9615_v27 = vpop.permute.xlu0 %6531 }
 0xa47   :  { %13593 = vst [vmem:[#allocation113_spill] sm:$0xff] %v9607_v25 }
 0xa48   :  { %13594 = vst [vmem:[#allocation114_spill] sm:$0xff] %v9615_v27 }
 0xa4b   :  { %6741 = vrot.lane.b32.xlu1 %v6740_v45, %s7684_s22  ;;  %6751 = vrot.lane.b32.xlu2 %v6750_v60, %s7684_s22  ;;  %v6755_v45 = vpack.i.bf16 %v6273_v54, %v2123_v17  ;;  %v6765_v60 = vpack.i.bf16 %v6283_v8, %v2173_v0  ;;  %v6254_v54 = vunpack.i.h.bf16 %v9183_v43  ;;  %v2248_v0 = vsel %vm2241_vm5, %v13089_v53, %v6298_v28 }
 0xa4c   :  { %6761 = vrot.lane.b32.xlu0 %v6760_v48, %s7684_s22  ;;  %v2223_v48 = vsel %vm2216_vm3, %v13084_v22, %v6293_v63  ;;  %v6780_v43 = vpack.i.bf16 %v6298_v28, %v2248_v0 }
 0xa4d   :  { %v9629_v12 = vpop.permute.xlu2 %6586  ;;  %v9631_v42 = vpop.permute.xlu1 %6526  ;;  %v6775_v14 = vpack.i.bf16 %v6293_v63, %v2223_v48  ;;  %v2198_v63 = vsel %vm2191_vm4, %v13088_v55, %v6288_v34  ;;  %v13602_v55 = vld [vmem:[#allocation65_spill] sm:$0xff] }
 0xa4e   :  { %13595 = vst [vmem:[#allocation115_spill] sm:$0xff] %v9629_v12  ;;  %v9639_v2 = vpop.permute.xlu0 %6546  ;;  %v6169_v53 = vunpack.i.h.bf16 %v13602_v55 }
 0xa4f   :  { %13596 = vst [vmem:[#allocation116_spill] sm:$0xff] %v9631_v42 }
 0xa50   :  { %13597 = vst [vmem:[#allocation117_spill] sm:$0xff] %v9639_v2  ;;  %v13095_v2 = vunpack.i.l.bf16 %v9271_v18 }
 0xa53   :  { %6756 = vrot.lane.b32.xlu1 %v6755_v45, %s7684_s22  ;;  %6766 = vrot.lane.b32.xlu2 %v6765_v60, %s7684_s22  ;;  %v6770_v45 = vpack.i.bf16 %v6288_v34, %v2198_v63  ;;  %v13601_v60 = vld [vmem:[#allocation70_spill] sm:$0xff]  ;;  %v6029_v34 = vunpack.i.h.bf16 %v8936_v23 }
 0xa54   :  { %6776 = vrot.lane.b32.xlu0 %v6775_v14, %s7684_s22  ;;  %v2024_v14 = vsel %vm2016_vm12, %v13091_v32, %v6254_v54  ;;  %v13094_v22 = vunpack.i.h.bf16 %v13601_v60  ;;  %v13098_v32 = vunpack.i.h.bf16 %v9199_v47  ;;  %v13665_v47 = vld [vmem:[#allocation13_spill] sm:$0xff] }
 0xa55   :  { %v9653_v8 = vpop.permute.xlu2 %6601  ;;  %v9655_v17 = vpop.permute.xlu1 %6541  ;;  %v6790_v40 = vpack.i.bf16 %v6254_v54, %v2024_v14 }
 0xa56   :  { %13598 = vst [vmem:[#allocation118_spill] sm:$0xff] %v9653_v8  ;;  %v9663_v48 = vpop.permute.xlu0 %6561  ;;  %v2297_v54 = vsel %vm2291_vm7, %v13094_v22, %v6169_v53  ;;  %v6168_v22 = vunpack.i.l.bf16 %v13602_v55 }
 0xa57   :  { %13599 = vst [vmem:[#allocation119_spill] sm:$0xff] %v9655_v17  ;;  %v6805_v23 = vpack.i.bf16 %v6169_v53, %v2297_v54 }
 0xa58   :  { %13600 = vst [vmem:[#allocation120_spill] sm:$0xff] %v9663_v48  ;;  %v6303_v48 = vunpack.i.l.bf16 %v9245_v49 }
 0xa5a   :  { %v2273_v0 = vsel %vm2266_vm8, %v13095_v2, %v6303_v48  ;;  %v6259_v2 = vunpack.i.h.bf16 %v9175_v26 }
 0xa5b   :  { %6771 = vrot.lane.b32.xlu1 %v6770_v45, %s7684_s22  ;;  %6781 = vrot.lane.b32.xlu2 %v6780_v43, %s7684_s22  ;;  %v6785_v45 = vpack.i.bf16 %v6303_v48, %v2273_v0  ;;  %v13097_v43 = vunpack.i.l.bf16 %v13601_v60  ;;  %v6269_v48 = vunpack.i.h.bf16 %v9207_v6  ;;  %v6279_v60 = vunpack.i.h.bf16 %v9125_v50 }
 0xa5c   :  { %6791 = vrot.lane.b32.xlu0 %v6790_v40, %s7684_s22  ;;  %v2295_v40 = vsel %vm2291_vm7, %v13096_v58, %v6029_v34  ;;  %v2049_v0 = vsel %vm2041_vm14, %v13098_v32, %v6259_v2  ;;  %v13105_v58 = vunpack.i.h.bf16 %v9343_v41  ;;  %v6274_v32 = vunpack.i.h.bf16 %v9197_v19  ;;  %v13693_v41 = vld [vmem:[#allocation23_spill] sm:$0xff] }
 0xa5d   :  { %v9677_v28 = vpop.permute.xlu2 %6616  ;;  %v9679_v63 = vpop.permute.xlu1 %6556  ;;  %v6810_v6 = vpack.i.bf16 %v6259_v2, %v2049_v0 }
 0xa5e   :  { %13603 = vst [vmem:[#allocation65_spill] sm:$0xff] %v9677_v28  ;;  %v9687_v14 = vpop.permute.xlu0 %6581  ;;  %v13099_v28 = vunpack.i.h.bf16 %v9319_v61 }
 0xa5f   :  { %13604 = vst [vmem:[#allocation121_spill] sm:$0xff] %v9679_v63  ;;  %v6795_v63 = vpack.i.bf16 %v6029_v34, %v2295_v40  ;;  %v2296_v34 = vsel %vm2291_vm7, %v13097_v43, %v6168_v22  ;;  %v6264_v43 = vunpack.i.h.bf16 %v13588_v5 }
 0xa60   :  { %13605 = vst [vmem:[#allocation122_spill] sm:$0xff] %v9687_v14  ;;  %v2099_v26 = vsel %vm2091_vm15, %v13099_v28, %v6269_v48  ;;  %v6800_v55 = vpack.i.bf16 %v6168_v22, %v2296_v34  ;;  %v6284_v22 = vunpack.i.h.bf16 %v9231_v30 }
 0xa62   :  { %v2174_v19 = vsel %vm2166_vm2, %v13105_v58, %v6284_v22 }
 0xa63   :  { %6786 = vrot.lane.b32.xlu1 %v6785_v45, %s7684_s22  ;;  %6806 = vrot.lane.b32.xlu2 %v6805_v23, %s7684_s22  ;;  %v13101_v45 = vunpack.i.h.bf16 %v9303_v35  ;;  %v6820_v23 = vpack.i.bf16 %v6269_v48, %v2099_v26  ;;  %v6835_v28 = vpack.i.bf16 %v6284_v22, %v2174_v19  ;;  %v13694_v35 = vunpack.i.l.bf16 %v13693_v41 }
 0xa64   :  { %6796 = vrot.lane.b32.xlu0 %v6795_v63, %s7684_s22  ;;  %v13100_v63 = vunpack.i.h.bf16 %v9223_v13  ;;  %v13678_v13 = vld [vmem:[#allocation47_spill] sm:$0xff] }
 0xa65   :  { %v9701_v53 = vpop.permute.xlu2 %6631  ;;  %v9703_v54 = vpop.permute.xlu1 %6576  ;;  %v2074_v0 = vsel %vm2066_vm13, %v13101_v45, %v6264_v43  ;;  %v13613_v45 = vld [vmem:[#allocation21_spill] sm:$0xff] }
 0xa66   :  { %13606 = vst [vmem:[#allocation123_spill] sm:$0xff] %v9701_v53  ;;  %v9711_v40 = vpop.permute.xlu0 %6596  ;;  %v2124_v48 = vsel %vm2116_vm1, %v13100_v63, %v6274_v32  ;;  %v6815_v5 = vpack.i.bf16 %v6264_v43, %v2074_v0  ;;  %v13113_v63 = vunpack.i.l.bf16 %v9375_v46  ;;  %v5893_v57 = vunpack.i.l.bf16 %v13613_v45 }
 0xa67   :  { %13607 = vst [vmem:[#allocation124_spill] sm:$0xff] %v9703_v54  ;;  %v6825_v30 = vpack.i.bf16 %v6274_v32, %v2124_v48  ;;  %v6308_v32 = vunpack.i.l.bf16 %v9173_v3  ;;  %v13680_v54 = vld [vmem:[#allocation50_spill] sm:$0xff] }
 0xa68   :  { %13608 = vst [vmem:[#allocation125_spill] sm:$0xff] %v9711_v40 }
 0xa69   :  { %v2298_v50 = vsel %vm2291_vm7, %v13113_v63, %v6308_v32 }
 0xa6b   :  { %6801 = vrot.lane.b32.xlu1 %v6800_v55, %s7684_s22  ;;  %6811 = vrot.lane.b32.xlu2 %v6810_v6, %s7684_s22  ;;  %v13612_v55 = vld [vmem:[#allocation33_spill] sm:$0xff] }
 0xa6c   :  { %6821 = vrot.lane.b32.xlu0 %v6820_v23, %s7684_s22  ;;  %v13109_v6 = vunpack.i.l.bf16 %v13612_v55  ;;  %v13110_v23 = vunpack.i.h.bf16 %v9327_v16 }
 0xa6d   :  { %v9725_v2 = vpop.permute.xlu2 %6646  ;;  %v9727_v34 = vpop.permute.xlu1 %6591 }
 0xa6e   :  { %13609 = vst [vmem:[#allocation126_spill] sm:$0xff] %v9725_v2  ;;  %v9735_v26 = vpop.permute.xlu0 %6611  ;;  %v2317_v22 = vsel %vm2316_vm9, %v13109_v6, %v5893_v57  ;;  %v2149_v0 = vsel %vm2141_vm0, %v13110_v23, %v6279_v60  ;;  %v13618_v6 = vld [vmem:[#allocation39_spill] sm:$0xff] }
 0xa6f   :  { %13610 = vst [vmem:[#allocation127_spill] sm:$0xff] %v9727_v34  ;;  %v6034_v23 = vunpack.i.h.bf16 %v13618_v6  ;;  %v6033_v61 = vunpack.i.l.bf16 %v13618_v6  ;;  %v13684_v34 = vld [vmem:[#allocation56_spill] sm:$0xff]  ;;  %v13687_v2 = vld [vmem:[#allocation51_spill] sm:$0xff] }
 0xa70   :  { %13611 = vst [vmem:[#allocation128_spill] sm:$0xff] %v9735_v26  ;;  %v13119_v26 = vunpack.i.h.bf16 %v13612_v55  ;;  %v6473_v53 = vunpack.i.l.bf16 %v13684_v34 }
 0xa73   :  { %6816 = vrot.lane.b32.xlu1 %v6815_v5, %s7684_s22  ;;  %6826 = vrot.lane.b32.xlu2 %v6825_v30, %s7684_s22  ;;  %v6845_v5 = vpack.i.bf16 %v5893_v57, %v2317_v22  ;;  %v13617_v30 = vld [vmem:[#allocation43_spill] sm:$0xff] }
 0xa74   :  { %6836 = vrot.lane.b32.xlu0 %v6835_v28, %s7684_s22  ;;  %v6830_v28 = vpack.i.bf16 %v6279_v60, %v2149_v0  ;;  %v13116_v58 = vunpack.i.h.bf16 %v13617_v30  ;;  %v5894_v60 = vunpack.i.h.bf16 %v13613_v45 }
 0xa75   :  { %v9749_v43 = vpop.permute.xlu2 %6661  ;;  %v9751_v48 = vpop.permute.xlu1 %6606 }
 0xa76   :  { %13614 = vst [vmem:[#allocation21_spill] sm:$0xff] %v9749_v43  ;;  %v9759_v19 = vpop.permute.xlu0 %6626  ;;  %v6840_v43 = vpack.i.bf16 %v6308_v32, %v2298_v50  ;;  %v2320_v32 = vsel %vm2316_vm9, %v13116_v58, %v6034_v23  ;;  %v2318_v6 = vsel %vm2316_vm9, %v13119_v26, %v5894_v60 }
 0xa77   :  { %13615 = vst [vmem:[#allocation129_spill] sm:$0xff] %v9751_v48  ;;  %v13115_v48 = vunpack.i.l.bf16 %v13617_v30  ;;  %v6860_v45 = vpack.i.bf16 %v6034_v23, %v2320_v32  ;;  %v6850_v63 = vpack.i.bf16 %v5894_v60, %v2318_v6  ;;  %v13623_v30 = vld [vmem:[#allocation85_spill] sm:$0xff] }
 0xa78   :  { %13616 = vst [vmem:[#allocation130_spill] sm:$0xff] %v9759_v19 }
 0xa79   :  { %v2319_v0 = vsel %vm2316_vm9, %v13115_v48, %v6033_v61  ;;  %v13622_v48 = vld [vmem:[#allocation60_spill] sm:$0xff] }
 0xa7a   :  { %v6174_v58 = vunpack.i.h.bf16 %v13622_v48 }
 0xa7b   :  { %6831 = vrot.lane.b32.xlu1 %v6830_v28, %s7684_s22  ;;  %6846 = vrot.lane.b32.xlu2 %v6845_v5, %s7684_s22  ;;  %v13122_v28 = vunpack.i.h.bf16 %v9159_v36  ;;  %v13123_v5 = vunpack.i.l.bf16 %v9391_v39 }
 0xa7c   :  { %6841 = vrot.lane.b32.xlu0 %v6840_v43, %s7684_s22  ;;  %v6855_v43 = vpack.i.bf16 %v6033_v61, %v2319_v0  ;;  %v6173_v61 = vunpack.i.l.bf16 %v13622_v48 }
 0xa7d   :  { %v9773_v57 = vpop.permute.xlu2 %6676  ;;  %v9775_v22 = vpop.permute.xlu1 %6621  ;;  %v2322_v60 = vsel %vm2316_vm9, %v13122_v28, %v6174_v58  ;;  %v13131_v28 = vunpack.i.h.bf16 %v9367_v10 }
 0xa7e   :  { %13619 = vst [vmem:[#allocation39_spill] sm:$0xff] %v9773_v57  ;;  %v9783_v50 = vpop.permute.xlu0 %6641  ;;  %v6313_v57 = vunpack.i.l.bf16 %v13623_v30 }
 0xa7f   :  { %13620 = vst [vmem:[#allocation131_spill] sm:$0xff] %v9775_v22  ;;  %v13130_v22 = vunpack.i.l.bf16 %v9159_v36 }
 0xa80   :  { %13621 = vst [vmem:[#allocation132_spill] sm:$0xff] %v9783_v50  ;;  %v2323_v0 = vsel %vm2316_vm9, %v13123_v5, %v6313_v57  ;;  %v13626_v5 = vld [vmem:[#allocation19_spill] sm:$0xff] }
 0xa81   :  { %v6875_v48 = vpack.i.bf16 %v6313_v57, %v2323_v0  ;;  %v9818_v16 = vunpack.i.h.bf16 %v13626_v5  ;;  %v9821_v36 = vunpack.i.l.bf16 %v13626_v5 }
 0xa83   :  { %6856 = vrot.lane.b32.xlu1 %v6855_v43, %s7684_s22  ;;  %6861 = vrot.lane.b32.xlu2 %v6860_v45, %s7684_s22  ;;  %v6870_v43 = vpack.i.bf16 %v6174_v58, %v2322_v60  ;;  %v13625_v45 = vld [vmem:[#allocation22_spill] sm:$0xff]  ;;  %13627 = vst [vmem:[#allocation85_spill] sm:$0xff] %v9818_v16  ;;  %v6299_v58 = vunpack.i.h.bf16 %v9255_v9 }
 0xa84   :  { %6851 = vrot.lane.b32.xlu0 %v6850_v63, %s7684_s22  ;;  %v2321_v63 = vsel %vm2316_vm9, %v13130_v22, %v6173_v61  ;;  %v13128_v26 = vunpack.i.h.bf16 %v13625_v45  ;;  %v13129_v55 = vunpack.i.l.bf16 %v13625_v45  ;;  %13628 = vst [vmem:[#allocation19_spill] sm:$0xff] %v9821_v36  ;;  %v6294_v22 = vunpack.i.h.bf16 %v9149_v21 }
 0xa85   :  { %v9797_v23 = vpop.permute.xlu2 %6691  ;;  %v9799_v32 = vpop.permute.xlu1 %6636  ;;  %v6865_v50 = vpack.i.bf16 %v6173_v61, %v2321_v63  ;;  %v2249_v9 = vsel %vm2241_vm5, %v13131_v28, %v6299_v58  ;;  %v6289_v28 = vunpack.i.h.bf16 %v9221_v29  ;;  %v13147_v45 = vunpack.i.h.bf16 %v9375_v46  ;;  %v13644_v46 = vld [vmem:[#allocation67_spill] sm:$0xff] }
 0xa86   :  { %v9807_v6 = vpop.permute.xlu0 %6656  ;;  %v9833_v60 = vsel %vm2341_vm10, %v13128_v26, %v9818_v16  ;;  %v9839_v5 = vsel %vm2341_vm10, %v13129_v55, %v9821_v36  ;;  %v6900_v26 = vpack.i.bf16 %v6299_v58, %v2249_v9  ;;  %v13141_v55 = vunpack.i.h.bf16 %v9391_v39 }
 0xa87   :  { %13624 = vst [vmem:[#allocation60_spill] sm:$0xff] %v9807_v6  ;;  %v6885_v63 = vpack.i.bf16 %v9818_v16, %v9833_v60  ;;  %v13634_v58 = vunpack.i.h.bf16 %v9247_v38  ;;  %v13636_v38 = vld [vmem:[#allocation52_spill] sm:$0xff] }
 0xa89   :  { %v2199_v9 = vsel %vm2191_vm4, %v13634_v58, %v6289_v28  ;;  %v6309_v58 = vunpack.i.h.bf16 %v9173_v3 }
 0xa8b   :  { %6871 = vrot.lane.b32.xlu1 %v6870_v43, %s7684_s22  ;;  %6876 = vrot.lane.b32.xlu2 %v6875_v48, %s7684_s22  ;;  %v13140_v48 = vunpack.i.h.bf16 %v9351_v33 }
 0xa8c   :  { %6866 = vrot.lane.b32.xlu0 %v6865_v50, %s7684_s22  ;;  %v6880_v50 = vpack.i.bf16 %v9821_v36, %v9839_v5  ;;  %v6314_v36 = vunpack.i.h.bf16 %v13623_v30  ;;  %v13146_v30 = vunpack.i.h.bf16 %v9271_v18 }
 0xa8d   :  { %v9825_v57 = vpop.permute.xlu2 %6706  ;;  %v9827_v61 = vpop.permute.xlu1 %6651 }
 0xa8e   :  { %13629 = vst [vmem:[#allocation133_spill] sm:$0xff] %v9825_v57  ;;  %v9841_v0 = vpop.permute.xlu0 %6671  ;;  %v2324_v21 = vsel %vm2316_vm9, %v13141_v55, %v6314_v36  ;;  %v13637_v55 = vld [vmem:[#allocation34_spill] sm:$0xff]  ;;  %vm3868_vm9 = vcmask 146432  }
 0xa8f   :  { %13630 = vst [vmem:[#allocation134_spill] sm:$0xff] %v9827_v61  ;;  %v6915_v10 = vpack.i.bf16 %v6314_v36, %v2324_v21  ;;  %v13674_v57 = vld [vmem:[#allocation94_spill] sm:$0xff] }
 0xa90   :  { %13631 = vst [vmem:[#allocation135_spill] sm:$0xff] %v9841_v0  ;;  %v3305_v0 = vld [vmem:[%s12886_s12 + $0x10] sm:$0xff] }
 0xa93   :  { %6881 = vrot.lane.b32.xlu1 %v6880_v50, %s7684_s22  ;;  %6886 = vrot.lane.b32.xlu2 %v6885_v63, %s7684_s22  ;;  %v2224_v50 = vsel %vm2216_vm3, %v13140_v48, %v6294_v22  ;;  %v6304_v48 = vunpack.i.h.bf16 %v9245_v49 }
 0xa94   :  { %6901 = vrot.lane.b32.xlu0 %v6900_v26, %s7684_s22  ;;  %v6895_v29 = vpack.i.bf16 %v6294_v22, %v2224_v50  ;;  %v6890_v26 = vpack.i.bf16 %v6289_v28, %v2199_v9  ;;  %v9883_v22 = vunpack.i.l.bf16 %v13637_v55  ;;  %v2299_v50 = vsel %vm2291_vm7, %v13147_v45, %v6309_v58 }
 0xa95   :  { %v9859_v16 = vpop.permute.xlu2 %6721  ;;  %v9861_v43 = vpop.permute.xlu1 %6666  ;;  %v2274_v36 = vsel %vm2266_vm8, %v13146_v30, %v6304_v48  ;;  %v9908_v45 = vunpack.i.h.bf16 %v13637_v55 }
 0xa96   :  { %13632 = vst [vmem:[#allocation136_spill] sm:$0xff] %v9859_v16  ;;  %v9869_v63 = vpop.permute.xlu0 %6686  ;;  %v6905_v21 = vpack.i.bf16 %v6304_v48, %v2274_v36  ;;  %v9911_v16 = vunpack.i.l.bf16 %v13644_v46  ;;  %v9915_v48 = vunpack.i.h.bf16 %v13644_v46 }
 0xa97   :  { %13633 = vst [vmem:[#allocation137_spill] sm:$0xff] %v9861_v43  ;;  %v13151_v43 = vunpack.i.l.bf16 %v13636_v38 }
 0xa98   :  { %13635 = vst [vmem:[#allocation138_spill] sm:$0xff] %v9869_v63 }
 0xa99   :  { %13638 = vst [vmem:[#allocation34_spill] sm:$0xff] %v9883_v22  ;;  %v2344_v49 = vsel %vm2341_vm10, %v13151_v43, %v9883_v22  ;;  %v13650_v43 = vld [vmem:[#allocation86_spill] sm:$0xff] }
 0xa9a   :  { %v6920_v33 = vpack.i.bf16 %v9883_v22, %v2344_v49  ;;  %13643 = vst [vmem:[#allocation142_spill] sm:$0xff] %v9908_v45 }
 0xa9b   :  { %6896 = vrot.lane.b32.xlu1 %v6895_v29, %s7684_s22  ;;  %6891 = vrot.lane.b32.xlu2 %v6890_v26, %s7684_s22  ;;  %v13152_v29 = vunpack.i.h.bf16 %v13636_v38  ;;  %v13642_v26 = vld [vmem:[#allocation78_spill] sm:$0xff]  ;;  %13645 = vst [vmem:[#allocation67_spill] sm:$0xff] %v9911_v16 }
 0xa9c   :  { %6916 = vrot.lane.b32.xlu0 %v6915_v10, %s7684_s22  ;;  %v6910_v10 = vpack.i.bf16 %v6309_v58, %v2299_v50  ;;  %v13155_v39 = vunpack.i.l.bf16 %v13642_v26  ;;  %v13157_v30 = vunpack.i.h.bf16 %v13642_v26  ;;  %13646 = vst [vmem:[#allocation143_spill] sm:$0xff] %v9915_v48 }
 0xa9d   :  { %v9885_v28 = vpop.permute.xlu1 %6681  ;;  %v9887_v9 = vpop.permute.xlu2 %6736  ;;  %v2345_v50 = vsel %vm2341_vm10, %v13152_v29, %v9908_v45  ;;  %v13162_v29 = vunpack.i.h.bf16 %v13650_v43 }
 0xa9e   :  { %13639 = vst [vmem:[#allocation139_spill] sm:$0xff] %v9885_v28  ;;  %v9895_v3 = vpop.permute.xlu0 %6701  ;;  %v9929_v55 = vsel %vm2341_vm10, %v13155_v39, %v9911_v16  ;;  %v6925_v46 = vpack.i.bf16 %v9908_v45, %v2345_v50  ;;  %v13651_v39 = vld [vmem:[#allocation83_spill] sm:$0xff] }
 0xa9f   :  { %13640 = vst [vmem:[#allocation140_spill] sm:$0xff] %v9887_v9 }
 0xaa0   :  { %13641 = vst [vmem:[#allocation141_spill] sm:$0xff] %v9895_v3  ;;  %v13691_v3 = vunpack.i.h.bf16 %v13674_v57 }
 0xaa3   :  { %6911 = vrot.lane.b32.xlu1 %v6910_v10, %s7684_s22  ;;  %6906 = vrot.lane.b32.xlu2 %v6905_v21, %s7684_s22  ;;  %v6930_v21 = vpack.i.bf16 %v9911_v16, %v9929_v55 }
 0xaa4   :  { %6921 = vrot.lane.b32.xlu0 %v6920_v33, %s7684_s22  ;;  %v2347_v33 = vsel %vm2341_vm10, %v13157_v30, %v9915_v48  ;;  %v9949_v30 = vunpack.i.l.bf16 %v13651_v39 }
 0xaa5   :  { %v9917_v58 = vpop.permute.xlu1 %6696  ;;  %v9919_v36 = vpop.permute.xlu2 %6751  ;;  %v6935_v38 = vpack.i.bf16 %v9915_v48, %v2347_v33 }
 0xaa6   :  { %13647 = vst [vmem:[#allocation144_spill] sm:$0xff] %v9917_v58  ;;  %v9931_v10 = vpop.permute.xlu0 %6716  ;;  %v13672_v58 = vld [vmem:[#allocation12_spill] sm:$0xff] }
 0xaa7   :  { %13648 = vst [vmem:[#allocation145_spill] sm:$0xff] %v9919_v36 }
 0xaa8   :  { %13649 = vst [vmem:[#allocation146_spill] sm:$0xff] %v9931_v10  ;;  %v9946_v10 = vunpack.i.h.bf16 %v13651_v39 }
 0xaa9   :  { %13653 = vst [vmem:[#allocation147_spill] sm:$0xff] %v9949_v30 }
 0xaaa   :  { %13652 = vst [vmem:[#allocation83_spill] sm:$0xff] %v9946_v10  ;;  %v2349_v22 = vsel %vm2341_vm10, %v13162_v29, %v9946_v10 }
 0xaab   :  { %6926 = vrot.lane.b32.xlu1 %v6925_v46, %s7684_s22  ;;  %6931 = vrot.lane.b32.xlu2 %v6930_v21, %s7684_s22  ;;  %v13656_v46 = vunpack.i.l.bf16 %v13650_v43  ;;  %v6945_v26 = vpack.i.bf16 %v9946_v10, %v2349_v22  ;;  %v10050_v31 = vsel %vm3150_vm11, %v13687_v2, %v2349_v22  ;;  %v13692_v2 = vunpack.i.h.bf16 %v13678_v13 }
 0xaac   :  { %6936 = vrot.lane.b32.xlu0 %v6935_v38, %s7684_s22  ;;  %v3303_v38 = vld [vmem:[%s12886_s12] sm:$0xff] }
 0xaad   :  { %v9952_v45 = vpop.permute.xlu1 %6711  ;;  %v9954_v16 = vpop.permute.xlu2 %6766  ;;  %v2348_v21 = vsel %vm2341_vm10, %v13656_v46, %v9949_v30 }
 0xaae   :  { %13654 = vst [vmem:[#allocation148_spill] sm:$0xff] %v9952_v45  ;;  %v9964_v48 = vpop.permute.xlu0 %6731  ;;  %v6940_v39 = vpack.i.bf16 %v9949_v30, %v2348_v21  ;;  %v3304_v30 = vld [vmem:[%s12886_s12 + $0x8] sm:$0xff] }
 0xaaf   :  { %13655 = vst [vmem:[#allocation149_spill] sm:$0xff] %v9954_v16 }
 0xab0   :  { %13657 = vst [vmem:[#allocation150_spill] sm:$0xff] %v9964_v48  ;;  %v13664_v48 = vld [vmem:[#allocation91_spill] sm:$0xff] }
 0xab1   :  { %v6408_v36 = vunpack.i.l.bf16 %v13664_v48 }
 0xab3   :  { %6941 = vrot.lane.b32.xlu1 %v6940_v39, %s7684_s22  ;;  %6946 = vrot.lane.b32.xlu2 %v6945_v26, %s7684_s22  ;;  %v3306_v39 = vld [vmem:[%s12886_s12 + $0x18] sm:$0xff] }
 0xab4   :  { %3309 = vperm.xlu0 %5419, %v3303_v38  }
 0xab5   :  { %v9973_v29 = vpop.permute.xlu1 %6726  ;;  %v9975_v43 = vpop.permute.xlu2 %6781 }
 0xab6   :  { %13658 = vst [vmem:[#allocation151_spill] sm:$0xff] %v9973_v29  ;;  %v9977_v46 = vpop.permute.xlu0 %6746  ;;  %v13663_v29 = vld [vmem:[#allocation88_spill] sm:$0xff] }
 0xab7   :  { %13659 = vst [vmem:[#allocation152_spill] sm:$0xff] %v9975_v43  ;;  %v6393_v18 = vunpack.i.l.bf16 %v13663_v29  ;;  %v13670_v43 = vld [vmem:[#allocation16_spill] sm:$0xff] }
 0xab8   :  { %v10013_v63 = vsel %vm3150_vm11, %v13670_v43, %v2344_v49 }
 0xabb   :  { %3314 = vperm.xlu1 %5417, %v3304_v30   ;;  %3319 = vperm.xlu2 %5418, %v3305_v0   ;;  %v10001_v0 = vsel %vm3150_vm11, %v13665_v47, %v9833_v60  ;;  %v13667_v30 = vld [vmem:[#allocation31_spill] sm:$0xff]  ;;  %v6423_v60 = vunpack.i.l.bf16 %v13674_v57  ;;  %v13686_v47 = vld [vmem:[#allocation58_spill] sm:$0xff] }
 0xabc   :  { %3324 = vperm.xlu0 %5419, %v3306_v39   ;;  %13666 = vst [vmem:[#allocation13_spill] sm:$0xff] %v10001_v0  ;;  %v10005_v39 = vsel %vm3150_vm11, %v13667_v30, %v2347_v33  ;;  %v13675_v33 = vunpack.i.h.bf16 %v13663_v29  ;;  %v6413_v29 = vunpack.i.l.bf16 %v13686_v47 }
 0xabd   :  { %v9988_v26 = vpop.permute.xlu1 %6741  ;;  %v9990_v38 = vpop.permute.xlu2 %6806 }
 0xabe   :  { %13660 = vst [vmem:[#allocation153_spill] sm:$0xff] %v9988_v26  ;;  %v9992_v10 = vpop.permute.xlu0 %6761  ;;  %v2798_v30 = vsel %vm2341_vm10, %v6393_v18, %v13675_v33  ;;  %v13677_v26 = vld [vmem:[#allocation98_spill] sm:$0xff]  ;;  %v6398_v18 = vunpack.i.l.bf16 %v13680_v54 }
 0xabf   :  { %13661 = vst [vmem:[#allocation154_spill] sm:$0xff] %v9990_v38  ;;  %v13668_v38 = vld [vmem:[#allocation14_spill] sm:$0xff]  ;;  %v6403_v49 = vunpack.i.l.bf16 %v13677_v26 }
 0xac0   :  { %13662 = vst [vmem:[#allocation155_spill] sm:$0xff] %v9992_v10  ;;  %v10009_v61 = vsel %vm3150_vm11, %v13668_v38, %v2345_v50  ;;  %v10018_v10 = vsel %vm3150_vm11, %v13672_v58, %v9839_v5  ;;  %v13676_v50 = vunpack.i.h.bf16 %v13664_v48  ;;  %v6438_v5 = vunpack.i.l.bf16 %v13678_v13  ;;  %v13679_v58 = vld [vmem:[#allocation55_spill] sm:$0xff] }
 0xac1   :  { %13669 = vst [vmem:[#allocation31_spill] sm:$0xff] %v10009_v61  ;;  %v2846_v61 = vsel %vm2341_vm10, %v6423_v60, %v13691_v3  ;;  %v13700_v60 = vld [vmem:[#allocation54_spill] sm:$0xff] }
 0xac2   :  { %13671 = vst [vmem:[#allocation14_spill] sm:$0xff] %v10013_v63  ;;  %v2822_v38 = vsel %vm2341_vm10, %v6408_v36, %v13676_v50  ;;  %v13683_v36 = vld [vmem:[#allocation99_spill] sm:$0xff]  ;;  %v13689_v63 = vld [vmem:[#allocation45_spill] sm:$0xff]  ;;  %v2870_v22 = vsel %vm2341_vm10, %v6438_v5, %v13692_v2  ;;  %v6433_v2 = vunpack.i.l.bf16 %v13700_v60  ;;  %v13709_v5 = vunpack.i.h.bf16 %v13686_v47 }
 0xac3   :  { %13673 = vst [vmem:[#allocation16_spill] sm:$0xff] %v10018_v10  ;;  %v6458_v10 = vunpack.i.l.bf16 %v13679_v58  ;;  %v6418_v43 = vunpack.i.l.bf16 %v13683_v36  ;;  %v10059_v40 = vsel %vm3150_vm11, %v13689_v63, %v2348_v21  ;;  %v13695_v63 = vunpack.i.h.bf16 %v13679_v58  ;;  %v13710_v58 = vld [vmem:[#allocation30_spill] sm:$0xff] }
 0xac4   :  { %v13696_v21 = vunpack.i.h.bf16 %v13680_v54  ;;  %v13702_v13 = vunpack.i.h.bf16 %v13683_v36 }
 0xac5   :  { %v10036_v33 = vpop.permute.xlu1 %6756  ;;  %v10038_v48 = vpop.permute.xlu2 %6811 }
 0xac6   :  { %13681 = vst [vmem:[#allocation12_spill] sm:$0xff] %v10036_v33  ;;  %v10044_v0 = vpop.permute.xlu0 %6776  ;;  %v13690_v33 = vunpack.i.h.bf16 %v13677_v26 }
 0xac7   :  { %13682 = vst [vmem:[#allocation156_spill] sm:$0xff] %v10038_v48  ;;  %v13688_v48 = vld [vmem:[#allocation27_spill] sm:$0xff] }
 0xac8   :  { %13685 = vst [vmem:[#allocation157_spill] sm:$0xff] %v10044_v0  ;;  %v10055_v50 = vsel %vm3150_vm11, %v13688_v48, %v9929_v55  ;;  %v2814_v0 = vsel %vm2341_vm10, %v6403_v49, %v13690_v33  ;;  %v10073_v48 = vsel %vm3150_vm11, %v13694_v35, %v2798_v30  ;;  %v2807_v55 = vsel %vm2341_vm10, %v6458_v10, %v13695_v63  ;;  %v13697_v33 = vld [vmem:[#allocation25_spill] sm:$0xff]  ;;  %v13703_v63 = vld [vmem:[#allocation24_spill] sm:$0xff] }
 0xac9   :  { %v2806_v49 = vsel %vm2341_vm10, %v6398_v18, %v13696_v21  ;;  %v13698_v57 = vunpack.i.l.bf16 %v13697_v33  ;;  %v13701_v35 = vunpack.i.h.bf16 %v13684_v34  ;;  %v2838_v10 = vsel %vm2341_vm10, %v6418_v43, %v13702_v13  ;;  %v13706_v21 = vld [vmem:[#allocation28_spill] sm:$0xff]  ;;  %v13713_v13 = vld [vmem:[#allocation62_spill] sm:$0xff]  ;;  %v13721_v43 = vld [vmem:[#allocation17_spill] sm:$0xff] }
 0xaca   :  { %v13704_v54 = vunpack.i.l.bf16 %v13703_v63  ;;  %v2830_v34 = vsel %vm2341_vm10, %v6413_v29, %v13709_v5  ;;  %v6503_v36 = vunpack.i.l.bf16 %v13713_v13  ;;  %v6738_v5 = vunpack.i.l.bf16 %v9887_v9 }
 0xacb   :  { %v10084_v3 = vsel %vm3150_vm11, %v13698_v57, %v2822_v38  ;;  %v2831_v30 = vsel %vm2341_vm10, %v6473_v53, %v13701_v35  ;;  %v13707_v57 = vunpack.i.l.bf16 %v13706_v21  ;;  %v13711_v53 = vunpack.i.l.bf16 %v13710_v58 }
 0xacc   :  { %13699 = vst [vmem:[#allocation51_spill] sm:$0xff] %v10084_v3  ;;  %v10097_v18 = vsel %vm3150_vm11, %v13704_v54, %v2814_v0  ;;  %v13714_v54 = vld [vmem:[#allocation15_spill] sm:$0xff]  ;;  %v13722_v47 = vunpack.i.h.bf16 %v13721_v43 }
 0xacd   :  { %13705 = vst [vmem:[#allocation27_spill] sm:$0xff] %v10097_v18  ;;  %v10102_v38 = vsel %vm3150_vm11, %v13707_v57, %v2846_v61  ;;  %v10110_v35 = vsel %vm3150_vm11, %v13711_v53, %v2870_v22  ;;  %v13715_v0 = vunpack.i.h.bf16 %v13714_v54  ;;  %v13717_v61 = vunpack.i.l.bf16 %v13714_v54  ;;  %v10126_v22 = vpop.permute.xlu1 %6771  ;;  %v10128_v53 = vpop.permute.xlu2 %6826 }
 0xace   :  { %13708 = vst [vmem:[#allocation45_spill] sm:$0xff] %v10102_v38  ;;  %v10142_v3 = vpop.permute.xlu0 %6791 }
 0xacf   :  { %13712 = vst [vmem:[#allocation23_spill] sm:$0xff] %v10110_v35  ;;  %v10117_v26 = vsel %vm3150_vm11, %v13715_v0, %v2807_v55  ;;  %v10122_v57 = vsel %vm3150_vm11, %v13717_v61, %v2806_v49  ;;  %v10133_v35 = vsel %vm3150_vm11, %v13722_v47, %v2831_v30  ;;  %v13724_v55 = vld [vmem:[#allocation26_spill] sm:$0xff]  ;;  %v13727_v49 = vld [vmem:[#allocation64_spill] sm:$0xff]  ;;  %v6793_v61 = vunpack.i.l.bf16 %v10142_v3 }
 0xad0   :  { %13716 = vst [vmem:[#allocation25_spill] sm:$0xff] %v10117_v26  ;;  %v13725_v0 = vunpack.i.l.bf16 %v13724_v55  ;;  %v6443_v29 = vunpack.i.l.bf16 %v13727_v49  ;;  %v13731_v26 = vunpack.i.h.bf16 %v13700_v60  ;;  %v13733_v60 = vunpack.i.h.bf16 %v9887_v9 }
 0xad1   :  { %13718 = vst [vmem:[#allocation24_spill] sm:$0xff] %v10122_v57 }
 0xad2   :  { %13719 = vst [vmem:[#allocation28_spill] sm:$0xff] %v10126_v22  ;;  %v10138_v54 = vsel %vm3150_vm11, %v13725_v0, %v2838_v10  ;;  %v13729_v22 = vunpack.i.l.bf16 %v13721_v43  ;;  %v2862_v47 = vsel %vm2341_vm10, %v6433_v2, %v13731_v26  ;;  %v6683_v10 = vunpack.i.l.bf16 %v9885_v28  ;;  %v13740_v26 = vld [vmem:[#allocation20_spill] sm:$0xff] }
 0xad3   :  { %13720 = vst [vmem:[#allocation30_spill] sm:$0xff] %v10128_v53  ;;  %v13212_v0 = vunpack.i.h.bf16 %v10142_v3  ;;  %v6628_v2 = vunpack.i.l.bf16 %v9759_v19  ;;  %v13738_v43 = vunpack.i.l.bf16 %v9295_v4  ;;  %v13741_v18 = vunpack.i.h.bf16 %v13740_v26 }
 0xad4   :  { %13723 = vst [vmem:[#allocation15_spill] sm:$0xff] %v10133_v35  ;;  %v10147_v57 = vsel %vm3150_vm11, %v13729_v22, %v2830_v34  ;;  %v6453_v35 = vunpack.i.l.bf16 %v9495_v24  ;;  %v13732_v34 = vunpack.i.h.bf16 %v13713_v13  ;;  %v6463_v13 = vunpack.i.l.bf16 %v9511_v52 }
 0xad5   :  { %13726 = vst [vmem:[#allocation17_spill] sm:$0xff] %v10138_v54  ;;  %v2805_v30 = vsel %vm2341_vm10, %v6793_v61, %v13212_v0  ;;  %v2804_v54 = vsel %vm2341_vm10, %v6738_v5, %v13733_v60  ;;  %v13735_v61 = vunpack.i.h.bf16 %v9885_v28  ;;  %v13736_v60 = vld [vmem:[#allocation29_spill] sm:$0xff] }
 0xad6   :  { %13728 = vst [vmem:[#allocation26_spill] sm:$0xff] %v10142_v3  ;;  %v2879_v22 = vsel %vm2341_vm10, %v6503_v36, %v13732_v34  ;;  %v13734_v36 = vunpack.i.h.bf16 %v9295_v4  ;;  %v6573_v3 = vunpack.i.l.bf16 %v9605_v56  ;;  %v13737_v5 = vunpack.i.l.bf16 %v13736_v60 }
 0xad7   :  { %13730 = vst [vmem:[#allocation158_spill] sm:$0xff] %v10147_v57  ;;  %v6523_v57 = vunpack.i.l.bf16 %v9509_v44  ;;  %v2803_v0 = vsel %vm2341_vm10, %v6683_v10, %v13735_v61  ;;  %v3165_v38 = vsel %vm3150_vm11, %v13738_v43, %v2804_v54  ;;  %v13742_v10 = vunpack.i.h.bf16 %v13727_v49  ;;  %v10203_v54 = vpop.permute.xlu1 %6786  ;;  %v10205_v43 = vpop.permute.xlu2 %6846 }
 0xad8   :  { %v3166_v34 = vsel %vm3150_vm11, %v13734_v36, %v2805_v30  ;;  %v10184_v9 = vsel %vm3150_vm11, %v13737_v5, %v2862_v47  ;;  %v13739_v30 = vunpack.i.h.bf16 %v9495_v24  ;;  %v6513_v4 = vunpack.i.l.bf16 %v9607_v25  ;;  %13743 = vst [vmem:[#allocation29_spill] sm:$0xff] %v10205_v43 }
 0xad9   :  { %3339 = vmatpush.msrb.mxu1 %v3166_v34  ;;  %v10195_v34 = vsel %vm3150_vm11, %v13741_v18, %v2879_v22  ;;  %v2878_v61 = vsel %vm2341_vm10, %v6443_v29, %v13742_v10  ;;  %v6468_v22 = vunpack.i.l.bf16 %v9519_v20  ;;  %v13746_v29 = vunpack.i.h.bf16 %v9063_v15 }
 0xada   :  { %v2799_v36 = vsel %vm2341_vm10, %v6453_v35, %v13739_v30  ;;  %v13744_v35 = vunpack.i.h.bf16 %v9759_v19  ;;  %v10211_v30 = vpop.permute.xlu0 %6796  ;;  %v13747_v47 = vunpack.i.h.bf16 %v9509_v44  ;;  %v13748_v5 = vunpack.i.h.bf16 %v9511_v52  ;;  %v13756_v44 = vld [vmem:[#allocation42_spill] sm:$0xff] }
 0xadb   :  { %3340 = vmatpush.msrb.mxu1 %v3165_v38  ;;  %13745 = vst [vmem:[#allocation20_spill] sm:$0xff] %v10211_v30  ;;  %v3164_v10 = vsel %vm3150_vm11, %v13746_v29, %v2803_v0  ;;  %v13749_v19 = vunpack.i.h.bf16 %v9605_v56  ;;  %v6483_v29 = vunpack.i.l.bf16 %v9543_v59  ;;  %v6553_v24 = vunpack.i.l.bf16 %v9557_v51 }
 0xadc   :  { %v2802_v18 = vsel %vm2341_vm10, %v6628_v2, %v13744_v35  ;;  %v2816_v38 = vsel %vm2341_vm10, %v6523_v57, %v13747_v47  ;;  %v2815_v49 = vsel %vm2341_vm10, %v6463_v13, %v13748_v5  ;;  %v6538_v2 = vunpack.i.l.bf16 %v9533_v7 }
 0xadd   :  { %3341 = vmatpush.msrb.mxu1 %v3164_v10  ;;  %v2801_v28 = vsel %vm2341_vm10, %v6573_v3, %v13749_v19  ;;  %v6478_v57 = vunpack.i.l.bf16 %v9535_v11  ;;  %v13750_v47 = vunpack.i.l.bf16 %v9063_v15  ;;  %v13751_v35 = vunpack.i.h.bf16 %v9607_v25  ;;  %v13752_v15 = vld [vmem:[#allocation35_spill] sm:$0xff] }
 0xade   :  { %v6498_v0 = vunpack.i.l.bf16 %v9567_v62  ;;  %v6493_v56 = vunpack.i.l.bf16 %v9559_v1  ;;  %v13753_v52 = vunpack.i.h.bf16 %v13752_v15  ;;  %v6518_v5 = vunpack.i.l.bf16 %v9591_v37 }
 0xadf   :  { %v3163_v13 = vsel %vm3150_vm11, %v13750_v47, %v2802_v18  ;;  %v2800_v19 = vsel %vm2341_vm10, %v6513_v4, %v13751_v35  ;;  %v6533_v10 = vunpack.i.l.bf16 %v9615_v27  ;;  %v13754_v4 = vunpack.i.l.bf16 %v13752_v15  ;;  %v10268_v15 = vpop.permute.xlu2 %6861 }
 0xae0   :  { %3342 = vmatpush.msrb.mxu1 %v3163_v13  ;;  %v3162_v18 = vsel %vm3150_vm11, %v13753_v52, %v2801_v28  ;;  %v13223_v13 = vunpack.i.h.bf16 %v9615_v27  ;;  %v13755_v3 = vunpack.i.h.bf16 %v13693_v41  ;;  %v13757_v30 = vunpack.i.l.bf16 %v13756_v44 }
 0xae1   :  { %v3161_v35 = vsel %vm3150_vm11, %v13754_v4, %v2800_v19  ;;  %v13758_v28 = vunpack.i.l.bf16 %v13740_v26  ;;  %v13759_v19 = vunpack.i.h.bf16 %v13703_v63  ;;  %v13816_v27 = vunpack.i.h.bf16 %v10128_v53 }
 0xae2   :  { %3343 = vmatpush.msrb.mxu1 %v3162_v18  ;;  %v3160_v25 = vsel %vm3150_vm11, %v13755_v3, %v2799_v36  ;;  %v10259_v52 = vsel %vm3150_vm11, %v13757_v30, %v2816_v38  ;;  %v10266_v18 = vpop.permute.xlu1 %6801  ;;  %v13760_v36 = vunpack.i.h.bf16 %v9533_v7  ;;  %v13761_v38 = vunpack.i.h.bf16 %v9535_v11  ;;  %v10284_v4 = vpop.permute.xlu0 %6821 }
 0xae3   :  { %v10264_v47 = vsel %vm3150_vm11, %v13758_v28, %v2878_v61  ;;  %v10273_v41 = vsel %vm3150_vm11, %v13759_v19, %v2815_v49  ;;  %v13762_v61 = vunpack.i.h.bf16 %v9519_v20  ;;  %v13764_v49 = vunpack.i.h.bf16 %v9557_v51 }
 0xae4   :  { %3344 = vmatpush.msrb.mxu1 %v3161_v35  ;;  %v2840_v30 = vsel %vm2341_vm10, %v6538_v2, %v13760_v36  ;;  %v2839_v26 = vsel %vm2341_vm10, %v6478_v57, %v13761_v38  ;;  %v13763_v35 = vunpack.i.h.bf16 %v9543_v59  ;;  %v13765_v2 = vunpack.i.h.bf16 %v9559_v1 }
 0xae5   :  { %v2823_v3 = vsel %vm2341_vm10, %v6468_v22, %v13762_v61  ;;  %v2864_v28 = vsel %vm2341_vm10, %v6553_v24, %v13764_v49  ;;  %v13766_v57 = vunpack.i.h.bf16 %v9567_v62  ;;  %v13224_v22 = vunpack.i.h.bf16 %v9653_v8  ;;  %v13768_v49 = vld [vmem:[#allocation46_spill] sm:$0xff] }
 0xae6   :  { %v2847_v63 = vsel %vm2341_vm10, %v6483_v29, %v13763_v35  ;;  %v2863_v19 = vsel %vm2341_vm10, %v6493_v56, %v13765_v2  ;;  %v6603_v38 = vunpack.i.l.bf16 %v9653_v8  ;;  %3345 = vmatpush.msrb.mxu1 %v3160_v25  ;;  %v2832_v29 = vsel %vm2341_vm10, %v6533_v10, %v13223_v13  ;;  %v13773_v35 = vld [vmem:[#allocation49_spill] sm:$0xff] }
 0xae7   :  { %v2871_v36 = vsel %vm2341_vm10, %v6498_v0, %v13766_v57  ;;  %v13767_v61 = vunpack.i.h.bf16 %v9591_v37  ;;  %v6543_v56 = vunpack.i.l.bf16 %v9655_v17  ;;  %v13769_v2 = vunpack.i.l.bf16 %v13768_v49  ;;  %v13818_v37 = vld [vmem:[#allocation127_spill] sm:$0xff] }
 0xae8   :  { %v13770_v57 = vunpack.i.h.bf16 %v13697_v33  ;;  %3346 = vmatpush.msrb.mxu1 %v10073_v48  ;;  %v13771_v10 = vunpack.i.h.bf16 %v13706_v21  ;;  %v13775_v33 = vunpack.i.h.bf16 %v13736_v60  ;;  %v13776_v21 = vld [vmem:[#allocation41_spill] sm:$0xff]  ;;  %v6588_v60 = vunpack.i.l.bf16 %v9629_v12 }
 0xae9   :  { %v2808_v24 = vsel %vm2341_vm10, %v6518_v5, %v13767_v61  ;;  %v10311_v0 = vsel %vm3150_vm11, %v13769_v2, %v2840_v30  ;;  %v13772_v61 = vunpack.i.h.bf16 %v13724_v55  ;;  %v13774_v30 = vunpack.i.l.bf16 %v13773_v35  ;;  %v13778_v55 = vld [vmem:[#allocation38_spill] sm:$0xff] }
 0xaea   :  { %v10316_v25 = vsel %vm3150_vm11, %v13770_v57, %v2823_v3  ;;  %v10322_v5 = vsel %vm3150_vm11, %v13771_v10, %v2847_v63  ;;  %v10337_v3 = vsel %vm3150_vm11, %v13775_v33, %v2863_v19  ;;  %v13777_v63 = vunpack.i.l.bf16 %v13776_v21  ;;  %3347 = vmatpush.msrb.mxu1 %v10050_v31 }
 0xaeb   :  { %v10327_v13 = vsel %vm3150_vm11, %v13772_v61, %v2839_v26  ;;  %v10332_v2 = vsel %vm3150_vm11, %v13774_v30, %v2864_v28  ;;  %v13779_v26 = vunpack.i.l.bf16 %v13778_v55  ;;  %v13780_v28 = vunpack.i.h.bf16 %v13710_v58 }
 0xaec   :  { %v10343_v57 = vsel %vm3150_vm11, %v13777_v63, %v2832_v29  ;;  %v2849_v29 = vsel %vm2341_vm10, %v6603_v38, %v13224_v22  ;;  %v6748_v58 = vunpack.i.l.bf16 %v9977_v46  ;;  %v6768_v30 = vunpack.i.l.bf16 %v9954_v16  ;;  %3348 = vmatpush.msrb.mxu1 %v10059_v40  ;;  %v10373_v38 = vpop.permute.xlu1 %6816  ;;  %v10375_v22 = vpop.permute.xlu2 %6876  ;;  %v13785_v40 = vld [vmem:[#allocation87_spill] sm:$0xff] }
 0xaed   :  { %v10348_v10 = vsel %vm3150_vm11, %v13779_v26, %v2808_v24  ;;  %v10353_v61 = vsel %vm3150_vm11, %v13780_v28, %v2871_v36  ;;  %v13781_v36 = vunpack.i.h.bf16 %v9655_v17  ;;  %v6583_v26 = vunpack.i.l.bf16 %v9687_v14  ;;  %13782 = vst [vmem:[#allocation35_spill] sm:$0xff] %v10375_v22  ;;  %v10381_v24 = vpop.permute.xlu0 %6836 }
 0xaee   :  { %v6693_v19 = vunpack.i.l.bf16 %v9797_v23  ;;  %13783 = vst [vmem:[#allocation42_spill] sm:$0xff] %v10381_v24  ;;  %v6713_v31 = vunpack.i.l.bf16 %v9952_v45  ;;  %v6838_v33 = vunpack.i.l.bf16 %v10381_v24  ;;  %3349 = vmatpush.msrb.mxu1 %v10005_v39  ;;  %v6638_v48 = vunpack.i.l.bf16 %v9799_v32 }
 0xaef   :  { %v2848_v63 = vsel %vm2341_vm10, %v6543_v56, %v13781_v36  ;;  %v13232_v56 = vunpack.i.h.bf16 %v10373_v38  ;;  %v6818_v36 = vunpack.i.l.bf16 %v10373_v38  ;;  %v13784_v51 = vunpack.i.h.bf16 %v9977_v46 }
 0xaf0   :  { %v6658_v11 = vunpack.i.l.bf16 %v9807_v6  ;;  %3350 = vmatpush.msrb.mxu1 %v10055_v50  ;;  %v13786_v7 = vunpack.i.h.bf16 %v13785_v40  ;;  %v13787_v62 = vunpack.i.h.bf16 %v10381_v24  ;;  %v13788_v59 = vunpack.i.h.bf16 %v9954_v16  ;;  %v13821_v16 = vld [vmem:[#allocation16_spill] sm:$0xff] }
 0xaf1   :  { %v2821_v1 = vsel %vm2341_vm10, %v6818_v36, %v13232_v56  ;;  %v2820_v28 = vsel %vm2341_vm10, %v6748_v58, %v13784_v51  ;;  %v13789_v56 = vld [vmem:[#allocation92_spill] sm:$0xff]  ;;  %v13791_v58 = vunpack.i.h.bf16 %v9797_v23  ;;  %v13792_v8 = vunpack.i.h.bf16 %v9687_v14  ;;  %v13844_v14 = vld [vmem:[#allocation27_spill] sm:$0xff] }
 0xaf2   :  { %v3182_v39 = vsel %vm3150_vm11, %v13786_v7, %v2821_v1  ;;  %v2853_v20 = vsel %vm2341_vm10, %v6838_v33, %v13787_v62  ;;  %v2852_v36 = vsel %vm2341_vm10, %v6768_v30, %v13788_v59  ;;  %v13790_v17 = vunpack.i.h.bf16 %v13789_v56  ;;  %v13794_v33 = vld [vmem:[#allocation31_spill] sm:$0xff] }
 0xaf3   :  { %3368 = vmatpush.msra.mxu3 %v3182_v39  ;;  %v2819_v50 = vsel %vm2341_vm10, %v6693_v19, %v13791_v58  ;;  %v2817_v7 = vsel %vm2341_vm10, %v6583_v26, %v13792_v8  ;;  %v13793_v1 = vunpack.i.h.bf16 %v9629_v12  ;;  %v6828_v30 = vunpack.i.l.bf16 %v10128_v53  ;;  %3351 = vmatpush.msrb.mxu1 %v13794_v33  ;;  %v13833_v53 = vld [vmem:[#allocation155_spill] sm:$0xff] }
 0xaf4   :  { %v3214_v51 = vsel %vm3150_vm11, %v13790_v17, %v2853_v20  ;;  %v13795_v20 = vunpack.i.l.bf16 %v13785_v40  ;;  %v13796_v19 = vunpack.i.h.bf16 %v9952_v45  ;;  %v13797_v26 = vunpack.i.l.bf16 %v13789_v56  ;;  %v10445_v56 = vpop.permute.xlu1 %6831 }
 0xaf5   :  { %v10419_v62 = vsel %vm2341_vm10, %v6588_v60, %v13793_v1  ;;  %3426 = vmatpush.msrb.mxu2 %v3214_v51  ;;  %v13798_v39 = vunpack.i.h.bf16 %v9799_v32  ;;  %v13799_v1 = vld [vmem:[#allocation37_spill] sm:$0xff]  ;;  %13804 = vst [vmem:[#allocation46_spill] sm:$0xff] %v10445_v56  ;;  %v13812_v12 = vunpack.i.h.bf16 %v13756_v44 }
 0xaf6   :  { %v3181_v17 = vsel %vm3150_vm11, %v13795_v20, %v2820_v28  ;;  %v2851_v8 = vsel %vm2341_vm10, %v6713_v31, %v13796_v19  ;;  %v3213_v60 = vsel %vm3150_vm11, %v13797_v26, %v2852_v36  ;;  %v13800_v33 = vunpack.i.h.bf16 %v13799_v1  ;;  %v13802_v20 = vld [vmem:[#allocation12_spill] sm:$0xff]  ;;  %v10447_v36 = vpop.permute.xlu2 %6886  ;;  %v13823_v44 = vld [vmem:[#allocation125_spill] sm:$0xff] }
 0xaf7   :  { %3369 = vmatpush.msra.mxu3 %v3181_v17  ;;  %v2818_v58 = vsel %vm2341_vm10, %v6638_v48, %v13798_v39  ;;  %v13801_v40 = vunpack.i.l.bf16 %v13799_v1  ;;  %v6758_v31 = vunpack.i.l.bf16 %v13802_v20  ;;  %v13803_v17 = vld [vmem:[#allocation14_spill] sm:$0xff]  ;;  %3427 = vmatpush.msrb.mxu2 %v3213_v60  ;;  %13805 = vst [vmem:[#allocation49_spill] sm:$0xff] %v10447_v36  ;;  %v13806_v48 = vld [vmem:[#allocation63_spill] sm:$0xff]  ;;  %v3178_v45 = vsel %vm3150_vm11, %v13812_v12, %v2817_v7 }
 0xaf8   :  { %v3210_v51 = vsel %vm3150_vm11, %v13800_v33, %v2849_v29  ;;  %3352 = vmatpush.msrb.mxu1 %v13803_v17  ;;  %v13807_v19 = vunpack.i.h.bf16 %v13806_v48  ;;  %v13808_v29 = vunpack.i.h.bf16 %v9807_v6  ;;  %v13810_v60 = vld [vmem:[#allocation75_spill] sm:$0xff]  ;;  %v6593_v7 = vunpack.i.l.bf16 %v13818_v37 }
 0xaf9   :  { %v3209_v28 = vsel %vm3150_vm11, %v13801_v40, %v2848_v63  ;;  %v13809_v63 = vld [vmem:[#allocation126_spill] sm:$0xff]  ;;  %v10457_v40 = vpop.permute.xlu0 %6841  ;;  %v13811_v17 = vunpack.i.h.bf16 %v13810_v60 }
 0xafa   :  { %v3180_v26 = vsel %vm3150_vm11, %v13807_v19, %v2819_v50  ;;  %v2850_v39 = vsel %vm2341_vm10, %v6658_v11, %v13808_v29  ;;  %v6648_v33 = vunpack.i.l.bf16 %v13809_v63  ;;  %v13813_v50 = vld [vmem:[#allocation141_spill] sm:$0xff]  ;;  %v13815_v29 = vunpack.i.l.bf16 %v13806_v48 }
 0xafb   :  { %3370 = vmatpush.msra.mxu3 %v3180_v26  ;;  %v3212_v59 = vsel %vm3150_vm11, %v13811_v17, %v2851_v8  ;;  %v6703_v6 = vunpack.i.l.bf16 %v13813_v50  ;;  %v13814_v11 = vld [vmem:[#allocation13_spill] sm:$0xff]  ;;  %v3271_v26 = vld [vmem:[#allocation4] sm:$0xff]  ;;  %v2837_v8 = vsel %vm2341_vm10, %v6828_v30, %v13816_v27  ;;  %v13819_v19 = vunpack.i.l.bf16 %v13810_v60 }
 0xafc   :  { %3353 = vmatpush.msrb.mxu1 %v13814_v11  ;;  %3428 = vmatpush.msrb.mxu2 %v3212_v59  ;;  %v3179_v1 = vsel %vm3150_vm11, %v13815_v29, %v2818_v58  ;;  %v13817_v17 = vld [vmem:[#allocation123_spill] sm:$0xff]  ;;  %v13820_v11 = vld [vmem:[#allocation124_spill] sm:$0xff]  ;;  %v13822_v27 = vunpack.i.h.bf16 %v13802_v20  ;;  %v10514_v24 = vpop.permute.xlu1 %6856 }
 0xafd   :  { %3371 = vmatpush.msra.mxu3 %v3179_v1  ;;  %v3211_v59 = vsel %vm3150_vm11, %v13819_v19, %v2850_v39  ;;  %v6633_v48 = vunpack.i.l.bf16 %v13817_v17  ;;  %v6578_v29 = vunpack.i.l.bf16 %v13820_v11  ;;  %v13824_v1 = vld [vmem:[#allocation156_spill] sm:$0xff]  ;;  %v13825_v39 = vld [vmem:[#allocation81_spill] sm:$0xff]  ;;  %v13840_v36 = vunpack.i.h.bf16 %v13817_v17 }
 0xafe   :  { %3354 = vmatpush.msrb.mxu1 %v13821_v16  ;;  %3429 = vmatpush.msrb.mxu2 %v3211_v59  ;;  %v2836_v30 = vsel %vm2341_vm10, %v6758_v31, %v13822_v27  ;;  %v6813_v60 = vunpack.i.l.bf16 %v13824_v1  ;;  %v13826_v19 = vunpack.i.h.bf16 %v13825_v39  ;;  %v6833_v16 = vunpack.i.l.bf16 %v10445_v56 }
 0xaff   :  { %3355 = vmatmul.f32.vlgmr.msrb.gmra.mxu1 %v3271_v26  ;;  %3372 = vmatpush.msra.mxu3 %v3178_v45  ;;  %v13827_v31 = vunpack.i.h.bf16 %v13813_v50  ;;  %v13828_v27 = vunpack.i.h.bf16 %v13809_v63  ;;  %v13829_v26 = vld [vmem:[#allocation153_spill] sm:$0xff]  ;;  %v13830_v45 = vunpack.i.l.bf16 %v13825_v39  ;;  %v10516_v39 = vpop.permute.xlu2 %6891  ;;  %v13839_v63 = vunpack.i.h.bf16 %v10445_v56  ;;  %v13846_v56 = vld [vmem:[#allocation120_spill] sm:$0xff] }
 0xb00   :  { %v3198_v58 = vsel %vm3150_vm11, %v13826_v19, %v2837_v8  ;;  %3430 = vmatpush.msrb.mxu2 %v3210_v51  ;;  %v6743_v20 = vunpack.i.l.bf16 %v13829_v26  ;;  %v13831_v51 = vunpack.i.h.bf16 %v13818_v37  ;;  %v13832_v19 = vld [vmem:[#allocation133_spill] sm:$0xff] }
 0xb01   :  { %3397 = vmatpush.msra.mxu1 %v3198_v58  ;;  %v2835_v59 = vsel %vm2341_vm10, %v6703_v6, %v13827_v31  ;;  %v2834_v12 = vsel %vm2341_vm10, %v6648_v33, %v13828_v27  ;;  %v3197_v8 = vsel %vm3150_vm11, %v13830_v45, %v2836_v30  ;;  %3373 = vmatpush.msra.mxu3 %v10259_v52  ;;  %v6708_v31 = vunpack.i.l.bf16 %v13832_v19  ;;  %v13834_v30 = vld [vmem:[#allocation138_spill] sm:$0xff]  ;;  %v10520_v37 = vpop.permute.xlu0 %6851  ;;  %v10531_v52 = vld [vmem:[#allocation4 + $0x40] sm:$0xff] }
 0xb02   :  { %v2833_v58 = vsel %vm2341_vm10, %v6593_v7, %v13831_v51  ;;  %v6763_v27 = vunpack.i.l.bf16 %v13833_v53  ;;  %3431 = vmatpush.msrb.mxu2 %v3209_v28  ;;  %v6688_v45 = vunpack.i.l.bf16 %v13834_v30  ;;  %v13835_v7 = vld [vmem:[#allocation71_spill] sm:$0xff]  ;;  %v13837_v33 = vunpack.i.h.bf16 %v13824_v1  ;;  %13838 = vst [vmem:[#allocation41_spill] sm:$0xff] %v10531_v52 }
 0xb03   :  { %3398 = vmatpush.msra.mxu1 %v3197_v8  ;;  %v13836_v51 = vunpack.i.h.bf16 %v13835_v7  ;;  %3374 = vmatpush.msra.mxu3 %v10273_v41  ;;  %v6598_v8 = vunpack.i.l.bf16 %v13823_v44  ;;  %v2845_v50 = vsel %vm2341_vm10, %v6833_v16, %v13839_v63  ;;  %v13841_v41 = vunpack.i.h.bf16 %v13820_v11 }
 0xb04   :  { %v2813_v28 = vsel %vm2341_vm10, %v6813_v60, %v13837_v33  ;;  %3432 = vmatpush.msrb.mxu2 %v10322_v5  ;;  %v13842_v60 = vld [vmem:[#allocation134_spill] sm:$0xff]  ;;  %v13843_v5 = vunpack.i.l.bf16 %v13835_v7  ;;  %v13845_v63 = vunpack.i.h.bf16 %v13829_v26  ;;  %v13849_v33 = vld [vmem:[#allocation80_spill] sm:$0xff] }
 0xb05   :  { %v3196_v6 = vsel %vm3150_vm11, %v13836_v51, %v2835_v59  ;;  %v2810_v59 = vsel %vm2341_vm10, %v6633_v48, %v13840_v36  ;;  %v2809_v51 = vsel %vm2341_vm10, %v6578_v29, %v13841_v41  ;;  %3375 = vmatpush.msra.mxu3 %v13844_v14  ;;  %v13847_v48 = vld [vmem:[#allocation45_spill] sm:$0xff]  ;;  %v13848_v29 = vunpack.i.h.bf16 %v13776_v21 }
 0xb06   :  { %3399 = vmatpush.msra.mxu1 %v3196_v6  ;;  %v6653_v6 = vunpack.i.l.bf16 %v13842_v60  ;;  %v3195_v1 = vsel %vm3150_vm11, %v13843_v5, %v2834_v12  ;;  %v2812_v16 = vsel %vm2341_vm10, %v6743_v20, %v13845_v63  ;;  %3433 = vmatpush.msrb.mxu2 %v13847_v48  ;;  %v13850_v11 = vunpack.i.h.bf16 %v13849_v33  ;;  %v13852_v20 = vld [vmem:[#allocation90_spill] sm:$0xff] }
 0xb07   :  { %v3194_v41 = vsel %vm3150_vm11, %v13848_v29, %v2833_v58  ;;  %v13851_v12 = vunpack.i.h.bf16 %v13833_v53  ;;  %3358 = vmatmul.f32.gmra.mxu1 %v10531_v52  ;;  %v13854_v21 = vunpack.i.h.bf16 %v13834_v30  ;;  %v13855_v48 = vunpack.i.h.bf16 %v13832_v19  ;;  %v13873_v52 = vld [vmem:[#allocation132_spill] sm:$0xff] }
 0xb08   :  { %3400 = vmatpush.msra.mxu1 %v3195_v1  ;;  %v3174_v7 = vsel %vm3150_vm11, %v13850_v11, %v2813_v28  ;;  %v13853_v1 = vunpack.i.h.bf16 %v13852_v20  ;;  %v13254_v28 = vunpack.i.h.bf16 %v10284_v4  ;;  %v13856_v29 = vunpack.i.l.bf16 %v13849_v33  ;;  %v13907_v53 = vld [vmem:[#allocation24_spill] sm:$0xff] }
 0xb09   :  { %v2844_v14 = vsel %vm2341_vm10, %v6763_v27, %v13851_v12  ;;  %3376 = vmatpush.msra.mxu3 %v3174_v7  ;;  %v2811_v58 = vsel %vm2341_vm10, %v6688_v45, %v13854_v21  ;;  %v2843_v11 = vsel %vm2341_vm10, %v6708_v31, %v13855_v48  ;;  %v6823_v27 = vunpack.i.l.bf16 %v10284_v4  ;;  %v13857_v12 = vld [vmem:[#allocation69_spill] sm:$0xff] }
 0xb0a   :  { %v3206_v63 = vsel %vm3150_vm11, %v13853_v1, %v2845_v50  ;;  %3401 = vmatpush.msra.mxu1 %v3194_v41  ;;  %v3173_v7 = vsel %vm3150_vm11, %v13856_v29, %v2812_v16  ;;  %v13858_v50 = vunpack.i.l.bf16 %v13857_v12  ;;  %v13859_v45 = vunpack.i.l.bf16 %v13852_v20  ;;  %v13863_v29 = vld [vmem:[#allocation145_spill] sm:$0xff]  ;;  %v10598_v20 = vpop.permute.xlu2 %6906 }
 0xb0b   :  { %3434 = vmatpush.msrb.mxu2 %v3206_v63  ;;  %3377 = vmatpush.msra.mxu3 %v3173_v7  ;;  %v13860_v31 = vunpack.i.h.bf16 %v13842_v60  ;;  %v13861_v41 = vunpack.i.h.bf16 %v13778_v55  ;;  %v13862_v33 = vunpack.i.h.bf16 %v13823_v44 }
 0xb0c   :  { %v3171_v1 = vsel %vm3150_vm11, %v13858_v50, %v2810_v59  ;;  %v3205_v21 = vsel %vm3150_vm11, %v13859_v45, %v2844_v14  ;;  %v6753_v59 = vunpack.i.l.bf16 %v13863_v29  ;;  %3402 = vmatpush.msra.mxu1 %v10343_v57  ;;  %v10596_v14 = vpop.permute.xlu1 %6871  ;;  %v6788_v45 = vunpack.i.l.bf16 %v10203_v54 }
 0xb0d   :  { %v2842_v48 = vsel %vm2341_vm10, %v6653_v6, %v13860_v31  ;;  %v3170_v63 = vsel %vm3150_vm11, %v13861_v41, %v2809_v51  ;;  %v2841_v16 = vsel %vm2341_vm10, %v6598_v8, %v13862_v33  ;;  %3435 = vmatpush.msrb.mxu2 %v3205_v21  ;;  %v13864_v6 = vunpack.i.h.bf16 %v13857_v12  ;;  %v13865_v51 = vld [vmem:[#allocation66_spill] sm:$0xff]  ;;  %v10608_v31 = vpop.permute.xlu0 %6866  ;;  %v13867_v41 = vld [vmem:[#allocation144_spill] sm:$0xff] }
 0xb0e   :  { %v13866_v7 = vunpack.i.h.bf16 %v13865_v51  ;;  %v13255_v57 = vunpack.i.h.bf16 %v10598_v20  ;;  %v6908_v21 = vunpack.i.l.bf16 %v10598_v20  ;;  %v6698_v12 = vunpack.i.l.bf16 %v13867_v41  ;;  %v13871_v8 = vld [vmem:[#allocation150_spill] sm:$0xff] }
 0xb0f   :  { %v3172_v55 = vsel %vm3150_vm11, %v13864_v6, %v2811_v58  ;;  %v13868_v58 = vld [vmem:[#allocation15_spill] sm:$0xff]  ;;  %v13872_v33 = vunpack.i.l.bf16 %v13865_v51 }
 0xb10   :  { %v3204_v50 = vsel %vm3150_vm11, %v13866_v7, %v2843_v11  ;;  %3378 = vmatpush.msra.mxu3 %v3172_v55  ;;  %3403 = vmatpush.msra.mxu1 %v13868_v58  ;;  %v10615_v6 = vld [vmem:[#allocation4 + $0x80] sm:$0xff]  ;;  %v2829_v11 = vsel %vm2341_vm10, %v6823_v27, %v13254_v28  ;;  %v13870_v7 = vunpack.i.h.bf16 %v13768_v49  ;;  %v6733_v55 = vunpack.i.l.bf16 %v13871_v8  ;;  %v13874_v49 = vld [vmem:[#allocation158_spill] sm:$0xff] }
 0xb11   :  { %3436 = vmatpush.msrb.mxu2 %v3204_v50  ;;  %13869 = vst [vmem:[#allocation38_spill] sm:$0xff] %v10615_v6  ;;  %v3203_v58 = vsel %vm3150_vm11, %v13872_v33, %v2842_v48  ;;  %v2885_v50 = vsel %vm2341_vm10, %v6908_v21, %v13255_v57  ;;  %v6643_v27 = vunpack.i.l.bf16 %v13873_v52  ;;  %v13878_v48 = vld [vmem:[#allocation39_spill] sm:$0xff]  ;;  %3361 = vmatmul.f32.gmra.mxu1 %v10615_v6  ;;  %v13879_v21 = vld [vmem:[#allocation89_spill] sm:$0xff]  ;;  %v13884_v33 = vunpack.i.h.bf16 %v9631_v42 }
 0xb12   :  { %v3202_v36 = vsel %vm3150_vm11, %v13870_v7, %v2841_v16  ;;  %3379 = vmatpush.msra.mxu3 %v3171_v1  ;;  %3404 = vmatpush.msra.mxu1 %v13874_v49  ;;  %v13875_v16 = vld [vmem:[#allocation84_spill] sm:$0xff]  ;;  %v13877_v1 = vunpack.i.h.bf16 %v13863_v29  ;;  %v6678_v5 = vunpack.i.l.bf16 %v13878_v48  ;;  %v13880_v57 = vunpack.i.h.bf16 %v13879_v21  ;;  %v13933_v29 = vld [vmem:[#allocation51_spill] sm:$0xff] }
 0xb13   :  { %3437 = vmatpush.msrb.mxu2 %v3203_v58  ;;  %v13876_v7 = vunpack.i.h.bf16 %v13875_v16  ;;  %v13881_v58 = vunpack.i.h.bf16 %v10203_v54  ;;  %v13885_v6 = vunpack.i.l.bf16 %v9631_v42  ;;  %v13913_v42 = vld [vmem:[#allocation152_spill] sm:$0xff] }
 0xb14   :  { %v2828_v51 = vsel %vm2341_vm10, %v6753_v59, %v13877_v1  ;;  %v3190_v44 = vsel %vm3150_vm11, %v13880_v57, %v2829_v11  ;;  %3380 = vmatpush.msra.mxu3 %v3170_v63  ;;  %v13883_v59 = vunpack.i.h.bf16 %v13867_v41  ;;  %v13886_v57 = vld [vmem:[#allocation59_spill] sm:$0xff] }
 0xb15   :  { %v3246_v28 = vsel %vm3150_vm11, %v13876_v7, %v2885_v50  ;;  %v2884_v49 = vsel %vm2341_vm10, %v6788_v45, %v13881_v58  ;;  %v13882_v50 = vld [vmem:[#allocation131_spill] sm:$0xff]  ;;  %3405 = vmatpush.msra.mxu1 %v3190_v44  ;;  %3438 = vmatpush.msrb.mxu2 %v3202_v36  ;;  %v2824_v63 = vsel %vm2341_vm10, %v13885_v6, %v13884_v33  ;;  %v13887_v45 = vunpack.i.l.bf16 %v13879_v21  ;;  %v13891_v6 = vld [vmem:[#allocation65_spill] sm:$0xff]  ;;  %v10678_v21 = vpop.permute.xlu1 %6881 }
 0xb16   :  { %v6623_v60 = vunpack.i.l.bf16 %v13882_v50  ;;  %v2827_v1 = vsel %vm2341_vm10, %v6698_v12, %v13883_v59  ;;  %3484 = vmatpush.msra.mxu0 %v3246_v28  ;;  %3381 = vmatpush.msra.mxu3 %v10348_v10  ;;  %v13888_v44 = vunpack.i.h.bf16 %v13871_v8  ;;  %v13889_v12 = vunpack.i.h.bf16 %v13846_v56 }
 0xb17   :  { %v3189_v58 = vsel %vm3150_vm11, %v13887_v45, %v2828_v51  ;;  %v13890_v59 = vunpack.i.l.bf16 %v13846_v56  ;;  %v6618_v28 = vunpack.i.l.bf16 %v13891_v6  ;;  %3439 = vmatpush.msrb.mxu2 %v10311_v0  ;;  %v13892_v51 = vunpack.i.l.bf16 %v13875_v16  ;;  %v13895_v0 = vld [vmem:[#allocation72_spill] sm:$0xff] }
 0xb18   :  { %v2883_v36 = vsel %vm2341_vm10, %v6733_v55, %v13888_v44  ;;  %3406 = vmatpush.msra.mxu1 %v3189_v58  ;;  %v10680_v55 = vpop.permute.xlu2 %6931  ;;  %v13893_v45 = vunpack.i.h.bf16 %v13873_v52  ;;  %v10687_v58 = vpop.permute.xlu0 %6901  ;;  %v13896_v33 = vunpack.i.h.bf16 %v13895_v0  ;;  %v13902_v56 = vld [vmem:[#allocation36_spill] sm:$0xff]  ;;  %v6868_v8 = vunpack.i.l.bf16 %v10608_v31 }
 0xb19   :  { %v2880_v7 = vsel %vm2341_vm10, %v13890_v59, %v13889_v12  ;;  %v3245_v10 = vsel %vm3150_vm11, %v13892_v51, %v2884_v49  ;;  %v13894_v12 = vld [vmem:[#allocation135_spill] sm:$0xff]  ;;  %v13897_v49 = vld [vmem:[#allocation25_spill] sm:$0xff]  ;;  %v13898_v51 = vunpack.i.h.bf16 %v13878_v48  ;;  %3440 = vmatpush.msrb.mxu2 %v10327_v13  ;;  %v13906_v13 = vunpack.i.l.bf16 %v13895_v0 }
 0xb1a   :  { %v2826_v44 = vsel %vm2341_vm10, %v6643_v27, %v13893_v45  ;;  %v6673_v11 = vunpack.i.l.bf16 %v13894_v12  ;;  %3485 = vmatpush.msra.mxu0 %v3245_v10  ;;  %v3188_v16 = vsel %vm3150_vm11, %v13896_v33, %v2827_v1  ;;  %3382 = vmatpush.msra.mxu3 %v13897_v49  ;;  %v13899_v27 = vld [vmem:[#allocation76_spill] sm:$0xff]  ;;  %v10701_v59 = vld [vmem:[#allocation4 + $0xc0] sm:$0xff]  ;;  %v13903_v1 = vunpack.i.h.bf16 %v13902_v56 }
 0xb1b   :  { %v2882_v19 = vsel %vm2341_vm10, %v6678_v5, %v13898_v51  ;;  %3407 = vmatpush.msra.mxu1 %v3188_v16  ;;  %v13900_v45 = vunpack.i.h.bf16 %v13899_v27  ;;  %13901 = vst [vmem:[#allocation87_spill] sm:$0xff] %v10701_v59  ;;  %v13904_v49 = vunpack.i.h.bf16 %v13882_v50  ;;  %v13905_v51 = vld [vmem:[#allocation61_spill] sm:$0xff]  ;;  %v3187_v16 = vsel %vm3150_vm11, %v13906_v13, %v2826_v44 }
 0xb1c   :  { %v3186_v33 = vsel %vm3150_vm11, %v13903_v1, %v10419_v62  ;;  %3383 = vmatpush.msra.mxu3 %v13907_v53  ;;  %v13910_v62 = vld [vmem:[#allocation48_spill] sm:$0xff]  ;;  %v6783_v0 = vunpack.i.l.bf16 %v13913_v42  ;;  %v13914_v44 = vld [vmem:[#allocation17_spill] sm:$0xff]  ;;  %v13915_v53 = vunpack.i.l.bf16 %v13899_v27  ;;  %3364 = vmatmul.f32.gmra.mxu1 %v10701_v59  ;;  %v13919_v27 = vunpack.i.h.bf16 %v13891_v6 }
 0xb1d   :  { %v3244_v10 = vsel %vm3150_vm11, %v13900_v45, %v2883_v36  ;;  %v2881_v5 = vsel %vm2341_vm10, %v6623_v60, %v13904_v49  ;;  %v10715_v36 = vld [vmem:[#allocation4 + $0x8] sm:$0xff]  ;;  %v13909_v45 = vunpack.i.l.bf16 %v13902_v56  ;;  %v13911_v1 = vunpack.i.l.bf16 %v13910_v62  ;;  %v13912_v60 = vld [vmem:[#allocation121_spill] sm:$0xff]  ;;  %3408 = vmatpush.msra.mxu1 %v3187_v16  ;;  %3441 = vmatpush.msrb.mxu2 %v13914_v44  ;;  %v10730_v56 = vld [vmem:[#allocation4 + $0x18] sm:$0xff] }
 0xb1e   :  { %3486 = vmatpush.msra.mxu0 %v3244_v10  ;;  %13908 = vst [vmem:[#allocation92_spill] sm:$0xff] %v10715_v36  ;;  %v3243_v13 = vsel %vm3150_vm11, %v13915_v53, %v2882_v19  ;;  %v10745_v19 = vsel %vm2341_vm10, %v6618_v28, %v13919_v27  ;;  %v13920_v44 = vld [vmem:[#allocation136_spill] sm:$0xff]  ;;  %v13922_v10 = vld [vmem:[#allocation151_spill] sm:$0xff]  ;;  %3384 = vmatmul.f32.vlgmr.msra.gmra.mxu3 %v10715_v36  ;;  %v6903_v28 = vunpack.i.l.bf16 %v10687_v58  ;;  %v13923_v27 = vld [vmem:[#allocation157_spill] sm:$0xff]  ;;  %v10760_v53 = vpop.permute.xlu1 %6896 }
 0xb1f   :  { %v3185_v52 = vsel %vm3150_vm11, %v13909_v45, %v2824_v63  ;;  %v3241_v50 = vsel %vm3150_vm11, %v13911_v1, %v2880_v7  ;;  %13916 = vst [vmem:[#allocation31_spill] sm:$0xff] %v10730_v56  ;;  %v13917_v7 = vunpack.i.h.bf16 %v13910_v62  ;;  %v13918_v1 = vunpack.i.h.bf16 %v13894_v12  ;;  %v13921_v63 = vld [vmem:[#allocation137_spill] sm:$0xff]  ;;  %3409 = vmatpush.msra.mxu1 %v3186_v33  ;;  %3442 = vmatmul.f32.vlgmr.msrb.gmra.mxu2 %v10730_v56 }
 0xb20   :  { %3487 = vmatpush.msra.mxu0 %v3243_v13  ;;  %v6723_v13 = vunpack.i.l.bf16 %v13920_v44  ;;  %v6778_v62 = vunpack.i.l.bf16 %v13923_v27  ;;  %13924 = vst [vmem:[#allocation37_spill] sm:$0xff] %v10760_v53  ;;  %v10762_v33 = vpop.permute.xlu2 %6946  ;;  %v6898_v59 = vunpack.i.l.bf16 %v10760_v53  ;;  %v10769_v36 = vpop.permute.xlu0 %6916  ;;  %v6873_v56 = vunpack.i.l.bf16 %v10596_v14 }
 0xb21   :  { %v3242_v45 = vsel %vm3150_vm11, %v13917_v7, %v2881_v5  ;;  %v10740_v16 = vsel %vm2341_vm10, %v6673_v11, %v13918_v1  ;;  %v6878_v11 = vunpack.i.l.bf16 %v10375_v22  ;;  %v6728_v1 = vunpack.i.l.bf16 %v13922_v10  ;;  %3410 = vmatpush.msra.mxu1 %v3185_v52  ;;  %13925 = vst [vmem:[#allocation14_spill] sm:$0xff] %v10762_v33 }
 0xb22   :  { %3488 = vmatpush.msra.mxu0 %v3242_v45  ;;  %v13926_v5 = vunpack.i.h.bf16 %v13913_v42  ;;  %v13275_v45 = vunpack.i.h.bf16 %v10760_v53  ;;  %13927 = vst [vmem:[#allocation63_spill] sm:$0xff] %v10769_v36  ;;  %v6948_v6 = vunpack.i.l.bf16 %v10762_v33  ;;  %v6918_v42 = vunpack.i.l.bf16 %v10769_v36  ;;  %v13934_v53 = vld [vmem:[#allocation93_spill] sm:$0xff] }
 0xb23   :  { %3411 = vmatpush.msra.mxu1 %v10316_v25  ;;  %v13930_v52 = vunpack.i.h.bf16 %v10687_v58  ;;  %v13931_v12 = vunpack.i.h.bf16 %v10762_v33  ;;  %v13932_v25 = vunpack.i.h.bf16 %v10375_v22  ;;  %v13942_v22 = vld [vmem:[#allocation128_spill] sm:$0xff] }
 0xb24   :  { %v2876_v7 = vsel %vm2341_vm10, %v6783_v0, %v13926_v5  ;;  %3489 = vmatpush.msra.mxu0 %v3241_v50  ;;  %v10778_v50 = vld [vmem:[#allocation4 + $0x10] sm:$0xff]  ;;  %v10781_v0 = vld [vmem:[#allocation4 + $0x48] sm:$0xff]  ;;  %v2869_v5 = vsel %vm2341_vm10, %v6898_v59, %v13275_v45  ;;  %v13935_v59 = vunpack.i.h.bf16 %v13934_v53 }
 0xb25   :  { %13928 = vst [vmem:[#allocation75_spill] sm:$0xff] %v10778_v50  ;;  %v2877_v49 = vsel %vm2341_vm10, %v6903_v28, %v13930_v52  ;;  %v2909_v48 = vsel %vm2341_vm10, %v6948_v6, %v13931_v12  ;;  %v2900_v41 = vsel %vm2341_vm10, %v6878_v11, %v13932_v25  ;;  %3412 = vmatpush.msra.mxu1 %v13933_v29  ;;  %v13936_v28 = vunpack.i.h.bf16 %v10769_v36  ;;  %v13937_v12 = vld [vmem:[#allocation97_spill] sm:$0xff] }
 0xb26   :  { %3490 = vmatpush.msra.mxu0 %v10195_v34  ;;  %13929 = vst [vmem:[#allocation13_spill] sm:$0xff] %v10781_v0  ;;  %v3230_v45 = vsel %vm3150_vm11, %v13935_v59, %v2869_v5  ;;  %v6668_v6 = vunpack.i.l.bf16 %v13921_v63  ;;  %3413 = vmatmul.f32.vlgmr.msra.gmra.mxu1 %v10778_v50  ;;  %v13938_v11 = vunpack.i.h.bf16 %v13937_v12  ;;  %v13939_v34 = vld [vmem:[#allocation86_spill] sm:$0xff]  ;;  %v13941_v5 = vunpack.i.h.bf16 %v13923_v27 }
 0xb27   :  { %v2901_v52 = vsel %vm2341_vm10, %v6918_v42, %v13936_v28  ;;  %v13940_v29 = vunpack.i.h.bf16 %v13939_v34  ;;  %3387 = vmatmul.f32.gmra.mxu3 %v10781_v0  ;;  %v13943_v28 = vld [vmem:[#allocation95_spill] sm:$0xff]  ;;  %v13945_v36 = vunpack.i.h.bf16 %v13920_v44  ;;  %v13948_v42 = vunpack.i.l.bf16 %v13937_v12 }
 0xb28   :  { %3491 = vmatpush.msra.mxu0 %v10264_v47  ;;  %v3262_v25 = vsel %vm3150_vm11, %v13938_v11, %v2901_v52  ;;  %v2868_v59 = vsel %vm2341_vm10, %v6778_v62, %v13941_v5  ;;  %v13944_v47 = vunpack.i.h.bf16 %v13943_v28  ;;  %v13946_v11 = vunpack.i.h.bf16 %v10596_v14  ;;  %3455 = vmatpush.msrb.mxu3 %v3230_v45 }
 0xb29   :  { %v3270_v33 = vsel %vm3150_vm11, %v13940_v29, %v2909_v48  ;;  %3513 = vmatpush.msrb.mxu1 %v3262_v25  ;;  %v2867_v52 = vsel %vm2341_vm10, %v6723_v13, %v13945_v36  ;;  %v6613_v29 = vunpack.i.l.bf16 %v13942_v22  ;;  %v13947_v62 = vunpack.i.l.bf16 %v13943_v28  ;;  %v10834_v25 = vld [vmem:[#allocation4 + $0x58] sm:$0xff] }
 0xb2a   :  { %v3238_v50 = vsel %vm3150_vm11, %v13944_v47, %v2877_v49  ;;  %v2899_v48 = vsel %vm2341_vm10, %v6873_v56, %v13946_v11  ;;  %v3261_v49 = vsel %vm3150_vm11, %v13948_v42, %v2900_v41  ;;  %13949 = vst [vmem:[#allocation123_spill] sm:$0xff] %v10834_v25  ;;  %v13950_v36 = vunpack.i.h.bf16 %v13922_v10  ;;  %3550 = vmatpush.msra.mxu2 %v3270_v33  ;;  %v10878_v56 = vld [vmem:[#allocation4 + $0x88] sm:$0xff] }
 0xb2b   :  { %3492 = vmatpush.msra.mxu0 %v3238_v50  ;;  %v3237_v5 = vsel %vm3150_vm11, %v13947_v62, %v2876_v7  ;;  %v6863_v47 = vunpack.i.l.bf16 %v10268_v15  ;;  %v13951_v45 = vunpack.i.l.bf16 %v13934_v53  ;;  %3514 = vmatpush.msrb.mxu1 %v3261_v49  ;;  %v10844_v7 = vpop.permute.xlu1 %6911  ;;  %v13952_v41 = vunpack.i.h.bf16 %v10608_v31  ;;  %13965 = vst [vmem:[#allocation16_spill] sm:$0xff] %v10878_v56 }
 0xb2c   :  { %v2875_v13 = vsel %vm2341_vm10, %v6728_v1, %v13950_v36  ;;  %v13953_v1 = vld [vmem:[#allocation79_spill] sm:$0xff]  ;;  %v13955_v33 = vunpack.i.h.bf16 %v13921_v63  ;;  %v13957_v62 = vunpack.i.l.bf16 %v13912_v60  ;;  %v6858_v36 = vunpack.i.l.bf16 %v10514_v24  ;;  %3445 = vmatmul.f32.gmra.mxu2 %v10834_v25 }
 0xb2d   :  { %v3229_v50 = vsel %vm3150_vm11, %v13951_v45, %v2868_v59  ;;  %v2898_v12 = vsel %vm2341_vm10, %v6868_v8, %v13952_v41  ;;  %3493 = vmatpush.msra.mxu0 %v3237_v5  ;;  %v13954_v28 = vunpack.i.h.bf16 %v13953_v1  ;;  %v13956_v59 = vunpack.i.h.bf16 %v13912_v60  ;;  %v13958_v5 = vld [vmem:[#allocation68_spill] sm:$0xff] }
 0xb2e   :  { %3456 = vmatpush.msrb.mxu3 %v3229_v50  ;;  %v2866_v53 = vsel %vm2341_vm10, %v6668_v6, %v13955_v33  ;;  %v13959_v45 = vunpack.i.h.bf16 %v13958_v5  ;;  %v13960_v50 = vld [vmem:[#allocation77_spill] sm:$0xff]  ;;  %v13964_v42 = vunpack.i.l.bf16 %v13953_v1  ;;  %v13993_v0 = vunpack.i.h.bf16 %v10844_v7 }
 0xb2f   :  { %v3260_v11 = vsel %vm3150_vm11, %v13954_v28, %v2899_v48  ;;  %v2872_v49 = vsel %vm2341_vm10, %v13957_v62, %v13956_v59  ;;  %v13961_v41 = vunpack.i.h.bf16 %v13960_v50  ;;  %v13962_v28 = vld [vmem:[#allocation57_spill] sm:$0xff]  ;;  %v13963_v59 = vunpack.i.l.bf16 %v13960_v50  ;;  %3390 = vmatmul.f32.gmra.mxu3 %v10878_v56  ;;  %v10920_v56 = vld [vmem:[#allocation4 + $0x98] sm:$0xff] }
 0xb30   :  { %v3228_v48 = vsel %vm3150_vm11, %v13959_v45, %v2867_v52  ;;  %3515 = vmatpush.msrb.mxu1 %v3260_v11  ;;  %v3259_v8 = vsel %vm3150_vm11, %v13964_v42, %v2898_v12  ;;  %v10880_v52 = vld [vmem:[#allocation4 + $0x50] sm:$0xff]  ;;  %v13969_v12 = vunpack.i.h.bf16 %v10268_v15  ;;  %13980 = vst [vmem:[#allocation153_spill] sm:$0xff] %v10920_v56 }
 0xb31   :  { %v3236_v6 = vsel %vm3150_vm11, %v13961_v41, %v2875_v13  ;;  %3457 = vmatpush.msrb.mxu3 %v3228_v48  ;;  %v3235_v62 = vsel %vm3150_vm11, %v13963_v59, %v10740_v16  ;;  %13966 = vst [vmem:[#allocation81_spill] sm:$0xff] %v10880_v52  ;;  %v13967_v13 = vunpack.i.h.bf16 %v13942_v22  ;;  %v6853_v48 = vunpack.i.l.bf16 %v10520_v37  ;;  %v10887_v41 = vpop.permute.xlu0 %6921  ;;  %v13970_v50 = vld [vmem:[#allocation73_spill] sm:$0xff]  ;;  %3416 = vmatmul.f32.gmra.mxu1 %v10880_v52 }
 0xb32   :  { %3494 = vmatpush.msra.mxu0 %v3236_v6  ;;  %v13968_v16 = vunpack.i.l.bf16 %v13958_v5  ;;  %3516 = vmatpush.msrb.mxu1 %v3259_v8  ;;  %v2897_v42 = vsel %vm2341_vm10, %v6863_v47, %v13969_v12  ;;  %v6568_v59 = vunpack.i.l.bf16 %v13970_v50  ;;  %v13974_v47 = vunpack.i.h.bf16 %v13773_v35  ;;  %v13976_v12 = vld [vmem:[#allocation21_spill] sm:$0xff]  ;;  %v13978_v6 = vld [vmem:[#allocation43_spill] sm:$0xff] }
 0xb33   :  { %v2865_v11 = vsel %vm2341_vm10, %v6613_v29, %v13967_v13  ;;  %v13971_v29 = vld [vmem:[#allocation40_spill] sm:$0xff]  ;;  %v13979_v8 = vunpack.i.h.bf16 %v13978_v6  ;;  %v6893_v35 = vunpack.i.l.bf16 %v10516_v39 }
 0xb34   :  { %v3227_v1 = vsel %vm3150_vm11, %v13968_v16, %v2866_v53  ;;  %3495 = vmatpush.msra.mxu0 %v3235_v62  ;;  %v13972_v13 = vunpack.i.h.bf16 %v13971_v29  ;;  %v13973_v5 = vunpack.i.l.bf16 %v13971_v29  ;;  %v6848_v16 = vunpack.i.l.bf16 %v10205_v43  ;;  %3448 = vmatmul.f32.gmra.mxu2 %v10920_v56  ;;  %v13985_v29 = vld [vmem:[#allocation110_spill] sm:$0xff]  ;;  %v13990_v56 = vld [vmem:[#allocation129_spill] sm:$0xff] }
 0xb35   :  { %3458 = vmatpush.msrb.mxu3 %v3227_v1  ;;  %v3226_v62 = vsel %vm3150_vm11, %v13974_v47, %v2865_v11  ;;  %v13975_v1 = vunpack.i.h.bf16 %v10514_v24  ;;  %v3258_v45 = vsel %vm3150_vm11, %v13979_v8, %v2897_v42  ;;  %v10925_v47 = vpop.permute.xlu1 %6926  ;;  %v6843_v42 = vunpack.i.l.bf16 %v10457_v40  ;;  %v13983_v11 = vld [vmem:[#allocation146_spill] sm:$0xff] }
 0xb36   :  { %v3234_v33 = vsel %vm3150_vm11, %v13972_v13, %v10745_v19  ;;  %v3233_v53 = vsel %vm3150_vm11, %v13973_v5, %v2872_v49  ;;  %v13977_v13 = vld [vmem:[#allocation28_spill] sm:$0xff]  ;;  %3517 = vmatpush.msrb.mxu1 %v3258_v45  ;;  %v13982_v8 = vunpack.i.l.bf16 %v13978_v6  ;;  %v6663_v45 = vunpack.i.l.bf16 %v13976_v12 }
 0xb37   :  { %v2896_v19 = vsel %vm2341_vm10, %v6858_v36, %v13975_v1  ;;  %3459 = vmatpush.msrb.mxu3 %v3226_v62  ;;  %3496 = vmatpush.msra.mxu0 %v3234_v33  ;;  %v6913_v36 = vunpack.i.l.bf16 %v10844_v7  ;;  %v13981_v1 = vunpack.i.h.bf16 %v10520_v37  ;;  %v6773_v33 = vunpack.i.l.bf16 %v13977_v13  ;;  %v10952_v5 = vld [vmem:[#allocation4 + $0xc8] sm:$0xff] }
 0xb38   :  { %v3257_v49 = vsel %vm3150_vm11, %v13982_v8, %v2896_v19  ;;  %v6718_v52 = vunpack.i.l.bf16 %v13983_v11  ;;  %v13987_v19 = vld [vmem:[#allocation33_spill] sm:$0xff]  ;;  %13989 = vst [vmem:[#allocation138_spill] sm:$0xff] %v10952_v5  ;;  %3393 = vmatmul.f32.gmra.mxu3 %v10952_v5 }
 0xb39   :  { %v2895_v62 = vsel %vm2341_vm10, %v6853_v48, %v13981_v1  ;;  %3460 = vmatpush.msrb.mxu3 %v10332_v2  ;;  %3497 = vmatpush.msra.mxu0 %v3233_v53  ;;  %v13984_v48 = vunpack.i.h.bf16 %v10205_v43  ;;  %v13986_v53 = vld [vmem:[#allocation154_spill] sm:$0xff]  ;;  %v13988_v8 = vunpack.i.h.bf16 %v13987_v19 }
 0xb3a   :  { %3518 = vmatpush.msrb.mxu1 %v3257_v49  ;;  %v6808_v6 = vunpack.i.l.bf16 %v13986_v53 }
 0xb3b   :  { %v2894_v1 = vsel %vm2341_vm10, %v6848_v16, %v13984_v48  ;;  %3461 = vmatpush.msrb.mxu3 %v10337_v3  ;;  %3498 = vmatpush.msra.mxu0 %v10353_v61  ;;  %v3256_v49 = vsel %vm3150_vm11, %v13988_v8, %v2895_v62  ;;  %v10955_v16 = vld [vmem:[#allocation4 + $0x90] sm:$0xff]  ;;  %v13992_v48 = vunpack.i.h.bf16 %v10516_v39  ;;  %v2893_v3 = vsel %vm2341_vm10, %v6913_v36, %v13993_v0  ;;  %v13995_v8 = vld [vmem:[#allocation23_spill] sm:$0xff] }
 0xb3c   :  { %3519 = vmatpush.msrb.mxu1 %v3256_v49  ;;  %13991 = vst [vmem:[#allocation71_spill] sm:$0xff] %v10955_v16  ;;  %v13994_v61 = vunpack.i.h.bf16 %v13970_v50  ;;  %v6608_v62 = vunpack.i.l.bf16 %v13990_v56  ;;  %v13996_v49 = vunpack.i.l.bf16 %v13987_v19  ;;  %v13998_v0 = vunpack.i.h.bf16 %v10457_v40  ;;  %v10982_v50 = vpop.permute.xlu0 %6936 }
 0xb3d   :  { %v2861_v2 = vsel %vm2341_vm10, %v6893_v35, %v13992_v48  ;;  %3462 = vmatpush.msrb.mxu3 %v10184_v9  ;;  %3499 = vmatpush.msra.mxu0 %v13995_v8  ;;  %v13997_v35 = vunpack.i.h.bf16 %v13977_v13  ;;  %v13999_v9 = vunpack.i.h.bf16 %v13983_v11  ;;  %v14000_v19 = vunpack.i.h.bf16 %v13976_v12  ;;  %v14001_v8 = vld [vmem:[#allocation117_spill] sm:$0xff] }
 0xb3e   :  { %v10966_v43 = vsel %vm2341_vm10, %v6568_v59, %v13994_v61  ;;  %v3255_v25 = vsel %vm3150_vm11, %v13996_v49, %v2894_v1  ;;  %v2892_v36 = vsel %vm2341_vm10, %v6843_v42, %v13998_v0  ;;  %v6803_v61 = vunpack.i.l.bf16 %v10266_v18  ;;  %3419 = vmatmul.f32.gmra.mxu1 %v10955_v16  ;;  %v14005_v59 = vld [vmem:[#allocation96_spill] sm:$0xff]  ;;  %v11012_v16 = vpop.permute.xlu1 %6941 }
 0xb3f   :  { %v2860_v48 = vsel %vm2341_vm10, %v6773_v33, %v13997_v35  ;;  %3520 = vmatpush.msrb.mxu1 %v3255_v25  ;;  %v2859_v1 = vsel %vm2341_vm10, %v6718_v52, %v13999_v9  ;;  %v2858_v33 = vsel %vm2341_vm10, %v6663_v45, %v14000_v19  ;;  %v14002_v42 = vunpack.i.h.bf16 %v10373_v38  ;;  %v14003_v35 = vld [vmem:[#allocation82_spill] sm:$0xff]  ;;  %v14008_v45 = vld [vmem:[#allocation20_spill] sm:$0xff] }
 0xb40   :  { %v14004_v0 = vunpack.i.h.bf16 %v14003_v35  ;;  %v14006_v5 = vunpack.i.h.bf16 %v14005_v59  ;;  %v14007_v52 = vunpack.i.h.bf16 %v13986_v53  ;;  %v6798_v49 = vunpack.i.l.bf16 %v14008_v45 }
 0xb41   :  { %3600 = vmatpush.msrb.mxu0 %v14002_v42  ;;  %v14009_v38 = vunpack.i.l.bf16 %v14003_v35  ;;  %v6943_v35 = vunpack.i.l.bf16 %v11012_v16  ;;  %v6933_v19 = vunpack.i.l.bf16 %v10680_v55 }
 0xb42   :  { %v3222_v25 = vsel %vm3150_vm11, %v14004_v0, %v2861_v2  ;;  %v3254_v11 = vsel %vm3150_vm11, %v14006_v5, %v2893_v3  ;;  %v2891_v9 = vsel %vm2341_vm10, %v6808_v6, %v14007_v52  ;;  %v14010_v2 = vunpack.i.l.bf16 %v14005_v59  ;;  %v11014_v5 = vld [vmem:[#allocation4 + $0xd8] sm:$0xff] }
 0xb43   :  { %3463 = vmatpush.msrb.mxu3 %v3222_v25  ;;  %3521 = vmatpush.msrb.mxu1 %v3254_v11  ;;  %v3221_v42 = vsel %vm3150_vm11, %v14009_v38, %v2860_v48  ;;  %v6938_v3 = vunpack.i.l.bf16 %v10982_v50  ;;  %v14011_v52 = vunpack.i.h.bf16 %v9977_v46  ;;  %v6548_v48 = vunpack.i.l.bf16 %v14001_v8 }
 0xb44   :  { %v3253_v0 = vsel %vm3150_vm11, %v14010_v2, %v2892_v36  ;;  %v14012_v36 = vld [vmem:[#allocation74_spill] sm:$0xff]  ;;  %v14014_v38 = vunpack.i.h.bf16 %v10266_v18  ;;  %v14015_v6 = vunpack.i.h.bf16 %v13990_v56  ;;  %3451 = vmatmul.f32.gmra.mxu2 %v11014_v5 }
 0xb45   :  { %3601 = vmatpush.msrb.mxu0 %v14011_v52  ;;  %3464 = vmatpush.msrb.mxu3 %v3221_v42  ;;  %v14013_v59 = vunpack.i.h.bf16 %v14012_v36  ;;  %v14016_v42 = vunpack.i.h.bf16 %v9797_v23  ;;  %v11047_v52 = vld [vmem:[#allocation4 + $0xd0] sm:$0xff]  ;;  %v14021_v23 = vunpack.i.h.bf16 %v14008_v45 }
 0xb46   :  { %3522 = vmatpush.msrb.mxu1 %v3253_v0  ;;  %v2890_v2 = vsel %vm2341_vm10, %v6803_v61, %v14014_v38  ;;  %v2857_v46 = vsel %vm2341_vm10, %v6608_v62, %v14015_v6  ;;  %v14017_v0 = vld [vmem:[#allocation70_spill] sm:$0xff]  ;;  %v6508_v38 = vunpack.i.l.bf16 %v13985_v29  ;;  %v14020_v62 = vunpack.i.l.bf16 %v14012_v36 }
 0xb47   :  { %v3220_v25 = vsel %vm3150_vm11, %v14013_v59, %v2859_v1  ;;  %3602 = vmatpush.msrb.mxu0 %v14016_v42  ;;  %v14018_v11 = vunpack.i.h.bf16 %v14017_v0  ;;  %v14019_v59 = vunpack.i.h.bf16 %v11012_v16  ;;  %v2889_v42 = vsel %vm2341_vm10, %v6798_v49, %v14021_v23  ;;  %3422 = vmatmul.f32.gmra.mxu1 %v11047_v52 }
 0xb48   :  { %3465 = vmatpush.msrb.mxu3 %v3220_v25  ;;  %v3219_v6 = vsel %vm3150_vm11, %v14020_v62, %v2858_v33  ;;  %v14023_v25 = vunpack.i.h.bf16 %v9799_v32  ;;  %v14024_v36 = vunpack.i.l.bf16 %v14017_v0  ;;  %v14027_v32 = vunpack.i.h.bf16 %v13886_v57 }
 0xb49   :  { %v3252_v1 = vsel %vm3150_vm11, %v14018_v11, %v2891_v9  ;;  %v2908_v61 = vsel %vm2341_vm10, %v6943_v35, %v14019_v59  ;;  %v14022_v9 = vunpack.i.l.bf16 %v13939_v34  ;;  %v6928_v59 = vunpack.i.l.bf16 %v10925_v47 }
 0xb4a   :  { %3523 = vmatpush.msrb.mxu1 %v3252_v1  ;;  %3603 = vmatpush.msrb.mxu0 %v14023_v25  ;;  %v3251_v33 = vsel %vm3150_vm11, %v14024_v36, %v2890_v2  ;;  %v14025_v1 = vunpack.i.h.bf16 %v10982_v50  ;;  %v6448_v34 = vunpack.i.l.bf16 %v13962_v28  ;;  %v14028_v23 = vunpack.i.l.bf16 %v13886_v57  ;;  %v14033_v25 = vld [vmem:[#allocation44_spill] sm:$0xff] }
 0xb4b   :  { %v3269_v11 = vsel %vm3150_vm11, %v14022_v9, %v2908_v61  ;;  %3466 = vmatpush.msrb.mxu3 %v3219_v6  ;;  %v14026_v61 = vunpack.i.h.bf16 %v14001_v8  ;;  %v14029_v2 = vunpack.i.h.bf16 %v13905_v51  ;;  %v14030_v9 = vunpack.i.l.bf16 %v13905_v51  ;;  %v14031_v6 = vld [vmem:[#allocation122_spill] sm:$0xff] }
 0xb4c   :  { %3551 = vmatpush.msra.mxu2 %v3269_v11  ;;  %v2907_v49 = vsel %vm2341_vm10, %v6938_v3, %v14025_v1  ;;  %3524 = vmatpush.msrb.mxu1 %v3251_v33  ;;  %v2855_v0 = vsel %vm2341_vm10, %v14028_v23, %v14027_v32  ;;  %v14032_v11 = vunpack.i.h.bf16 %v14031_v6  ;;  %v14034_v36 = vunpack.i.h.bf16 %v14033_v25  ;;  %v14035_v33 = vld [vmem:[#allocation53_spill] sm:$0xff]  ;;  %v14039_v6 = vld [vmem:[#allocation78_spill] sm:$0xff] }
 0xb4d   :  { %v2856_v62 = vsel %vm2341_vm10, %v6548_v48, %v14026_v61  ;;  %v2854_v3 = vsel %vm2341_vm10, %v14030_v9, %v14029_v2  ;;  %v14036_v1 = vunpack.i.h.bf16 %v14035_v33  ;;  %v14037_v32 = vunpack.i.h.bf16 %v10680_v55 }
 0xb4e   :  { %3604 = vmatpush.msrb.mxu0 %v14032_v11  ;;  %v3218_v48 = vsel %vm3150_vm11, %v14034_v36, %v2857_v46  ;;  %v14038_v2 = vunpack.i.l.bf16 %v14035_v33  ;;  %v14040_v11 = vunpack.i.h.bf16 %v14039_v6  ;;  %v14041_v46 = vunpack.i.h.bf16 %v13985_v29 }
 0xb4f   :  { %v3250_v61 = vsel %vm3150_vm11, %v14036_v1, %v2889_v42  ;;  %v2906_v23 = vsel %vm2341_vm10, %v6933_v19, %v14037_v32  ;;  %3467 = vmatpush.msrb.mxu3 %v3218_v48  ;;  %v6924_v42 = vunpack.i.h.bf16 %v10887_v41  ;;  %v6923_v1 = vunpack.i.l.bf16 %v10887_v41  ;;  %v14042_v19 = vld [vmem:[#allocation101_spill] sm:$0xff] }
 0xb50   :  { %3525 = vmatpush.msrb.mxu1 %v3250_v61  ;;  %v3249_v9 = vsel %vm3150_vm11, %v14038_v2, %v10966_v43  ;;  %v3268_v35 = vsel %vm3150_vm11, %v14040_v11, %v2907_v49  ;;  %v2887_v36 = vsel %vm2341_vm10, %v6508_v38, %v14041_v46  ;;  %v14043_v48 = vunpack.i.h.bf16 %v14042_v19  ;;  %v14048_v46 = vld [vmem:[#allocation49_spill] sm:$0xff] }
 0xb51   :  { %v14044_v61 = vunpack.i.l.bf16 %v14033_v25  ;;  %3552 = vmatpush.msra.mxu2 %v3268_v35  ;;  %v14045_v43 = vunpack.i.h.bf16 %v10925_v47  ;;  %v14046_v38 = vunpack.i.l.bf16 %v14039_v6  ;;  %v14047_v2 = vunpack.i.h.bf16 %v13962_v28 }
 0xb52   :  { %3605 = vmatpush.msrb.mxu0 %v14043_v48  ;;  %3526 = vmatpush.msrb.mxu1 %v3249_v9  ;;  %v6888_v25 = vunpack.i.l.bf16 %v14048_v46  ;;  %v14051_v48 = vld [vmem:[#allocation18_spill] sm:$0xff]  ;;  %v14053_v9 = vld [vmem:[#allocation32_spill] sm:$0xff]  ;;  %v14237_v41 = vunpack.i.h.bf16 %v13986_v53 }
 0xb53   :  { %v3217_v33 = vsel %vm3150_vm11, %v14044_v61, %v2856_v62  ;;  %v2905_v49 = vsel %vm2341_vm10, %v6928_v59, %v14045_v43  ;;  %v3267_v32 = vsel %vm3150_vm11, %v14046_v38, %v2906_v23  ;;  %v2886_v11 = vsel %vm2341_vm10, %v6448_v34, %v14047_v2  ;;  %v14049_v62 = vld [vmem:[#allocation102_spill] sm:$0xff]  ;;  %v14056_v43 = vld [vmem:[#allocation52_spill] sm:$0xff] }
 0xb54   :  { %3468 = vmatpush.msrb.mxu3 %v3217_v33  ;;  %v14050_v35 = vunpack.i.h.bf16 %v14049_v62  ;;  %v14052_v61 = vunpack.i.h.bf16 %v14051_v48  ;;  %v14054_v33 = vunpack.i.h.bf16 %v14053_v9  ;;  %3553 = vmatpush.msra.mxu2 %v3267_v32  ;;  %v14055_v34 = vunpack.i.l.bf16 %v14051_v48  ;;  %v11133_v62 = vld [vmem:[#allocation4 + $0x20] sm:$0xff]  ;;  %v14244_v53 = vld [vmem:[#allocation16_spill] sm:$0xff] }
 0xb55   :  { %v14057_v38 = vunpack.i.h.bf16 %v14056_v43 }
 0xb56   :  { %3606 = vmatpush.msrb.mxu0 %v14050_v35  ;;  %v3216_v59 = vsel %vm3150_vm11, %v14052_v61, %v2855_v0  ;;  %v3248_v6 = vsel %vm3150_vm11, %v14054_v33, %v2887_v36  ;;  %v3215_v23 = vsel %vm3150_vm11, %v14055_v34, %v2854_v3  ;;  %v6884_v35 = vunpack.i.h.bf16 %v10678_v21  ;;  %v14058_v61 = vld [vmem:[#allocation98_spill] sm:$0xff] }
 0xb57   :  { %3469 = vmatpush.msrb.mxu3 %v3216_v59  ;;  %3527 = vmatpush.msrb.mxu1 %v3248_v6  ;;  %v3266_v2 = vsel %vm3150_vm11, %v14057_v38, %v2905_v49  ;;  %v6883_v0 = vunpack.i.l.bf16 %v10678_v21  ;;  %v14059_v19 = vunpack.i.h.bf16 %v14058_v61  ;;  %v14060_v36 = vunpack.i.l.bf16 %v14053_v9  ;;  %v14061_v49 = vld [vmem:[#allocation156_spill] sm:$0xff]  ;;  %v14064_v33 = vld [vmem:[#allocation26_spill] sm:$0xff] }
 0xb58   :  { %3554 = vmatpush.msra.mxu2 %v3266_v2  ;;  %v2904_v3 = vsel %vm2341_vm10, %v6923_v1, %v6924_v42  ;;  %v14062_v48 = vunpack.i.h.bf16 %v14061_v49  ;;  %v14063_v59 = vunpack.i.h.bf16 %v14048_v46  ;;  %v14065_v9 = vunpack.i.h.bf16 %v14064_v33  ;;  %v14070_v2 = vld [vmem:[#allocation140_spill] sm:$0xff] }
 0xb59   :  { %3607 = vmatpush.msrb.mxu0 %v14059_v19  ;;  %v3247_v32 = vsel %vm3150_vm11, %v14060_v36, %v2886_v11  ;;  %3470 = vmatpush.msrb.mxu3 %v3215_v23  ;;  %v14066_v11 = vld [vmem:[#allocation30_spill] sm:$0xff]  ;;  %v14068_v34 = vunpack.i.l.bf16 %v14056_v43  ;;  %v14069_v23 = vunpack.i.h.bf16 %v13829_v26  ;;  %v2902_v38 = vsel %vm2341_vm10, %v6883_v0, %v6884_v35  ;;  %v14072_v61 = vld [vmem:[#allocation12_spill] sm:$0xff]  ;;  %v14079_v0 = vld [vmem:[#allocation141_spill] sm:$0xff] }
 0xb5a   :  { %3528 = vmatpush.msrb.mxu1 %v3247_v32  ;;  %3471 = vmatmul.f32.vlgmr.msrb.gmra.mxu3 %v11133_v62  ;;  %v2903_v19 = vsel %vm2341_vm10, %v6888_v25, %v14063_v59  ;;  %v14067_v6 = vunpack.i.h.bf16 %v14066_v11  ;;  %v14071_v25 = vunpack.i.h.bf16 %v14070_v2  ;;  %v14073_v36 = vunpack.i.h.bf16 %v14072_v61  ;;  %v14074_v32 = vld [vmem:[#allocation22_spill] sm:$0xff] }
 0xb5b   :  { %3608 = vmatpush.msrb.mxu0 %v14062_v48  ;;  %3571 = vmatpush.msra.mxu3 %v14065_v9  ;;  %v3265_v1 = vsel %vm3150_vm11, %v14068_v34, %v2904_v3  ;;  %v14075_v49 = vunpack.i.h.bf16 %v14074_v32  ;;  %v14076_v3 = vunpack.i.h.bf16 %v13834_v30  ;;  %v11172_v26 = vld [vmem:[#allocation4 + $0x38] sm:$0xff]  ;;  %v14077_v48 = vld [vmem:[#allocation139_spill] sm:$0xff]  ;;  %v14080_v33 = vunpack.i.h.bf16 %v14079_v0  ;;  %v11185_v30 = vld [vmem:[#allocation4 + $0x28] sm:$0xff] }
 0xb5c   :  { %3629 = vmatpush.msra.mxu1 %v14067_v6  ;;  %3555 = vmatpush.msra.mxu2 %v3265_v1  ;;  %v14078_v59 = vunpack.i.h.bf16 %v14077_v48  ;;  %v14081_v9 = vunpack.i.l.bf16 %v14074_v32  ;;  %v14082_v6 = vunpack.i.h.bf16 %v13817_v17  ;;  %v14083_v34 = vld [vmem:[#allocation130_spill] sm:$0xff]  ;;  %v11197_v17 = vld [vmem:[#allocation4 + $0x30] sm:$0xff]  ;;  %v14091_v32 = vld [vmem:[#allocation124_spill] sm:$0xff]  ;;  %v14245_v21 = vunpack.i.h.bf16 %v14001_v8 }
 0xb5d   :  { %3609 = vmatpush.msrb.mxu0 %v14069_v23  ;;  %3572 = vmatpush.msra.mxu3 %v14071_v25  ;;  %v3264_v43 = vsel %vm3150_vm11, %v14075_v49, %v2903_v19  ;;  %v11183_v19 = vld [vmem:[#allocation4 + $0x60] sm:$0xff]  ;;  %v14084_v1 = vunpack.i.h.bf16 %v14083_v34  ;;  %v14085_v23 = vld [vmem:[#allocation126_spill] sm:$0xff]  ;;  %v14092_v49 = vunpack.i.h.bf16 %v14091_v32  ;;  %v14095_v48 = vld [vmem:[#allocation149_spill] sm:$0xff]  ;;  %vm4974_vm10 = vcmask 261120  }
 0xb5e   :  { %3630 = vmatpush.msra.mxu1 %v14073_v36  ;;  %3556 = vmatpush.msra.mxu2 %v3264_v43  ;;  %v3263_v11 = vsel %vm3150_vm11, %v14081_v9, %v2902_v38  ;;  %v14086_v2 = vunpack.i.h.bf16 %v14085_v23  ;;  %v14087_v25 = vld [vmem:[#allocation42_spill] sm:$0xff]  ;;  %v14089_v38 = vld [vmem:[#allocation112_spill] sm:$0xff]  ;;  %v14093_v43 = vld [vmem:[#allocation127_spill] sm:$0xff] }
 0xb5f   :  { %3610 = vmatpush.msrb.mxu0 %v14076_v3  ;;  %3573 = vmatpush.msra.mxu3 %v14078_v59  ;;  %v14088_v61 = vunpack.i.h.bf16 %v14087_v25  ;;  %v14090_v36 = vunpack.i.h.bf16 %v14089_v38  ;;  %v14094_v3 = vunpack.i.h.bf16 %v14093_v43  ;;  %v14096_v59 = vunpack.i.h.bf16 %v14095_v48  ;;  %v14097_v0 = vld [vmem:[#allocation113_spill] sm:$0xff]  ;;  %v14099_v9 = vld [vmem:[#allocation111_spill] sm:$0xff]  ;;  %v14109_v32 = vld [vmem:[#allocation56_spill] sm:$0xff] }
 0xb60   :  { %3631 = vmatpush.msra.mxu1 %v14080_v33  ;;  %3557 = vmatpush.msra.mxu2 %v3263_v11  ;;  %v14098_v33 = vunpack.i.h.bf16 %v14097_v0  ;;  %v14100_v11 = vunpack.i.h.bf16 %v14099_v9  ;;  %v14107_v38 = vld [vmem:[#allocation55_spill] sm:$0xff]  ;;  %v14111_v43 = vld [vmem:[#allocation60_spill] sm:$0xff]  ;;  %v14253_v8 = vld [vmem:[#allocation138_spill] sm:$0xff] }
 0xb61   :  { %3611 = vmatpush.msrb.mxu0 %v14082_v6  ;;  %5353 = vmatmul.msk.f32.vlgmr.msra.gmra.mxu2 %vm678_vm6, %v11172_v26  ;;  %v14101_v6 = vld [vmem:[#allocation114_spill] sm:$0xff]  ;;  %v14113_v48 = vld [vmem:[#allocation88_spill] sm:$0xff]  ;;  %v11228_v0 = vld [vmem:[#allocation4 + $0xa0] sm:$0xff] }
 0xb62   :  { %3574 = vmatpush.msra.mxu3 %v14084_v1  ;;  %3632 = vmatpush.msra.mxu1 %v14086_v2  ;;  %v14102_v34 = vunpack.i.h.bf16 %v14101_v6  ;;  %v14103_v1 = vld [vmem:[#allocation148_spill] sm:$0xff]  ;;  %v14117_v6 = vld [vmem:[#allocation58_spill] sm:$0xff] }
 0xb63   :  { %3658 = vmatpush.msrb.mxu2 %v14088_v61  ;;  %3474 = vmatmul.f32.gmra.mxu3 %v11183_v19  ;;  %v14104_v23 = vunpack.i.h.bf16 %v14103_v1  ;;  %v14105_v2 = vld [vmem:[#allocation100_spill] sm:$0xff]  ;;  %v11218_v61 = vld [vmem:[#allocation4 + $0x78] sm:$0xff] }
 0xb64   :  { %3500 = vmatmul.f32.vlgmr.msra.gmra.mxu0 %v11185_v30  ;;  %3575 = vmatpush.msra.mxu3 %v14090_v36  ;;  %v14106_v25 = vunpack.i.h.bf16 %v14105_v2  ;;  %v14108_v36 = vunpack.i.h.bf16 %v14107_v38  ;;  %v14119_v1 = vld [vmem:[#allocation118_spill] sm:$0xff]  ;;  %v14121_v2 = vunpack.i.h.bf16 %v10598_v20  ;;  %v14122_v38 = vld [vmem:[#allocation83_spill] sm:$0xff] }
 0xb65   :  { %3612 = vmatpush.msrb.mxu0 %v14092_v49  ;;  %3633 = vmatpush.msra.mxu1 %v14094_v3  ;;  %v14110_v49 = vunpack.i.h.bf16 %v14109_v32  ;;  %v14112_v3 = vunpack.i.h.bf16 %v14111_v43  ;;  %v14124_v32 = vld [vmem:[#allocation119_spill] sm:$0xff]  ;;  %v14126_v43 = vunpack.i.h.bf16 %v10203_v54 }
 0xb66   :  { %3659 = vmatpush.msrb.mxu2 %v14096_v59  ;;  %3529 = vmatmul.f32.vlgmr.msrb.gmra.mxu1 %v11197_v17  ;;  %v14114_v59 = vunpack.i.h.bf16 %v14113_v48  ;;  %v14127_v20 = vld [vmem:[#allocation147_spill] sm:$0xff] }
 0xb67   :  { %3576 = vmatpush.msra.mxu3 %v14098_v33  ;;  %3613 = vmatpush.msrb.mxu0 %v14100_v11  ;;  %v14115_v33 = vld [vmem:[#allocation50_spill] sm:$0xff]  ;;  %v11234_v11 = vld [vmem:[#allocation4 + $0x68] sm:$0xff] }
 0xb68   :  { %3634 = vmatpush.msra.mxu1 %v14102_v34  ;;  %3660 = vmatpush.msrb.mxu2 %v14104_v23  ;;  %v14116_v9 = vunpack.i.h.bf16 %v14115_v33  ;;  %v14118_v34 = vunpack.i.h.bf16 %v14117_v6  ;;  %v14120_v23 = vunpack.i.h.bf16 %v14119_v1  ;;  %v14135_v1 = vld [vmem:[#allocation144_spill] sm:$0xff] }
 0xb69   :  { %3577 = vmatpush.msra.mxu3 %v14106_v25  ;;  %3614 = vmatpush.msrb.mxu0 %v14108_v36  ;;  %v11243_v25 = vld [vmem:[#allocation4 + $0x70] sm:$0xff]  ;;  %v14123_v36 = vunpack.i.h.bf16 %v10284_v4  ;;  %v11261_v4 = vld [vmem:[#allocation4 + $0xb8] sm:$0xff]  ;;  %v14136_v54 = vunpack.i.h.bf16 %v14135_v1  ;;  %v14149_v1 = vld [vmem:[#allocation115_spill] sm:$0xff] }
 0xb6a   :  { %3635 = vmatpush.msra.mxu1 %v14110_v49  ;;  %3661 = vmatpush.msrb.mxu2 %v14112_v3  ;;  %v14125_v49 = vunpack.i.h.bf16 %v14124_v32  ;;  %v14128_v3 = vld [vmem:[#allocation145_spill] sm:$0xff]  ;;  %v11270_v32 = vld [vmem:[#allocation4 + $0xe0] sm:$0xff] }
 0xb6b   :  { %3578 = vmatpush.msra.mxu3 %v14114_v59  ;;  %5354 = vmatmul.msk.f32.gmra.mxu2 %vm678_vm6, %v11218_v61  ;;  %v14129_v48 = vunpack.i.h.bf16 %v14128_v3  ;;  %v14130_v59 = vld [vmem:[#allocation106_spill] sm:$0xff] }
 0xb6c   :  { %3615 = vmatpush.msrb.mxu0 %v14116_v9  ;;  %3636 = vmatpush.msra.mxu1 %v14118_v34  ;;  %v14131_v33 = vunpack.i.h.bf16 %v14130_v59  ;;  %v14132_v9 = vld [vmem:[#allocation150_spill] sm:$0xff]  ;;  %v14134_v34 = vld [vmem:[#allocation143_spill] sm:$0xff] }
 0xb6d   :  { %3662 = vmatpush.msrb.mxu2 %v14120_v23  ;;  %3477 = vmatmul.f32.gmra.mxu3 %v11228_v0  ;;  %v14133_v6 = vunpack.i.h.bf16 %v14132_v9  ;;  %v14137_v23 = vld [vmem:[#allocation94_spill] sm:$0xff] }
 0xb6e   :  { %3716 = vmatpush.msra.mxu0 %v14121_v2  ;;  %3579 = vmatpush.msra.mxu3 %v14122_v38  ;;  %v14138_v2 = vunpack.i.h.bf16 %v14137_v23  ;;  %v14139_v38 = vld [vmem:[#allocation39_spill] sm:$0xff] }
 0xb6f   :  { %3503 = vmatmul.f32.gmra.mxu0 %v11234_v11  ;;  %3637 = vmatpush.msra.mxu1 %v14123_v36  ;;  %v14140_v36 = vunpack.i.h.bf16 %v14139_v38  ;;  %v14151_v23 = vld [vmem:[#allocation155_spill] sm:$0xff]  ;;  %v14153_v38 = vld [vmem:[#allocation120_spill] sm:$0xff] }
 0xb70   :  { %3663 = vmatpush.msrb.mxu2 %v14125_v49  ;;  %3717 = vmatpush.msra.mxu0 %v14126_v43  ;;  %v14141_v49 = vld [vmem:[#allocation67_spill] sm:$0xff]  ;;  %v11275_v43 = vld [vmem:[#allocation4 + $0xa8] sm:$0xff] }
 0xb71   :  { %3532 = vmatmul.f32.gmra.mxu1 %v11243_v25  ;;  %3580 = vmatpush.msra.mxu3 %v14127_v20  ;;  %v14142_v20 = vld [vmem:[#allocation132_spill] sm:$0xff] }
 0xb72   :  { %3638 = vmatpush.msra.mxu1 %v14129_v48  ;;  %3664 = vmatpush.msrb.mxu2 %v14131_v33  ;;  %v14143_v3 = vunpack.i.h.bf16 %v14142_v20  ;;  %v14144_v48 = vld [vmem:[#allocation46_spill] sm:$0xff]  ;;  %v14146_v33 = vld [vmem:[#allocation131_spill] sm:$0xff]  ;;  %v14156_v20 = vld [vmem:[#allocation116_spill] sm:$0xff] }
 0xb73   :  { %3718 = vmatpush.msra.mxu0 %v14133_v6  ;;  %3581 = vmatpush.msra.mxu3 %v14134_v34  ;;  %v14145_v59 = vunpack.i.h.bf16 %v14144_v48  ;;  %v14147_v9 = vunpack.i.h.bf16 %v14146_v33  ;;  %v11284_v6 = vld [vmem:[#allocation4 + $0xb0] sm:$0xff]  ;;  %v14148_v34 = vld [vmem:[#allocation142_spill] sm:$0xff] }
 0xb74   :  { %3639 = vmatpush.msra.mxu1 %v14136_v54  ;;  %3665 = vmatpush.msrb.mxu2 %v14138_v2  ;;  %v14150_v54 = vunpack.i.h.bf16 %v14149_v1  ;;  %v14152_v2 = vunpack.i.h.bf16 %v14151_v23  ;;  %v14158_v48 = vld [vmem:[#allocation133_spill] sm:$0xff]  ;;  %v14160_v33 = vld [vmem:[#allocation62_spill] sm:$0xff] }
 0xb75   :  { %3719 = vmatpush.msra.mxu0 %v14140_v36  ;;  %5355 = vmatmul.msk.f32.gmra.mxu2 %vm678_vm6, %v11261_v4  ;;  %v14154_v36 = vunpack.i.h.bf16 %v14153_v38  ;;  %v14162_v1 = vld [vmem:[#allocation85_spill] sm:$0xff] }
 0xb76   :  { %3582 = vmatpush.msra.mxu3 %v14141_v49  ;;  %3640 = vmatpush.msra.mxu1 %v14143_v3  ;;  %v14155_v49 = vld [vmem:[#allocation34_spill] sm:$0xff]  ;;  %v14157_v3 = vunpack.i.h.bf16 %v14156_v20  ;;  %v14169_v20 = vld [vmem:[#allocation19_spill] sm:$0xff] }
 0xb77   :  { %3666 = vmatpush.msrb.mxu2 %v14145_v59  ;;  %3720 = vmatpush.msra.mxu0 %v14147_v9  ;;  %v14159_v59 = vunpack.i.h.bf16 %v14158_v48  ;;  %v14161_v9 = vunpack.i.h.bf16 %v14160_v33  ;;  %v14170_v48 = vld [vmem:[#allocation91_spill] sm:$0xff]  ;;  %v14172_v33 = vld [vmem:[#allocation125_spill] sm:$0xff] }
 0xb78   :  { %3480 = vmatmul.f32.gmra.mxu3 %v11270_v32  ;;  %3506 = vmatmul.f32.gmra.mxu0 %v11275_v43 }
 0xb79   :  { %3583 = vmatpush.msra.mxu3 %v14148_v34  ;;  %3641 = vmatpush.msra.mxu1 %v14150_v54  ;;  %v11302_v34 = vld [vmem:[#allocation4 + $0xf8] sm:$0xff]  ;;  %v14163_v54 = vld [vmem:[#allocation103_spill] sm:$0xff] }
 0xb7a   :  { %3667 = vmatpush.msrb.mxu2 %v14152_v2  ;;  %3721 = vmatpush.msra.mxu0 %v14154_v36  ;;  %v14164_v23 = vunpack.i.h.bf16 %v14163_v54  ;;  %v14165_v2 = vld [vmem:[#allocation134_spill] sm:$0xff]  ;;  %v14167_v36 = vld [vmem:[#allocation64_spill] sm:$0xff] }
 0xb7b   :  { %3535 = vmatmul.f32.gmra.mxu1 %v11284_v6  ;;  %3584 = vmatpush.msra.mxu3 %v14155_v49  ;;  %v14166_v38 = vunpack.i.h.bf16 %v14165_v2  ;;  %v14168_v49 = vunpack.i.h.bf16 %v14167_v36  ;;  %v14177_v2 = vld [vmem:[#allocation63_spill] sm:$0xff] }
 0xb7c   :  { %3642 = vmatpush.msra.mxu1 %v14157_v3  ;;  %3668 = vmatpush.msrb.mxu2 %v14159_v59  ;;  %v11314_v3 = vld [vmem:[#allocation4 + $0xe8] sm:$0xff]  ;;  %v14171_v59 = vunpack.i.h.bf16 %v14170_v48  ;;  %v7553_v36 = vld [vmem:[#allocation4] sm:$0xff]  ;;  %v11329_v48 = vld [vmem:[#allocation4 + $0xf0] sm:$0xff] }
 0xb7d   :  { %3722 = vmatpush.msra.mxu0 %v14161_v9  ;;  %3585 = vmatpush.msra.mxu3 %v14162_v1  ;;  %v14173_v9 = vunpack.i.h.bf16 %v14172_v33  ;;  %v14174_v1 = vld [vmem:[#allocation37_spill] sm:$0xff]  ;;  %v14182_v33 = vld [vmem:[#allocation152_spill] sm:$0xff] }
 0xb7e   :  { %3643 = vmatpush.msra.mxu1 %v14164_v23  ;;  %3669 = vmatpush.msrb.mxu2 %v14166_v38  ;;  %v14175_v54 = vunpack.i.h.bf16 %v14174_v1  ;;  %v14176_v23 = vunpack.i.h.bf16 %v10687_v58  ;;  %v14178_v38 = vunpack.i.h.bf16 %v14177_v2  ;;  %v14184_v58 = vld [vmem:[#allocation35_spill] sm:$0xff]  ;;  %v14188_v2 = vunpack.i.h.bf16 %v13920_v44  ;;  %v14197_v44 = vld [vmem:[#allocation14_spill] sm:$0xff] }
 0xb7f   :  { %3723 = vmatpush.msra.mxu0 %v14168_v49  ;;  %5356 = vmatmul.msk.f32.gmra.mxu2 %vm678_vm6, %v11302_v34  ;;  %v14179_v49 = vld [vmem:[#allocation104_spill] sm:$0xff]  ;;  %v14185_v1 = vunpack.i.h.bf16 %v14184_v58  ;;  %v14198_v58 = vunpack.i.h.bf16 %v14197_v44  ;;  %v14219_v44 = vld [vmem:[#allocation54_spill] sm:$0xff] }
 0xb80   :  { %3586 = vmatpush.msra.mxu3 %v14169_v20  ;;  %3644 = vmatpush.msra.mxu1 %v14171_v59  ;;  %v14180_v20 = vunpack.i.h.bf16 %v14179_v49  ;;  %v14181_v59 = vunpack.i.h.bf16 %v13923_v27  ;;  %v14190_v27 = vunpack.i.h.bf16 %v10596_v14  ;;  %v14200_v14 = vld [vmem:[#allocation31_spill] sm:$0xff] }
 0xb81   :  { %3670 = vmatpush.msrb.mxu2 %v14173_v9  ;;  %3724 = vmatpush.msra.mxu0 %v14176_v23  ;;  %v14183_v9 = vunpack.i.h.bf16 %v14182_v33 }
 0xb82   :  { %3687 = vmatpush.msrb.mxu3 %v14175_v54  ;;  %3745 = vmatpush.msrb.mxu1 %v14178_v38  ;;  %v14186_v54 = vld [vmem:[#allocation105_spill] sm:$0xff]  ;;  %v14189_v38 = vunpack.i.h.bf16 %v13922_v10  ;;  %v14199_v10 = vunpack.i.h.bf16 %v13942_v22  ;;  %v14209_v22 = vunpack.i.h.bf16 %v13912_v60  ;;  %v14218_v60 = vunpack.i.h.bf16 %v10680_v55 }
 0xb83   :  { %3509 = vmatmul.f32.gmra.mxu0 %v11314_v3  ;;  %3587 = vmatmul.f32.vlgmr.msra.gmra.mxu3 %v7553_v36  ;;  %v14187_v23 = vunpack.i.h.bf16 %v14186_v54  ;;  %v14191_v36 = vld [vmem:[#allocation99_spill] sm:$0xff]  ;;  %v14228_v55 = vunpack.i.h.bf16 %v10844_v7  ;;  %v14234_v7 = vld [vmem:[#allocation81_spill] sm:$0xff] }
 0xb84   :  { %3671 = vmatpush.msrb.mxu2 %v14180_v20  ;;  %3688 = vmatpush.msrb.mxu3 %v14181_v59  ;;  %v14192_v49 = vunpack.i.h.bf16 %v14191_v36  ;;  %v14193_v20 = vunpack.i.h.bf16 %v13921_v63  ;;  %v14194_v59 = vld [vmem:[#allocation135_spill] sm:$0xff]  ;;  %v14203_v63 = vunpack.i.h.bf16 %v10268_v15  ;;  %v14210_v36 = vunpack.i.h.bf16 %v10514_v24 }
 0xb85   :  { %3725 = vmatpush.msra.mxu0 %v14183_v9  ;;  %3746 = vmatpush.msrb.mxu1 %v14185_v1  ;;  %v14195_v33 = vunpack.i.h.bf16 %v14194_v59  ;;  %v14196_v9 = vunpack.i.h.bf16 %v10608_v31  ;;  %v14201_v1 = vld [vmem:[#allocation65_spill] sm:$0xff]  ;;  %v14206_v31 = vld [vmem:[#allocation92_spill] sm:$0xff]  ;;  %v14212_v15 = vld [vmem:[#allocation75_spill] sm:$0xff]  ;;  %v14220_v24 = vunpack.i.h.bf16 %v14219_v44 }
 0xb86   :  { %3672 = vmatpush.msrb.mxu2 %v14187_v23  ;;  %3538 = vmatmul.f32.gmra.mxu1 %v11329_v48  ;;  %v14202_v54 = vunpack.i.h.bf16 %v14201_v1  ;;  %v14204_v23 = vunpack.i.h.bf16 %v11012_v16  ;;  %v14213_v16 = vld [vmem:[#allocation108_spill] sm:$0xff]  ;;  %v14215_v59 = vld [vmem:[#allocation109_spill] sm:$0xff]  ;;  %v14225_v1 = vunpack.i.h.bf16 %v10925_v47  ;;  %v14231_v47 = vunpack.i.h.bf16 %v13977_v13  ;;  %v3842_v44 = vld [vmem:[#allocation6 + $0xf8] sm:$0xff] }
 0xb87   :  { %3689 = vmatpush.msrb.mxu3 %v14188_v2  ;;  %3726 = vmatpush.msra.mxu0 %v14189_v38  ;;  %v14205_v2 = vld [vmem:[#allocation41_spill] sm:$0xff]  ;;  %v14207_v38 = vld [vmem:[#allocation107_spill] sm:$0xff]  ;;  %v14238_v13 = vunpack.i.h.bf16 %v13976_v12 }
 0xb88   :  { %3747 = vmatpush.msrb.mxu1 %v14190_v27  ;;  %3673 = vmatpush.msrb.mxu2 %v14192_v49  ;;  %v14208_v27 = vunpack.i.h.bf16 %v14207_v38  ;;  %v14211_v49 = vunpack.i.h.bf16 %v10982_v50  ;;  %v14235_v38 = vld [vmem:[#allocation146_spill] sm:$0xff] }
 0xb89   :  { %3690 = vmatpush.msrb.mxu3 %v14193_v20  ;;  %3727 = vmatpush.msra.mxu0 %v14195_v33  ;;  %v14214_v20 = vunpack.i.h.bf16 %v14213_v16  ;;  %v14216_v33 = vunpack.i.h.bf16 %v14215_v59  ;;  %v14252_v16 = vunpack.i.h.bf16 %v13962_v28  ;;  %v3857_v59 = vld [vmem:[#allocation6 + $0x170] sm:$0xff]  ;;  %v3850_v28 = vld [vmem:[#allocation6 + $0x138] sm:$0xff] }
 0xb8a   :  { %3748 = vmatpush.msrb.mxu1 %v14196_v9  ;;  %3782 = vmatpush.msra.mxu2 %v14198_v58  ;;  %v14217_v9 = vunpack.i.h.bf16 %v10520_v37  ;;  %v14221_v58 = vld [vmem:[#allocation47_spill] sm:$0xff] }
 0xb8b   :  { %3691 = vmatpush.msrb.mxu3 %v14199_v10  ;;  %3674 = vmatmul.f32.vlgmr.msrb.gmra.mxu2 %v14200_v14  ;;  %v14222_v50 = vunpack.i.h.bf16 %v14221_v58  ;;  %v14223_v10 = vld [vmem:[#allocation29_spill] sm:$0xff]  ;;  %v14227_v37 = vld [vmem:[#allocation123_spill] sm:$0xff]  ;;  %v3836_v58 = vld [vmem:[#allocation6 + $0xc8] sm:$0xff] }
 0xb8c   :  { %3728 = vmatpush.msra.mxu0 %v14202_v54  ;;  %3749 = vmatpush.msrb.mxu1 %v14203_v63  ;;  %v14224_v14 = vunpack.i.h.bf16 %v14223_v10  ;;  %v14226_v54 = vunpack.i.h.bf16 %v10516_v39  ;;  %v11397_v63 = vpop.f32.mrf.mxu1  ;;  %v14232_v39 = vunpack.i.h.bf16 %v10457_v40  ;;  %v14239_v40 = vunpack.i.h.bf16 %v10266_v18  ;;  %v3833_v10 = vld [vmem:[#allocation6 + $0xb0] sm:$0xff] }
 0xb8d   :  { %3783 = vmatpush.msra.mxu2 %v14204_v23  ;;  %3590 = vmatmul.f32.gmra.mxu3 %v14205_v2  ;;  %v14229_v23 = vld [vmem:[#allocation38_spill] sm:$0xff]  ;;  %v14230_v2 = vld [vmem:[#allocation13_spill] sm:$0xff] }
 0xb8e   :  { %3616 = vmatmul.f32.vlgmr.msrb.gmra.mxu0 %v14206_v31  ;;  %3692 = vmatpush.msrb.mxu3 %v14208_v27  ;;  %v14233_v31 = vunpack.i.h.bf16 %v14048_v46  ;;  %v14236_v27 = vunpack.i.h.bf16 %v14235_v38  ;;  %v14241_v46 = vunpack.i.h.bf16 %v13990_v56  ;;  %v14249_v56 = vunpack.i.h.bf16 %v13886_v57  ;;  %v3856_v57 = vld [vmem:[#allocation6 + $0x168] sm:$0xff] }
 0xb8f   :  { %3729 = vmatpush.msra.mxu0 %v14209_v22  ;;  %3750 = vmatpush.msrb.mxu1 %v14210_v36  ;;  %v14242_v22 = vunpack.i.h.bf16 %v14008_v45  ;;  %v14243_v36 = vld [vmem:[#allocation87_spill] sm:$0xff]  ;;  %v14250_v45 = vunpack.i.h.bf16 %v13985_v29  ;;  %v3853_v29 = vld [vmem:[#allocation6 + $0x150] sm:$0xff]  ;;  %v3812_v38 = vld [vmem:[#allocation6 + $0x8] sm:$0xff] }
 0xb90   :  { %3784 = vmatpush.msra.mxu2 %v14211_v49  ;;  %3645 = vmatmul.f32.vlgmr.msra.gmra.mxu1 %v14212_v15  ;;  %v14248_v49 = vld [vmem:[#allocation71_spill] sm:$0xff]  ;;  %v14251_v15 = vunpack.i.h.bf16 %v13905_v51  ;;  %v3854_v51 = vld [vmem:[#allocation6 + $0x158] sm:$0xff] }
 0xb91   :  { %3693 = vmatpush.msrb.mxu3 %v14214_v20  ;;  %3730 = vmatpush.msra.mxu0 %v14216_v33  ;;  %v3844_v33 = vld [vmem:[#allocation6 + $0x108] sm:$0xff] }
 0xb92   :  { %3751 = vmatpush.msrb.mxu1 %v14217_v9  ;;  %3785 = vmatpush.msra.mxu2 %v14218_v60  ;;  %v3845_v9 = vld [vmem:[#allocation6 + $0x110] sm:$0xff] }
 0xb93   :  { %3694 = vmatpush.msrb.mxu3 %v14220_v24  ;;  %3731 = vmatpush.msra.mxu0 %v14222_v50  ;;  %v3841_v60 = vld [vmem:[#allocation6 + $0xf0] sm:$0xff]  ;;  %v3832_v50 = vld [vmem:[#allocation6 + $0xa8] sm:$0xff] }
 0xb94   :  { %3752 = vmatpush.msrb.mxu1 %v14224_v14  ;;  %3786 = vmatpush.msra.mxu2 %v14225_v1  ;;  %v11429_v12 = vpop.f32.mrf.mxu1  ;;  %v3829_v14 = vld [vmem:[#allocation6 + $0x90] sm:$0xff]  ;;  %v3826_v1 = vld [vmem:[#allocation6 + $0x78] sm:$0xff] }
 0xb95   :  { %3695 = vmatpush.msrb.mxu3 %v14226_v54  ;;  %3677 = vmatmul.f32.gmra.mxu2 %v14227_v37  ;;  %v3827_v54 = vld [vmem:[#allocation6 + $0x80] sm:$0xff] }
 0xb96   :  { %3753 = vmatpush.msrb.mxu1 %v14228_v55  ;;  %3787 = vmatpush.msra.mxu2 %v6924_v42  ;;  %v14240_v42 = vld [vmem:[#allocation153_spill] sm:$0xff]  ;;  %v3823_v37 = vld [vmem:[#allocation6 + $0x60] sm:$0xff]  ;;  %v3824_v55 = vld [vmem:[#allocation6 + $0x68] sm:$0xff] }
 0xb97   :  { %3593 = vmatmul.f32.gmra.mxu3 %v14229_v23  ;;  %3619 = vmatmul.f32.gmra.mxu0 %v14230_v2  ;;  %v3821_v23 = vld [vmem:[#allocation6 + $0x50] sm:$0xff] }
 0xb98   :  { %3696 = vmatpush.msrb.mxu3 %v14231_v47  ;;  %3754 = vmatpush.msrb.mxu1 %v14232_v39  ;;  %v3817_v2 = vld [vmem:[#allocation6 + $0x30] sm:$0xff]  ;;  %v3818_v47 = vld [vmem:[#allocation6 + $0x38] sm:$0xff] }
 0xb99   :  { %3788 = vmatpush.msra.mxu2 %v14233_v31  ;;  %3648 = vmatmul.f32.gmra.mxu1 %v14234_v7  ;;  %v3814_v39 = vld [vmem:[#allocation6 + $0x18] sm:$0xff]  ;;  %v3811_v7 = vld [vmem:[#allocation6] sm:$0xff] }
 0xb9a   :  { %3697 = vmatpush.msrb.mxu3 %v14236_v27  ;;  %3755 = vmatpush.msrb.mxu1 %v14237_v41 }
 0xb9b   :  { %3789 = vmatpush.msra.mxu2 %v6884_v35  ;;  %v14246_v35 = vld [vmem:[#allocation73_spill] sm:$0xff] }
 0xb9c   :  { %3698 = vmatpush.msrb.mxu3 %v14238_v13  ;;  %3756 = vmatpush.msrb.mxu1 %v14239_v40  ;;  %v14247_v18 = vunpack.i.h.bf16 %v14246_v35  ;;  %v11446_v20 = vpop.f32.mrf.mxu1  ;;  %v3852_v40 = vld [vmem:[#allocation6 + $0x148] sm:$0xff] }
 0xb9d   :  { %3680 = vmatmul.f32.gmra.mxu2 %v14240_v42 }
 0xb9e   :  { %3699 = vmatpush.msrb.mxu3 %v14241_v46  ;;  %3757 = vmatpush.msrb.mxu1 %v14242_v22  ;;  %v3849_v22 = vld [vmem:[#allocation6 + $0x130] sm:$0xff] }
 0xb9f   :  { %3596 = vmatmul.f32.gmra.mxu3 %v14243_v36  ;;  %3622 = vmatmul.f32.gmra.mxu0 %v14244_v53  ;;  %v3846_v53 = vld [vmem:[#allocation6 + $0x118] sm:$0xff] }
 0xba0   :  { %3700 = vmatpush.msrb.mxu3 %v14245_v21  ;;  %3758 = vmatpush.msrb.mxu1 %v14247_v18  ;;  %v11473_v21 = vpop.permute.xlu1 %3314 }
 0xba1   :  { %3651 = vmatmul.f32.gmra.mxu1 %v14248_v49  ;;  %v3385_v24 = vpop.f32.mrf.mxu3  ;;  %v3360_v18 = vadd.f32 %v11429_v12, %v11473_v21  ;;  %v11479_v12 = vpop.permute.xlu2 %3319 }
 0xba2   :  { %3701 = vmatpush.msrb.mxu3 %v14249_v56  ;;  %3759 = vmatpush.msrb.mxu1 %v14250_v45  ;;  %v3843_v56 = vld [vmem:[#allocation6 + $0x100] sm:$0xff]  ;;  %v3840_v45 = vld [vmem:[#allocation6 + $0xe8] sm:$0xff] }
 0xba4   :  { %3702 = vmatpush.msrb.mxu3 %v14251_v15  ;;  %3760 = vmatpush.msrb.mxu1 %v14252_v16 }
 0xba5   :  { %3683 = vmatmul.f32.gmra.mxu2 %v11014_v5  ;;  %v3851_v5 = vld [vmem:[#allocation6 + $0x140] sm:$0xff] }
 0xba6   :  { %3891 = vmatpush.msra.mxu3 %v3856_v57  ;;  %3949 = vmatpush.msra.mxu1 %v3857_v59  ;;  %v3837_v59 = vld [vmem:[#allocation6 + $0xd0] sm:$0xff] }
 0xba7   :  { %3703 = vmatmul.f32.vlgmr.msrb.gmra.mxu3 %v11133_v62  ;;  %3625 = vmatmul.f32.gmra.mxu0 %v14253_v8  ;;  %v3848_v62 = vld [vmem:[#allocation6 + $0x128] sm:$0xff] }
 0xba8   :  { %3892 = vmatpush.msra.mxu3 %v3853_v29  ;;  %3950 = vmatpush.msra.mxu1 %v3854_v51 }
 0xba9   :  { %3654 = vmatmul.f32.gmra.mxu1 %v11047_v52  ;;  %v3847_v52 = vld [vmem:[#allocation6 + $0x120] sm:$0xff] }
 0xbaa   :  { %3893 = vmatpush.msra.mxu3 %v3850_v28  ;;  %3951 = vmatpush.msra.mxu1 %v3851_v5 }
 0xbac   :  { %3894 = vmatpush.msra.mxu3 %v3847_v52  ;;  %3952 = vmatpush.msra.mxu1 %v3848_v62  ;;  %v3834_v62 = vld [vmem:[#allocation6 + $0xb8] sm:$0xff] }
 0xbad   :  { %5357 = vmatmul.msk.f32.vlgmr.msra.gmra.mxu2 %vm678_vm6, %v11172_v26  ;;  %v11453_v26 = vpop.f32.mrf.mxu1 }
 0xbae   :  { %3895 = vmatpush.msra.mxu3 %v3844_v33  ;;  %3953 = vmatpush.msra.mxu1 %v3845_v9  ;;  %v3363_v33 = vadd.f32 %v11446_v20, %v11479_v12 }
 0xbaf   :  { %3706 = vmatmul.f32.gmra.mxu3 %v11183_v19  ;;  %3732 = vmatmul.f32.vlgmr.msra.gmra.mxu0 %v11185_v30  ;;  %v3838_v19 = vld [vmem:[#allocation6 + $0xd8] sm:$0xff]  ;;  %v3839_v30 = vld [vmem:[#allocation6 + $0xe0] sm:$0xff] }
 0xbb0   :  { %3896 = vmatpush.msra.mxu3 %v3841_v60  ;;  %3954 = vmatpush.msra.mxu1 %v3842_v44 }
 0xbb1   :  { %3761 = vmatmul.f32.vlgmr.msrb.gmra.mxu1 %v11197_v17  ;;  %v3835_v17 = vld [vmem:[#allocation6 + $0xc0] sm:$0xff] }
 0xbb2   :  { %3897 = vmatpush.msra.mxu3 %v3838_v19  ;;  %3955 = vmatpush.msra.mxu1 %v3839_v30  ;;  %v3831_v19 = vld [vmem:[#allocation6 + $0xa0] sm:$0xff] }
 0xbb4   :  { %3898 = vmatpush.msra.mxu3 %v3835_v17  ;;  %3956 = vmatpush.msra.mxu1 %v3836_v58  ;;  %v3828_v58 = vld [vmem:[#allocation6 + $0x88] sm:$0xff] }
 0xbb5   :  { %5358 = vmatmul.msk.f32.gmra.mxu2 %vm678_vm6, %v11218_v61  ;;  %v3830_v61 = vld [vmem:[#allocation6 + $0x98] sm:$0xff] }
 0xbb6   :  { %3899 = vmatpush.msra.mxu3 %v3832_v50  ;;  %3957 = vmatpush.msra.mxu1 %v3833_v10  ;;  %v3825_v10 = vld [vmem:[#allocation6 + $0x70] sm:$0xff] }
 0xbb7   :  { %3709 = vmatmul.f32.gmra.mxu3 %v11228_v0  ;;  %3735 = vmatmul.f32.gmra.mxu0 %v11234_v11  ;;  %v3414_v0 = vpop.f32.mrf.mxu1  ;;  %v3443_v11 = vpop.f32.mrf.mxu2 }
 0xbb8   :  { %3900 = vmatpush.msra.mxu3 %v3829_v14  ;;  %3958 = vmatpush.msra.mxu1 %v3830_v61 }
 0xbb9   :  { %3764 = vmatmul.f32.gmra.mxu1 %v11243_v25  ;;  %v3388_v25 = vpop.f32.mrf.mxu3 }
 0xbba   :  { %3901 = vmatpush.msra.mxu3 %v3826_v1  ;;  %3959 = vmatpush.msra.mxu1 %v3827_v54  ;;  %v3389_v16 = vadd.f32 %v3388_v25, %v3360_v18  ;;  %v3819_v25 = vld [vmem:[#allocation6 + $0x40] sm:$0xff] }
 0xbbc   :  { %3902 = vmatpush.msra.mxu3 %v3823_v37  ;;  %3960 = vmatpush.msra.mxu1 %v3824_v55 }
 0xbbd   :  { %5359 = vmatmul.msk.f32.gmra.mxu2 %vm678_vm6, %v11261_v4  ;;  %v3820_v4 = vld [vmem:[#allocation6 + $0x48] sm:$0xff] }
 0xbbe   :  { %3903 = vmatpush.msra.mxu3 %v3820_v4  ;;  %3961 = vmatpush.msra.mxu1 %v3821_v23 }
 0xbbf   :  { %3712 = vmatmul.f32.gmra.mxu3 %v11270_v32  ;;  %3738 = vmatmul.f32.gmra.mxu0 %v11275_v43  ;;  %v3417_v32 = vpop.f32.mrf.mxu1  ;;  %v3446_v43 = vpop.f32.mrf.mxu2 }
 0xbc0   :  { %3904 = vmatpush.msra.mxu3 %v3817_v2  ;;  %3962 = vmatpush.msra.mxu1 %v3818_v47  ;;  %v3418_v51 = vadd.f32 %v3417_v32, %v3389_v16  ;;  %v3816_v32 = vld [vmem:[#allocation6 + $0x28] sm:$0xff]  ;;  %v3866_v16 = vld [vmem:[#allocation6 + $0x1b8] sm:$0x3] }
 0xbc1   :  { %3767 = vmatmul.f32.gmra.mxu1 %v11284_v6  ;;  %v3815_v6 = vld [vmem:[#allocation6 + $0x20] sm:$0xff]  ;;  %v3391_v31 = vpop.f32.mrf.mxu3 }
 0xbc2   :  { %3905 = vmatpush.msra.mxu3 %v3814_v39  ;;  %3963 = vmatpush.msra.mxu1 %v3815_v6  ;;  %v3447_v9 = vadd.f32 %v3446_v43, %v3418_v51  ;;  %v3392_v30 = vadd.f32 %v3391_v31, %v3363_v33  ;;  %v3813_v39 = vld [vmem:[#allocation6 + $0x10] sm:$0xff]  ;;  %v3860_v51 = vld [vmem:[#allocation6 + $0x188] sm:$0xff] }
 0xbc4   :  { %3906 = vmatpush.msra.mxu3 %v3811_v7  ;;  %3964 = vmatpush.msra.mxu1 %v3812_v38 }
 0xbc5   :  { %5360 = vmatmul.msk.f32.gmra.mxu2 %vm678_vm6, %v11302_v34  ;;  %v3858_v34 = vld [vmem:[#allocation6 + $0x178] sm:$0xff]  ;;  %vm3881_vm6 = vcmask 1041408  }
 0xbc6   :  { %4007 = vmatpush.msrb.mxu3 %v3858_v34  ;;  %5366 = vmatpush.msk.msrb.mxu2 %vm3881_vm6, %v3866_v16 }
 0xbc7   :  { %3741 = vmatmul.f32.gmra.mxu0 %v11314_v3  ;;  %v11469_v3 = vpop.permute.xlu0 %3309  ;;  %v3420_v27 = vpop.f32.mrf.mxu1 }
 0xbc8   :  { %v3357_v41 = vadd.f32 %v11397_v63, %v11469_v3  ;;  %v3449_v13 = vpop.f32.mrf.mxu2  ;;  %v3421_v14 = vadd.f32 %v3420_v27, %v3392_v30 }
 0xbc9   :  { %3770 = vmatmul.f32.gmra.mxu1 %v11329_v48  ;;  %v3855_v48 = vld [vmem:[#allocation6 + $0x160] sm:$0xff]  ;;  %v3394_v46 = vpop.f32.mrf.mxu3 }
 0xbca   :  { %4008 = vmatpush.msrb.mxu3 %v3855_v48  ;;  %v3386_v42 = vadd.f32 %v3385_v24, %v3357_v41  ;;  %v3450_v55 = vadd.f32 %v3449_v13, %v3421_v14 }
 0xbcc   :  { %4009 = vmatpush.msrb.mxu3 %v3852_v40  ;;  %v3415_v36 = vadd.f32 %v3414_v0, %v3386_v42  ;;  %v3822_v0 = vld [vmem:[#allocation6 + $0x58] sm:$0xff] }
 0xbce   :  { %4010 = vmatpush.msrb.mxu3 %v3849_v22  ;;  %v3444_v49 = vadd.f32 %v3443_v11, %v3415_v36 }
 0xbcf   :  { %v3423_v35 = vpop.f32.mrf.mxu1  ;;  %v11487_v54 = vpop.permute.xlu0 %3324 }
 0xbd0   :  { %4011 = vmatpush.msrb.mxu3 %v3846_v53  ;;  %v11477_v63 = vpop.f32.mrf.mxu2  ;;  %v3366_v37 = vadd.f32 %v11453_v26, %v11487_v54 }
 0xbd2   :  { %4012 = vmatpush.msrb.mxu3 %v3843_v56  ;;  %v3395_v43 = vadd.f32 %v3394_v46, %v3366_v37  ;;  %v3867_v37 = vld [vmem:[#allocation6 + $0x1c0] sm:$0x3] }
 0xbd4   :  { %4013 = vmatpush.msrb.mxu3 %v3840_v45  ;;  %v3424_v31 = vadd.f32 %v3423_v35, %v3395_v43 }
 0xbd6   :  { %4014 = vmatpush.msrb.mxu3 %v3837_v59  ;;  %v3453_v26 = vadd.f32 %v11477_v63, %v3424_v31  ;;  %v3865_v63 = vld [vmem:[#allocation6 + $0x1b0] sm:$0x3]  ;;  %v3863_v59 = vld [vmem:[#allocation6 + $0x1a0] sm:$0xff] }
 0xbd7   :  { %5361 = vmatpush.msk.msrb.mxu0 %vm3881_vm6, %v3865_v63  ;;  %3992 = vmatpush.msrb.mxu2 %v3863_v59 }
 0xbd8   :  { %4015 = vmatpush.msrb.mxu3 %v3834_v62 }
 0xbd9   :  { %3993 = vmatpush.msrb.mxu2 %v3860_v51 }
 0xbda   :  { %4016 = vmatpush.msrb.mxu3 %v3831_v19 }
 0xbdc   :  { %4017 = vmatpush.msrb.mxu3 %v3828_v58 }
 0xbdd   :  { %v3472_v15 = vpop.f32.mrf.mxu3 }
 0xbde   :  { %v3473_v8 = vadd.f32 %v3472_v15, %v3444_v49  ;;  %4018 = vmatpush.msrb.mxu3 %v3825_v10 }
 0xbe0   :  { %4019 = vmatpush.msrb.mxu3 %v3822_v0 }
 0xbe1   :  { %v3501_v57 = vpop.f32.mrf.mxu0 }
 0xbe2   :  { %v3502_v29 = vadd.f32 %v3501_v57, %v3473_v8  ;;  %4020 = vmatpush.msrb.mxu3 %v3819_v25  ;;  %v3862_v57 = vld [vmem:[#allocation6 + $0x198] sm:$0xff] }
 0xbe3   :  { %v3530_v28 = vpop.f32.mrf.mxu1  ;;  %3934 = vmatpush.msrb.mxu0 %v3862_v57 }
 0xbe4   :  { %v3531_v5 = vadd.f32 %v3530_v28, %v3502_v29  ;;  %v3559_v52 = vpop.f32.mrf.mxu2  ;;  %4021 = vmatpush.msrb.mxu3 %v3816_v32  ;;  %v3859_v29 = vld [vmem:[#allocation6 + $0x180] sm:$0xff] }
 0xbe5   :  { %3935 = vmatpush.msrb.mxu0 %v3859_v29 }
 0xbe6   :  { %v3560_v60 = vadd.f32 %v3559_v52, %v3531_v5  ;;  %v3475_v44 = vpop.f32.mrf.mxu3  ;;  %4022 = vmatpush.msrb.mxu3 %v3813_v39 }
 0xbe7   :  { %v3476_v24 = vadd.f32 %v3475_v44, %v3447_v9  ;;  %5371 = vmatpush.msk.msra.mxu0 %vm3881_vm6, %v3867_v37 }
 0xbe8   :  { %v11483_v17 = vmax.f32 %v3560_v60, 0.0 }
 0xbea   :  { %3907 = vmatmul.f32.vlgmr.msra.gmra.mxu3 %v11483_v17  ;;  %3965 = vmatmul.f32.vlgmr.msra.gmra.mxu1 %v11483_v17 }
 0xbec   :  { %v3504_v50 = vpop.f32.mrf.mxu0 }
 0xbed   :  { %v3505_v61 = vadd.f32 %v3504_v50, %v3476_v24 }
 0xbee   :  { %v3533_v20 = vpop.f32.mrf.mxu1  ;;  %v3562_v1 = vpop.f32.mrf.mxu2 }
 0xbef   :  { %v3534_v11 = vadd.f32 %v3533_v20, %v3505_v61 }
 0xbf0   :  { %v3478_v23 = vpop.f32.mrf.mxu3 }
 0xbf1   :  { %v3563_v4 = vadd.f32 %v3562_v1, %v3534_v11  ;;  %v3479_v47 = vadd.f32 %v3478_v23, %v3450_v55  ;;  %v3864_v55 = vld [vmem:[#allocation6 + $0x1a8] sm:$0xff] }
 0xbf2   :  { %4050 = vmatpush.msra.mxu0 %v3864_v55 }
 0xbf3   :  { %v3805_v2 = vmax.f32 %v3563_v4, 0.0 }
 0xbf5   :  { %3910 = vmatmul.f32.gmra.mxu3 %v3805_v2  ;;  %3968 = vmatmul.f32.gmra.mxu1 %v3805_v2  ;;  %v3507_v6 = vpop.f32.mrf.mxu0 }
 0xbf6   :  { %v3508_v7 = vadd.f32 %v3507_v6, %v3479_v47 }
 0xbf8   :  { %v3536_v38 = vpop.f32.mrf.mxu1  ;;  %v3565_v27 = vpop.f32.mrf.mxu2 }
 0xbf9   :  { %v3537_v34 = vadd.f32 %v3536_v38, %v3508_v7 }
 0xbfb   :  { %v3566_v41 = vadd.f32 %v3565_v27, %v3537_v34  ;;  %v3481_v13 = vpop.f32.mrf.mxu3 }
 0xbfc   :  { %v3482_v40 = vadd.f32 %v3481_v13, %v3453_v26 }
 0xbfd   :  { %v3807_v48 = vmax.f32 %v3566_v41, 0.0 }
 0xbff   :  { %3913 = vmatmul.f32.gmra.mxu3 %v3807_v48  ;;  %3971 = vmatmul.f32.gmra.mxu1 %v3807_v48 }
 0xc00   :  { %v3510_v42 = vpop.f32.mrf.mxu0 }
 0xc01   :  { %v3511_v46 = vadd.f32 %v3510_v42, %v3482_v40 }
 0xc02   :  { %v3568_v36 = vpop.f32.mrf.mxu2 }
 0xc03   :  { %v3539_v22 = vpop.f32.mrf.mxu1 }
 0xc04   :  { %v3540_v53 = vadd.f32 %v3539_v22, %v3511_v46 }
 0xc06   :  { %v3569_v18 = vadd.f32 %v3568_v36, %v3540_v53  ;;  %v3588_v49 = vpop.f32.mrf.mxu3 }
 0xc07   :  { %v3589_v33 = vadd.f32 %v3588_v49, %v11469_v3 }
 0xc08   :  { %v3809_v35 = vmax.f32 %v3569_v18, 0.0 }
 0xc0a   :  { %3916 = vmatmul.f32.gmra.mxu3 %v3809_v35  ;;  %3974 = vmatmul.f32.gmra.mxu1 %v3809_v35 }
 0xc0b   :  { %v3617_v56 = vpop.f32.mrf.mxu0 }
 0xc0c   :  { %v3618_v44 = vadd.f32 %v3617_v56, %v3589_v33 }
 0xc0d   :  { %v3646_v45 = vpop.f32.mrf.mxu1 }
 0xc0e   :  { %v3675_v15 = vpop.f32.mrf.mxu2 }
 0xc10   :  { %v3591_v8 = vpop.f32.mrf.mxu3 }
 0xc11   :  { %v3592_v24 = vadd.f32 %v3591_v8, %v11473_v21  ;;  %v3861_v21 = vld [vmem:[#allocation6 + $0x190] sm:$0xff] }
 0xc12   :  { %4023 = vmatmul.f32.vlgmr.msrb.gmra.mxu3 %v11483_v17  ;;  %v3647_v17 = vadd.f32 %v3646_v45, %v3618_v44  ;;  %4051 = vmatpush.msra.mxu0 %v3861_v21 }
 0xc14   :  { %v3620_v28 = vpop.f32.mrf.mxu0  ;;  %v3676_v10 = vadd.f32 %v3675_v15, %v3647_v17 }
 0xc15   :  { %v3621_v14 = vadd.f32 %v3620_v28, %v3592_v24 }
 0xc16   :  { %v3649_v5 = vpop.f32.mrf.mxu1 }
 0xc17   :  { %v3650_v11 = vadd.f32 %v3649_v5, %v3621_v14 }
 0xc18   :  { %v3678_v52 = vpop.f32.mrf.mxu2 }
 0xc19   :  { %v3679_v32 = vadd.f32 %v3678_v52, %v3650_v11 }
 0xc1a   :  { %v3594_v62 = vpop.f32.mrf.mxu3  ;;  %4026 = vmatmul.f32.gmra.mxu3 %v3805_v2 }
 0xc1b   :  { %v3595_v3 = vadd.f32 %v3594_v62, %v11479_v12 }
 0xc1c   :  { %v3623_v9 = vpop.f32.mrf.mxu0 }
 0xc1d   :  { %v3624_v43 = vadd.f32 %v3623_v9, %v3595_v3 }
 0xc1e   :  { %v3652_v60 = vpop.f32.mrf.mxu1 }
 0xc1f   :  { %v3653_v12 = vadd.f32 %v3652_v60, %v3624_v43 }
 0xc20   :  { %v3681_v19 = vpop.f32.mrf.mxu2 }
 0xc21   :  { %v3682_v41 = vadd.f32 %v3681_v19, %v3653_v12 }
 0xc22   :  { %v3597_v30 = vpop.f32.mrf.mxu3  ;;  %4029 = vmatmul.f32.gmra.mxu3 %v3807_v48 }
 0xc23   :  { %v3598_v7 = vadd.f32 %v3597_v30, %v11487_v54 }
 0xc24   :  { %v3626_v58 = vpop.f32.mrf.mxu0 }
 0xc25   :  { %v3627_v13 = vadd.f32 %v3626_v58, %v3598_v7 }
 0xc26   :  { %v3655_v50 = vpop.f32.mrf.mxu1 }
 0xc27   :  { %v3656_v36 = vadd.f32 %v3655_v50, %v3627_v13 }
 0xc28   :  { %v3684_v61 = vpop.f32.mrf.mxu2 }
 0xc2a   :  { %v3704_v20 = vpop.f32.mrf.mxu3  ;;  %4032 = vmatmul.f32.gmra.mxu3 %v3809_v35  ;;  %v3685_v35 = vadd.f32 %v3684_v61, %v3656_v36 }
 0xc2b   :  { %v3705_v0 = vadd.f32 %v3704_v20, %v3676_v10 }
 0xc2c   :  { %v3733_v1 = vpop.f32.mrf.mxu0 }
 0xc2d   :  { %v3734_v25 = vadd.f32 %v3733_v1, %v3705_v0 }
 0xc2e   :  { %v3762_v4 = vpop.f32.mrf.mxu1 }
 0xc2f   :  { %v3763_v23 = vadd.f32 %v3762_v4, %v3734_v25 }
 0xc30   :  { %v3791_v2 = vpop.f32.mrf.mxu2 }
 0xc31   :  { %v3792_v47 = vadd.f32 %v3791_v2, %v3763_v23 }
 0xc32   :  { %v3707_v39 = vpop.f32.mrf.mxu3 }
 0xc33   :  { %v3708_v6 = vadd.f32 %v3707_v39, %v3679_v32  ;;  %v3804_v31 = vmax.f32 %v3792_v47, 0.0 }
 0xc34   :  { %v3736_v38 = vpop.f32.mrf.mxu0 }
 0xc35   :  { %v3737_v34 = vadd.f32 %v3736_v38, %v3708_v6  ;;  %5362 = vmatmul.msk.f32.vlgmr.msrb.gmra.mxu0 %vm3868_vm9, %v3804_v31  ;;  %5367 = vmatmul.msk.f32.vlgmr.msrb.gmra.mxu2 %vm3868_vm9, %v3804_v31 }
 0xc36   :  { %v3765_v27 = vpop.f32.mrf.mxu1 }
 0xc37   :  { %v3766_v26 = vadd.f32 %v3765_v27, %v3737_v34 }
 0xc38   :  { %v3794_v48 = vpop.f32.mrf.mxu2 }
 0xc39   :  { %v3795_v40 = vadd.f32 %v3794_v48, %v3766_v26 }
 0xc3a   :  { %v3710_v42 = vpop.f32.mrf.mxu3 }
 0xc3b   :  { %v3711_v46 = vadd.f32 %v3710_v42, %v3682_v41  ;;  %v3806_v22 = vmax.f32 %v3795_v40, 0.0 }
 0xc3c   :  { %v3739_v53 = vpop.f32.mrf.mxu0 }
 0xc3d   :  { %v3740_v18 = vadd.f32 %v3739_v53, %v3711_v46  ;;  %5363 = vmatmul.msk.f32.gmra.mxu0 %vm3868_vm9, %v3806_v22  ;;  %5368 = vmatmul.msk.f32.gmra.mxu2 %vm3868_vm9, %v3806_v22 }
 0xc3e   :  { %v3768_v54 = vpop.f32.mrf.mxu1 }
 0xc3f   :  { %v3769_v49 = vadd.f32 %v3768_v54, %v3740_v18 }
 0xc40   :  { %v3797_v56 = vpop.f32.mrf.mxu2 }
 0xc41   :  { %v3798_v45 = vadd.f32 %v3797_v56, %v3769_v49 }
 0xc42   :  { %v3713_v15 = vpop.f32.mrf.mxu3 }
 0xc43   :  { %v3714_v63 = vadd.f32 %v3713_v15, %v3685_v35  ;;  %v3808_v16 = vmax.f32 %v3798_v45, 0.0 }
 0xc44   :  { %v3742_v8 = vpop.f32.mrf.mxu0 }
 0xc45   :  { %v3743_v57 = vadd.f32 %v3742_v8, %v3714_v63  ;;  %5364 = vmatmul.msk.f32.gmra.mxu0 %vm3868_vm9, %v3808_v16  ;;  %5369 = vmatmul.msk.f32.gmra.mxu2 %vm3868_vm9, %v3808_v16 }
 0xc46   :  { %v3771_v59 = vpop.f32.mrf.mxu1 }
 0xc47   :  { %v3772_v29 = vadd.f32 %v3771_v59, %v3743_v57 }
 0xc48   :  { %v3800_v51 = vpop.f32.mrf.mxu2 }
 0xc49   :  { %v3801_v28 = vadd.f32 %v3800_v51, %v3772_v29 }
 0xc4b   :  { %v3810_v5 = vmax.f32 %v3801_v28, 0.0 }
 0xc4d   :  { %5365 = vmatmul.msk.f32.gmra.mxu0 %vm3868_vm9, %v3810_v5  ;;  %5370 = vmatmul.msk.f32.gmra.mxu2 %vm3868_vm9, %v3810_v5 }
 0xc55   :  { %5372 = vmatmul.msk.f32.vlgmr.msra.gmra.mxu0 %vm3868_vm9, %v3804_v31 }
 0xc5d   :  { %5373 = vmatmul.msk.f32.gmra.mxu0 %vm3868_vm9, %v3806_v22 }
 0xc65   :  { %5374 = vmatmul.msk.f32.gmra.mxu0 %vm3868_vm9, %v3808_v16 }
 0xc67   :  { %v3966_v62 = vpop.f32.mrf.mxu1 }
 0xc6d   :  { %5375 = vmatmul.msk.f32.gmra.mxu0 %vm3868_vm9, %v3810_v5  ;;  %v3908_v33 = vpop.f32.mrf.mxu3 }
 0xc72   :  { %v3969_v17 = vpop.f32.mrf.mxu1 }
 0xc78   :  { %v3911_v50 = vpop.f32.mrf.mxu3 }
 0xc7c   :  { %v3972_v20 = vpop.f32.mrf.mxu1 }
 0xc82   :  { %v3914_v3 = vpop.f32.mrf.mxu3 }
 0xc87   :  { %v3975_v55 = vpop.f32.mrf.mxu1 }
 0xc8d   :  { %v3917_v32 = vpop.f32.mrf.mxu3 }
 0xc95   :  { %v4024_v31 = vpop.f32.mrf.mxu3 }
 0xc9d   :  { %v4027_v27 = vpop.f32.mrf.mxu3 }
 0xca5   :  { %v4030_v35 = vpop.f32.mrf.mxu3 }
 0xcad   :  { %v4033_v16 = vpop.f32.mrf.mxu3 }
 0xcb2   :  { %v3937_v52 = vpop.f32.mrf.mxu0 }
 0xcb3   :  { %v11512_v60 = vadd.f32 %v3937_v52, %v3908_v33 }
 0xcb8   :  { %v3995_v9 = vpop.f32.mrf.mxu2 }
 0xcb9   :  { %v11514_v44 = vadd.f32 %v3995_v9, %v3966_v62 }
 0xcba   :  { %v3940_v24 = vpop.f32.mrf.mxu0 }
 0xcbb   :  { %14254 = vst [vmem:[#allocation27_spill] sm:$0xff] %v11514_v44  ;;  %v6960_v19 = vpack.i.bf16 %v11514_v44, %v11512_v60  ;;  %v11532_v10 = vadd.f32 %v3940_v24, %v3911_v50 }
 0xcbd   :  { %6961 = vrot.lane.b32.xlu0 %v6960_v19, %s7679_s4  ;;  %6956 = vrot.lane.b32.xlu2 %v6960_v19, %s7670_s29 }
 0xcbe   :  { %6951 = vrot.lane.b32.xlu1 %v6960_v19, %s7669_s27 }
 0xcc0   :  { %v3998_v30 = vpop.f32.mrf.mxu2 }
 0xcc1   :  { %v11530_v58 = vadd.f32 %v3998_v30, %v3969_v17 }
 0xcc2   :  { %v3943_v0 = vpop.f32.mrf.mxu0 }
 0xcc3   :  { %14255 = vst [vmem:[#allocation45_spill] sm:$0xff] %v11530_v58  ;;  %v7015_v14 = vpack.i.bf16 %v11530_v58, %v11532_v10  ;;  %v11550_v1 = vadd.f32 %v3943_v0, %v3914_v3 }
 0xcc5   :  { %6976 = vrot.lane.b32.xlu0 %v6960_v19, %s7680_s9  ;;  %6971 = vrot.lane.b32.xlu2 %v6960_v19, %s7678_s6 }
 0xcc6   :  { %6966 = vrot.lane.b32.xlu1 %v6960_v19, %s7668_s21 }
 0xcc8   :  { %v4001_v61 = vpop.f32.mrf.mxu2 }
 0xcc9   :  { %v11548_v11 = vadd.f32 %v4001_v61, %v3972_v20 }
 0xcca   :  { %v3946_v4 = vpop.f32.mrf.mxu0 }
 0xccb   :  { %14256 = vst [vmem:[#allocation80_spill] sm:$0xff] %v11548_v11  ;;  %v7080_v25 = vpack.i.bf16 %v11548_v11, %v11550_v1  ;;  %v11570_v43 = vadd.f32 %v3946_v4, %v3917_v32 }
 0xccd   :  { %6991 = vrot.lane.b32.xlu0 %v6960_v19, %s7683_s19  ;;  %6986 = vrot.lane.b32.xlu2 %v6960_v19, %s7672_s13 }
 0xcce   :  { %6981 = vrot.lane.b32.xlu1 %v6960_v19, %s7677_s7 }
 0xcd0   :  { %v4004_v37 = vpop.f32.mrf.mxu2 }
 0xcd1   :  { %v11566_v23 = vadd.f32 %v4004_v37, %v3975_v55 }
 0xcd2   :  { %v4053_v6 = vpop.f32.mrf.mxu0 }
 0xcd3   :  { %14257 = vst [vmem:[#allocation90_spill] sm:$0xff] %v11566_v23  ;;  %v7140_v2 = vpack.i.bf16 %v11566_v23, %v11570_v43  ;;  %v4054_v40 = vadd.f32 %v4053_v6, %v4024_v31 }
 0xcd5   :  { %7006 = vrot.lane.b32.xlu0 %v6960_v19, %s7685_s24  ;;  %7001 = vrot.lane.b32.xlu2 %v6960_v19, %s7682_s2 }
 0xcd6   :  { %6996 = vrot.lane.b32.xlu1 %v6960_v19, %s7674_s3 }
 0xcda   :  { %v4056_v34 = vpop.f32.mrf.mxu0 }
 0xcdb   :  { %v4057_v26 = vadd.f32 %v4056_v34, %v4027_v27 }
 0xcdd   :  { %7016 = vrot.lane.b32.xlu0 %v7015_v14, %s7670_s29  ;;  %7011 = vrot.lane.b32.xlu2 %v7015_v14, %s7669_s27  ;;  %v7195_v42 = vpack.i.bf16 %v4057_v26, %v4054_v40 }
 0xcde   :  { %7021 = vrot.lane.b32.xlu1 %v7015_v14, %s7679_s4 }
 0xce2   :  { %v4059_v49 = vpop.f32.mrf.mxu0 }
 0xce3   :  { %v4060_v51 = vadd.f32 %v4059_v49, %v4030_v35 }
 0xce5   :  { %7031 = vrot.lane.b32.xlu0 %v7015_v14, %s7678_s6  ;;  %7026 = vrot.lane.b32.xlu2 %v7015_v14, %s7668_s21 }
 0xce6   :  { %7036 = vrot.lane.b32.xlu1 %v7015_v14, %s7680_s9 }
 0xcea   :  { %v4062_v63 = vpop.f32.mrf.mxu0 }
 0xceb   :  { %v4063_v8 = vadd.f32 %v4062_v63, %v4033_v16 }
 0xced   :  { %7046 = vrot.lane.b32.xlu0 %v7015_v14, %s7672_s13  ;;  %7041 = vrot.lane.b32.xlu2 %v7015_v14, %s7677_s7  ;;  %v7260_v28 = vpack.i.bf16 %v4063_v8, %v4060_v51 }
 0xcee   :  { %7051 = vrot.lane.b32.xlu1 %v7015_v14, %s7683_s19 }
 0xcf5   :  { %7061 = vrot.lane.b32.xlu0 %v7015_v14, %s7682_s2  ;;  %7056 = vrot.lane.b32.xlu2 %v7015_v14, %s7674_s3 }
 0xcf6   :  { %7066 = vrot.lane.b32.xlu1 %v7015_v14, %s7685_s24 }
 0xcfd   :  { %7081 = vrot.lane.b32.xlu2 %v7080_v25, %s7679_s4  ;;  %7071 = vrot.lane.b32.xlu0 %v7080_v25, %s7669_s27 }
 0xcfe   :  { %7076 = vrot.lane.b32.xlu1 %v7080_v25, %s7670_s29 }
 0xd05   :  { %7096 = vrot.lane.b32.xlu2 %v7080_v25, %s7680_s9  ;;  %7086 = vrot.lane.b32.xlu0 %v7080_v25, %s7668_s21 }
 0xd06   :  { %7091 = vrot.lane.b32.xlu1 %v7080_v25, %s7678_s6 }
 0xd0d   :  { %7111 = vrot.lane.b32.xlu2 %v7080_v25, %s7683_s19  ;;  %7101 = vrot.lane.b32.xlu0 %v7080_v25, %s7677_s7 }
 0xd0e   :  { %7106 = vrot.lane.b32.xlu1 %v7080_v25, %s7672_s13 }
 0xd15   :  { %7126 = vrot.lane.b32.xlu2 %v7080_v25, %s7685_s24  ;;  %7116 = vrot.lane.b32.xlu0 %v7080_v25, %s7674_s3 }
 0xd16   :  { %7121 = vrot.lane.b32.xlu1 %v7080_v25, %s7682_s2 }
 0xd17   :  { %v11568_v21 = vpop.permute.xlu2 %6956 }
 0xd1d   :  { %7141 = vrot.lane.b32.xlu0 %v7140_v2, %s7679_s4  ;;  %7136 = vrot.lane.b32.xlu2 %v7140_v2, %s7670_s29 }
 0xd1e   :  { %7131 = vrot.lane.b32.xlu1 %v7140_v2, %s7669_s27 }
 0xd1f   :  { %v11577_v47 = vpop.permute.xlu2 %6971 }
 0xd25   :  { %7156 = vrot.lane.b32.xlu0 %v7140_v2, %s7680_s9  ;;  %7151 = vrot.lane.b32.xlu2 %v7140_v2, %s7678_s6 }
 0xd26   :  { %7146 = vrot.lane.b32.xlu1 %v7140_v2, %s7668_s21 }
 0xd27   :  { %v11582_v39 = vpop.permute.xlu2 %6986 }
 0xd2d   :  { %7171 = vrot.lane.b32.xlu0 %v7140_v2, %s7683_s19  ;;  %7166 = vrot.lane.b32.xlu2 %v7140_v2, %s7672_s13 }
 0xd2e   :  { %7161 = vrot.lane.b32.xlu1 %v7140_v2, %s7677_s7 }
 0xd2f   :  { %v11587_v12 = vpop.permute.xlu0 %6961  ;;  %v11589_v7 = vpop.permute.xlu2 %7001 }
 0xd30   :  { %v11591_v38 = vpop.permute.xlu1 %6951 }
 0xd35   :  { %7186 = vrot.lane.b32.xlu0 %v7140_v2, %s7685_s24  ;;  %7181 = vrot.lane.b32.xlu2 %v7140_v2, %s7682_s2 }
 0xd36   :  { %7176 = vrot.lane.b32.xlu1 %v7140_v2, %s7674_s3 }
 0xd37   :  { %v11596_v41 = vpop.permute.xlu0 %6976  ;;  %v11598_v13 = vpop.permute.xlu2 %7011 }
 0xd38   :  { %v11600_v48 = vpop.permute.xlu1 %6966 }
 0xd3d   :  { %7196 = vrot.lane.b32.xlu0 %v7195_v42, %s7670_s29  ;;  %7201 = vrot.lane.b32.xlu2 %v7195_v42, %s7679_s4 }
 0xd3e   :  { %7191 = vrot.lane.b32.xlu1 %v7195_v42, %s7669_s27 }
 0xd3f   :  { %v11605_v46 = vpop.permute.xlu0 %6991  ;;  %v11607_v22 = vpop.permute.xlu2 %7026 }
 0xd40   :  { %v11609_v36 = vpop.permute.xlu1 %6981 }
 0xd45   :  { %7211 = vrot.lane.b32.xlu0 %v7195_v42, %s7678_s6  ;;  %7216 = vrot.lane.b32.xlu2 %v7195_v42, %s7680_s9 }
 0xd46   :  { %7206 = vrot.lane.b32.xlu1 %v7195_v42, %s7668_s21 }
 0xd47   :  { %v11614_v53 = vpop.permute.xlu0 %7006  ;;  %v11616_v18 = vpop.permute.xlu2 %7041 }
 0xd48   :  { %v11618_v54 = vpop.permute.xlu1 %6996 }
 0xd4d   :  { %7226 = vrot.lane.b32.xlu0 %v7195_v42, %s7672_s13  ;;  %7231 = vrot.lane.b32.xlu2 %v7195_v42, %s7683_s19 }
 0xd4e   :  { %7221 = vrot.lane.b32.xlu1 %v7195_v42, %s7677_s7 }
 0xd4f   :  { %v11623_v56 = vpop.permute.xlu0 %7016  ;;  %v11625_v45 = vpop.permute.xlu2 %7056 }
 0xd50   :  { %v11627_v15 = vpop.permute.xlu1 %7021 }
 0xd51   :  { %v11689_v35 = vunpack.i.h.bf16 %v11627_v15  ;;  %v7023_v63 = vunpack.i.l.bf16 %v11627_v15  ;;  %v7003_v15 = vunpack.i.l.bf16 %v11589_v7 }
 0xd55   :  { %7241 = vrot.lane.b32.xlu0 %v7195_v42, %s7682_s2  ;;  %7246 = vrot.lane.b32.xlu2 %v7195_v42, %s7685_s24 }
 0xd56   :  { %7236 = vrot.lane.b32.xlu1 %v7195_v42, %s7674_s3 }
 0xd57   :  { %v11632_v57 = vpop.permute.xlu0 %7031  ;;  %v7082_v59 = vpop.permute.xlu2 %7081 }
 0xd58   :  { %v11634_v29 = vpop.permute.xlu1 %7036  ;;  %v11678_v4 = vunpack.i.h.bf16 %v7082_v59  ;;  %v7083_v32 = vunpack.i.l.bf16 %v7082_v59 }
 0xd5d   :  { %7261 = vrot.lane.b32.xlu0 %v7260_v28, %s7679_s4  ;;  %7251 = vrot.lane.b32.xlu2 %v7260_v28, %s7669_s27 }
 0xd5e   :  { %7256 = vrot.lane.b32.xlu1 %v7260_v28, %s7670_s29 }
 0xd5f   :  { %v11639_v5 = vpop.permute.xlu0 %7046  ;;  %v11641_v52 = vpop.permute.xlu2 %7096 }
 0xd60   :  { %v11643_v62 = vpop.permute.xlu1 %7051 }
 0xd65   :  { %7276 = vrot.lane.b32.xlu0 %v7260_v28, %s7680_s9  ;;  %7266 = vrot.lane.b32.xlu2 %v7260_v28, %s7668_s21  ;;  %s7686_s9 = smov 103  }
 0xd66   :  { %7271 = vrot.lane.b32.xlu1 %v7260_v28, %s7678_s6 }
 0xd67   :  { %v7062_v33 = vpop.permute.xlu0 %7061  ;;  %v11648_v9 = vpop.permute.xlu2 %7111 }
 0xd68   :  { %v11650_v19 = vpop.permute.xlu1 %7066  ;;  %v11692_v16 = vunpack.i.h.bf16 %v7062_v33  ;;  %v7063_v8 = vunpack.i.l.bf16 %v7062_v33  ;;  %v4147_v33 = vsel %vm2066_vm13, %v7083_v32, %v11678_v4 }
 0xd6d   :  { %7291 = vrot.lane.b32.xlu0 %v7260_v28, %s7683_s19  ;;  %7281 = vrot.lane.b32.xlu2 %v7260_v28, %s7677_s7 }
 0xd6e   :  { %7286 = vrot.lane.b32.xlu1 %v7260_v28, %s7672_s13 }
 0xd6f   :  { %v11655_v30 = vpop.permute.xlu2 %7126  ;;  %v11657_v17 = vpop.permute.xlu0 %7071 }
 0xd70   :  { %v11659_v24 = vpop.permute.xlu1 %7076 }
 0xd71   :  { %v11721_v32 = vunpack.i.h.bf16 %v11659_v24 }
 0xd73   :  { %14261 = vst [vmem:[#allocation158_spill] sm:$0xff] %v11721_v32 }
 0xd75   :  { %7306 = vrot.lane.b32.xlu0 %v7260_v28, %s7685_s24  ;;  %7296 = vrot.lane.b32.xlu2 %v7260_v28, %s7674_s3 }
 0xd76   :  { %7301 = vrot.lane.b32.xlu1 %v7260_v28, %s7682_s2  ;;  %v11699_v28 = vunpack.i.h.bf16 %v11587_v12 }
 0xd77   :  { %v11664_v50 = vpop.permute.xlu0 %7086  ;;  %v7137_v14 = vpop.permute.xlu2 %7136 }
 0xd78   :  { %v11666_v61 = vpop.permute.xlu1 %7091 }
 0xd7f   :  { %v11668_v20 = vpop.permute.xlu0 %7101  ;;  %v11670_v0 = vpop.permute.xlu2 %7151 }
 0xd80   :  { %v11672_v3 = vpop.permute.xlu1 %7106  ;;  %v11766_v23 = vunpack.i.h.bf16 %v11668_v20  ;;  %v7103_v44 = vunpack.i.l.bf16 %v11668_v20 }
 0xd87   :  { %v11674_v25 = vpop.permute.xlu0 %7116  ;;  %v11676_v37 = vpop.permute.xlu2 %7166 }
 0xd88   :  { %v7122_v55 = vpop.permute.xlu1 %7121 }
 0xd89   :  { %v11680_v2 = vunpack.i.h.bf16 %v7122_v55  ;;  %v7123_v6 = vunpack.i.l.bf16 %v7122_v55  ;;  %v6963_v55 = vunpack.i.l.bf16 %v11587_v12  ;;  %v4146_v12 = vsel %vm2066_vm13, %v7023_v63, %v11689_v35 }
 0xd8f   :  { %v7142_v31 = vpop.permute.xlu0 %7141  ;;  %v7182_v34 = vpop.permute.xlu2 %7181 }
 0xd90   :  { %v11682_v27 = vunpack.i.h.bf16 %v7142_v31  ;;  %v7143_v26 = vunpack.i.l.bf16 %v7142_v31  ;;  %v11684_v40 = vunpack.i.h.bf16 %v7182_v34  ;;  %v7183_v42 = vunpack.i.l.bf16 %v7182_v34  ;;  %v11686_v49 = vpop.permute.xlu1 %7131 }
 0xd91   :  { %v11703_v31 = vunpack.i.h.bf16 %v11589_v7  ;;  %v4371_v34 = vsel %vm2266_vm8, %v7123_v6, %v11680_v2  ;;  %v7078_v6 = vunpack.i.l.bf16 %v11659_v24  ;;  %v11737_v24 = vunpack.i.h.bf16 %v11568_v21 }
 0xd92   :  { %14258 = vst [vmem:[#allocation69_spill] sm:$0xff] %v11682_v27  ;;  %v4148_v59 = vsel %vm2066_vm13, %v7143_v26, %v11682_v27  ;;  %v4372_v51 = vsel %vm2266_vm8, %v7183_v42, %v11684_v40  ;;  %v11710_v26 = vunpack.i.h.bf16 %v7137_v14  ;;  %v7138_v42 = vunpack.i.l.bf16 %v7137_v14 }
 0xd93   :  { %14259 = vst [vmem:[#allocation66_spill] sm:$0xff] %v11684_v40  ;;  %4981 = vmatpush.msrb.mxu1 %v4148_v59  ;;  %5027 = vmatpush.msra.mxu3 %v4372_v51  ;;  %v4370_v59 = vsel %vm2266_vm8, %v7063_v8, %v11692_v16  ;;  %v4145_v14 = vsel %vm2066_vm13, %v6963_v55, %v11699_v28  ;;  %v11731_v8 = vunpack.i.h.bf16 %v11623_v56  ;;  %v6983_v40 = vunpack.i.l.bf16 %v11609_v36 }
 0xd94   :  { %14260 = vst [vmem:[#allocation15_spill] sm:$0xff] %v11710_v26  ;;  %v4369_v63 = vsel %vm2266_vm8, %v7003_v15, %v11703_v31  ;;  %v4119_v55 = vsel %vm2041_vm14, %v7078_v6, %v11721_v32  ;;  %v11743_v15 = vunpack.i.h.bf16 %v11686_v49  ;;  %v6953_v6 = vunpack.i.l.bf16 %v11591_v38 }
 0xd95   :  { %4982 = vmatpush.msrb.mxu1 %v4147_v33  ;;  %5028 = vmatpush.msra.mxu3 %v4371_v34  ;;  %v7018_v34 = vunpack.i.l.bf16 %v11623_v56  ;;  %v7043_v27 = vunpack.i.l.bf16 %v11616_v18 }
 0xd96   :  { %14262 = vst [vmem:[#allocation84_spill] sm:$0xff] %v11743_v15 }
 0xd97   :  { %v11716_v51 = vpop.permute.xlu0 %7156  ;;  %4983 = vmatpush.msrb.mxu1 %v4146_v12  ;;  %v11718_v7 = vpop.permute.xlu2 %7201  ;;  %5029 = vmatpush.msra.mxu3 %v4370_v59  ;;  %v4120_v12 = vsel %vm2041_vm14, %v7138_v42, %v11710_v26  ;;  %v6958_v59 = vunpack.i.l.bf16 %v11568_v21  ;;  %v4118_v56 = vsel %vm2041_vm14, %v7018_v34, %v11731_v8  ;;  %v11749_v42 = vunpack.i.h.bf16 %v11591_v38 }
 0xd98   :  { %v11724_v33 = vpop.permute.xlu1 %7146  ;;  %v7073_v34 = vunpack.i.l.bf16 %v11657_v17  ;;  %v7013_v38 = vunpack.i.l.bf16 %v11598_v13  ;;  %v11779_v26 = vunpack.i.h.bf16 %v11616_v18  ;;  %v6978_v18 = vunpack.i.l.bf16 %v11596_v41 }
 0xd99   :  { %4984 = vmatpush.msrb.mxu1 %v4145_v14  ;;  %5030 = vmatpush.msra.mxu3 %v4369_v63  ;;  %v7133_v14 = vunpack.i.l.bf16 %v11686_v49  ;;  %14263 = vst [vmem:[#allocation89_spill] sm:$0xff] %v11749_v42  ;;  %v4117_v21 = vsel %vm2041_vm14, %v6958_v59, %v11737_v24  ;;  %v11762_v49 = vunpack.i.h.bf16 %v11657_v17  ;;  %v11773_v59 = vunpack.i.h.bf16 %v11609_v36 }
 0xd9a   :  { %v4259_v36 = vsel %vm2166_vm2, %v7103_v44, %v11766_v23  ;;  %v7158_v44 = vunpack.i.l.bf16 %v11716_v51 }
 0xd9b   :  { %4985 = vmatpush.msrb.mxu1 %v4120_v12  ;;  %v11759_v12 = vunpack.i.h.bf16 %v11598_v13  ;;  %v4092_v17 = vsel %vm2016_vm12, %v7133_v14, %v11743_v15  ;;  %v4091_v13 = vsel %vm2016_vm12, %v7073_v34, %v11762_v49  ;;  %v4089_v14 = vsel %vm2016_vm12, %v6953_v6, %v11749_v42 }
 0xd9c   :  { %v4257_v34 = vsel %vm2166_vm2, %v6983_v40, %v11773_v59  ;;  %v7058_v40 = vunpack.i.l.bf16 %v11625_v45  ;;  %v11827_v15 = vunpack.i.h.bf16 %v11634_v29 }
 0xd9d   :  { %4986 = vmatpush.msrb.mxu1 %v4119_v55 }
 0xd9f   :  { %v11751_v63 = vpop.permute.xlu0 %7171  ;;  %v11753_v11 = vpop.permute.xlu2 %7216  ;;  %4987 = vmatpush.msrb.mxu1 %v4118_v56 }
 0xda0   :  { %v7162_v55 = vpop.permute.xlu1 %7161 }
 0xda1   :  { %v11769_v56 = vunpack.i.h.bf16 %v7162_v55  ;;  %v7163_v58 = vunpack.i.l.bf16 %v7162_v55  ;;  %4988 = vmatpush.msrb.mxu1 %v4117_v21  ;;  %v11787_v21 = vunpack.i.h.bf16 %v11596_v41  ;;  %v11795_v55 = vunpack.i.h.bf16 %v11618_v54 }
 0xda3   :  { %14264 = vst [vmem:[#allocation59_spill] sm:$0xff] %v11769_v56  ;;  %4989 = vmatpush.msrb.mxu1 %v4092_v17  ;;  %v4260_v20 = vsel %vm2166_vm2, %v7163_v58, %v11769_v56  ;;  %v4090_v58 = vsel %vm2016_vm12, %v7013_v38, %v11759_v12  ;;  %v6998_v17 = vunpack.i.l.bf16 %v11618_v54  ;;  %v11813_v38 = vunpack.i.h.bf16 %v11625_v45 }
 0xda4   :  { %5004 = vmatpush.msra.mxu2 %v4260_v20  ;;  %14265 = vst [vmem:[#allocation72_spill] sm:$0xff] %v11795_v55  ;;  %v11803_v20 = vunpack.i.h.bf16 %v11716_v51  ;;  %v11817_v54 = vunpack.i.h.bf16 %v11641_v52  ;;  %v11821_v51 = vunpack.i.h.bf16 %v11674_v25  ;;  %v7038_v45 = vunpack.i.l.bf16 %v11634_v29 }
 0xda5   :  { %4990 = vmatpush.msrb.mxu1 %v4091_v13  ;;  %v4258_v13 = vsel %vm2166_vm2, %v7043_v27, %v11779_v26  ;;  %14268 = vst [vmem:[#allocation36_spill] sm:$0xff] %v11813_v38 }
 0xda6   :  { %5005 = vmatpush.msra.mxu2 %v4259_v36  ;;  %14266 = vst [vmem:[#allocation25_spill] sm:$0xff] %v11803_v20  ;;  %v7098_v36 = vunpack.i.l.bf16 %v11641_v52  ;;  %v4232_v52 = vsel %vm2141_vm0, %v7158_v44, %v11803_v20  ;;  %v11850_v44 = vunpack.i.h.bf16 %v11632_v57 }
 0xda7   :  { %v11806_v6 = vpop.permute.xlu0 %7186  ;;  %v11808_v41 = vpop.permute.xlu2 %7231  ;;  %4991 = vmatpush.msrb.mxu1 %v4090_v58  ;;  %14269 = vst [vmem:[#allocation61_spill] sm:$0xff] %v11817_v54  ;;  %v7118_v58 = vunpack.i.l.bf16 %v11674_v25  ;;  %v11836_v25 = vunpack.i.h.bf16 %v11614_v53 }
 0xda8   :  { %14267 = vst [vmem:[#allocation76_spill] sm:$0xff] %v11808_v41  ;;  %v7177_v56 = vpop.permute.xlu1 %7176  ;;  %5006 = vmatpush.msra.mxu2 %v4258_v13  ;;  %v4231_v29 = vsel %vm2141_vm0, %v7098_v36, %v11817_v54  ;;  %v11859_v36 = vunpack.i.h.bf16 %v11670_v0  ;;  %v7053_v54 = vunpack.i.l.bf16 %v11643_v62 }
 0xda9   :  { %14270 = vst [vmem:[#allocation24_spill] sm:$0xff] %v11821_v51  ;;  %v11824_v41 = vunpack.i.h.bf16 %v7177_v56  ;;  %v7178_v27 = vunpack.i.l.bf16 %v7177_v56  ;;  %4992 = vmatpush.msrb.mxu1 %v4089_v14  ;;  %v4229_v56 = vsel %vm2141_vm0, %v6978_v18, %v11787_v21  ;;  %v4342_v14 = vsel %vm2241_vm5, %v7058_v40, %v11813_v38 }
 0xdaa   :  { %5007 = vmatpush.msra.mxu2 %v4257_v34  ;;  %14272 = vst [vmem:[#allocation121_spill] sm:$0xff] %v11836_v25  ;;  %v4341_v34 = vsel %vm2241_vm5, %v6998_v17, %v11795_v55  ;;  %v11854_v18 = vunpack.i.h.bf16 %v11643_v62  ;;  %v7153_v40 = vunpack.i.l.bf16 %v11670_v0  ;;  %v11863_v17 = vunpack.i.h.bf16 %v11806_v6 }
 0xdab   :  { %14271 = vst [vmem:[#allocation48_spill] sm:$0xff] %v11824_v41  ;;  %4993 = vmatpush.msrb.mxu1 %v11570_v43  ;;  %v4344_v13 = vsel %vm2241_vm5, %v7178_v27, %v11824_v41  ;;  %v4343_v43 = vsel %vm2241_vm5, %v7118_v58, %v11821_v51  ;;  %v7033_v27 = vunpack.i.l.bf16 %v11632_v57  ;;  %v7188_v58 = vunpack.i.l.bf16 %v11806_v6 }
 0xdac   :  { %5008 = vmatpush.msra.mxu2 %v4232_v52  ;;  %5031 = vmatpush.msra.mxu3 %v4344_v13  ;;  %14273 = vst [vmem:[#allocation17_spill] sm:$0xff] %v11850_v44  ;;  %v11872_v13 = vunpack.i.h.bf16 %v11655_v30  ;;  %v7128_v6 = vunpack.i.l.bf16 %v11655_v30  ;;  %v11883_v41 = vunpack.i.h.bf16 %v11666_v61 }
 0xdad   :  { %4994 = vmatpush.msrb.mxu1 %v11550_v1  ;;  %14274 = vst [vmem:[#allocation136_spill] sm:$0xff] %v11854_v18  ;;  %v4230_v1 = vsel %vm2141_vm0, %v7038_v45, %v11827_v15  ;;  %v11875_v45 = vunpack.i.h.bf16 %v11751_v63 }
 0xdae   :  { %5009 = vmatpush.msra.mxu2 %v4231_v29  ;;  %5032 = vmatpush.msra.mxu3 %v4343_v43  ;;  %14275 = vst [vmem:[#allocation137_spill] sm:$0xff] %v11863_v17  ;;  %v7173_v29 = vunpack.i.l.bf16 %v11751_v63  ;;  %v11892_v63 = vunpack.i.h.bf16 %v11648_v9 }
 0xdaf   :  { %v11866_v52 = vpop.permute.xlu0 %7196  ;;  %v11868_v57 = vpop.permute.xlu2 %7246  ;;  %4995 = vmatpush.msrb.mxu1 %v11532_v10  ;;  %14277 = vst [vmem:[#allocation157_spill] sm:$0xff] %v11872_v13  ;;  %v7093_v10 = vunpack.i.l.bf16 %v11666_v61  ;;  %v4400_v61 = vsel %vm2291_vm7, %v7188_v58, %v11863_v17  ;;  %v4399_v58 = vsel %vm2291_vm7, %v7128_v6, %v11872_v13 }
 0xdb0   :  { %14276 = vst [vmem:[#allocation151_spill] sm:$0xff] %v11868_v57  ;;  %v7198_v0 = vunpack.i.l.bf16 %v11866_v52  ;;  %v11879_v43 = vpop.permute.xlu1 %7191  ;;  %5010 = vmatpush.msra.mxu2 %v4230_v1  ;;  %5033 = vmatpush.msra.mxu3 %v4342_v14  ;;  %v11889_v57 = vunpack.i.h.bf16 %v11650_v19  ;;  %v7113_v1 = vunpack.i.l.bf16 %v11648_v9  ;;  %v7068_v14 = vunpack.i.l.bf16 %v11650_v19 }
 0xdb1   :  { %14278 = vst [vmem:[#allocation51_spill] sm:$0xff] %v11875_v45  ;;  %v7193_v20 = vunpack.i.l.bf16 %v11879_v43  ;;  %4996 = vmatpush.msrb.mxu1 %v11512_v60  ;;  %v4204_v60 = vsel %vm2116_vm1, %v7153_v40, %v11859_v36  ;;  %v7194_v32 = vunpack.i.h.bf16 %v11879_v43  ;;  %v4316_v19 = vsel %vm2216_vm3, %v7173_v29, %v11875_v45 }
 0xdb2   :  { %14279 = vst [vmem:[#allocation93_spill] sm:$0xff] %v11883_v41  ;;  %v4433_v30 = vsel %vm2041_vm14, %v11737_v24, %v7198_v0  ;;  %5011 = vmatpush.msra.mxu2 %v4229_v56  ;;  %5034 = vmatpush.msra.mxu3 %v4341_v34  ;;  %v7008_v56 = vunpack.i.l.bf16 %v11614_v53  ;;  %v4203_v62 = vsel %vm2116_vm1, %v7093_v10, %v11883_v41  ;;  %v11915_v40 = vunpack.i.h.bf16 %v11577_v47 }
 0xdb3   :  { %14280 = vst [vmem:[#allocation97_spill] sm:$0xff] %v11889_v57  ;;  %v7315_v51 = vpack.i.bf16 %v7198_v0, %v4433_v30  ;;  %v4421_v9 = vsel %vm2016_vm12, %v11749_v42, %v7193_v20  ;;  %5062 = vmatpush.msra.mxu1 %v4400_v61  ;;  %v6973_v0 = vunpack.i.l.bf16 %v11577_v47  ;;  %v7218_v43 = vunpack.i.l.bf16 %v11753_v11 }
 0xdb4   :  { %14281 = vst [vmem:[#allocation86_spill] sm:$0xff] %v11892_v63  ;;  %5012 = vmatpush.msra.mxu2 %v4204_v60  ;;  %v7310_v34 = vpack.i.bf16 %v7193_v20, %v4421_v9  ;;  %5035 = vmatpush.msra.mxu3 %v4316_v19  ;;  %v4315_v53 = vsel %vm2216_vm3, %v7113_v1, %v11892_v63  ;;  %v11922_v20 = vunpack.i.h.bf16 %v11605_v46  ;;  %v11935_v1 = vunpack.i.h.bf16 %v11724_v33 }
 0xdb5   :  { %7316 = vrot.lane.b32.xlu2 %v7315_v51, %s7685_s24  ;;  %14282 = vst [vmem:[#allocation128_spill] sm:$0xff] %v11915_v40  ;;  %5063 = vmatpush.msra.mxu1 %v4399_v58  ;;  %v6993_v51 = vunpack.i.l.bf16 %v11605_v46  ;;  %v4398_v29 = vsel %vm2291_vm7, %v7068_v14, %v11889_v57  ;;  %v4202_v10 = vsel %vm2116_vm1, %v7033_v27, %v11850_v44  ;;  %v7148_v30 = vunpack.i.l.bf16 %v11724_v33 }
 0xdb6   :  { %5013 = vmatpush.msra.mxu2 %v4203_v62  ;;  %14283 = vst [vmem:[#allocation95_spill] sm:$0xff] %v11922_v20  ;;  %7311 = vrot.lane.b32.xlu1 %v7310_v34, %s7685_s24  ;;  %v4422_v46 = vsel %vm2016_vm12, %v11759_v12, %v7194_v32  ;;  %v4314_v14 = vsel %vm2216_vm3, %v7053_v54, %v11854_v18  ;;  %v11945_v60 = vunpack.i.h.bf16 %v11676_v37  ;;  %v7168_v27 = vunpack.i.l.bf16 %v11676_v37 }
 0xdb7   :  { %5036 = vmatpush.msra.mxu3 %v4315_v53  ;;  %v11928_v6 = vpop.permute.xlu0 %7211  ;;  %v11930_v47 = vpop.permute.xlu2 %7251  ;;  %14284 = vst [vmem:[#allocation79_spill] sm:$0xff] %v11935_v1  ;;  %5064 = vmatpush.msra.mxu1 %v4398_v29  ;;  %v4397_v9 = vsel %vm2291_vm7, %v7008_v56, %v11836_v25  ;;  %v11951_v33 = vunpack.i.h.bf16 %v11664_v50  ;;  %v7088_v19 = vunpack.i.l.bf16 %v11664_v50  ;;  %v4481_v34 = vsel %vm2141_vm0, %v11787_v21, %v7218_v43 }
 0xdb8   :  { %v11940_v61 = vpop.permute.xlu1 %7206  ;;  %5014 = vmatpush.msra.mxu2 %v4202_v10  ;;  %14285 = vst [vmem:[#allocation68_spill] sm:$0xff] %v11945_v60  ;;  %v4201_v54 = vsel %vm2116_vm1, %v6973_v0, %v11915_v40  ;;  %v11959_v58 = vunpack.i.h.bf16 %v11672_v3  ;;  %v7108_v37 = vunpack.i.l.bf16 %v11672_v3  ;;  %v7350_v62 = vpack.i.bf16 %v7194_v32, %v4422_v46 }
 0xdb9   :  { %5037 = vmatpush.msra.mxu3 %v4314_v14  ;;  %14286 = vst [vmem:[#allocation77_spill] sm:$0xff] %v11951_v33  ;;  %5065 = vmatpush.msra.mxu1 %v4397_v9  ;;  %v4313_v56 = vsel %vm2216_vm3, %v6993_v51, %v11922_v20  ;;  %v11965_v53 = vunpack.i.h.bf16 %v11607_v22  ;;  %v7028_v50 = vunpack.i.l.bf16 %v11607_v22  ;;  %v4176_v29 = vsel %vm2091_vm15, %v7148_v30, %v11935_v1 }
 0xdba   :  { %14287 = vst [vmem:[#allocation57_spill] sm:$0xff] %v11959_v58  ;;  %5015 = vmatpush.msra.mxu2 %v4201_v54  ;;  %v11971_v0 = vunpack.i.h.bf16 %v11639_v5  ;;  %v7048_v10 = vunpack.i.l.bf16 %v11639_v5  ;;  %v7330_v3 = vpack.i.bf16 %v7218_v43, %v4481_v34  ;;  %v4288_v32 = vsel %vm2191_vm4, %v7168_v27, %v11945_v60 }
 0xdbb   :  { %14288 = vst [vmem:[#allocation40_spill] sm:$0xff] %v11965_v53  ;;  %5038 = vmatpush.msra.mxu3 %v4313_v56  ;;  %v11978_v51 = vunpack.i.h.bf16 %v11600_v48  ;;  %v6968_v22 = vunpack.i.l.bf16 %v11600_v48  ;;  %v4175_v30 = vsel %vm2091_vm15, %v7088_v19, %v11951_v33  ;;  %v11984_v46 = vunpack.i.h.bf16 %v11582_v39 }
 0xdbc   :  { %14289 = vst [vmem:[#allocation21_spill] sm:$0xff] %v11971_v0  ;;  %5016 = vmatpush.msra.mxu2 %v4176_v29  ;;  %v6988_v5 = vunpack.i.l.bf16 %v11582_v39  ;;  %v4287_v43 = vsel %vm2191_vm4, %v7108_v37, %v11959_v58  ;;  %v4174_v9 = vsel %vm2091_vm15, %v7028_v50, %v11965_v53  ;;  %v4286_v39 = vsel %vm2191_vm4, %v7048_v10, %v11971_v0 }
 0xdbd   :  { %7351 = vrot.lane.b32.xlu2 %v7350_v62, %s7685_s24  ;;  %14290 = vst [vmem:[#allocation28_spill] sm:$0xff] %v11978_v51  ;;  %5039 = vmatpush.msra.mxu3 %v4288_v32  ;;  %v4173_v34 = vsel %vm2091_vm15, %v6968_v22, %v11978_v51  ;;  %v7203_v56 = vunpack.i.l.bf16 %v11718_v7 }
 0xdbe   :  { %14291 = vst [vmem:[#allocation43_spill] sm:$0xff] %v11984_v46  ;;  %7331 = vrot.lane.b32.xlu1 %v7330_v3, %s7685_s24  ;;  %5017 = vmatpush.msra.mxu2 %v4175_v30  ;;  %v4285_v54 = vsel %vm2191_vm4, %v6988_v5, %v11984_v46 }
 0xdbf   :  { %v11990_v14 = vpop.permute.xlu0 %7226  ;;  %v11992_v27 = vpop.permute.xlu2 %7266  ;;  %5040 = vmatpush.msra.mxu3 %v4287_v43  ;;  %v4445_v22 = vsel %vm2066_vm13, %v11699_v28, %v7203_v56 }
 0xdc0   :  { %v7222_v48 = vpop.permute.xlu1 %7221  ;;  %5018 = vmatpush.msra.mxu2 %v4174_v9 }
 0xdc1   :  { %v7223_v19 = vunpack.i.l.bf16 %v7222_v48  ;;  %5041 = vmatpush.msra.mxu3 %v4286_v39 }
 0xdc2   :  { %5019 = vmatpush.msra.mxu2 %v4173_v34  ;;  %v7325_v34 = vpack.i.bf16 %v7203_v56, %v4445_v22  ;;  %v7204_v22 = vunpack.i.h.bf16 %v11718_v7 }
 0xdc3   :  { %v4493_v37 = vsel %vm2166_vm2, %v11773_v59, %v7223_v19  ;;  %5042 = vmatpush.msra.mxu3 %v4285_v54  ;;  %v7213_v54 = vunpack.i.l.bf16 %v11928_v6 }
 0xdc4   :  { %v7320_v62 = vpack.i.bf16 %v7223_v19, %v4493_v37  ;;  %v7224_v19 = vunpack.i.h.bf16 %v7222_v48 }
 0xdc5   :  { %v4469_v56 = vsel %vm2116_vm1, %v11915_v40, %v7213_v54 }
 0xdc6   :  { %7321 = vrot.lane.b32.xlu0 %v7320_v62, %s7685_s24  ;;  %v4494_v37 = vsel %vm2166_vm2, %v11779_v26, %v7224_v19 }
 0xdc7   :  { %v7242_v50 = vpop.permute.xlu0 %7241  ;;  %v12008_v32 = vpop.permute.xlu2 %7281 }
 0xdc8   :  { %v7244_v29 = vunpack.i.h.bf16 %v7242_v50  ;;  %v7243_v10 = vunpack.i.l.bf16 %v7242_v50  ;;  %v12006_v3 = vpop.permute.xlu1 %7236  ;;  %v7283_v39 = vunpack.i.l.bf16 %v12008_v32 }
 0xdca   :  { %v4542_v30 = vsel %vm2266_vm8, %v11692_v16, %v7244_v29  ;;  %v4541_v5 = vsel %vm2266_vm8, %v11703_v31, %v7243_v10  ;;  %v4495_v62 = vsel %vm2166_vm2, %v11766_v23, %v7283_v39 }
 0xdcb   :  { %v7375_v43 = vpack.i.bf16 %v7244_v29, %v4542_v30  ;;  %v7335_v9 = vpack.i.bf16 %v7243_v10, %v4541_v5  ;;  %v7360_v29 = vpack.i.bf16 %v7224_v19, %v4494_v37  ;;  %v7395_v10 = vpack.i.bf16 %v7283_v39, %v4495_v62 }
 0xdcc   :  { %v7340_v5 = vpack.i.bf16 %v7213_v54, %v4469_v56  ;;  %v7219_v37 = vunpack.i.h.bf16 %v11753_v11  ;;  %v7199_v56 = vunpack.i.h.bf16 %v11866_v52  ;;  %v7253_v52 = vunpack.i.l.bf16 %v11930_v47 }
 0xdcd   :  { %7376 = vrot.lane.b32.xlu2 %v7375_v43, %s7685_s24  ;;  %7336 = vrot.lane.b32.xlu1 %v7335_v9, %s7685_s24  ;;  %v7238_v43 = vunpack.i.l.bf16 %v12006_v3  ;;  %v4446_v9 = vsel %vm2066_vm13, %v11689_v35, %v7204_v22 }
 0xdce   :  { %7326 = vrot.lane.b32.xlu0 %v7325_v34, %s7685_s24  ;;  %v7365_v34 = vpack.i.bf16 %v7204_v22, %v4446_v9  ;;  %v4434_v22 = vsel %vm2041_vm14, %v11731_v8, %v7199_v56 }
 0xdcf   :  { %v12027_v48 = vpop.permute.xlu0 %7261  ;;  %v4529_v7 = vsel %vm2241_vm5, %v11795_v55, %v7238_v43 }
 0xdd0   :  { %v12025_v50 = vpop.permute.xlu1 %7256  ;;  %v7263_v30 = vunpack.i.l.bf16 %v12027_v48  ;;  %v7345_v62 = vpack.i.bf16 %v7238_v43, %v4529_v7  ;;  %v7355_v43 = vpack.i.bf16 %v7199_v56, %v4434_v22 }
 0xdd2   :  { %v4447_v19 = vsel %vm2066_vm13, %v11678_v4, %v7263_v30 }
 0xdd3   :  { %v7400_v54 = vpack.i.bf16 %v7263_v30, %v4447_v19  ;;  %v7214_v30 = vunpack.i.h.bf16 %v11928_v6 }
 0xdd5   :  { %7396 = vrot.lane.b32.xlu2 %v7395_v10, %s7685_s24  ;;  %7361 = vrot.lane.b32.xlu1 %v7360_v29, %s7685_s24  ;;  %v4482_v10 = vsel %vm2141_vm0, %v11827_v15, %v7219_v37  ;;  %v4470_v9 = vsel %vm2116_vm1, %v11850_v44, %v7214_v30 }
 0xdd6   :  { %7341 = vrot.lane.b32.xlu0 %v7340_v5, %s7685_s24  ;;  %v7370_v11 = vpack.i.bf16 %v7219_v37, %v4482_v10  ;;  %v7380_v6 = vpack.i.bf16 %v7214_v30, %v4470_v9  ;;  %v14293_v9 = vld [vmem:[#allocation158_spill] sm:$0xff] }
 0xdd7   :  { %v12049_v29 = vpop.permute.xlu0 %7276 }
 0xdd8   :  { %v12041_v39 = vpop.permute.xlu1 %7271 }
 0xdd9   :  { %v7273_v22 = vunpack.i.l.bf16 %v12041_v39 }
 0xddd   :  { %7401 = vrot.lane.b32.xlu2 %v7400_v54, %s7685_s24  ;;  %7366 = vrot.lane.b32.xlu1 %v7365_v34, %s7685_s24  ;;  %v4423_v54 = vsel %vm2016_vm12, %v11762_v49, %v7253_v52 }
 0xdde   :  { %7346 = vrot.lane.b32.xlu0 %v7345_v62, %s7685_s24  ;;  %v7239_v62 = vunpack.i.h.bf16 %v12006_v3  ;;  %v7390_v10 = vpack.i.bf16 %v7253_v52, %v4423_v54  ;;  %v4471_v3 = vsel %vm2116_vm1, %v11883_v41, %v7273_v22  ;;  %v12086_v52 = vpop.permute.xlu2 %7296 }
 0xddf   :  { %v12066_v7 = vpop.permute.xlu0 %7291 }
 0xde0   :  { %v12054_v5 = vpop.permute.xlu1 %7286  ;;  %v4530_v30 = vsel %vm2241_vm5, %v11813_v38, %v7239_v62  ;;  %v7293_v40 = vunpack.i.l.bf16 %v12066_v7 }
 0xde1   :  { %v7385_v54 = vpack.i.bf16 %v7239_v62, %v4530_v30  ;;  %v14296_v62 = vld [vmem:[#allocation61_spill] sm:$0xff] }
 0xde5   :  { %7371 = vrot.lane.b32.xlu1 %v7370_v11, %s7685_s24  ;;  %v7258_v11 = vunpack.i.l.bf16 %v12025_v50 }
 0xde6   :  { %7356 = vrot.lane.b32.xlu0 %v7355_v43, %s7685_s24  ;;  %v12081_v43 = vld [vmem:[#allocation7] sm:$0xff] }
 0xde7   :  { %14292 = vst [vmem:[#allocation110_spill] sm:$0xff] %v12081_v43  ;;  %4997 = vmatmul.f32.vlgmr.msrb.gmra.mxu1 %v12081_v43  ;;  %v12100_v43 = vld [vmem:[#allocation7 + $0x8] sm:$0xff] }
 0xde8   :  { %v12064_v19 = vpop.permute.xlu1 %7301  ;;  %14295 = vst [vmem:[#allocation33_spill] sm:$0xff] %v12100_v43  ;;  %5020 = vmatmul.f32.vlgmr.msra.gmra.mxu2 %v12100_v43 }
 0xde9   :  { %v7303_v34 = vunpack.i.l.bf16 %v12064_v19 }
 0xdeb   :  { %v4543_v37 = vsel %vm2266_vm8, %v11680_v2, %v7303_v34 }
 0xdec   :  { %v7410_v56 = vpack.i.bf16 %v7303_v34, %v4543_v37  ;;  %v4435_v34 = vsel %vm2041_vm14, %v14293_v9, %v7258_v11  ;;  %v7278_v37 = vunpack.i.l.bf16 %v12049_v29 }
 0xded   :  { %7381 = vrot.lane.b32.xlu1 %v7380_v6, %s7685_s24  ;;  %v12090_v6 = vpop.permute.xlu0 %7306  ;;  %v7415_v38 = vpack.i.bf16 %v7258_v11, %v4435_v34  ;;  %v14299_v11 = vld [vmem:[#allocation24_spill] sm:$0xff] }
 0xdee   :  { %7411 = vrot.lane.b32.xlu2 %v7410_v56, %s7685_s24  ;;  %7391 = vrot.lane.b32.xlu0 %v7390_v10, %s7685_s24  ;;  %v7420_v56 = vpack.i.bf16 %v7273_v22, %v4471_v3  ;;  %v7298_v10 = vunpack.i.l.bf16 %v12086_v52  ;;  %v12096_v55 = vunpack.i.l.bf16 %v12090_v6  ;;  %v4483_v30 = vsel %vm2141_vm0, %v14296_v62, %v7278_v37  ;;  %v12105_v22 = vld [vmem:[#allocation7 + $0x20] sm:$0x1f]  ;;  %v12107_v3 = vld [vmem:[#allocation7 + $0x10] sm:$0xff] }
 0xdef   :  { %14297 = vst [vmem:[#allocation129_spill] sm:$0xff] %v12105_v22  ;;  %5000 = vmatmul.f32.gmra.mxu1 %v12105_v22  ;;  %5043 = vmatmul.f32.vlgmr.msra.gmra.mxu3 %v12107_v3 }
 0xdf0   :  { %14294 = vst [vmem:[#allocation154_spill] sm:$0xff] %v12096_v55  ;;  %v4531_v34 = vsel %vm2241_vm5, %v14299_v11, %v7298_v10  ;;  %v14301_v11 = vld [vmem:[#allocation151_spill] sm:$0xff] }
 0xdf1   :  { %14298 = vst [vmem:[#allocation23_spill] sm:$0xff] %v12107_v3  ;;  %v7425_v43 = vpack.i.bf16 %v7298_v10, %v4531_v34  ;;  %v12124_v22 = vunpack.i.h.bf16 %v14301_v11  ;;  %v12128_v3 = vld [vmem:[#allocation7 + $0x28] sm:$0x1f]  ;;  %v14306_v10 = vld [vmem:[#allocation84_spill] sm:$0xff]  ;;  %v4519_v34 = vsel %vm2216_vm3, %v11892_v63, %v7293_v40 }
 0xdf2   :  { %14303 = vst [vmem:[#allocation96_spill] sm:$0xff] %v12128_v3  ;;  %5023 = vmatmul.f32.gmra.mxu2 %v12128_v3 }
 0xdf3   :  { %14302 = vst [vmem:[#allocation82_spill] sm:$0xff] %v12124_v22 }
 0xdf5   :  { %7386 = vrot.lane.b32.xlu1 %v7385_v54, %s7685_s24  ;;  %v7405_v54 = vpack.i.bf16 %v7278_v37, %v4483_v30  ;;  %v12130_v37 = vld [vmem:[#allocation7 + $0x30] sm:$0x1f] }
 0xdf6   :  { %7421 = vrot.lane.b32.xlu2 %v7420_v56, %s7685_s24  ;;  %7416 = vrot.lane.b32.xlu0 %v7415_v38, %s7685_s24  ;;  %v12116_v38 = vsel %vm2291_vm7, %v11872_v13, %v12096_v55  ;;  %v7254_v56 = vunpack.i.h.bf16 %v11930_v47  ;;  %14304 = vst [vmem:[#allocation20_spill] sm:$0xff] %v12130_v37  ;;  %v12132_v47 = vld [vmem:[#allocation7 + $0x18] sm:$0xff]  ;;  %v14307_v13 = vld [vmem:[#allocation76_spill] sm:$0xff] }
 0xdf7   :  { %14300 = vst [vmem:[#allocation117_spill] sm:$0xff] %v12116_v38  ;;  %v7455_v42 = vpack.i.bf16 %v12096_v55, %v12116_v38  ;;  %5046 = vmatmul.f32.gmra.mxu3 %v12130_v37  ;;  %5376 = vmatmul.msk.f32.vlgmr.msra.gmra.mxu1 %vm4974_vm10, %v12132_v47  ;;  %v7450_v55 = vpack.i.bf16 %v7293_v40, %v4519_v34  ;;  %v7234_v38 = vunpack.i.h.bf16 %v14307_v13  ;;  %v7264_v37 = vunpack.i.h.bf16 %v12027_v48  ;;  %v14309_v40 = vld [vmem:[#allocation69_spill] sm:$0xff] }
 0xdf8   :  { %14305 = vst [vmem:[#allocation74_spill] sm:$0xff] %v12132_v47  ;;  %v4424_v30 = vsel %vm2016_vm12, %v14306_v10, %v7254_v56  ;;  %v14308_v47 = vld [vmem:[#allocation59_spill] sm:$0xff]  ;;  %vm4901_vm12 = vcmask 203776  }
 0xdfd   :  { %7406 = vrot.lane.b32.xlu1 %v7405_v54, %s7685_s24  ;;  %v7284_v54 = vunpack.i.h.bf16 %v12008_v32  ;;  %v4518_v32 = vsel %vm2216_vm3, %v11854_v18, %v7234_v38  ;;  %v14313_v18 = vld [vmem:[#allocation66_spill] sm:$0xff] }
 0xdfe   :  { %7426 = vrot.lane.b32.xlu2 %v7425_v43, %s7685_s24  ;;  %7456 = vrot.lane.b32.xlu0 %v7455_v42, %s7685_s24  ;;  %v12145_v42 = vsel %vm2291_vm7, %v11889_v57, %v12124_v22  ;;  %v7430_v43 = vpack.i.bf16 %v7254_v56, %v4424_v30  ;;  %v4448_v56 = vsel %vm2066_vm13, %v14309_v40, %v7264_v37  ;;  %v12161_v30 = vld [vmem:[#allocation7 + $0x38] sm:$0x1f]  ;;  %vm5266_vm13 = vcmask 200704  }
 0xdff   :  { %v7470_v3 = vpack.i.bf16 %v12124_v22, %v12145_v42  ;;  %v4496_v57 = vsel %vm2166_vm2, %v14308_v47, %v7284_v54  ;;  %14310 = vst [vmem:[#allocation70_spill] sm:$0xff] %v12161_v30  ;;  %5377 = vmatmul.msk.f32.gmra.mxu1 %vm4974_vm10, %v12161_v30  ;;  %v7465_v48 = vpack.i.bf16 %v7234_v38, %v4518_v32  ;;  %v7259_v22 = vunpack.i.h.bf16 %v12025_v50  ;;  %v14312_v38 = vld [vmem:[#allocation15_spill] sm:$0xff] }
 0xe00   :  { %v7435_v34 = vpack.i.bf16 %v7284_v54, %v4496_v57  ;;  %v14311_v54 = vld [vmem:[#allocation25_spill] sm:$0xff]  ;;  %v7304_v50 = vunpack.i.h.bf16 %v12064_v19 }
 0xe01   :  { %v4436_v32 = vsel %vm2041_vm14, %v14312_v38, %v7259_v22  ;;  %vm5280_vm14 = vcmask 842752  }
 0xe05   :  { %7431 = vrot.lane.b32.xlu1 %v7430_v43, %s7685_s24  ;;  %v7480_v43 = vpack.i.bf16 %v7264_v37, %v4448_v56 }
 0xe06   :  { %7451 = vrot.lane.b32.xlu2 %v7450_v55, %s7685_s24  ;;  %7471 = vrot.lane.b32.xlu0 %v7470_v3, %s7685_s24  ;;  %v7268_v55 = vunpack.i.l.bf16 %v11992_v27  ;;  %v7279_v3 = vunpack.i.h.bf16 %v12049_v29  ;;  %v7209_v29 = vunpack.i.h.bf16 %v11940_v61 }
 0xe08   :  { %v4459_v57 = vsel %vm2091_vm15, %v11951_v33, %v7268_v55  ;;  %v4484_v30 = vsel %vm2141_vm0, %v14311_v54, %v7279_v3 }
 0xe09   :  { %v7440_v37 = vpack.i.bf16 %v7268_v55, %v4459_v57  ;;  %v7485_v56 = vpack.i.bf16 %v7279_v3, %v4484_v30  ;;  %v4544_v55 = vsel %vm2266_vm8, %v14313_v18, %v7304_v50  ;;  %v7208_v3 = vunpack.i.l.bf16 %v11940_v61 }
 0xe0a   :  { %v7490_v57 = vpack.i.bf16 %v7304_v50, %v4544_v55  ;;  %v7294_v55 = vunpack.i.h.bf16 %v12066_v7 }
 0xe0d   :  { %7436 = vrot.lane.b32.xlu1 %v7435_v34, %s7685_s24  ;;  %v7495_v34 = vpack.i.bf16 %v7259_v22, %v4436_v32 }
 0xe0e   :  { %7466 = vrot.lane.b32.xlu2 %v7465_v48, %s7685_s24  ;;  %7481 = vrot.lane.b32.xlu0 %v7480_v43, %s7685_s24  ;;  %v7274_v48 = vunpack.i.h.bf16 %v12041_v39  ;;  %v4458_v43 = vsel %vm2091_vm15, %v11965_v53, %v7209_v29  ;;  %v7269_v39 = vunpack.i.h.bf16 %v11992_v27  ;;  %v7233_v27 = vunpack.i.l.bf16 %v14307_v13 }
 0xe0f   :  { %v12189_v22 = vpop.permute.xlu2 %7316  ;;  %v7445_v19 = vpack.i.bf16 %v7209_v29, %v4458_v43  ;;  %v4520_v13 = vsel %vm2216_vm3, %v11875_v45, %v7294_v55 }
 0xe10   :  { %v4472_v30 = vsel %vm2116_vm1, %v11859_v36, %v7274_v48  ;;  %v4460_v29 = vsel %vm2091_vm15, %v11935_v1, %v7269_v39 }
 0xe11   :  { %v7500_v32 = vpack.i.bf16 %v7274_v48, %v4472_v30  ;;  %v7510_v48 = vpack.i.bf16 %v7269_v39, %v4460_v29  ;;  %v12209_v30 = vunpack.i.h.bf16 %v12090_v6  ;;  %v7288_v6 = vunpack.i.l.bf16 %v12054_v5 }
 0xe12   :  { %v7289_v29 = vunpack.i.h.bf16 %v12054_v5  ;;  %v7229_v5 = vunpack.i.h.bf16 %v11990_v14 }
 0xe13   :  { %14315 = vst [vmem:[#allocation122_spill] sm:$0xff] %v12209_v30 }
 0xe15   :  { %7441 = vrot.lane.b32.xlu1 %v7440_v37, %s7685_s24  ;;  %v7299_v37 = vunpack.i.h.bf16 %v12086_v52 }
 0xe16   :  { %7486 = vrot.lane.b32.xlu2 %v7485_v56, %s7685_s24  ;;  %7496 = vrot.lane.b32.xlu0 %v7495_v34, %s7685_s24  ;;  %v4457_v56 = vsel %vm2091_vm15, %v11978_v51, %v7208_v3  ;;  %v14314_v34 = vld [vmem:[#allocation48_spill] sm:$0xff] }
 0xe17   :  { %v4532_v61 = vsel %vm2241_vm5, %v14314_v34, %v7299_v37  ;;  %v7460_v50 = vpack.i.bf16 %v7208_v3, %v4457_v56  ;;  %v12204_v43 = vpop.permute.xlu2 %7351  ;;  %v12220_v3 = vsel %vm2291_vm7, %v11863_v17, %v12209_v30 }
 0xe18   :  { %v7505_v52 = vpack.i.bf16 %v7299_v37, %v4532_v61  ;;  %14316 = vst [vmem:[#allocation44_spill] sm:$0xff] %v12220_v3  ;;  %v7535_v37 = vpack.i.bf16 %v12209_v30, %v12220_v3  ;;  %v4507_v61 = vsel %vm2191_vm4, %v11959_v58, %v7288_v6 }
 0xe1d   :  { %7446 = vrot.lane.b32.xlu1 %v7445_v19, %s7685_s24  ;;  %v4517_v19 = vsel %vm2216_vm3, %v11922_v20, %v7233_v27 }
 0xe1e   :  { %7491 = vrot.lane.b32.xlu2 %v7490_v57, %s7685_s24  ;;  %7501 = vrot.lane.b32.xlu0 %v7500_v32, %s7685_s24  ;;  %v7475_v7 = vpack.i.bf16 %v7233_v27, %v4517_v19  ;;  %v7515_v57 = vpack.i.bf16 %v7294_v55, %v4520_v13  ;;  %v12226_v32 = vunpack.i.l.bf16 %v14301_v11  ;;  %v7525_v27 = vpack.i.bf16 %v7288_v6, %v4507_v61 }
 0xe1f   :  { %v7228_v55 = vunpack.i.l.bf16 %v11990_v14  ;;  %v4962_v14 = vld [vmem:[%s12889_s15] sm:$0xff] }
 0xe20   :  { %14318 = vst [vmem:[#allocation78_spill] sm:$0xff] %v12226_v32  ;;  %v12241_v11 = vsel %vm2291_vm7, %v11836_v25, %v12226_v32 }
 0xe21   :  { %14319 = vst [vmem:[#allocation101_spill] sm:$0xff] %v12241_v11  ;;  %v4505_v6 = vsel %vm2191_vm4, %v11984_v46, %v7228_v55 }
 0xe25   :  { %7461 = vrot.lane.b32.xlu1 %v7460_v50, %s7685_s24  ;;  %v4508_v50 = vsel %vm2191_vm4, %v11945_v60, %v7289_v29 }
 0xe26   :  { %7511 = vrot.lane.b32.xlu2 %v7510_v48, %s7685_s24  ;;  %7506 = vrot.lane.b32.xlu0 %v7505_v52, %s7685_s24  ;;  %v7520_v48 = vpack.i.bf16 %v12226_v32, %v12241_v11  ;;  %v7540_v52 = vpack.i.bf16 %v7289_v29, %v4508_v50  ;;  %v7545_v29 = vpack.i.bf16 %v7228_v55, %v4505_v6 }
 0xe27   :  { %v12223_v39 = vpop.permute.xlu2 %7376 }
 0xe28   :  { %14317 = vst [vmem:[#allocation53_spill] sm:$0xff] %v12223_v39  ;;  %v12230_v56 = vpop.permute.xlu1 %7311 }
 0xe2d   :  { %7476 = vrot.lane.b32.xlu1 %v7475_v7, %s7685_s24  ;;  %v4506_v7 = vsel %vm2191_vm4, %v11971_v0, %v7229_v5 }
 0xe2e   :  { %7516 = vrot.lane.b32.xlu2 %v7515_v57, %s7685_s24  ;;  %7536 = vrot.lane.b32.xlu0 %v7535_v37, %s7685_s24  ;;  %v7530_v37 = vpack.i.bf16 %v7229_v5, %v4506_v7 }
 0xe2f   :  { %v12250_v19 = vpop.permute.xlu2 %7396 }
 0xe30   :  { %v12253_v13 = vpop.permute.xlu1 %7331  ;;  %v7398_v11 = vunpack.i.l.bf16 %v12250_v19 }
 0xe35   :  { %7526 = vrot.lane.b32.xlu1 %v7525_v27, %s7685_s24 }
 0xe36   :  { %7521 = vrot.lane.b32.xlu2 %v7520_v48, %s7685_s24  ;;  %7541 = vrot.lane.b32.xlu0 %v7540_v52, %s7685_s24  ;;  %v4963_v48 = vld [vmem:[%s12889_s15 + $0x8] sm:$0x1f] }
 0xe37   :  { %v12269_v50 = vpop.permute.xlu2 %7401 }
 0xe38   :  { %v12258_v57 = vpop.permute.xlu0 %7321 }
 0xe39   :  { %v7323_v3 = vunpack.i.l.bf16 %v12258_v57 }
 0xe3d   :  { %4966 = vperm.xlu1 %5417, %v4962_v14  }
 0xe3e   :  { %7531 = vrot.lane.b32.xlu2 %v7530_v37, %s7685_s24  ;;  %7546 = vrot.lane.b32.xlu0 %v7545_v29, %s7685_s24 }
 0xe3f   :  { %v12267_v61 = vpop.permute.xlu1 %7336 }
 0xe40   :  { %14320 = vst [vmem:[#allocation49_spill] sm:$0xff] %v12267_v61  ;;  %v12271_v27 = vpop.permute.xlu0 %7326  ;;  %v7338_v45 = vunpack.i.l.bf16 %v12267_v61 }
 0xe46   :  { %4971 = vperm.xlu2 %5418, %v4963_v48  }
 0xe47   :  { %v12276_v52 = vpop.permute.xlu1 %7361 }
 0xe48   :  { %v12278_v5 = vpop.permute.xlu2 %7411  ;;  %v12280_v55 = vpop.permute.xlu0 %7341 }
 0xe49   :  { %v7413_v17 = vunpack.i.l.bf16 %v12278_v5  ;;  %v14328_v44 = vunpack.i.h.bf16 %v12278_v5 }
 0xe4f   :  { %v12282_v7 = vpop.permute.xlu1 %7366 }
 0xe50   :  { %v12284_v6 = vpop.permute.xlu2 %7421  ;;  %v12286_v14 = vpop.permute.xlu0 %7346 }
 0xe57   :  { %v12288_v37 = vpop.permute.xlu1 %7371 }
 0xe58   :  { %v12290_v29 = vpop.permute.xlu2 %7426  ;;  %v12292_v32 = vpop.permute.xlu0 %7356 }
 0xe59   :  { %14321 = vst [vmem:[#allocation102_spill] sm:$0xff] %v12290_v29 }
 0xe5f   :  { %v12294_v30 = vpop.permute.xlu1 %7381 }
 0xe60   :  { %v12296_v48 = vpop.permute.xlu2 %7451  ;;  %v12298_v46 = vpop.permute.xlu0 %7391 }
 0xe61   :  { %14322 = vst [vmem:[#allocation18_spill] sm:$0xff] %v12296_v48  ;;  %v7378_v48 = vunpack.i.l.bf16 %v12223_v39 }
 0xe67   :  { %v12300_v0 = vpop.permute.xlu1 %7386 }
 0xe68   :  { %14323 = vst [vmem:[#allocation32_spill] sm:$0xff] %v12300_v0  ;;  %v12302_v58 = vpop.permute.xlu2 %7466  ;;  %v12304_v60 = vpop.permute.xlu0 %7416 }
 0xe69   :  { %14324 = vst [vmem:[#allocation52_spill] sm:$0xff] %v12302_v58 }
 0xe6f   :  { %v12306_v25 = vpop.permute.xlu1 %7406 }
 0xe70   :  { %v12308_v20 = vpop.permute.xlu2 %7486  ;;  %v12310_v63 = vpop.permute.xlu0 %7456  ;;  %v7408_v41 = vunpack.i.l.bf16 %v12306_v25 }
 0xe71   :  { %14325 = vst [vmem:[#allocation98_spill] sm:$0xff] %v12310_v63  ;;  %v14329_v63 = vunpack.i.h.bf16 %v12223_v39 }
 0xe73   :  { %v4790_v29 = vsel %vm2291_vm7, %v7378_v48, %v14329_v63 }
 0xe77   :  { %v12314_v51 = vpop.permute.xlu1 %7431 }
 0xe78   :  { %v12318_v33 = vpop.permute.xlu2 %7491  ;;  %v12320_v58 = vpop.permute.xlu0 %7471 }
 0xe79   :  { %14326 = vst [vmem:[#allocation156_spill] sm:$0xff] %v12318_v33  ;;  %v13368_v34 = vunpack.i.h.bf16 %v12318_v33  ;;  %v7493_v1 = vunpack.i.l.bf16 %v12318_v33 }
 0xe7a   :  { %14327 = vst [vmem:[#allocation26_spill] sm:$0xff] %v12320_v58  ;;  %v4791_v58 = vsel %vm2291_vm7, %v7413_v17, %v14328_v44  ;;  %v7403_v17 = vunpack.i.l.bf16 %v12269_v50 }
 0xe7b   :  { %v4792_v53 = vsel %vm2291_vm7, %v7493_v1, %v13368_v34  ;;  %v4948_v1 = vsel %vm4901_vm12, %v11680_v2, %v4791_v58  ;;  %v14330_v34 = vunpack.i.h.bf16 %v12267_v61  ;;  %v7363_v58 = vunpack.i.l.bf16 %v12276_v52 }
 0xe7c   :  { %v4949_v0 = vsel %vm4901_vm12, %v14313_v18, %v4792_v53  ;;  %v4947_v53 = vsel %vm4901_vm12, %v11692_v16, %v4790_v29  ;;  %v7328_v16 = vunpack.i.l.bf16 %v12271_v27  ;;  %v7488_v61 = vunpack.i.l.bf16 %v12308_v20 }
 0xe7d   :  { %5119 = vmatpush.msrb.mxu1 %v4949_v0  ;;  %v4789_v44 = vsel %vm2291_vm7, %v7338_v45, %v14330_v34  ;;  %v14331_v0 = vunpack.i.h.bf16 %v12250_v19  ;;  %v13372_v18 = vunpack.i.h.bf16 %v12253_v13 }
 0xe7f   :  { %5120 = vmatpush.msrb.mxu1 %v4948_v1  ;;  %v12349_v63 = vpop.permute.xlu1 %7436  ;;  %v4775_v48 = vsel %vm2291_vm7, %v7398_v11, %v14331_v0  ;;  %v4946_v11 = vsel %vm4901_vm12, %v11703_v31, %v4789_v44  ;;  %v7368_v0 = vunpack.i.l.bf16 %v12282_v7  ;;  %v14333_v31 = vunpack.i.h.bf16 %v12269_v50 }
 0xe80   :  { %v12358_v33 = vpop.permute.xlu2 %7511  ;;  %v13371_v45 = vunpack.i.h.bf16 %v12349_v63  ;;  %v7438_v34 = vunpack.i.l.bf16 %v12349_v63  ;;  %v12365_v29 = vpop.permute.xlu0 %7481 }
 0xe81   :  { %14332 = vst [vmem:[#allocation30_spill] sm:$0xff] %v12358_v33  ;;  %5121 = vmatpush.msrb.mxu1 %v4947_v53  ;;  %v7483_v2 = vunpack.i.l.bf16 %v12365_v29  ;;  %v4759_v44 = vsel %vm2291_vm7, %v7403_v17, %v14333_v31  ;;  %v14334_v39 = vunpack.i.h.bf16 %v12365_v29  ;;  %v13374_v31 = vunpack.i.h.bf16 %v12306_v25 }
 0xe82   :  { %v4776_v1 = vsel %vm2291_vm7, %v7438_v34, %v13371_v45  ;;  %v14335_v45 = vunpack.i.h.bf16 %v12276_v52 }
 0xe83   :  { %5122 = vmatpush.msrb.mxu1 %v4946_v11  ;;  %v4933_v53 = vsel %vm4901_vm12, %v14308_v47, %v4776_v1  ;;  %v4760_v34 = vsel %vm2291_vm7, %v7483_v2, %v14334_v39  ;;  %v7333_v47 = vunpack.i.l.bf16 %v12253_v13  ;;  %v4932_v1 = vsel %vm4901_vm12, %v11766_v23, %v4775_v48 }
 0xe84   :  { %5096 = vmatpush.msrb.mxu2 %v4933_v53  ;;  %v4774_v11 = vsel %vm2291_vm7, %v7363_v58, %v14335_v45  ;;  %v4917_v17 = vsel %vm4901_vm12, %v14309_v40, %v4760_v34  ;;  %v14336_v39 = vunpack.i.h.bf16 %v12282_v7  ;;  %v14337_v58 = vunpack.i.h.bf16 %v12258_v57  ;;  %v12404_v53 = vpop.f32.mrf.mxu1 }
 0xe85   :  { %5073 = vmatpush.msrb.mxu0 %v4917_v17  ;;  %v4916_v23 = vsel %vm4901_vm12, %v11678_v4, %v4759_v44  ;;  %v4931_v34 = vsel %vm4901_vm12, %v11779_v26, %v4774_v11  ;;  %v14339_v17 = vunpack.i.h.bf16 %v12271_v27  ;;  %v14340_v4 = vunpack.i.h.bf16 %v12308_v20 }
 0xe86   :  { %5097 = vmatpush.msrb.mxu2 %v4932_v1  ;;  %v4758_v2 = vsel %vm2291_vm7, %v7368_v0, %v14336_v39  ;;  %v4773_v45 = vsel %vm2291_vm7, %v7323_v3, %v14337_v58  ;;  %v7373_v1 = vunpack.i.l.bf16 %v12288_v37  ;;  %v7418_v39 = vunpack.i.l.bf16 %v12304_v60 }
 0xe87   :  { %v12409_v48 = vpop.permute.xlu1 %7441  ;;  %v4757_v0 = vsel %vm2291_vm7, %v7328_v16, %v14339_v17  ;;  %5074 = vmatpush.msrb.mxu0 %v4916_v23  ;;  %v4772_v44 = vsel %vm2291_vm7, %v7488_v61, %v14340_v4  ;;  %v7353_v26 = vunpack.i.l.bf16 %v12204_v43  ;;  %v13373_v11 = vunpack.i.h.bf16 %v12292_v32 }
 0xe88   :  { %14338 = vst [vmem:[#allocation140_spill] sm:$0xff] %v12409_v48  ;;  %v12419_v58 = vpop.permute.xlu2 %7516  ;;  %5098 = vmatpush.msrb.mxu2 %v4931_v34  ;;  %v12426_v40 = vpop.permute.xlu0 %7496  ;;  %v4915_v16 = vsel %vm4901_vm12, %v11689_v35, %v4758_v2  ;;  %v4930_v17 = vsel %vm4901_vm12, %v11773_v59, %v4773_v45  ;;  %v7358_v23 = vunpack.i.l.bf16 %v12292_v32  ;;  %v4771_v61 = vsel %vm2291_vm7, %v7408_v41, %v13374_v31 }
 0xe89   :  { %v13382_v34 = vunpack.i.h.bf16 %v12426_v40  ;;  %v7498_v3 = vunpack.i.l.bf16 %v12426_v40  ;;  %5075 = vmatpush.msrb.mxu0 %v4915_v16  ;;  %v4914_v4 = vsel %vm4901_vm12, %v11699_v28, %v4757_v0  ;;  %v4929_v35 = vsel %vm4901_vm12, %v14311_v54, %v4772_v44 }
 0xe8a   :  { %5099 = vmatpush.msrb.mxu2 %v4930_v17  ;;  %v4769_v59 = vsel %vm2291_vm7, %v7333_v47, %v13372_v18  ;;  %v14341_v45 = vunpack.i.h.bf16 %v12304_v60  ;;  %v14342_v16 = vunpack.i.h.bf16 %v12288_v37  ;;  %v4928_v47 = vsel %vm4901_vm12, %v14296_v62, %v4771_v61 }
 0xe8b   :  { %5076 = vmatpush.msrb.mxu0 %v4914_v4  ;;  %v4756_v2 = vsel %vm2291_vm7, %v7498_v3, %v13382_v34  ;;  %v14343_v0 = vunpack.i.h.bf16 %v12189_v22  ;;  %v14344_v44 = vunpack.i.l.bf16 %v12189_v22  ;;  %v14345_v17 = vunpack.i.h.bf16 %v12204_v43  ;;  %v14353_v34 = vld [vmem:[#allocation89_spill] sm:$0xff] }
 0xe8c   :  { %5100 = vmatpush.msrb.mxu2 %v4929_v35  ;;  %v4755_v41 = vsel %vm2291_vm7, %v7418_v39, %v14341_v45  ;;  %v4770_v28 = vsel %vm2291_vm7, %v7373_v1, %v14342_v16  ;;  %v4913_v54 = vsel %vm4901_vm12, %v14312_v38, %v4756_v2  ;;  %v13376_v4 = vunpack.i.h.bf16 %v12230_v56 }
 0xe8d   :  { %v4753_v3 = vsel %vm2291_vm7, %v14344_v44, %v14343_v0  ;;  %v4750_v39 = vsel %vm2291_vm7, %v7353_v26, %v14345_v17  ;;  %v13381_v1 = vunpack.i.h.bf16 %v12314_v51  ;;  %v7433_v35 = vunpack.i.l.bf16 %v12314_v51  ;;  %5077 = vmatpush.msrb.mxu0 %v4913_v54 }
 0xe8e   :  { %5101 = vmatpush.msrb.mxu2 %v4928_v47  ;;  %v4754_v62 = vsel %vm2291_vm7, %v7358_v23, %v13373_v11  ;;  %v7313_v38 = vunpack.i.l.bf16 %v12230_v56  ;;  %v4912_v61 = vsel %vm4901_vm12, %v14293_v9, %v4755_v41  ;;  %v4927_v26 = vsel %vm4901_vm12, %v11827_v15, %v4770_v28  ;;  %v12487_v9 = vpop.f32.mrf.mxu1  ;;  %v14347_v11 = vld [vmem:[#allocation45_spill] sm:$0xff] }
 0xe8f   :  { %v12475_v2 = vpop.permute.xlu1 %7446  ;;  %v4926_v45 = vsel %vm4901_vm12, %v11787_v21, %v4769_v59  ;;  %v13378_v16 = vunpack.i.h.bf16 %v12284_v6  ;;  %v7423_v54 = vunpack.i.l.bf16 %v12284_v6  ;;  %v13379_v47 = vunpack.i.h.bf16 %v12298_v46  ;;  %5078 = vmatpush.msrb.mxu0 %v4912_v61 }
 0xe90   :  { %14346 = vst [vmem:[#allocation12_spill] sm:$0xff] %v12475_v2  ;;  %v7393_v23 = vunpack.i.l.bf16 %v12298_v46  ;;  %v12485_v0 = vpop.permute.xlu2 %7521  ;;  %5102 = vmatpush.msrb.mxu2 %v4927_v26  ;;  %v13375_v41 = vunpack.i.h.bf16 %v12280_v55  ;;  %v7343_v15 = vunpack.i.l.bf16 %v12280_v55  ;;  %v13377_v21 = vunpack.i.h.bf16 %v12294_v30  ;;  %v12492_v59 = vpop.permute.xlu0 %7501 }
 0xe91   :  { %v4911_v28 = vsel %vm4901_vm12, %v11731_v8, %v4754_v62  ;;  %v7383_v44 = vunpack.i.l.bf16 %v12294_v30  ;;  %v13380_v17 = vunpack.i.h.bf16 %v12492_v59  ;;  %v7503_v61 = vunpack.i.l.bf16 %v12492_v59 }
 0xe92   :  { %5079 = vmatpush.msrb.mxu0 %v4911_v28  ;;  %5103 = vmatpush.msrb.mxu2 %v4926_v45  ;;  %v4752_v26 = vsel %vm2291_vm7, %v7433_v35, %v13381_v1  ;;  %v4910_v18 = vsel %vm4901_vm12, %v11737_v24, %v4753_v3  ;;  %v12507_v31 = vsel %vm4901_vm12, %v14347_v11, %v12145_v42  ;;  %v13383_v3 = vunpack.i.h.bf16 %v12358_v33  ;;  %v14348_v28 = vld [vmem:[#allocation93_spill] sm:$0xff] }
 0xe93   :  { %v4768_v8 = vsel %vm2291_vm7, %v7503_v61, %v13380_v17  ;;  %v4751_v62 = vsel %vm2291_vm7, %v7393_v23, %v13379_v47  ;;  %v4767_v35 = vsel %vm2291_vm7, %v7423_v54, %v13378_v16  ;;  %v4907_v24 = vsel %vm4901_vm12, %v11759_v12, %v4750_v39  ;;  %v12529_v54 = vpop.f32.mrf.mxu2 }
 0xe94   :  { %5080 = vmatpush.msrb.mxu0 %v4910_v18  ;;  %v7513_v42 = vunpack.i.l.bf16 %v12358_v33  ;;  %v4909_v18 = vsel %vm4901_vm12, %v14306_v10, %v4752_v26  ;;  %v4925_v11 = vsel %vm4901_vm12, %v11859_v36, %v4768_v8  ;;  %v4766_v45 = vsel %vm2291_vm7, %v7383_v44, %v13377_v21  ;;  %v14350_v26 = vld [vmem:[#allocation102_spill] sm:$0xff]  ;;  %v14355_v8 = vld [vmem:[#allocation101_spill] sm:$0xff] }
 0xe95   :  { %5104 = vmatpush.msrb.mxu2 %v4925_v11  ;;  %v4749_v12 = vsel %vm2291_vm7, %v7313_v38, %v13376_v4  ;;  %v4765_v39 = vsel %vm2291_vm7, %v7343_v15, %v13375_v41  ;;  %v13384_v10 = vunpack.i.h.bf16 %v12286_v14  ;;  %v7348_v36 = vunpack.i.l.bf16 %v12286_v14  ;;  %v12551_v41 = vpop.f32.mrf.mxu3  ;;  %v14352_v4 = vld [vmem:[#allocation17_spill] sm:$0xff] }
 0xe96   :  { %5081 = vmatpush.msrb.mxu0 %v4909_v18  ;;  %v4908_v23 = vsel %vm4901_vm12, %v11762_v49, %v4751_v62  ;;  %v4924_v44 = vsel %vm4901_vm12, %v14348_v28, %v4767_v35  ;;  %v7428_v38 = vunpack.i.l.bf16 %v14350_v26  ;;  %v7443_v15 = vunpack.i.l.bf16 %v12409_v48  ;;  %v14351_v49 = vld [vmem:[#allocation32_spill] sm:$0xff]  ;;  %v12566_v1 = vpop.f32.mrf.mxu1 }
 0xe97   :  { %v12543_v61 = vpop.permute.xlu1 %7461  ;;  %5105 = vmatpush.msrb.mxu2 %v4924_v44  ;;  %v7388_v35 = vunpack.i.l.bf16 %v14351_v49  ;;  %v4923_v21 = vsel %vm4901_vm12, %v14352_v4, %v4766_v45  ;;  %v4764_v16 = vsel %vm2291_vm7, %v7513_v42, %v13383_v3  ;;  %v7448_v44 = vunpack.i.l.bf16 %v12475_v2  ;;  %v14354_v4 = vld [vmem:[#allocation128_spill] sm:$0xff]  ;;  %v14356_v42 = vld [vmem:[#allocation27_spill] sm:$0xff] }
 0xe98   :  { %14349 = vst [vmem:[#allocation22_spill] sm:$0xff] %v12543_v61  ;;  %5082 = vmatpush.msrb.mxu0 %v4908_v23  ;;  %v12549_v11 = vpop.permute.xlu2 %7531  ;;  %v12555_v28 = vpop.permute.xlu0 %7506  ;;  %v4906_v62 = vsel %vm4901_vm12, %v14353_v34, %v4749_v12  ;;  %v4922_v45 = vsel %vm4901_vm12, %v14354_v4, %v4765_v39  ;;  %v4902_v3 = vsel %vm4901_vm12, %v14356_v42, %v14355_v8  ;;  %v14358_v39 = vld [vmem:[#allocation44_spill] sm:$0xff]  ;;  %v14359_v8 = vld [vmem:[#allocation90_spill] sm:$0xff]  ;;  %v14360_v42 = vld [vmem:[#allocation79_spill] sm:$0xff] }
 0xe99   :  { %v13385_v47 = vunpack.i.h.bf16 %v12555_v28  ;;  %v7508_v17 = vunpack.i.l.bf16 %v12555_v28  ;;  %5106 = vmatpush.msrb.mxu2 %v4923_v21  ;;  %v4785_v23 = vsel %vm2291_vm7, %v7348_v36, %v13384_v10  ;;  %v7463_v21 = vunpack.i.l.bf16 %v12543_v61  ;;  %v14361_v10 = vld [vmem:[#allocation48_spill] sm:$0xff] }
 0xe9a   :  { %5083 = vmatpush.msrb.mxu0 %v4907_v24  ;;  %v14357_v24 = vunpack.i.h.bf16 %v12409_v48  ;;  %v4905_v4 = vsel %vm4901_vm12, %v14359_v8, %v14358_v39  ;;  %v4921_v36 = vsel %vm4901_vm12, %v14360_v42, %v4764_v16  ;;  %v14366_v8 = vunpack.i.h.bf16 %v14351_v49  ;;  %v14379_v48 = vld [vmem:[#allocation26_spill] sm:$0xff] }
 0xe9b   :  { %5107 = vmatpush.msrb.mxu2 %v4922_v45  ;;  %v4788_v34 = vsel %vm2291_vm7, %v7508_v17, %v13385_v47  ;;  %v14363_v17 = vld [vmem:[#allocation117_spill] sm:$0xff]  ;;  %v14364_v47 = vld [vmem:[#allocation80_spill] sm:$0xff] }
 0xe9c   :  { %5084 = vmatpush.msrb.mxu0 %v4906_v62  ;;  %v4763_v12 = vsel %vm2291_vm7, %v7443_v15, %v14357_v24  ;;  %v4945_v18 = vsel %vm4901_vm12, %v14361_v10, %v4788_v34  ;;  %v14362_v62 = vunpack.i.h.bf16 %v14350_v26  ;;  %v4904_v15 = vsel %vm4901_vm12, %v14364_v47, %v14363_v17 }
 0xe9d   :  { %5108 = vmatpush.msrb.mxu2 %v4921_v36  ;;  %v14365_v24 = vunpack.i.h.bf16 %v12475_v2  ;;  %v4786_v16 = vsel %vm2291_vm7, %v7388_v35, %v14366_v8  ;;  %v7518_v34 = vunpack.i.l.bf16 %v12419_v58  ;;  %5123 = vmatpush.msrb.mxu1 %v4945_v18  ;;  %v14368_v36 = vld [vmem:[#allocation72_spill] sm:$0xff]  ;;  %v5024_v18 = vpop.f32.mrf.mxu2  ;;  %v14372_v10 = vunpack.i.h.bf16 %v12543_v61 }
 0xe9e   :  { %v4787_v45 = vsel %vm2291_vm7, %v7428_v38, %v14362_v62  ;;  %5085 = vmatpush.msrb.mxu0 %v4905_v4  ;;  %v14367_v38 = vld [vmem:[#allocation77_spill] sm:$0xff]  ;;  %v4942_v47 = vsel %vm4901_vm12, %v14368_v36, %v4785_v23  ;;  %v14369_v62 = vld [vmem:[#allocation18_spill] sm:$0xff]  ;;  %v14370_v35 = vld [vmem:[#allocation24_spill] sm:$0xff]  ;;  %v5070_v33 = vpop.f32.mrf.mxu1 }
 0xe9f   :  { %v4762_v39 = vsel %vm2291_vm7, %v7448_v44, %v14365_v24  ;;  %v4920_v4 = vsel %vm4901_vm12, %v14367_v38, %v4763_v12  ;;  %v12609_v42 = vpop.permute.xlu1 %7476  ;;  %v7453_v44 = vunpack.i.l.bf16 %v14369_v62  ;;  %v4944_v24 = vsel %vm4901_vm12, %v14370_v35, %v4787_v45  ;;  %v14373_v38 = vld [vmem:[#allocation52_spill] sm:$0xff]  ;;  %v14376_v35 = vld [vmem:[#allocation98_spill] sm:$0xff] }
 0xea0   :  { %5086 = vmatpush.msrb.mxu0 %v4904_v15  ;;  %5109 = vmatpush.msrb.mxu2 %v4920_v4  ;;  %v12617_v8 = vpop.permute.xlu2 %4971  ;;  %v4761_v12 = vsel %vm2291_vm7, %v7463_v21, %v14372_v10  ;;  %v12623_v23 = vpop.permute.xlu0 %7536  ;;  %v14374_v36 = vld [vmem:[#allocation40_spill] sm:$0xff]  ;;  %v7458_v61 = vunpack.i.l.bf16 %v14376_v35  ;;  %v7473_v21 = vunpack.i.l.bf16 %v14379_v48 }
 0xea1   :  { %14371 = vst [vmem:[#allocation139_spill] sm:$0xff] %v12617_v8  ;;  %5124 = vmatpush.msrb.mxu1 %v4944_v24  ;;  %v4919_v17 = vsel %vm4901_vm12, %v14374_v36, %v4762_v39  ;;  %v14375_v15 = vld [vmem:[#allocation36_spill] sm:$0xff]  ;;  %v5002_v45 = vadd.f32 %v12487_v9, %v12617_v8  ;;  %v7538_v10 = vunpack.i.l.bf16 %v12623_v23  ;;  %v5047_v24 = vpop.f32.mrf.mxu3  ;;  %v7468_v39 = vunpack.i.l.bf16 %v14373_v38 }
 0xea2   :  { %v4943_v4 = vsel %vm4901_vm12, %v14375_v15, %v4786_v16  ;;  %5087 = vmatpush.msrb.mxu0 %v12507_v31  ;;  %5110 = vmatpush.msrb.mxu2 %v4919_v17  ;;  %v14377_v16 = vld [vmem:[#allocation28_spill] sm:$0xff]  ;;  %v14378_v9 = vunpack.i.h.bf16 %v12419_v58  ;;  %v14380_v31 = vunpack.i.h.bf16 %v12623_v23  ;;  %v14385_v8 = vunpack.i.h.bf16 %v12365_v29 }
 0xea3   :  { %5125 = vmatpush.msrb.mxu1 %v4943_v4  ;;  %v5025_v36 = vadd.f32 %v5024_v18, %v5002_v45  ;;  %v4918_v15 = vsel %vm4901_vm12, %v14377_v16, %v4761_v12  ;;  %v14381_v18 = vunpack.i.h.bf16 %v14369_v62  ;;  %v7478_v45 = vunpack.i.l.bf16 %v12609_v42  ;;  %v14382_v16 = vld [vmem:[#allocation110_spill] sm:$0xff] }
 0xea4   :  { %v4784_v2 = vsel %vm2291_vm7, %v7518_v34, %v14378_v9  ;;  %5088 = vmatpush.msrb.mxu0 %v4902_v3  ;;  %5111 = vmatpush.msrb.mxu2 %v4918_v15  ;;  %v4796_v17 = vsel %vm2291_vm7, %v7538_v10, %v14380_v31  ;;  %v14383_v9 = vld [vmem:[#allocation137_spill] sm:$0xff]  ;;  %v7523_v10 = vunpack.i.l.bf16 %v12485_v0  ;;  %v14389_v15 = vunpack.i.h.bf16 %v14373_v38 }
 0xea5   :  { %v4783_v4 = vsel %vm2291_vm7, %v7453_v44, %v14381_v18  ;;  %5126 = vmatpush.msrb.mxu1 %v4942_v47  ;;  %v5048_v34 = vadd.f32 %v5047_v24, %v5025_v36  ;;  %5089 = vmatmul.f32.vlgmr.msrb.gmra.mxu0 %v14382_v16  ;;  %v4953_v3 = vsel %vm4901_vm12, %v14383_v9, %v4796_v17  ;;  %v14384_v31 = vld [vmem:[#allocation33_spill] sm:$0xff]  ;;  %v14386_v44 = vld [vmem:[#allocation51_spill] sm:$0xff]  ;;  %v14387_v47 = vunpack.i.h.bf16 %v14376_v35 }
 0xea6   :  { %5112 = vmatmul.f32.vlgmr.msrb.gmra.mxu2 %v14384_v31  ;;  %5165 = vmatpush.msra.mxu0 %v14385_v8  ;;  %v4941_v18 = vsel %vm4901_vm12, %v14386_v44, %v4784_v2  ;;  %v14388_v36 = vunpack.i.h.bf16 %v12349_v63  ;;  %v4782_v12 = vsel %vm2291_vm7, %v7468_v39, %v14389_v15  ;;  %v14390_v29 = vunpack.i.h.bf16 %v12269_v50  ;;  %v14391_v2 = vld [vmem:[#allocation86_spill] sm:$0xff] }
 0xea7   :  { %v4795_v24 = vsel %vm2291_vm7, %v7458_v61, %v14387_v47  ;;  %5127 = vmatpush.msrb.mxu1 %v4941_v18  ;;  %v5071_v17 = vadd.f32 %v5070_v33, %v5048_v34  ;;  %v12667_v9 = vpop.permute.xlu1 %7526  ;;  %5154 = vmatpush.msrb.mxu3 %v4953_v3  ;;  %v4940_v8 = vsel %vm4901_vm12, %v14391_v2, %v4783_v4  ;;  %v14392_v61 = vunpack.i.h.bf16 %v14379_v48  ;;  %v14394_v34 = vld [vmem:[#allocation157_spill] sm:$0xff] }
 0xea8   :  { %5188 = vmatpush.msra.mxu2 %v14388_v36  ;;  %5166 = vmatpush.msra.mxu0 %v14390_v29  ;;  %v14393_v33 = vunpack.i.h.bf16 %v12250_v19  ;;  %v4952_v18 = vsel %vm4901_vm12, %v14394_v34, %v4795_v24  ;;  %v12683_v39 = vpop.permute.xlu0 %7541  ;;  %v14395_v50 = vunpack.i.h.bf16 %v12609_v42  ;;  %v14397_v19 = vld [vmem:[#allocation136_spill] sm:$0xff]  ;;  %v14398_v36 = vunpack.i.h.bf16 %v12485_v0 }
 0xea9   :  { %v4794_v63 = vsel %vm2291_vm7, %v7473_v21, %v14392_v61  ;;  %v5260_v44 = vmax.f32 %v5071_v17, 0.0  ;;  %5128 = vmatpush.msrb.mxu1 %v4940_v8  ;;  %5155 = vmatpush.msrb.mxu3 %v4952_v18  ;;  %v7544_v4 = vunpack.i.h.bf16 %v12683_v39  ;;  %v7543_v15 = vunpack.i.l.bf16 %v12683_v39  ;;  %v14406_v18 = vld [vmem:[#allocation68_spill] sm:$0xff] }
 0xeaa   :  { %5189 = vmatpush.msra.mxu2 %v14393_v33  ;;  %v4781_v3 = vsel %vm2291_vm7, %v7478_v45, %v14395_v50  ;;  %v14396_v21 = vunpack.i.h.bf16 %v12282_v7  ;;  %v4939_v47 = vsel %vm4901_vm12, %v14397_v19, %v4782_v12  ;;  %v4793_v24 = vsel %vm2291_vm7, %v7523_v10, %v14398_v36  ;;  %v14400_v7 = vld [vmem:[#allocation97_spill] sm:$0xff]  ;;  %v14402_v10 = vld [vmem:[#allocation95_spill] sm:$0xff] }
 0xeab   :  { %5265 = vst [vmem:[%s12890_s16 + $0x10] sm:$0x1f] %v5260_v44  ;;  %v7529_v45 = vunpack.i.h.bf16 %v12667_v9  ;;  %v7528_v17 = vunpack.i.l.bf16 %v12667_v9  ;;  %v14399_v29 = vunpack.i.h.bf16 %v12276_v52  ;;  %5129 = vmatpush.msrb.mxu1 %v4939_v47  ;;  %v4951_v2 = vsel %vm4901_vm12, %v14400_v7, %v4794_v63  ;;  %v14404_v63 = vld [vmem:[#allocation121_spill] sm:$0xff]  ;;  %v14410_v47 = vld [vmem:[#allocation156_spill] sm:$0xff] }
 0xeac   :  { %5167 = vmatpush.msra.mxu0 %v14396_v21  ;;  %5156 = vmatpush.msrb.mxu3 %v4951_v2  ;;  %v14401_v12 = vunpack.i.h.bf16 %v12271_v27  ;;  %v4938_v8 = vsel %vm4901_vm12, %v14402_v10, %v4781_v3  ;;  %v4780_v61 = vsel %vm2291_vm7, %v7543_v15, %v7544_v4  ;;  %v7534_v44 = vunpack.i.h.bf16 %v12549_v11  ;;  %v14405_v27 = vld [vmem:[#allocation129_spill] sm:$0xff]  ;;  %v14407_v3 = vld [vmem:[#allocation96_spill] sm:$0xff] }
 0xead   :  { %5190 = vmatpush.msra.mxu2 %v14399_v29  ;;  %v7533_v52 = vunpack.i.l.bf16 %v12549_v11  ;;  %v14403_v33 = vunpack.i.h.bf16 %v12258_v57  ;;  %5130 = vmatpush.msrb.mxu1 %v4938_v8  ;;  %v4950_v34 = vsel %vm4901_vm12, %v14404_v63, %v4793_v24  ;;  %v4937_v50 = vsel %vm4901_vm12, %v14406_v18, %v4780_v61  ;;  %v14415_v2 = vld [vmem:[#allocation57_spill] sm:$0xff]  ;;  %v14421_v18 = vld [vmem:[#allocation74_spill] sm:$0xff] }
 0xeae   :  { %5168 = vmatpush.msra.mxu0 %v14401_v12  ;;  %5157 = vmatpush.msrb.mxu3 %v4950_v34  ;;  %v14408_v15 = vunpack.i.h.bf16 %v12426_v40  ;;  %v4779_v57 = vsel %vm2291_vm7, %v7528_v17, %v7529_v45  ;;  %v14409_v19 = vunpack.i.h.bf16 %v12308_v20  ;;  %v14411_v36 = vunpack.i.h.bf16 %v14410_v47  ;;  %v14417_v61 = vld [vmem:[#allocation53_spill] sm:$0xff] }
 0xeaf   :  { %5191 = vmatpush.msra.mxu2 %v14403_v33  ;;  %5092 = vmatmul.f32.gmra.mxu0 %v14405_v27  ;;  %v12728_v21 = vpop.permute.xlu1 %4966  ;;  %v14412_v29 = vunpack.i.h.bf16 %v12304_v60  ;;  %v4778_v17 = vsel %vm2291_vm7, %v7533_v52, %v7534_v44  ;;  %v14413_v7 = vunpack.i.h.bf16 %v12306_v25  ;;  %v14414_v20 = vunpack.i.h.bf16 %v12278_v5  ;;  %v14420_v33 = vld [vmem:[#allocation21_spill] sm:$0xff] }
 0xeb0   :  { %5115 = vmatmul.f32.gmra.mxu2 %v14407_v3  ;;  %5169 = vmatpush.msra.mxu0 %v14408_v15  ;;  %v4999_v24 = vadd.f32 %v12404_v53, %v12728_v21  ;;  %v12738_v40 = vpop.permute.xlu0 %7546  ;;  %v4936_v12 = vsel %vm4901_vm12, %v14415_v2, %v4779_v57  ;;  %v14416_v8 = vunpack.i.h.bf16 %v12292_v32  ;;  %v14418_v52 = vunpack.i.h.bf16 %v14417_v61 }
 0xeb1   :  { %5192 = vmatpush.msra.mxu2 %v14409_v19  ;;  %5211 = vmatpush.msra.mxu3 %v14411_v36  ;;  %v7549_v53 = vunpack.i.h.bf16 %v12738_v40  ;;  %v7548_v60 = vunpack.i.l.bf16 %v12738_v40  ;;  %v14419_v5 = vunpack.i.h.bf16 %v12288_v37  ;;  %v4935_v63 = vsel %vm4901_vm12, %v14420_v33, %v4778_v17  ;;  %v14445_v17 = vld [vmem:[#allocation30_spill] sm:$0xff] }
 0xeb2   :  { %5131 = vmatpush.msrb.mxu1 %v4937_v50  ;;  %5170 = vmatpush.msra.mxu0 %v14412_v29  ;;  %v5022_v10 = vadd.f32 %v12529_v54, %v4999_v24  ;;  %v14422_v54 = vld [vmem:[#allocation43_spill] sm:$0xff]  ;;  %v14423_v15 = vunpack.i.h.bf16 %v12189_v22  ;;  %v14424_v37 = vunpack.i.h.bf16 %v12253_v13  ;;  %v14427_v47 = vunpack.i.h.bf16 %v12314_v51 }
 0xeb3   :  { %5193 = vmatpush.msra.mxu2 %v14413_v7  ;;  %5212 = vmatpush.msra.mxu3 %v14414_v20  ;;  %v4777_v34 = vsel %vm2291_vm7, %v7548_v60, %v7549_v53  ;;  %v14428_v36 = vunpack.i.h.bf16 %v12492_v59  ;;  %v14429_v24 = vunpack.i.h.bf16 %v12555_v28  ;;  %v14431_v22 = vunpack.i.h.bf16 %v12298_v46  ;;  %v14449_v20 = vld [vmem:[#allocation154_spill] sm:$0xff]  ;;  %v14455_v60 = vld [vmem:[#allocation12_spill] sm:$0xff] }
 0xeb4   :  { %5132 = vmatpush.msrb.mxu1 %v4936_v12  ;;  %5171 = vmatpush.msra.mxu0 %v14416_v8  ;;  %v5045_v25 = vadd.f32 %v12551_v41, %v5022_v10  ;;  %v4934_v32 = vsel %vm4901_vm12, %v14422_v54, %v4777_v34  ;;  %v14425_v41 = vld [vmem:[#allocation49_spill] sm:$0xff]  ;;  %v14432_v13 = vunpack.i.h.bf16 %v12284_v6  ;;  %v14433_v51 = vunpack.i.h.bf16 %v14350_v26  ;;  %v14439_v6 = vld [vmem:[#allocation70_spill] sm:$0xff] }
 0xeb5   :  { %5213 = vmatpush.msra.mxu3 %v14418_v52  ;;  %5194 = vmatpush.msra.mxu2 %v14419_v5  ;;  %v14426_v57 = vunpack.i.h.bf16 %v14425_v41  ;;  %v14434_v59 = vunpack.i.h.bf16 %v12623_v23  ;;  %v14435_v28 = vunpack.i.h.bf16 %v12204_v43  ;;  %v14436_v29 = vunpack.i.h.bf16 %v12294_v30  ;;  %v14454_v12 = vld [vmem:[#allocation82_spill] sm:$0xff] }
 0xeb6   :  { %5133 = vmatpush.msrb.mxu1 %v4935_v63  ;;  %5378 = vmatmul.msk.f32.vlgmr.msrb.gmra.mxu3 %vm4974_vm10, %v14421_v18  ;;  %v5068_v50 = vadd.f32 %v12566_v1, %v5045_v25  ;;  %v14430_v1 = vld [vmem:[#allocation23_spill] sm:$0xff]  ;;  %v14437_v40 = vunpack.i.h.bf16 %v14351_v49  ;;  %v14438_v46 = vunpack.i.h.bf16 %v14376_v35  ;;  %v14440_v26 = vunpack.i.h.bf16 %v12230_v56  ;;  %v14444_v49 = vld [vmem:[#allocation122_spill] sm:$0xff] }
 0xeb7   :  { %5172 = vmatpush.msra.mxu0 %v14423_v15  ;;  %5195 = vmatpush.msra.mxu2 %v14424_v37  ;;  %v14441_v23 = vunpack.i.h.bf16 %v12280_v55  ;;  %v14442_v43 = vunpack.i.h.bf16 %v12286_v14  ;;  %v14443_v30 = vunpack.i.h.bf16 %v14379_v48  ;;  %v14446_v35 = vunpack.i.h.bf16 %v14445_v17  ;;  %v14450_v55 = vld [vmem:[#allocation20_spill] sm:$0xff]  ;;  %v14459_v8 = vld [vmem:[#allocation22_spill] sm:$0xff] }
 0xeb8   :  { %5214 = vmatpush.msra.mxu3 %v14426_v57  ;;  %5134 = vmatpush.msrb.mxu1 %v4934_v32  ;;  %v5257_v19 = vmax.f32 %v5068_v50, 0.0  ;;  %v14447_v7 = vunpack.i.h.bf16 %v12419_v58  ;;  %v14448_v56 = vunpack.i.h.bf16 %v12485_v0  ;;  %v14451_v14 = vld [vmem:[#allocation140_spill] sm:$0xff]  ;;  %v14453_v48 = vunpack.i.h.bf16 %v14369_v62  ;;  %v14458_v0 = vld [vmem:[#allocation78_spill] sm:$0xff] }
 0xeb9   :  { %5173 = vmatpush.msra.mxu0 %v14427_v47  ;;  %5196 = vmatpush.msra.mxu2 %v14428_v36  ;;  %v14452_v2 = vunpack.i.h.bf16 %v14451_v14  ;;  %v14456_v10 = vunpack.i.h.bf16 %v14455_v60  ;;  %v14457_v58 = vunpack.i.h.bf16 %v14373_v38  ;;  %v14460_v61 = vunpack.i.h.bf16 %v14459_v8 }
 0xeba   :  { %5215 = vmatpush.msra.mxu3 %v14429_v24  ;;  %5135 = vmatmul.f32.vlgmr.msrb.gmra.mxu1 %v14430_v1  ;;  %5263 = vst [vmem:[%s12890_s16] sm:$0xff] %v5257_v19  ;;  %v14461_v52 = vunpack.i.h.bf16 %v12609_v42 }
 0xebb   :  { %5174 = vmatpush.msra.mxu0 %v14431_v22  ;;  %5197 = vmatpush.msra.mxu2 %v14432_v13 }
 0xebc   :  { %5216 = vmatpush.msra.mxu3 %v14433_v51  ;;  %5246 = vmatpush.msra.mxu1 %v14434_v59 }
 0xebd   :  { %5175 = vmatpush.msra.mxu0 %v14435_v28  ;;  %5198 = vmatpush.msra.mxu2 %v14436_v29 }
 0xebe   :  { %5217 = vmatpush.msra.mxu3 %v14437_v40  ;;  %5247 = vmatpush.msra.mxu1 %v14438_v46 }
 0xebf   :  { %5379 = vmatmul.msk.f32.gmra.mxu3 %vm4974_vm10, %v14439_v6  ;;  %5176 = vmatpush.msra.mxu0 %v14440_v26 }
 0xec0   :  { %5199 = vmatpush.msra.mxu2 %v14441_v23  ;;  %5218 = vmatpush.msra.mxu3 %v14442_v43 }
 0xec1   :  { %5248 = vmatpush.msra.mxu1 %v14443_v30  ;;  %5177 = vmatpush.msra.mxu0 %v14444_v49 }
 0xec2   :  { %5200 = vmatpush.msra.mxu2 %v14446_v35  ;;  %5219 = vmatpush.msra.mxu3 %v14447_v7 }
 0xec3   :  { %5249 = vmatpush.msra.mxu1 %v14448_v56  ;;  %5178 = vmatpush.msra.mxu0 %v14449_v20 }
 0xec4   :  { %5138 = vmatmul.f32.gmra.mxu1 %v14450_v55  ;;  %5201 = vmatpush.msra.mxu2 %v14452_v2 }
 0xec5   :  { %5220 = vmatpush.msra.mxu3 %v14453_v48  ;;  %5179 = vmatpush.msra.mxu0 %v14454_v12 }
 0xec6   :  { %5202 = vmatpush.msra.mxu2 %v14456_v10 }
 0xec7   :  { %5221 = vmatpush.msra.mxu3 %v14457_v58  ;;  %5180 = vmatpush.msra.mxu0 %v14458_v0 }
 0xec8   :  { %5203 = vmatpush.msra.mxu2 %v14460_v61  ;;  %5181 = vmatmul.f32.vlgmr.msra.gmra.mxu0 %v14382_v16 }
 0xec9   :  { %5222 = vmatpush.msra.mxu3 %v14461_v52  ;;  %5204 = vmatmul.f32.vlgmr.msra.gmra.mxu2 %v14384_v31 }
 0xecb   :  { %5223 = vmatpush.msra.mxu3 %v7544_v4 }
 0xecc   :  { %5380 = vmatmul.msk.f32.vlgmr.msra.gmra.mxu1 %vm4974_vm10, %v14421_v18 }
 0xecd   :  { %5224 = vmatpush.msra.mxu3 %v7529_v45 }
 0xecf   :  { %5225 = vmatpush.msra.mxu3 %v7534_v44 }
 0xed0   :  { %5184 = vmatmul.f32.gmra.mxu0 %v14405_v27  ;;  %v14462_v27 = vld [vmem:[#allocation139_spill] sm:$0xff] }
 0xed1   :  { %5226 = vmatpush.msra.mxu3 %v7549_v53  ;;  %5207 = vmatmul.f32.gmra.mxu2 %v14407_v3 }
 0xed2   :  { %5227 = vmatmul.f32.vlgmr.msra.gmra.mxu3 %v14430_v1 }
 0xed4   :  { %5381 = vmatmul.msk.f32.gmra.mxu1 %vm4974_vm10, %v14439_v6 }
 0xeda   :  { %5230 = vmatmul.f32.gmra.mxu3 %v14450_v55 }
 0xf22   :  { %v5090_v42 = vpop.f32.mrf.mxu0 }
 0xf23   :  { %v5091_v38 = vadd.f32 %v5090_v42, %v12728_v21 }
 0xf29   :  { %v5113_v62 = vpop.f32.mrf.mxu2 }
 0xf2a   :  { %v5114_v16 = vadd.f32 %v5113_v62, %v5091_v38 }
 0xf2c   :  { %v5093_v4 = vpop.f32.mrf.mxu0 }
 0xf2d   :  { %v5094_v3 = vadd.f32 %v5093_v4, %v14462_v27 }
 0xf33   :  { %v5116_v44 = vpop.f32.mrf.mxu2 }
 0xf34   :  { %v5117_v53 = vadd.f32 %v5116_v44, %v5094_v3 }
 0xf37   :  { %v5136_v31 = vpop.f32.mrf.mxu1 }
 0xf38   :  { %v5137_v11 = vadd.f32 %v5136_v31, %v5114_v16 }
 0xf39   :  { %v5159_v9 = vpop.f32.mrf.mxu3 }
 0xf3a   :  { %v5160_v39 = vadd.f32 %v5159_v9, %v5137_v11 }
 0xf3c   :  { %v5258_v45 = vmax.f32 %v5160_v39, 0.0 }
 0xf3e   :  { %5264 = vst.msk [vmem:[%s12890_s16 + $0x8] sm:$0xff] %vm4901_vm12, %v5258_v45  ;;  %5272 = vrot.lane.b32.xlu0 %v5258_v45, %s7686_s9 }
 0xf41   :  { %v5139_v25 = vpop.f32.mrf.mxu1 }
 0xf42   :  { %v5140_v5 = vadd.f32 %v5139_v25, %v5117_v53  ;;  %v5162_v33 = vpop.f32.mrf.mxu3 }
 0xf44   :  { %v5163_v63 = vadd.f32 %v5162_v33, %v5140_v5 }
 0xf45   :  { %v5182_v18 = vpop.f32.mrf.mxu0 }
 0xf46   :  { %v5261_v34 = vmax.f32 %v5163_v63, 0.0  ;;  %v5183_v32 = vadd.f32 %v5182_v18, %v12728_v21 }
 0xf48   :  { %5276 = vrot.lane.b32.xlu2 %v5261_v34, %s7686_s9  ;;  %5267 = vst.msk [vmem:[%s12890_s16 + $0x18] sm:$0x1f] %vm5266_vm13, %v5261_v34 }
 0xf49   :  { %v5251_v50 = vpop.f32.mrf.mxu1 }
 0xf4c   :  { %v5205_v54 = vpop.f32.mrf.mxu2 }
 0xf4d   :  { %v5206_v15 = vadd.f32 %v5205_v54, %v5183_v32  ;;  %v5185_v57 = vpop.f32.mrf.mxu0 }
 0xf4e   :  { %v5186_v36 = vadd.f32 %v5185_v57, %v14462_v27 }
 0xf51   :  { %v5254_v13 = vpop.f32.mrf.mxu1 }
 0xf54   :  { %v5208_v47 = vpop.f32.mrf.mxu2 }
 0xf55   :  { %v5228_v37 = vpop.f32.mrf.mxu3  ;;  %v5209_v1 = vadd.f32 %v5208_v47, %v5186_v36 }
 0xf56   :  { %v5229_v41 = vadd.f32 %v5228_v37, %v5206_v15 }
 0xf58   :  { %v5252_v19 = vadd.f32 %v5251_v50, %v5229_v41 }
 0xf5a   :  { %v5259_v24 = vmax.f32 %v5252_v19, 0.0 }
 0xf5c   :  { %5274 = vrot.lane.b32.xlu1 %v5259_v24, %s7686_s9 }
 0xf5d   :  { %v5231_v22 = vpop.f32.mrf.mxu3 }
 0xf5e   :  { %v5232_v51 = vadd.f32 %v5231_v22, %v5209_v1 }
 0xf60   :  { %v5255_v59 = vadd.f32 %v5254_v13, %v5232_v51 }
 0xf62   :  { %v5262_v28 = vmax.f32 %v5255_v59, 0.0 }
 0xf64   :  { %5278 = vrot.lane.b32.xlu0 %v5262_v28, %s7686_s9 }
 0xfa2   :  { %v5277_v46 = vpop.permute.xlu2 %5276 }
 0xfb0   :  { %v5273_v21 = vpop.permute.xlu0 %5272 }
 0xfce   :  { %v5275_v29 = vpop.permute.xlu1 %5274 }
 0xfcf   :  { %v5281_v40 = vsel %vm5280_vm14, %v5273_v21, %v5275_v29  ;;  %5383 = vst.msk [vmem:[%s12890_s16 + $0x28] sm:$0xff] %vm4901_vm12, %v5275_v29 }
 0xfd0   :  { %5382 = vst [vmem:[%s12890_s16 + $0x20] sm:$0xff] %v5281_v40 }
 0xfd6   :  { %v5279_v6 = vpop.permute.xlu0 %5278 }
 0xfd7   :  { %v5282_v26 = vsel %vm5280_vm14, %v5277_v46, %v5279_v6  ;;  %5385 = vst.msk [vmem:[%s12890_s16 + $0x38] sm:$0x1f] %vm5266_vm13, %v5279_v6 }
 0xfd8   :  { %5384 = vst [vmem:[%s12890_s16 + $0x30] sm:$0x1f] %v5282_v26 }
 0xfd9   :  { %5296 = vsyncpa [#allocation3], 1 }
 0xfda   :  { %5297 = vsyncpa [#allocation5], 1 }
 0xfdb   :  { %5298 = vsyncpa [#allocation8], 1 }

</bundles_post_ra>
